<compile_context>
chip_gen: v5e
topology: v5e:2x2
jax: 0.10.0
libtpu: 0.0.40
codegen_flags: <defaults>
</compile_context>

<pallas_src>
import jax
import jax.numpy as jnp
import numpy as np
from jax.experimental import pallas as pl
from jax.experimental.pallas import tpu as pltpu

HID = 16      # hidden channels
K = 3         # conv kernel size
GUARD = 128   # lane-tile aligned guard at both ends of each flat slab


def _choose_block_b(n):
    """Images per grid step: amortize per-step overhead but keep grid >= 2."""
    for b in (8, 4, 2):
        if n % b == 0 and n // b >= 2:
            return b
    return 1


def _make_kernel(wp, length):
    """Kernel for padded row width `wp` and slab interior length `length`
    (= B * Hp * Wp)."""
    G = GUARD
    # Lane shift of tap (dy, dx): reading the slab at flat offset i + shift
    # yields in_pad[r - 1 + dy, c - 1 + dx] for output position (r, c).
    shifts = tuple((dy - 1) * wp + (dx - 1) for dy in range(K) for dx in range(K))

    def kernel(x_ref, w1_ref, b1_ref, w2_ref, b2_ref, w3_ref, b3_ref, mask_ref,
               o_ref, s1_ref, s2_ref):
        # x_ref : (Cin, 2G + L)   channels-major flat input slab (zero halo/guards)
        # w1_ref: (9, 16, Cin)    per-tap weights, (dy,dx)-major, each (Cout, Cin)
        # w2_ref: (9, 16, 16)     b1_ref/b2_ref: (16, 1)
        # w3_ref: (9, 16, 1)      b3_ref: (1, 1)
        # mask_ref: (1, L) float  1 at interior pixels, 0 at halo pixels
        # o_ref : (1, L)          lane-dense output slab (halo lanes are garbage)
        # s1_ref/s2_ref: (16, 2G + L) channels-major hidden activations (VMEM)
        keep = mask_ref[...] > 0.5                                   # (1, L) bool

        def conv3x3(src_ref, w_ref):
            # 9 accumulated channels-major matmuls (no im2col concatenate):
            #   y(Cout, L) += w_tap(Cout, Cin) @ src[:, shifted window]
            acc = None
            for k, s in enumerate(shifts):
                tap = src_ref[:, G + s:G + s + length]
                y = jnp.dot(w_ref[k], tap, preferred_element_type=jnp.float32)
                acc = y if acc is None else acc + y
            return acc                                               # (Cout, L) f32

        # ---- layer 1: conv3x3(Cin -> 16) + ReLU ----
        y1 = conv3x3(x_ref, w1_ref) + b1_ref[...]
        # Zero halo outputs: reproduces SAME padding for layer 2 and discards any
        # garbage read from the (uninitialised) guard lanes.
        y1 = jnp.where(keep, jnp.maximum(y1, 0.0), 0.0)
        s1_ref[:, G:G + length] = y1.astype(s1_ref.dtype)            # aligned dense store

        # ---- layer 2: conv3x3(16 -> 16) + ReLU ----
        y2 = conv3x3(s1_ref, w2_ref) + b2_ref[...]
        y2 = jnp.where(keep, jnp.maximum(y2, 0.0), 0.0)
        s2_ref[:, G:G + length] = y2.astype(s2_ref.dtype)

        # ---- layer 3: conv3x3(16 -> 1): 9 shifted VPU FMAs + one sublane reduce ----
        acc = jnp.zeros((HID, length), jnp.float32)
        for k, s in enumerate(shifts):
            tap = s2_ref[:, G + s:G + s + length].astype(jnp.float32)
            acc = acc + tap * w3_ref[k]                              # (16, L) * (16, 1)
        o_ref[...] = jnp.sum(acc, axis=0, keepdims=True) + b3_ref[...]

    return kernel


def rcnn_forward(x_nchw, params, *, block_b=None, use_bf16=False):
    """x_nchw: (N, C, H, W) float32 -> (N, 1, H, W) float32."""
    w1, b1, w2, b2, w3, b3 = params                 # HWIO weights, (Cout,) biases
    N, C, H, W = x_nchw.shape
    Hp, Wp = H + 2, W + 2
    B = block_b if block_b is not None else _choose_block_b(N)
    assert N % B == 0, (N, B)
    nblk = N // B
    L = B * Hp * Wp
    G = GUARD
    Ltot = L + 2 * G
    mm_dt = jnp.bfloat16 if use_bf16 else jnp.float32   # MXU-operand / scratch dtype

    # Channels-major flat input slabs: spatial zero-pad (SAME), flatten each image
    # to Hp*Wp lanes, concatenate B images per block and add zero guard lanes at
    # both ends so every tap slice stays in-bounds.
    xp = jnp.pad(x_nchw, ((0, 0), (0, 0), (1, 1), (1, 1)))           # (N, C, Hp, Wp)
    xf = xp.reshape(nblk, B, C, Hp * Wp).transpose(0, 2, 1, 3)        # (nblk, C, B, Hp*Wp)
    xf = xf.reshape(nblk, C, L)
    xf = jnp.pad(xf, ((0, 0), (0, 0), (G, G))).astype(mm_dt)          # (nblk, C, Ltot)

    # Per-tap weights, (dy,dx)-major, shaped (Cout, Cin) for channels-major matmuls.
    def per_tap(w_hwio):
        kh, kw, ci, co = w_hwio.shape
        return jnp.transpose(w_hwio, (0, 1, 3, 2)).reshape(kh * kw, co, ci)

    w1t = per_tap(w1).astype(mm_dt)                                    # (9, 16, C)
    w2t = per_tap(w2).astype(mm_dt)                                    # (9, 16, 16)
    w3t = w3.reshape(K * K, HID, 1).astype(jnp.float32)                # (9, 16, 1) VPU f32
    b1r = b1.reshape(HID, 1).astype(jnp.float32)
    b2r = b2.reshape(HID, 1).astype(jnp.float32)
    b3r = b3.reshape(1, 1).astype(jnp.float32)

    # Interior mask (1 inside the H x W image, 0 on the 1-pixel halo), tiled over
    # the B images of one block.
    m = jnp.zeros((Hp, Wp), jnp.float32).at[1:H + 1, 1:W + 1].set(1.0)
    mask = jnp.tile(m.reshape(1, Hp * Wp), (1, B))                     # (1, L)

    # TODO(synk): for real EMVD resolutions, add a row-strip grid axis
    # ("arbitrary") with a 2-row halo and set vmem_limit_bytes explicitly so the
    # channels-major strip scratches stay inside v7x's 64 MiB VMEM.

    kernel = _make_kernel(Wp, L)
    out = pl.pallas_call(
        kernel,
        out_shape=jax.ShapeDtypeStruct((nblk, 1, L), jnp.float32),
        grid=(nblk,),
        in_specs=[
            pl.BlockSpec((None, C, Ltot), lambda i: (i, 0, 0)),
            pl.BlockSpec((K * K, HID, C), lambda i: (0, 0, 0)),
            pl.BlockSpec((HID, 1), lambda i: (0, 0)),
            pl.BlockSpec((K * K, HID, HID), lambda i: (0, 0, 0)),
            pl.BlockSpec((HID, 1), lambda i: (0, 0)),
            pl.BlockSpec((K * K, HID, 1), lambda i: (0, 0, 0)),
            pl.BlockSpec((1, 1), lambda i: (0, 0)),
            pl.BlockSpec((1, L), lambda i: (0, 0)),
        ],
        out_specs=pl.BlockSpec((None, 1, L), lambda i: (i, 0, 0)),
        scratch_shapes=[
            pltpu.VMEM((HID, Ltot), mm_dt),
            pltpu.VMEM((HID, Ltot), mm_dt),
        ],
        compiler_params=pltpu.CompilerParams(
            dimension_semantics=("parallel",)),
    )(xf, w1t, b1r, w2t, b2r, w3t, b3r, mask)

    # (nblk, 1, B*Hp*Wp) -> (N, 1, Hp, Wp) -> crop the 1-pixel halo.
    out = out.reshape(nblk, 1, B, Hp, Wp).transpose(0, 2, 1, 3, 4)
    out = out.reshape(N, 1, Hp, Wp)
    return out[:, :, 1:H + 1, 1:W + 1]


def init_params(key, in_ch):
    """Deterministic PyTorch-style (uniform +/- 1/sqrt(fan_in)) init, HWIO."""
    def conv_init(k, cin, cout):
        fan_in = K * K * cin
        bound = 1.0 / np.sqrt(fan_in)
        kw, kb = jax.random.split(k)
        w = jax.random.uniform(kw, (K, K, cin, cout), jnp.float32, -bound, bound)
        b = jax.random.uniform(kb, (cout,), jnp.float32, -bound, bound)
        return w, b

    k1, k2, k3 = jax.random.split(key, 3)
    w1, b1 = conv_init(k1, in_ch, HID)
    w2, b2 = conv_init(k2, HID, HID)
    w3, b3 = conv_init(k3, HID, 1)
    return w1, b1, w2, b2, w3, b3


def reference_forward(x_nchw, params):
    """Pure-JAX reference using lax conv (matches PyTorch semantics)."""
    w1, b1, w2, b2, w3, b3 = params
    y = jnp.transpose(x_nchw, (0, 2, 3, 1))

    def conv(y, w, b, relu):
        dn = jax.lax.conv_dimension_numbers(y.shape, w.shape,
                                            ('NHWC', 'HWIO', 'NHWC'))
        y = jax.lax.conv_general_dilated(y, w, (1, 1), 'SAME',
                                         dimension_numbers=dn,
                                         precision=jax.lax.Precision.HIGHEST)
        y = y + b.reshape(1, 1, 1, -1)
        return jnp.maximum(y, 0.0) if relu else y

    y = conv(y, w1, b1, True)
    y = conv(y, w2, b2, True)
    y = conv(y, w3, b3, False)
    return jnp.transpose(y, (0, 3, 1, 2))


if __name__ == "__main__":
    key = jax.random.PRNGKey(0)
    kx, kp = jax.random.split(key)

    # Small shapes; N=8 exercises batch blocking (B=4) with a grid of 2.
    N, C, H, W = 8, 4, 16, 16
    x = jax.random.normal(kx, (N, C, H, W), jnp.float32)
    params = init_params(kp, C)

    out = jax.block_until_ready(rcnn_forward(x, params))
    assert out.shape == (N, 1, H, W), out.shape

    ref = reference_forward(x, params)
    np.testing.assert_allclose(np.asarray(out), np.asarray(ref),
                               atol=1e-4, rtol=1e-4)

    # (use_bf16=True gives bf16 MXU operands with f32 accumulation; it needs a
    #  looser ~1e-2 tolerance, so the default f32 path is what we assert here.)
    print("KERNEL_OK")
</pallas_src>

<mosaic_0001>
module attributes {stable_mosaic.version = 11 : i64} {
  func.func @kernel(%arg0: i32, %arg1: memref<1x4x1552xf32, #tpu.memory_space<vmem>>, %arg2: memref<9x16x4xf32, #tpu.memory_space<vmem>>, %arg3: memref<16x1xf32, #tpu.memory_space<vmem>>, %arg4: memref<9x16x16xf32, #tpu.memory_space<vmem>>, %arg5: memref<16x1xf32, #tpu.memory_space<vmem>>, %arg6: memref<9x16x1xf32, #tpu.memory_space<vmem>>, %arg7: memref<1x1xf32, #tpu.memory_space<vmem>>, %arg8: memref<1x1296xf32, #tpu.memory_space<vmem>>, %arg9: memref<1x1x1296xf32, #tpu.memory_space<vmem>>, %arg10: memref<16x1552xf32, #tpu.memory_space<vmem>>, %arg11: memref<16x1552xf32, #tpu.memory_space<vmem>>) attributes {dimension_semantics = [#tpu.dimension_semantics<parallel>], iteration_bounds = array<i64: 2>, scalar_prefetch = 0 : i64, scratch_operands = 2 : i64, tpu.core_type = #tpu.core_type<tc>, window_params = [{transform_indices = @transform_0, window_bounds = array<i64: 1, 4, 1552>}, {pipeline_mode = #tpu.pipeline_mode<synchronous>, transform_indices = @transform_1, window_bounds = array<i64: 9, 16, 4>}, {pipeline_mode = #tpu.pipeline_mode<synchronous>, transform_indices = @transform_2, window_bounds = array<i64: 16, 1>}, {pipeline_mode = #tpu.pipeline_mode<synchronous>, transform_indices = @transform_3, window_bounds = array<i64: 9, 16, 16>}, {pipeline_mode = #tpu.pipeline_mode<synchronous>, transform_indices = @transform_4, window_bounds = array<i64: 16, 1>}, {pipeline_mode = #tpu.pipeline_mode<synchronous>, transform_indices = @transform_5, window_bounds = array<i64: 9, 16, 1>}, {pipeline_mode = #tpu.pipeline_mode<synchronous>, transform_indices = @transform_6, window_bounds = array<i64: 1, 1>}, {pipeline_mode = #tpu.pipeline_mode<synchronous>, transform_indices = @transform_7, window_bounds = array<i64: 1, 1296>}, {transform_indices = @transform_8, window_bounds = array<i64: 1, 1, 1296>}]} {
    %c0 = arith.constant 0 : index
    %c0_0 = arith.constant 0 : index
    %0 = vector.load %arg8[%c0, %c0_0] : memref<1x1296xf32, #tpu.memory_space<vmem>>, vector<1x1296xf32>
    %cst = arith.constant 5.000000e-01 : f32
    %1 = vector.broadcast %cst : f32 to vector<1x1296xf32>
    %2 = arith.cmpf ogt, %0, %1 : vector<1x1296xf32>
    %c0_1 = arith.constant 0 : index
    %c0_2 = arith.constant 0 : index
    %c109 = arith.constant 109 : index
    %3 = vector.load %arg1[%c0_1, %c0_2, %c109] : memref<1x4x1552xf32, #tpu.memory_space<vmem>>, vector<1x4x1296xf32>
    %4 = vector.shape_cast %3 : vector<1x4x1296xf32> to vector<4x1296xf32>
    %c0_3 = arith.constant 0 : index
    %c0_4 = arith.constant 0 : index
    %c0_5 = arith.constant 0 : index
    %5 = vector.load %arg2[%c0_3, %c0_4, %c0_5] : memref<9x16x4xf32, #tpu.memory_space<vmem>>, vector<1x16x4xf32>
    %6 = vector.shape_cast %5 : vector<1x16x4xf32> to vector<16x4xf32>
    %cst_6 = arith.constant dense<0.000000e+00> : vector<16x1296xf32>
    %7 = tpu.matmul %6, %4, %cst_6 {dimension_numbers = #tpu.dot_dimension_numbers<[1], [0], [0], [1], [0, 0, 1, 1], [], []>} : vector<16x4xf32>, vector<4x1296xf32>, vector<16x1296xf32> -> vector<16x1296xf32>
    %c0_7 = arith.constant 0 : index
    %c0_8 = arith.constant 0 : index
    %c110 = arith.constant 110 : index
    %8 = vector.load %arg1[%c0_7, %c0_8, %c110] : memref<1x4x1552xf32, #tpu.memory_space<vmem>>, vector<1x4x1296xf32>
    %9 = vector.shape_cast %8 : vector<1x4x1296xf32> to vector<4x1296xf32>
    %c1 = arith.constant 1 : index
    %c0_9 = arith.constant 0 : index
    %c0_10 = arith.constant 0 : index
    %10 = vector.load %arg2[%c1, %c0_9, %c0_10] : memref<9x16x4xf32, #tpu.memory_space<vmem>>, vector<1x16x4xf32>
    %11 = vector.shape_cast %10 : vector<1x16x4xf32> to vector<16x4xf32>
    %cst_11 = arith.constant dense<0.000000e+00> : vector<16x1296xf32>
    %12 = tpu.matmul %11, %9, %cst_11 {dimension_numbers = #tpu.dot_dimension_numbers<[1], [0], [0], [1], [0, 0, 1, 1], [], []>} : vector<16x4xf32>, vector<4x1296xf32>, vector<16x1296xf32> -> vector<16x1296xf32>
    %13 = arith.addf %7, %12 : vector<16x1296xf32>
    %c0_12 = arith.constant 0 : index
    %c0_13 = arith.constant 0 : index
    %c111 = arith.constant 111 : index
    %14 = vector.load %arg1[%c0_12, %c0_13, %c111] : memref<1x4x1552xf32, #tpu.memory_space<vmem>>, vector<1x4x1296xf32>
    %15 = vector.shape_cast %14 : vector<1x4x1296xf32> to vector<4x1296xf32>
    %c2 = arith.constant 2 : index
    %c0_14 = arith.constant 0 : index
    %c0_15 = arith.constant 0 : index
    %16 = vector.load %arg2[%c2, %c0_14, %c0_15] : memref<9x16x4xf32, #tpu.memory_space<vmem>>, vector<1x16x4xf32>
    %17 = vector.shape_cast %16 : vector<1x16x4xf32> to vector<16x4xf32>
    %cst_16 = arith.constant dense<0.000000e+00> : vector<16x1296xf32>
    %18 = tpu.matmul %17, %15, %cst_16 {dimension_numbers = #tpu.dot_dimension_numbers<[1], [0], [0], [1], [0, 0, 1, 1], [], []>} : vector<16x4xf32>, vector<4x1296xf32>, vector<16x1296xf32> -> vector<16x1296xf32>
    %19 = arith.addf %13, %18 : vector<16x1296xf32>
    %c0_17 = arith.constant 0 : index
    %c0_18 = arith.constant 0 : index
    %c127 = arith.constant 127 : index
    %20 = vector.load %arg1[%c0_17, %c0_18, %c127] : memref<1x4x1552xf32, #tpu.memory_space<vmem>>, vector<1x4x1296xf32>
    %21 = vector.shape_cast %20 : vector<1x4x1296xf32> to vector<4x1296xf32>
    %c3 = arith.constant 3 : index
    %c0_19 = arith.constant 0 : index
    %c0_20 = arith.constant 0 : index
    %22 = vector.load %arg2[%c3, %c0_19, %c0_20] : memref<9x16x4xf32, #tpu.memory_space<vmem>>, vector<1x16x4xf32>
    %23 = vector.shape_cast %22 : vector<1x16x4xf32> to vector<16x4xf32>
    %cst_21 = arith.constant dense<0.000000e+00> : vector<16x1296xf32>
    %24 = tpu.matmul %23, %21, %cst_21 {dimension_numbers = #tpu.dot_dimension_numbers<[1], [0], [0], [1], [0, 0, 1, 1], [], []>} : vector<16x4xf32>, vector<4x1296xf32>, vector<16x1296xf32> -> vector<16x1296xf32>
    %25 = arith.addf %19, %24 : vector<16x1296xf32>
    %c0_22 = arith.constant 0 : index
    %c0_23 = arith.constant 0 : index
    %c128 = arith.constant 128 : index
    %26 = vector.load %arg1[%c0_22, %c0_23, %c128] : memref<1x4x1552xf32, #tpu.memory_space<vmem>>, vector<1x4x1296xf32>
    %27 = vector.shape_cast %26 : vector<1x4x1296xf32> to vector<4x1296xf32>
    %c4 = arith.constant 4 : index
    %c0_24 = arith.constant 0 : index
    %c0_25 = arith.constant 0 : index
    %28 = vector.load %arg2[%c4, %c0_24, %c0_25] : memref<9x16x4xf32, #tpu.memory_space<vmem>>, vector<1x16x4xf32>
    %29 = vector.shape_cast %28 : vector<1x16x4xf32> to vector<16x4xf32>
    %cst_26 = arith.constant dense<0.000000e+00> : vector<16x1296xf32>
    %30 = tpu.matmul %29, %27, %cst_26 {dimension_numbers = #tpu.dot_dimension_numbers<[1], [0], [0], [1], [0, 0, 1, 1], [], []>} : vector<16x4xf32>, vector<4x1296xf32>, vector<16x1296xf32> -> vector<16x1296xf32>
    %31 = arith.addf %25, %30 : vector<16x1296xf32>
    %c0_27 = arith.constant 0 : index
    %c0_28 = arith.constant 0 : index
    %c129 = arith.constant 129 : index
    %32 = vector.load %arg1[%c0_27, %c0_28, %c129] : memref<1x4x1552xf32, #tpu.memory_space<vmem>>, vector<1x4x1296xf32>
    %33 = vector.shape_cast %32 : vector<1x4x1296xf32> to vector<4x1296xf32>
    %c5 = arith.constant 5 : index
    %c0_29 = arith.constant 0 : index
    %c0_30 = arith.constant 0 : index
    %34 = vector.load %arg2[%c5, %c0_29, %c0_30] : memref<9x16x4xf32, #tpu.memory_space<vmem>>, vector<1x16x4xf32>
    %35 = vector.shape_cast %34 : vector<1x16x4xf32> to vector<16x4xf32>
    %cst_31 = arith.constant dense<0.000000e+00> : vector<16x1296xf32>
    %36 = tpu.matmul %35, %33, %cst_31 {dimension_numbers = #tpu.dot_dimension_numbers<[1], [0], [0], [1], [0, 0, 1, 1], [], []>} : vector<16x4xf32>, vector<4x1296xf32>, vector<16x1296xf32> -> vector<16x1296xf32>
    %37 = arith.addf %31, %36 : vector<16x1296xf32>
    %c0_32 = arith.constant 0 : index
    %c0_33 = arith.constant 0 : index
    %c145 = arith.constant 145 : index
    %38 = vector.load %arg1[%c0_32, %c0_33, %c145] : memref<1x4x1552xf32, #tpu.memory_space<vmem>>, vector<1x4x1296xf32>
    %39 = vector.shape_cast %38 : vector<1x4x1296xf32> to vector<4x1296xf32>
    %c6 = arith.constant 6 : index
    %c0_34 = arith.constant 0 : index
    %c0_35 = arith.constant 0 : index
    %40 = vector.load %arg2[%c6, %c0_34, %c0_35] : memref<9x16x4xf32, #tpu.memory_space<vmem>>, vector<1x16x4xf32>
    %41 = vector.shape_cast %40 : vector<1x16x4xf32> to vector<16x4xf32>
    %cst_36 = arith.constant dense<0.000000e+00> : vector<16x1296xf32>
    %42 = tpu.matmul %41, %39, %cst_36 {dimension_numbers = #tpu.dot_dimension_numbers<[1], [0], [0], [1], [0, 0, 1, 1], [], []>} : vector<16x4xf32>, vector<4x1296xf32>, vector<16x1296xf32> -> vector<16x1296xf32>
    %43 = arith.addf %37, %42 : vector<16x1296xf32>
    %c0_37 = arith.constant 0 : index
    %c0_38 = arith.constant 0 : index
    %c146 = arith.constant 146 : index
    %44 = vector.load %arg1[%c0_37, %c0_38, %c146] : memref<1x4x1552xf32, #tpu.memory_space<vmem>>, vector<1x4x1296xf32>
    %45 = vector.shape_cast %44 : vector<1x4x1296xf32> to vector<4x1296xf32>
    %c7 = arith.constant 7 : index
    %c0_39 = arith.constant 0 : index
    %c0_40 = arith.constant 0 : index
    %46 = vector.load %arg2[%c7, %c0_39, %c0_40] : memref<9x16x4xf32, #tpu.memory_space<vmem>>, vector<1x16x4xf32>
    %47 = vector.shape_cast %46 : vector<1x16x4xf32> to vector<16x4xf32>
    %cst_41 = arith.constant dense<0.000000e+00> : vector<16x1296xf32>
    %48 = tpu.matmul %47, %45, %cst_41 {dimension_numbers = #tpu.dot_dimension_numbers<[1], [0], [0], [1], [0, 0, 1, 1], [], []>} : vector<16x4xf32>, vector<4x1296xf32>, vector<16x1296xf32> -> vector<16x1296xf32>
    %49 = arith.addf %43, %48 : vector<16x1296xf32>
    %c0_42 = arith.constant 0 : index
    %c0_43 = arith.constant 0 : index
    %c147 = arith.constant 147 : index
    %50 = vector.load %arg1[%c0_42, %c0_43, %c147] : memref<1x4x1552xf32, #tpu.memory_space<vmem>>, vector<1x4x1296xf32>
    %51 = vector.shape_cast %50 : vector<1x4x1296xf32> to vector<4x1296xf32>
    %c8 = arith.constant 8 : index
    %c0_44 = arith.constant 0 : index
    %c0_45 = arith.constant 0 : index
    %52 = vector.load %arg2[%c8, %c0_44, %c0_45] : memref<9x16x4xf32, #tpu.memory_space<vmem>>, vector<1x16x4xf32>
    %53 = vector.shape_cast %52 : vector<1x16x4xf32> to vector<16x4xf32>
    %cst_46 = arith.constant dense<0.000000e+00> : vector<16x1296xf32>
    %54 = tpu.matmul %53, %51, %cst_46 {dimension_numbers = #tpu.dot_dimension_numbers<[1], [0], [0], [1], [0, 0, 1, 1], [], []>} : vector<16x4xf32>, vector<4x1296xf32>, vector<16x1296xf32> -> vector<16x1296xf32>
    %55 = arith.addf %49, %54 : vector<16x1296xf32>
    %c0_47 = arith.constant 0 : index
    %c0_48 = arith.constant 0 : index
    %56 = vector.load %arg3[%c0_47, %c0_48] : memref<16x1xf32, #tpu.memory_space<vmem>>, vector<16x1xf32>
    %57 = vector.broadcast %56 : vector<16x1xf32> to vector<16x1296xf32>
    %58 = arith.addf %55, %57 : vector<16x1296xf32>
    %cst_49 = arith.constant 0.000000e+00 : f32
    %59 = vector.broadcast %cst_49 : f32 to vector<16x1296xf32>
    %60 = arith.maximumf %58, %59 : vector<16x1296xf32>
    %cst_50 = arith.constant 0.000000e+00 : f32
    %61 = vector.shape_cast %2 : vector<1x1296xi1> to vector<1x1296xi1>
    %62 = vector.broadcast %61 : vector<1x1296xi1> to vector<16x1296xi1>
    %63 = vector.broadcast %cst_50 : f32 to vector<16x1296xf32>
    %64 = arith.select %62, %60, %63 : vector<16x1296xi1>, vector<16x1296xf32>
    %c0_51 = arith.constant 0 : index
    %c128_52 = arith.constant 128 : index
    %65 = vector.load %arg10[%c0_51, %c128_52] : memref<16x1552xf32, #tpu.memory_space<vmem>>, vector<16x1296xf32>
    tpu.vector_store %arg10[%c0_51, %c128_52], %64 {strides = array<i32>} : memref<16x1552xf32, #tpu.memory_space<vmem>>, vector<16x1296xf32>,
    %c0_53 = arith.constant 0 : index
    %c109_54 = arith.constant 109 : index
    %66 = vector.load %arg10[%c0_53, %c109_54] : memref<16x1552xf32, #tpu.memory_space<vmem>>, vector<16x1296xf32>
    %c0_55 = arith.constant 0 : index
    %c0_56 = arith.constant 0 : index
    %c0_57 = arith.constant 0 : index
    %67 = vector.load %arg4[%c0_55, %c0_56, %c0_57] : memref<9x16x16xf32, #tpu.memory_space<vmem>>, vector<1x16x16xf32>
    %68 = vector.shape_cast %67 : vector<1x16x16xf32> to vector<16x16xf32>
    %cst_58 = arith.constant dense<0.000000e+00> : vector<16x1296xf32>
    %69 = tpu.matmul %68, %66, %cst_58 {dimension_numbers = #tpu.dot_dimension_numbers<[1], [0], [0], [1], [0, 0, 1, 1], [], []>} : vector<16x16xf32>, vector<16x1296xf32>, vector<16x1296xf32> -> vector<16x1296xf32>
    %c0_59 = arith.constant 0 : index
    %c110_60 = arith.constant 110 : index
    %70 = vector.load %arg10[%c0_59, %c110_60] : memref<16x1552xf32, #tpu.memory_space<vmem>>, vector<16x1296xf32>
    %c1_61 = arith.constant 1 : index
    %c0_62 = arith.constant 0 : index
    %c0_63 = arith.constant 0 : index
    %71 = vector.load %arg4[%c1_61, %c0_62, %c0_63] : memref<9x16x16xf32, #tpu.memory_space<vmem>>, vector<1x16x16xf32>
    %72 = vector.shape_cast %71 : vector<1x16x16xf32> to vector<16x16xf32>
    %cst_64 = arith.constant dense<0.000000e+00> : vector<16x1296xf32>
    %73 = tpu.matmul %72, %70, %cst_64 {dimension_numbers = #tpu.dot_dimension_numbers<[1], [0], [0], [1], [0, 0, 1, 1], [], []>} : vector<16x16xf32>, vector<16x1296xf32>, vector<16x1296xf32> -> vector<16x1296xf32>
    %74 = arith.addf %69, %73 : vector<16x1296xf32>
    %c0_65 = arith.constant 0 : index
    %c111_66 = arith.constant 111 : index
    %75 = vector.load %arg10[%c0_65, %c111_66] : memref<16x1552xf32, #tpu.memory_space<vmem>>, vector<16x1296xf32>
    %c2_67 = arith.constant 2 : index
    %c0_68 = arith.constant 0 : index
    %c0_69 = arith.constant 0 : index
    %76 = vector.load %arg4[%c2_67, %c0_68, %c0_69] : memref<9x16x16xf32, #tpu.memory_space<vmem>>, vector<1x16x16xf32>
    %77 = vector.shape_cast %76 : vector<1x16x16xf32> to vector<16x16xf32>
    %cst_70 = arith.constant dense<0.000000e+00> : vector<16x1296xf32>
    %78 = tpu.matmul %77, %75, %cst_70 {dimension_numbers = #tpu.dot_dimension_numbers<[1], [0], [0], [1], [0, 0, 1, 1], [], []>} : vector<16x16xf32>, vector<16x1296xf32>, vector<16x1296xf32> -> vector<16x1296xf32>
    %79 = arith.addf %74, %78 : vector<16x1296xf32>
    %c0_71 = arith.constant 0 : index
    %c127_72 = arith.constant 127 : index
    %80 = vector.load %arg10[%c0_71, %c127_72] : memref<16x1552xf32, #tpu.memory_space<vmem>>, vector<16x1296xf32>
    %c3_73 = arith.constant 3 : index
    %c0_74 = arith.constant 0 : index
    %c0_75 = arith.constant 0 : index
    %81 = vector.load %arg4[%c3_73, %c0_74, %c0_75] : memref<9x16x16xf32, #tpu.memory_space<vmem>>, vector<1x16x16xf32>
    %82 = vector.shape_cast %81 : vector<1x16x16xf32> to vector<16x16xf32>
    %cst_76 = arith.constant dense<0.000000e+00> : vector<16x1296xf32>
    %83 = tpu.matmul %82, %80, %cst_76 {dimension_numbers = #tpu.dot_dimension_numbers<[1], [0], [0], [1], [0, 0, 1, 1], [], []>} : vector<16x16xf32>, vector<16x1296xf32>, vector<16x1296xf32> -> vector<16x1296xf32>
    %84 = arith.addf %79, %83 : vector<16x1296xf32>
    %c0_77 = arith.constant 0 : index
    %c128_78 = arith.constant 128 : index
    %85 = vector.load %arg10[%c0_77, %c128_78] : memref<16x1552xf32, #tpu.memory_space<vmem>>, vector<16x1296xf32>
    %c4_79 = arith.constant 4 : index
    %c0_80 = arith.constant 0 : index
    %c0_81 = arith.constant 0 : index
    %86 = vector.load %arg4[%c4_79, %c0_80, %c0_81] : memref<9x16x16xf32, #tpu.memory_space<vmem>>, vector<1x16x16xf32>
    %87 = vector.shape_cast %86 : vector<1x16x16xf32> to vector<16x16xf32>
    %cst_82 = arith.constant dense<0.000000e+00> : vector<16x1296xf32>
    %88 = tpu.matmul %87, %85, %cst_82 {dimension_numbers = #tpu.dot_dimension_numbers<[1], [0], [0], [1], [0, 0, 1, 1], [], []>} : vector<16x16xf32>, vector<16x1296xf32>, vector<16x1296xf32> -> vector<16x1296xf32>
    %89 = arith.addf %84, %88 : vector<16x1296xf32>
    %c0_83 = arith.constant 0 : index
    %c129_84 = arith.constant 129 : index
    %90 = vector.load %arg10[%c0_83, %c129_84] : memref<16x1552xf32, #tpu.memory_space<vmem>>, vector<16x1296xf32>
    %c5_85 = arith.constant 5 : index
    %c0_86 = arith.constant 0 : index
    %c0_87 = arith.constant 0 : index
    %91 = vector.load %arg4[%c5_85, %c0_86, %c0_87] : memref<9x16x16xf32, #tpu.memory_space<vmem>>, vector<1x16x16xf32>
    %92 = vector.shape_cast %91 : vector<1x16x16xf32> to vector<16x16xf32>
    %cst_88 = arith.constant dense<0.000000e+00> : vector<16x1296xf32>
    %93 = tpu.matmul %92, %90, %cst_88 {dimension_numbers = #tpu.dot_dimension_numbers<[1], [0], [0], [1], [0, 0, 1, 1], [], []>} : vector<16x16xf32>, vector<16x1296xf32>, vector<16x1296xf32> -> vector<16x1296xf32>
    %94 = arith.addf %89, %93 : vector<16x1296xf32>
    %c0_89 = arith.constant 0 : index
    %c145_90 = arith.constant 145 : index
    %95 = vector.load %arg10[%c0_89, %c145_90] : memref<16x1552xf32, #tpu.memory_space<vmem>>, vector<16x1296xf32>
    %c6_91 = arith.constant 6 : index
    %c0_92 = arith.constant 0 : index
    %c0_93 = arith.constant 0 : index
    %96 = vector.load %arg4[%c6_91, %c0_92, %c0_93] : memref<9x16x16xf32, #tpu.memory_space<vmem>>, vector<1x16x16xf32>
    %97 = vector.shape_cast %96 : vector<1x16x16xf32> to vector<16x16xf32>
    %cst_94 = arith.constant dense<0.000000e+00> : vector<16x1296xf32>
    %98 = tpu.matmul %97, %95, %cst_94 {dimension_numbers = #tpu.dot_dimension_numbers<[1], [0], [0], [1], [0, 0, 1, 1], [], []>} : vector<16x16xf32>, vector<16x1296xf32>, vector<16x1296xf32> -> vector<16x1296xf32>
    %99 = arith.addf %94, %98 : vector<16x1296xf32>
    %c0_95 = arith.constant 0 : index
    %c146_96 = arith.constant 146 : index
    %100 = vector.load %arg10[%c0_95, %c146_96] : memref<16x1552xf32, #tpu.memory_space<vmem>>, vector<16x1296xf32>
    %c7_97 = arith.constant 7 : index
    %c0_98 = arith.constant 0 : index
    %c0_99 = arith.constant 0 : index
    %101 = vector.load %arg4[%c7_97, %c0_98, %c0_99] : memref<9x16x16xf32, #tpu.memory_space<vmem>>, vector<1x16x16xf32>
    %102 = vector.shape_cast %101 : vector<1x16x16xf32> to vector<16x16xf32>
    %cst_100 = arith.constant dense<0.000000e+00> : vector<16x1296xf32>
    %103 = tpu.matmul %102, %100, %cst_100 {dimension_numbers = #tpu.dot_dimension_numbers<[1], [0], [0], [1], [0, 0, 1, 1], [], []>} : vector<16x16xf32>, vector<16x1296xf32>, vector<16x1296xf32> -> vector<16x1296xf32>
    %104 = arith.addf %99, %103 : vector<16x1296xf32>
    %c0_101 = arith.constant 0 : index
    %c147_102 = arith.constant 147 : index
    %105 = vector.load %arg10[%c0_101, %c147_102] : memref<16x1552xf32, #tpu.memory_space<vmem>>, vector<16x1296xf32>
    %c8_103 = arith.constant 8 : index
    %c0_104 = arith.constant 0 : index
    %c0_105 = arith.constant 0 : index
    %106 = vector.load %arg4[%c8_103, %c0_104, %c0_105] : memref<9x16x16xf32, #tpu.memory_space<vmem>>, vector<1x16x16xf32>
    %107 = vector.shape_cast %106 : vector<1x16x16xf32> to vector<16x16xf32>
    %cst_106 = arith.constant dense<0.000000e+00> : vector<16x1296xf32>
    %108 = tpu.matmul %107, %105, %cst_106 {dimension_numbers = #tpu.dot_dimension_numbers<[1], [0], [0], [1], [0, 0, 1, 1], [], []>} : vector<16x16xf32>, vector<16x1296xf32>, vector<16x1296xf32> -> vector<16x1296xf32>
    %109 = arith.addf %104, %108 : vector<16x1296xf32>
    %c0_107 = arith.constant 0 : index
    %c0_108 = arith.constant 0 : index
    %110 = vector.load %arg5[%c0_107, %c0_108] : memref<16x1xf32, #tpu.memory_space<vmem>>, vector<16x1xf32>
    %111 = vector.broadcast %110 : vector<16x1xf32> to vector<16x1296xf32>
    %112 = arith.addf %109, %111 : vector<16x1296xf32>
    %cst_109 = arith.constant 0.000000e+00 : f32
    %113 = vector.broadcast %cst_109 : f32 to vector<16x1296xf32>
    %114 = arith.maximumf %112, %113 : vector<16x1296xf32>
    %cst_110 = arith.constant 0.000000e+00 : f32
    %115 = vector.shape_cast %2 : vector<1x1296xi1> to vector<1x1296xi1>
    %116 = vector.broadcast %115 : vector<1x1296xi1> to vector<16x1296xi1>
    %117 = vector.broadcast %cst_110 : f32 to vector<16x1296xf32>
    %118 = arith.select %116, %114, %117 : vector<16x1296xi1>, vector<16x1296xf32>
    %c0_111 = arith.constant 0 : index
    %c128_112 = arith.constant 128 : index
    %119 = vector.load %arg11[%c0_111, %c128_112] : memref<16x1552xf32, #tpu.memory_space<vmem>>, vector<16x1296xf32>
    tpu.vector_store %arg11[%c0_111, %c128_112], %118 {strides = array<i32>} : memref<16x1552xf32, #tpu.memory_space<vmem>>, vector<16x1296xf32>,
    %cst_113 = arith.constant 0.000000e+00 : f32
    %120 = vector.broadcast %cst_113 : f32 to vector<16x1296xf32>
    %c0_114 = arith.constant 0 : index
    %c109_115 = arith.constant 109 : index
    %121 = vector.load %arg11[%c0_114, %c109_115] : memref<16x1552xf32, #tpu.memory_space<vmem>>, vector<16x1296xf32>
    %c0_116 = arith.constant 0 : index
    %c0_117 = arith.constant 0 : index
    %c0_118 = arith.constant 0 : index
    %122 = vector.load %arg6[%c0_116, %c0_117, %c0_118] : memref<9x16x1xf32, #tpu.memory_space<vmem>>, vector<1x16x1xf32>
    %123 = vector.shape_cast %122 : vector<1x16x1xf32> to vector<16x1xf32>
    %124 = vector.broadcast %123 : vector<16x1xf32> to vector<16x1296xf32>
    %125 = arith.mulf %121, %124 : vector<16x1296xf32>
    %126 = arith.addf %120, %125 : vector<16x1296xf32>
    %c0_119 = arith.constant 0 : index
    %c110_120 = arith.constant 110 : index
    %127 = vector.load %arg11[%c0_119, %c110_120] : memref<16x1552xf32, #tpu.memory_space<vmem>>, vector<16x1296xf32>
    %c1_121 = arith.constant 1 : index
    %c0_122 = arith.constant 0 : index
    %c0_123 = arith.constant 0 : index
    %128 = vector.load %arg6[%c1_121, %c0_122, %c0_123] : memref<9x16x1xf32, #tpu.memory_space<vmem>>, vector<1x16x1xf32>
    %129 = vector.shape_cast %128 : vector<1x16x1xf32> to vector<16x1xf32>
    %130 = vector.broadcast %129 : vector<16x1xf32> to vector<16x1296xf32>
    %131 = arith.mulf %127, %130 : vector<16x1296xf32>
    %132 = arith.addf %126, %131 : vector<16x1296xf32>
    %c0_124 = arith.constant 0 : index
    %c111_125 = arith.constant 111 : index
    %133 = vector.load %arg11[%c0_124, %c111_125] : memref<16x1552xf32, #tpu.memory_space<vmem>>, vector<16x1296xf32>
    %c2_126 = arith.constant 2 : index
    %c0_127 = arith.constant 0 : index
    %c0_128 = arith.constant 0 : index
    %134 = vector.load %arg6[%c2_126, %c0_127, %c0_128] : memref<9x16x1xf32, #tpu.memory_space<vmem>>, vector<1x16x1xf32>
    %135 = vector.shape_cast %134 : vector<1x16x1xf32> to vector<16x1xf32>
    %136 = vector.broadcast %135 : vector<16x1xf32> to vector<16x1296xf32>
    %137 = arith.mulf %133, %136 : vector<16x1296xf32>
    %138 = arith.addf %132, %137 : vector<16x1296xf32>
    %c0_129 = arith.constant 0 : index
    %c127_130 = arith.constant 127 : index
    %139 = vector.load %arg11[%c0_129, %c127_130] : memref<16x1552xf32, #tpu.memory_space<vmem>>, vector<16x1296xf32>
    %c3_131 = arith.constant 3 : index
    %c0_132 = arith.constant 0 : index
    %c0_133 = arith.constant 0 : index
    %140 = vector.load %arg6[%c3_131, %c0_132, %c0_133] : memref<9x16x1xf32, #tpu.memory_space<vmem>>, vector<1x16x1xf32>
    %141 = vector.shape_cast %140 : vector<1x16x1xf32> to vector<16x1xf32>
    %142 = vector.broadcast %141 : vector<16x1xf32> to vector<16x1296xf32>
    %143 = arith.mulf %139, %142 : vector<16x1296xf32>
    %144 = arith.addf %138, %143 : vector<16x1296xf32>
    %c0_134 = arith.constant 0 : index
    %c128_135 = arith.constant 128 : index
    %145 = vector.load %arg11[%c0_134, %c128_135] : memref<16x1552xf32, #tpu.memory_space<vmem>>, vector<16x1296xf32>
    %c4_136 = arith.constant 4 : index
    %c0_137 = arith.constant 0 : index
    %c0_138 = arith.constant 0 : index
    %146 = vector.load %arg6[%c4_136, %c0_137, %c0_138] : memref<9x16x1xf32, #tpu.memory_space<vmem>>, vector<1x16x1xf32>
    %147 = vector.shape_cast %146 : vector<1x16x1xf32> to vector<16x1xf32>
    %148 = vector.broadcast %147 : vector<16x1xf32> to vector<16x1296xf32>
    %149 = arith.mulf %145, %148 : vector<16x1296xf32>
    %150 = arith.addf %144, %149 : vector<16x1296xf32>
    %c0_139 = arith.constant 0 : index
    %c129_140 = arith.constant 129 : index
    %151 = vector.load %arg11[%c0_139, %c129_140] : memref<16x1552xf32, #tpu.memory_space<vmem>>, vector<16x1296xf32>
    %c5_141 = arith.constant 5 : index
    %c0_142 = arith.constant 0 : index
    %c0_143 = arith.constant 0 : index
    %152 = vector.load %arg6[%c5_141, %c0_142, %c0_143] : memref<9x16x1xf32, #tpu.memory_space<vmem>>, vector<1x16x1xf32>
    %153 = vector.shape_cast %152 : vector<1x16x1xf32> to vector<16x1xf32>
    %154 = vector.broadcast %153 : vector<16x1xf32> to vector<16x1296xf32>
    %155 = arith.mulf %151, %154 : vector<16x1296xf32>
    %156 = arith.addf %150, %155 : vector<16x1296xf32>
    %c0_144 = arith.constant 0 : index
    %c145_145 = arith.constant 145 : index
    %157 = vector.load %arg11[%c0_144, %c145_145] : memref<16x1552xf32, #tpu.memory_space<vmem>>, vector<16x1296xf32>
    %c6_146 = arith.constant 6 : index
    %c0_147 = arith.constant 0 : index
    %c0_148 = arith.constant 0 : index
    %158 = vector.load %arg6[%c6_146, %c0_147, %c0_148] : memref<9x16x1xf32, #tpu.memory_space<vmem>>, vector<1x16x1xf32>
    %159 = vector.shape_cast %158 : vector<1x16x1xf32> to vector<16x1xf32>
    %160 = vector.broadcast %159 : vector<16x1xf32> to vector<16x1296xf32>
    %161 = arith.mulf %157, %160 : vector<16x1296xf32>
    %162 = arith.addf %156, %161 : vector<16x1296xf32>
    %c0_149 = arith.constant 0 : index
    %c146_150 = arith.constant 146 : index
    %163 = vector.load %arg11[%c0_149, %c146_150] : memref<16x1552xf32, #tpu.memory_space<vmem>>, vector<16x1296xf32>
    %c7_151 = arith.constant 7 : index
    %c0_152 = arith.constant 0 : index
    %c0_153 = arith.constant 0 : index
    %164 = vector.load %arg6[%c7_151, %c0_152, %c0_153] : memref<9x16x1xf32, #tpu.memory_space<vmem>>, vector<1x16x1xf32>
    %165 = vector.shape_cast %164 : vector<1x16x1xf32> to vector<16x1xf32>
    %166 = vector.broadcast %165 : vector<16x1xf32> to vector<16x1296xf32>
    %167 = arith.mulf %163, %166 : vector<16x1296xf32>
    %168 = arith.addf %162, %167 : vector<16x1296xf32>
    %c0_154 = arith.constant 0 : index
    %c147_155 = arith.constant 147 : index
    %169 = vector.load %arg11[%c0_154, %c147_155] : memref<16x1552xf32, #tpu.memory_space<vmem>>, vector<16x1296xf32>
    %c8_156 = arith.constant 8 : index
    %c0_157 = arith.constant 0 : index
    %c0_158 = arith.constant 0 : index
    %170 = vector.load %arg6[%c8_156, %c0_157, %c0_158] : memref<9x16x1xf32, #tpu.memory_space<vmem>>, vector<1x16x1xf32>
    %171 = vector.shape_cast %170 : vector<1x16x1xf32> to vector<16x1xf32>
    %172 = vector.broadcast %171 : vector<16x1xf32> to vector<16x1296xf32>
    %173 = arith.mulf %169, %172 : vector<16x1296xf32>
    %174 = arith.addf %168, %173 : vector<16x1296xf32>
    %cst_159 = arith.constant dense<0.000000e+00> : vector<1296xf32>
    %175 = vector.multi_reduction <add>, %174, %cst_159 [0] : vector<16x1296xf32> to vector<1296xf32>
    %176 = vector.shape_cast %175 : vector<1296xf32> to vector<1x1296xf32>
    %c0_160 = arith.constant 0 : index
    %c0_161 = arith.constant 0 : index
    %177 = vector.load %arg7[%c0_160, %c0_161] : memref<1x1xf32, #tpu.memory_space<vmem>>, vector<1x1xf32>
    %178 = vector.broadcast %177 : vector<1x1xf32> to vector<1x1296xf32>
    %179 = arith.addf %176, %178 : vector<1x1296xf32>
    %c0_162 = arith.constant 0 : index
    %c0_163 = arith.constant 0 : index
    %c0_164 = arith.constant 0 : index
    %180 = vector.load %arg9[%c0_162, %c0_163, %c0_164] : memref<1x1x1296xf32, #tpu.memory_space<vmem>>, vector<1x1x1296xf32>
    %181 = vector.shape_cast %180 : vector<1x1x1296xf32> to vector<1x1296xf32>
    %182 = vector.shape_cast %179 : vector<1x1296xf32> to vector<1x1x1296xf32>
    tpu.vector_store %arg9[%c0_162, %c0_163, %c0_164], %182 {strides = array<i32>} : memref<1x1x1296xf32, #tpu.memory_space<vmem>>, vector<1x1x1296xf32>,
    return
  }
  func.func @transform_0(%arg0: i32) -> (i32, i32, i32) {
    %c0_i32 = arith.constant 0 : i32
    %c0_i32_0 = arith.constant 0 : i32
    %c0_i32_1 = arith.constant 0 : i32
    return %arg0, %c0_i32, %c0_i32_0 : i32, i32, i32
  }
  func.func @transform_1(%arg0: i32) -> (i32, i32, i32) {
    %c0_i32 = arith.constant 0 : i32
    %c0_i32_0 = arith.constant 0 : i32
    %c0_i32_1 = arith.constant 0 : i32
    %c0_i32_2 = arith.constant 0 : i32
    return %c0_i32, %c0_i32_0, %c0_i32_1 : i32, i32, i32
  }
  func.func @transform_2(%arg0: i32) -> (i32, i32) {
    %c0_i32 = arith.constant 0 : i32
    %c0_i32_0 = arith.constant 0 : i32
    %c0_i32_1 = arith.constant 0 : i32
    return %c0_i32, %c0_i32_0 : i32, i32
  }
  func.func @transform_3(%arg0: i32) -> (i32, i32, i32) {
    %c0_i32 = arith.constant 0 : i32
    %c0_i32_0 = arith.constant 0 : i32
    %c0_i32_1 = arith.constant 0 : i32
    %c0_i32_2 = arith.constant 0 : i32
    return %c0_i32, %c0_i32_0, %c0_i32_1 : i32, i32, i32
  }
  func.func @transform_4(%arg0: i32) -> (i32, i32) {
    %c0_i32 = arith.constant 0 : i32
    %c0_i32_0 = arith.constant 0 : i32
    %c0_i32_1 = arith.constant 0 : i32
    return %c0_i32, %c0_i32_0 : i32, i32
  }
  func.func @transform_5(%arg0: i32) -> (i32, i32, i32) {
    %c0_i32 = arith.constant 0 : i32
    %c0_i32_0 = arith.constant 0 : i32
    %c0_i32_1 = arith.constant 0 : i32
    %c0_i32_2 = arith.constant 0 : i32
    return %c0_i32, %c0_i32_0, %c0_i32_1 : i32, i32, i32
  }
  func.func @transform_6(%arg0: i32) -> (i32, i32) {
    %c0_i32 = arith.constant 0 : i32
    %c0_i32_0 = arith.constant 0 : i32
    %c0_i32_1 = arith.constant 0 : i32
    return %c0_i32, %c0_i32_0 : i32, i32
  }
  func.func @transform_7(%arg0: i32) -> (i32, i32) {
    %c0_i32 = arith.constant 0 : i32
    %c0_i32_0 = arith.constant 0 : i32
    %c0_i32_1 = arith.constant 0 : i32
    return %c0_i32, %c0_i32_0 : i32, i32
  }
  func.func @transform_8(%arg0: i32) -> (i32, i32, i32) {
    %c0_i32 = arith.constant 0 : i32
    %c0_i32_0 = arith.constant 0 : i32
    %c0_i32_1 = arith.constant 0 : i32
    return %arg0, %c0_i32, %c0_i32_0 : i32, i32, i32
  }
}

</mosaic_0001>

<bundles_post_ra>
// kernel: tpu_custom_call.1
= control target key start
LH: loop header
LB: loop body
LE: loop exit
PB: predicated region body
PF: predicated region fallthrough
CT: control target
= control target key end

     0   :  { %s15015_s0 = inlined_call_operand.vmem [shape: f32[2,4,1552], index: 0, kind: input, shape index: {}]   ;;  %s15016_s1 = inlined_call_operand.vmem [shape: f32[9,16,4], index: 1, kind: input, shape index: {}]   ;;  %s15017_s2 = inlined_call_operand.vmem [shape: f32[16,1], index: 2, kind: input, shape index: {}]   ;;  %s15018_s3 = inlined_call_operand.vmem [shape: f32[9,16,16], index: 3, kind: input, shape index: {}]   ;;  %s15019_s4 = inlined_call_operand.vmem [shape: f32[16,1], index: 4, kind: input, shape index: {}]   ;;  %s15020_s5 = inlined_call_operand.vmem [shape: f32[9,16,1], index: 5, kind: input, shape index: {}]   ;;  %s15021_s6 = inlined_call_operand.<no memory space> [shape: f32[1,1], index: 6, kind: input, shape index: {}]   ;;  %s15022_s7 = inlined_call_operand.vmem [shape: f32[1,1296], index: 7, kind: input, shape index: {}]   ;;  %s15023_s8 = inlined_call_operand.hbm [shape: f32[2,1,1296], index: 8, kind: output, shape index: {}]  }
   0x1   :  { %v13_v0 = vstv %s15021_s6 }
   0x2   :  { %14 = vst [vmem:[#allocation4] sm:$0x1] %v13_v0 }
   0x3   :  { %15 = vsyncpa [#allocation6], 0 }
   0x4   :  { %17 = vsyncpa [#allocation6 + $0x1], 0  ;;  %s9967_s29 = smov 0   ;;  %s9969_s30 = smov 0  }
   0x5   :  { %s9971_s9 = smov 0   ;;  %s9973_s10 = smov 0  }
   0x6 LB: > { %s9988_s6 = sadd.s32 4294967295, %s9903_s10   ;;  %s8753_s11 = sadd.s32 4294967294, %s9903_s10   ;;  %s9903_s10 = sphi %s9973_s10, %s15821_s10   ;;  %s9899_s9 = sphi %s9971_s9, %s15820_s9   ;;  %s9895_s30 = sphi %s9969_s30, %s15819_s30   ;;  %s9891_s29 = sphi %s9967_s29, %s15818_s29  }
   0x7   : > { %s9992_s12 = sadd.s32 1, %s9903_s10   ;;  %s203_s13 = sadd.s32 1, %s9899_s9 }
   0x8   : > { %s200_s14 = ssub.s32 %s9903_s10, %s9992_s12  ;;  %p213_p0 = scmp.ne.s32.totalorder %s9899_s9, %s9895_s30 }
   0x9   : > { %p201_p1 = scmp.eq.s32.totalorder %s200_s14, 0  ;;  %p214_p2 = scmp.eq.s32.totalorder %s9988_s6, 1 }
   0xa   : > { %p219_p3 = scmp.ne.s32.totalorder %s9895_s30, %s9891_s29  ;;  %p220_p4 = scmp.eq.s32.totalorder %s8753_s11, 1 }
   0xb   : > { %s10003_s15 = scalar_select %p201_p1, %s9899_s9, %s203_s13  }
   0xc   : > { %p10005_p5 = por %p214_p2, %p213_p0  ;;  %p10009_p6 = por %p220_p4, %p219_p3 }
   0xd   : > { %p8756_p7 = scmp.ge.s32.totalorder %s9903_s10, 1  ;;  %p267_p8 = scmp.lt.s32.totalorder %s9903_s10, 3 }
   0xf   : > { %p268_p9 = pnand %p8756_p7, %p267_p8 }
  0x11   : > { %271 = sbr.rel (%p268_p9) target bundleno = 2489 (0x9b9), region = 52 }
  0x16   : > { %p301_p10 = scmp.lt.s32.totalorder %s9988_s6, 1  ;;  %s9905_s23 = smov 18   ;;  %vm369_vm0 = vcmask 146432   ;;  %vm15026_vm1 = vcmask 1043456   ;;  %v10101_v54 = vld [vmem:[%s15016_s1 + $0x10] sm:$0xff]  ;;  %vm380_vm2 = vcmask 31744  }
  0x17   : > { %s9906_s24 = smov 19   ;;  %s9907_s25 = smov 17   ;;  %v10106_v55 = vld [vmem:[%s15016_s1 + $0x18] sm:$0xff]  ;;  %vm15129_vm3 = vcmask 154624   ;;  %vm1054_vm4 = vcmask 138240   ;;  %vm15109_vm5 = vcmask 7168  }
  0x18   : > { %s302_s18 = scalar_select %p301_p10, %s9988_s6, 1  ;;  %vm15030_vm6 = vcmask 1039360   ;;  %vm15029_vm7 = vcmask 908288   ;;  %vm15028_vm8 = vcmask 900096   ;;  %vm15027_vm9 = vcmask 891904  }
  0x19   : > { %s9908_s26 = smov 1   ;;  %s9909_s21 = smov 127  }
  0x1a   : > { %s9306_s19 = smul.u32 52, %s302_s18  ;;  %s9910_s14 = smov 111  }
  0x1b   : > { %s9911_s28 = smov 110   ;;  %s9912_s20 = smov 109  }
  0x1c   : > { %s10020_s22 = scalar_lea.vmem %s15015_s0, %s9306_s19  ;;  %s9914_s13 = smov 126  }
  0x1d   : > { %v10023_v1 = vld [vmem:[%s10020_s22 + $0x8] sm:$0xff]  ;;  %v10026_v2 = vld [vmem:[%s10020_s22] sm:$0xff]  ;;  %v10029_v3 = vld [vmem:[%s10020_s22 + $0x18] sm:$0xff]  ;;  %s9915_s18 = smov 108   ;;  %s9918_s19 = smov 90  }
  0x1e   : > { %329 = vst [vmem:[#allocation1 + $0x10] ss:$2 sm:$0xff] %v10023_v1  ;;  %v10033_v4 = vld [vmem:[%s10020_s22 + $0x10] sm:$0xff]  ;;  %v315_v6 = vld [vmem:[%s10020_s22 + $0x28] sm:$0xf]  ;;  %v10040_v7 = vld [vmem:[%s10020_s22 + $0x20] sm:$0xff] }
  0x1f   : > { %327 = vst [vmem:[#allocation1] ss:$2 sm:$0xff] %v10026_v2  ;;  %v1002_v29 = vld [vmem:[%s10020_s22 + $0x28] sm:$0xf]  ;;  %v10127_v62 = vld [vmem:[%s10020_s22 + $0x1c] sm:$0xff] }
  0x20   : > { %333 = vst [vmem:[#allocation1 + $0x30] ss:$2 sm:$0xff] %v10029_v3 }
  0x21   : > { %331 = vst [vmem:[#allocation1 + $0x20] ss:$2 sm:$0xff] %v10033_v4 }
  0x25   : > { %v336_v5 = vld.sshfl [vmem:[#allocation1 + $0x10] sm:$0xff pattern:$0x75316420]  ;;  %v337_v9 = vld.sshfl [vmem:[#allocation1 + $0x18] sm:$0xff pattern:$0x75316420] }
  0x26   : > { %351 = vrot.lane.b32.xlu1 %v336_v5, %s9905_s23  ;;  %v334_v8 = vld.sshfl [vmem:[#allocation1] sm:$0xff pattern:$0x75316420]  ;;  %v335_v13 = vld.sshfl [vmem:[#allocation1 + $0x8] sm:$0xff pattern:$0x75316420] }
  0x27   : > { %347 = vrot.lane.b32.xlu0 %v334_v8, %s9905_s23  ;;  %v340_v10 = vld.sshfl [vmem:[#allocation1 + $0x30] sm:$0xff pattern:$0x75316420]  ;;  %v341_v11 = vld.sshfl [vmem:[#allocation1 + $0x38] sm:$0xff pattern:$0x75316420] }
  0x28   : > { %669 = vst [vmem:[#allocation1 + $0x30] ss:$2 sm:$0xff] %v10029_v3  ;;  %v338_v12 = vld.sshfl [vmem:[#allocation1 + $0x20] sm:$0xff pattern:$0x75316420]  ;;  %v10150_v8 = vld [vmem:[%s10020_s22 + $0x14] sm:$0xff] }
  0x29   : > { %355 = vrot.lane.b32.xlu2 %v338_v12, %s9905_s23  ;;  %343 = vst [vmem:[#allocation1 + $0x10] ss:$2 sm:$0xff] %v315_v6  ;;  %v339_v14 = vld.sshfl [vmem:[#allocation1 + $0x28] sm:$0xff pattern:$0x75316420] }
  0x2a   : > { %342 = vst [vmem:[#allocation1] ss:$2 sm:$0xff] %v10040_v7 }
  0x2b   : > { %667 = vst [vmem:[#allocation1 + $0x20] ss:$2 sm:$0xff] %v10033_v4 }
  0x2e   : > { %353 = vrot.lane.b32.xlu1 %v337_v9, %s9905_s23 }
  0x2f   : > { %349 = vrot.lane.b32.xlu0 %v335_v13, %s9905_s23  ;;  %v677_v24 = vld.sshfl [vmem:[#allocation1 + $0x38] sm:$0xff pattern:$0x75316420]  ;;  %v676_v25 = vld.sshfl [vmem:[#allocation1 + $0x30] sm:$0xff pattern:$0x75316420] }
  0x30   : > { %v346_v15 = vld.sshfl [vmem:[#allocation1 + $0x10] sm:$0xff pattern:$0x75316420]  ;;  %1018 = vst [vmem:[#allocation1 + $0x30] ss:$2 sm:$0xff] %v10029_v3 }
  0x31   : > { %665 = vst [vmem:[#allocation1 + $0x10] ss:$2 sm:$0xff] %v10023_v1  ;;  %v345_v16 = vld.sshfl [vmem:[#allocation1 + $0x8] sm:$0xff pattern:$0x75316420]  ;;  %357 = vrot.lane.b32.xlu2 %v339_v14, %s9905_s23 }
  0x32   : > { %v344_v17 = vld.sshfl [vmem:[#allocation1] sm:$0xff pattern:$0x75316420]  ;;  %v675_v19 = vld.sshfl [vmem:[#allocation1 + $0x28] sm:$0xff pattern:$0x75316420] }
  0x33   : > { %v674_v18 = vld.sshfl [vmem:[#allocation1 + $0x20] sm:$0xff pattern:$0x75316420]  ;;  %663 = vst [vmem:[#allocation1] ss:$2 sm:$0xff] %v10026_v2 }
  0x34   : > { %1016 = vst [vmem:[#allocation1 + $0x20] ss:$2 sm:$0xff] %v10033_v4 }
  0x36   : > { %361 = vrot.lane.b32.xlu1 %v341_v11, %s9905_s23 }
  0x37   : > { %359 = vrot.lane.b32.xlu0 %v340_v10, %s9905_s23  ;;  %v1025_v34 = vld.sshfl [vmem:[#allocation1 + $0x30] sm:$0xff pattern:$0x75316420]  ;;  %v1026_v41 = vld.sshfl [vmem:[#allocation1 + $0x38] sm:$0xff pattern:$0x75316420] }
  0x38   : > { %v672_v20 = vld.sshfl [vmem:[#allocation1 + $0x10] sm:$0xff pattern:$0x75316420]  ;;  %v673_v21 = vld.sshfl [vmem:[#allocation1 + $0x18] sm:$0xff pattern:$0x75316420] }
  0x39   : > { %363 = vrot.lane.b32.xlu2 %v344_v17, %s9905_s23  ;;  %679 = vst [vmem:[#allocation1 + $0x10] ss:$2 sm:$0xff] %v315_v6 }
  0x3a   : > { %v671_v22 = vld.sshfl [vmem:[#allocation1 + $0x8] sm:$0xff pattern:$0x75316420]  ;;  %v670_v23 = vld.sshfl [vmem:[#allocation1] sm:$0xff pattern:$0x75316420] }
  0x3b   : > { %678 = vst [vmem:[#allocation1] ss:$2 sm:$0xff] %v10040_v7  ;;  %v1024_v35 = vld.sshfl [vmem:[#allocation1 + $0x28] sm:$0xff pattern:$0x75316420] }
  0x3c   : > { %v1023_v37 = vld.sshfl [vmem:[#allocation1 + $0x20] sm:$0xff pattern:$0x75316420]  ;;  %1389 = vst [vmem:[#allocation1 + $0x30] ss:$2 sm:$0xff] %v10029_v3  ;;  %v1373_v3 = vld [vmem:[%s10020_s22 + $0x28] sm:$0xff] }
  0x3d   : > { %1387 = vst [vmem:[#allocation1 + $0x20] ss:$2 sm:$0xff] %v10033_v4 }
  0x3e   : > { %367 = vrot.lane.b32.xlu1 %v346_v15, %s9905_s23 }
  0x3f   : > { %365 = vrot.lane.b32.xlu0 %v345_v16, %s9905_s23 }
  0x40   : > { %v682_v26 = vld.sshfl [vmem:[#allocation1 + $0x10] sm:$0xff pattern:$0x75316420] }
  0x41   : > { %683 = vrot.lane.b32.xlu2 %v670_v23, %s9906_s24  ;;  %1014 = vst [vmem:[#allocation1 + $0x10] ss:$2 sm:$0xff] %v10023_v1 }
  0x42   : > { %v680_v27 = vld.sshfl [vmem:[#allocation1] sm:$0xff pattern:$0x75316420]  ;;  %v681_v28 = vld.sshfl [vmem:[#allocation1 + $0x8] sm:$0xff pattern:$0x75316420] }
  0x43   : > { %1012 = vst [vmem:[#allocation1] ss:$2 sm:$0xff] %v10026_v2  ;;  %v1396_v49 = vld.sshfl [vmem:[#allocation1 + $0x30] sm:$0xff pattern:$0x75316420] }
  0x44   : > { %v1394_v44 = vld.sshfl [vmem:[#allocation1 + $0x20] sm:$0xff pattern:$0x75316420]  ;;  %v1397_v61 = vld.sshfl [vmem:[#allocation1 + $0x38] sm:$0xff pattern:$0x75316420] }
  0x45   : > { %1764 = vst [vmem:[#allocation1 + $0x30] ss:$2 sm:$0xff] %v10127_v62 }
  0x46   : > { %687 = vrot.lane.b32.xlu1 %v672_v20, %s9906_s24 }
  0x47   : > { %685 = vrot.lane.b32.xlu0 %v671_v22, %s9906_s24 }
  0x48   : > { %v1021_v30 = vld.sshfl [vmem:[#allocation1 + $0x10] sm:$0xff pattern:$0x75316420]  ;;  %v1022_v31 = vld.sshfl [vmem:[#allocation1 + $0x18] sm:$0xff pattern:$0x75316420] }
  0x49   : > { %689 = vrot.lane.b32.xlu2 %v673_v21, %s9906_s24  ;;  %1028 = vst [vmem:[#allocation1 + $0x10] ss:$2 sm:$0xff] %v1002_v29 }
  0x4a   : > { %v1019_v32 = vld.sshfl [vmem:[#allocation1] sm:$0xff pattern:$0x75316420]  ;;  %v1020_v33 = vld.sshfl [vmem:[#allocation1 + $0x8] sm:$0xff pattern:$0x75316420] }
  0x4b   : > { %1027 = vst [vmem:[#allocation1] ss:$2 sm:$0xff] %v10040_v7 }
  0x4c   : > { %v10152_v9 = vld.sshfl [vmem:[#allocation1 + $0x30] sm:$0xff pattern:$0x75316420]  ;;  %v10154_v10 = vld.sshfl [vmem:[#allocation1 + $0x38] sm:$0xff pattern:$0x75316420] }
  0x4d   : > { %2102 = vst [vmem:[#allocation1 + $0x30] ss:$2 sm:$0xff] %v10127_v62 }
  0x4e   : > { %693 = vrot.lane.b32.xlu1 %v675_v19, %s9906_s24 }
  0x4f   : > { %691 = vrot.lane.b32.xlu0 %v674_v18, %s9906_s24 }
  0x50   : > { %v1031_v43 = vld.sshfl [vmem:[#allocation1 + $0x10] sm:$0xff pattern:$0x75316420] }
  0x51   : > { %695 = vrot.lane.b32.xlu2 %v676_v25, %s9906_s24  ;;  %1385 = vst [vmem:[#allocation1 + $0x10] ss:$2 sm:$0xff] %v10023_v1 }
  0x52   : > { %v1029_v36 = vld.sshfl [vmem:[#allocation1] sm:$0xff pattern:$0x75316420]  ;;  %v1030_v38 = vld.sshfl [vmem:[#allocation1 + $0x8] sm:$0xff pattern:$0x75316420] }
  0x53   : > { %1383 = vst [vmem:[#allocation1] ss:$2 sm:$0xff] %v10026_v2 }
  0x56   : > { %699 = vrot.lane.b32.xlu1 %v680_v27, %s9906_s24 }
  0x57   : > { %697 = vrot.lane.b32.xlu0 %v677_v24, %s9906_s24 }
  0x58   : > { %v1393_v47 = vld.sshfl [vmem:[#allocation1 + $0x18] sm:$0xff pattern:$0x75316420]  ;;  %v1392_v60 = vld.sshfl [vmem:[#allocation1 + $0x10] sm:$0xff pattern:$0x75316420] }
  0x59   : > { %701 = vrot.lane.b32.xlu2 %v681_v28, %s9906_s24  ;;  %1399 = vst [vmem:[#allocation1 + $0x10] ss:$2 sm:$0xff] %v1373_v3 }
  0x5a   : > { %v1391_v39 = vld.sshfl [vmem:[#allocation1 + $0x8] sm:$0xff pattern:$0x75316420]  ;;  %v1390_v40 = vld.sshfl [vmem:[#allocation1] sm:$0xff pattern:$0x75316420] }
  0x5b   : > { %1398 = vst [vmem:[#allocation1] ss:$2 sm:$0xff] %v10040_v7  ;;  %v1395_v7 = vld.sshfl [vmem:[#allocation1 + $0x28] sm:$0xff pattern:$0x75316420] }
  0x5c   : > { %1762 = vst [vmem:[#allocation1 + $0x20] ss:$2 sm:$0xff] %v10150_v8 }
  0x5e   : > { %1032 = vrot.lane.b32.xlu1 %v1019_v32, %s9907_s25  ;;  %v10204_v32 = vld [vmem:[%s10020_s22 + $0x24] sm:$0xff] }
  0x5f   : > { %703 = vrot.lane.b32.xlu0 %v682_v26, %s9906_s24  ;;  %v10193_v26 = vld [vmem:[%s10020_s22 + $0x4] sm:$0xff] }
  0x60   : > { %v1402_v13 = vld.sshfl [vmem:[#allocation1 + $0x10] sm:$0xff pattern:$0x75316420] }
  0x61   : > { %1034 = vrot.lane.b32.xlu2 %v1020_v33, %s9907_s25 }
  0x62   : > { %v1401_v63 = vld.sshfl [vmem:[#allocation1 + $0x8] sm:$0xff pattern:$0x75316420]  ;;  %v1400_v25 = vld.sshfl [vmem:[#allocation1] sm:$0xff pattern:$0x75316420] }
  0x63   : > { %v10173_v17 = vld.sshfl [vmem:[#allocation1 + $0x20] sm:$0xff pattern:$0x75316420]  ;;  %v10175_v18 = vld.sshfl [vmem:[#allocation1 + $0x28] sm:$0xff pattern:$0x75316420] }
  0x64   : > { %2100 = vst [vmem:[#allocation1 + $0x20] ss:$2 sm:$0xff] %v10150_v8 }
  0x65   : > { %1758 = vst [vmem:[#allocation1] ss:$2 sm:$0xff] %v10193_v26 }
  0x66   : > { %1038 = vrot.lane.b32.xlu1 %v1022_v31, %s9907_s25 }
  0x67   : > { %1036 = vrot.lane.b32.xlu0 %v1021_v30, %s9907_s25 }
  0x69   : > { %1040 = vrot.lane.b32.xlu2 %v1023_v37, %s9907_s25 }
  0x6c   : > { %v10214_v33 = vld.sshfl [vmem:[#allocation1] sm:$0xff pattern:$0x75316420] }
  0x6e   : > { %1044 = vrot.lane.b32.xlu1 %v1025_v34, %s9907_s25  ;;  %v10216_v34 = vld.sshfl [vmem:[#allocation1 + $0x8] sm:$0xff pattern:$0x75316420] }
  0x6f   : > { %1042 = vrot.lane.b32.xlu0 %v1024_v35, %s9907_s25  ;;  %1773 = vst [vmem:[#allocation1] ss:$2 sm:$0xff] %v10204_v32 }
  0x71   : > { %1046 = vrot.lane.b32.xlu2 %v1026_v41, %s9907_s25 }
  0x76   : > { %1050 = vrot.lane.b32.xlu1 %v1030_v38, %s9907_s25  ;;  %v10222_v38 = vld [vmem:[%s15016_s1] sm:$0xff] }
  0x77   : > { %1048 = vrot.lane.b32.xlu0 %v1029_v36, %s9907_s25 }
  0x79   : > { %1052 = vrot.lane.b32.xlu2 %v1031_v43, %s9907_s25  ;;  %v10238_v43 = vld.sshfl [vmem:[#allocation1 + $0x8] sm:$0xff pattern:$0x75316420] }
  0x7e   : > { %1406 = vrot.lane.b32.xlu1 %v1391_v39, %s9908_s26 }
  0x7f   : > { %1404 = vrot.lane.b32.xlu0 %v1390_v40, %s9908_s26 }
  0x81   : > { %1408 = vrot.lane.b32.xlu2 %v1392_v60, %s9908_s26 }
  0x83   : > { %v356_v42 = vpop.permute.xlu2 %355 }
  0x86   : > { %1412 = vrot.lane.b32.xlu1 %v1394_v44, %s9908_s26  ;;  %v1403_v44 = vld.sshfl [vmem:[#allocation1 + $0x18] sm:$0xff pattern:$0x75316420] }
  0x87   : > { %1410 = vrot.lane.b32.xlu0 %v1393_v47, %s9908_s26 }
  0x89   : > { %1414 = vrot.lane.b32.xlu2 %v1395_v7, %s9908_s26 }
  0x8b   : > { %v358_v48 = vpop.permute.xlu2 %357 }
  0x8c   : > { %v374_v58 = vsel %vm369_vm0, %v356_v42, %v358_v48 }
  0x8e   : > { %1418 = vrot.lane.b32.xlu1 %v1397_v61, %s9908_s26 }
  0x8f   : > { %1416 = vrot.lane.b32.xlu0 %v1396_v49, %s9908_s26  ;;  %v10251_v49 = vld [vmem:[%s15016_s1 + $0x8] sm:$0xff] }
  0x91   : > { %1420 = vrot.lane.b32.xlu2 %v1400_v25, %s9908_s26 }
  0x93   : > { %v364_v56 = vpop.permute.xlu2 %363 }
  0x96   : > { %1424 = vrot.lane.b32.xlu1 %v1402_v13, %s9908_s26  ;;  %v2107_v13 = vld.sshfl [vmem:[#allocation1 + $0x20] sm:$0xff pattern:$0x75316420] }
  0x97   : > { %1422 = vrot.lane.b32.xlu0 %v1401_v63, %s9908_s26 }
  0x98   : > { %v352_v45 = vpop.permute.xlu1 %351 }
  0x99   : > { %v348_v46 = vpop.permute.xlu0 %347  ;;  %1426 = vrot.lane.b32.xlu2 %v1403_v44, %s9908_s26 }
  0x9b   : > { %v684_v6 = vpop.permute.xlu2 %683 }
  0xa0   : > { %v354_v50 = vpop.permute.xlu1 %353 }
  0xa1   : > { %v350_v51 = vpop.permute.xlu0 %349  ;;  %v373_v57 = vsel %vm369_vm0, %v354_v50, %v356_v42  ;;  %v372_v59 = vsel %vm369_vm0, %v352_v45, %v354_v50  ;;  %v10236_v42 = vld.sshfl [vmem:[#allocation1] sm:$0xff pattern:$0x75316420] }
  0xa2   : > { %v370_v52 = vsel %vm369_vm0, %v348_v46, %v350_v51  ;;  %v371_v53 = vsel %vm369_vm0, %v350_v51, %v352_v45  ;;  %v10243_v45 = vld [vmem:[%s10020_s22 + $0xc] sm:$0xff]  ;;  %2096 = vst [vmem:[#allocation1] ss:$2 sm:$0xff] %v10193_v26 }
  0xa3   : > { %8760 = vmatpush.msk.msra.mxu0 %vm15026_vm1, %v370_v52  ;;  %9303 = vmatpush.msk.msra.mxu2 %vm15026_vm1, %v370_v52  ;;  %v690_v16 = vpop.permute.xlu2 %689  ;;  %1760 = vst [vmem:[#allocation1 + $0x10] ss:$2 sm:$0xff] %v10243_v45  ;;  %v1748_v51 = vld [vmem:[%s10020_s22 + $0x2c] sm:$0xf] }
  0xa4   : > { %8763 = vmatpush.msk.msra.mxu1 %vm15026_vm1, %v371_v53  ;;  %9304 = vmatpush.msk.msra.mxu3 %vm15026_vm1, %v371_v53 }
  0xa5   : > { %8761 = vmatmul.msk.f32.vlgmr.msra.gmra.mxu0 %vm380_vm2, %v10101_v54  ;;  %8762 = vmatmul.msk.f32.vlgmr.msra.gmra.mxu2 %vm380_vm2, %v10106_v55 }
  0xa6   : > { %8764 = vmatmul.msk.f32.vlgmr.msra.gmra.mxu1 %vm380_vm2, %v10101_v54  ;;  %8765 = vmatmul.msk.f32.vlgmr.msra.gmra.mxu3 %vm380_vm2, %v10106_v55 }
  0xa7   : > { %8769 = vmatpush.msk.msrb.mxu3 %vm15026_vm1, %v373_v57  ;;  %8772 = vmatpush.msk.msrb.mxu0 %vm15026_vm1, %v374_v58 }
  0xa8   : > { %8766 = vmatpush.msk.msrb.mxu2 %vm15026_vm1, %v372_v59  ;;  %v362_v0 = vpop.permute.xlu1 %361 }
  0xa9   : > { %v360_v1 = vpop.permute.xlu0 %359  ;;  %v377_v2 = vsel %vm369_vm0, %v362_v0, %v364_v56  ;;  %v2103_v61 = vld.sshfl [vmem:[#allocation1] sm:$0xff pattern:$0x75316420] }
  0xaa   : > { %v375_v4 = vsel %vm369_vm0, %v358_v48, %v360_v1  ;;  %v376_v5 = vsel %vm369_vm0, %v360_v1, %v362_v0  ;;  %8781 = vmatpush.msk.msra.mxu3 %vm15026_vm1, %v377_v2  ;;  %v10265_v52 = vld.sshfl [vmem:[#allocation1 + $0x10] sm:$0xff pattern:$0x75316420]  ;;  %v10267_v53 = vld.sshfl [vmem:[#allocation1 + $0x18] sm:$0xff pattern:$0x75316420]  ;;  %2116 = vrot.lane.b32.xlu0 %v2103_v61, %s9909_s21 }
  0xab   : > { %8775 = vmatpush.msk.msrb.mxu1 %vm15026_vm1, %v375_v4  ;;  %8778 = vmatpush.msk.msra.mxu2 %vm15026_vm1, %v376_v5  ;;  %v696_v24 = vpop.permute.xlu2 %695  ;;  %1774 = vst [vmem:[#allocation1 + $0x10] ss:$2 sm:$0xff] %v1748_v51  ;;  %v2104_v1 = vld.sshfl [vmem:[#allocation1 + $0x8] sm:$0xff pattern:$0x75316420] }
  0xac   : > { %2118 = vrot.lane.b32.xlu1 %v2104_v1, %s9909_s21  ;;  %2111 = vst [vmem:[#allocation1] ss:$2 sm:$0xff] %v10204_v32 }
  0xad   : > { %8767 = vmatmul.msk.f32.vlgmr.msrb.gmra.mxu2 %vm380_vm2, %v10101_v54  ;;  %8773 = vmatmul.msk.f32.vlgmr.msrb.gmra.mxu0 %vm380_vm2, %v10101_v54 }
  0xae   : > { %8770 = vmatmul.msk.f32.vlgmr.msrb.gmra.mxu3 %vm380_vm2, %v10101_v54  ;;  %8776 = vmatmul.msk.f32.vlgmr.msrb.gmra.mxu1 %vm380_vm2, %v10101_v54 }
  0xb0   : > { %v368_v11 = vpop.permute.xlu1 %367 }
  0xb1   : > { %v366_v12 = vpop.permute.xlu0 %365  ;;  %8790 = vmatpush.msk.msrb.mxu2 %vm15026_vm1, %v368_v11 }
  0xb2   : > { %v379_v14 = vsel %vm369_vm0, %v366_v12, %v368_v11  ;;  %v378_v15 = vsel %vm369_vm0, %v364_v56, %v366_v12  ;;  %v10286_v0 = vld.sshfl [vmem:[#allocation1 + $0x10] sm:$0xff pattern:$0x75316420] }
  0xb3   : > { %8784 = vmatpush.msk.msra.mxu0 %vm15026_vm1, %v378_v15  ;;  %8787 = vmatpush.msk.msra.mxu1 %vm15026_vm1, %v379_v14  ;;  %v702_v35 = vpop.permute.xlu2 %701  ;;  %2098 = vst [vmem:[#allocation1 + $0x10] ss:$2 sm:$0xff] %v10243_v45  ;;  %v2110_v15 = vld.sshfl [vmem:[#allocation1 + $0x38] sm:$0xff pattern:$0x75316420] }
  0xb4   : > { %2124 = vrot.lane.b32.xlu1 %v2107_v13, %s9909_s21 }
  0xb5   : > { %8768 = vmatmul.msk.f32.gmra.mxu2 %vm380_vm2, %v10106_v55  ;;  %8774 = vmatmul.msk.f32.gmra.mxu0 %vm380_vm2, %v10106_v55 }
  0xb6   : > { %8771 = vmatmul.msk.f32.gmra.mxu3 %vm380_vm2, %v10106_v55  ;;  %8777 = vmatmul.msk.f32.gmra.mxu1 %vm380_vm2, %v10106_v55 }
  0xb8   : > { %v688_v19 = vpop.permute.xlu1 %687 }
  0xb9   : > { %v686_v20 = vpop.permute.xlu0 %685  ;;  %v708_v21 = vsel %vm15129_vm3, %v688_v19, %v690_v16 }
  0xba   : > { %v706_v22 = vsel %vm15129_vm3, %v684_v6, %v686_v20  ;;  %v707_v23 = vsel %vm15129_vm3, %v686_v20, %v688_v19  ;;  %8799 = vmatpush.msk.msrb.mxu1 %vm15026_vm1, %v708_v21  ;;  %v2106_v3 = vld.sshfl [vmem:[#allocation1 + $0x18] sm:$0xff pattern:$0x75316420]  ;;  %v10331_v20 = vld [vmem:[%s15016_s1 + $0x20] sm:$0xff] }
  0xbb   : > { %8793 = vmatpush.msk.msrb.mxu3 %vm15026_vm1, %v706_v22  ;;  %8796 = vmatpush.msk.msrb.mxu0 %vm15026_vm1, %v707_v23  ;;  %v1035_v46 = vpop.permute.xlu2 %1034 }
  0xbc   : > { %2122 = vrot.lane.b32.xlu0 %v2106_v3, %s9909_s21  ;;  %2130 = vrot.lane.b32.xlu1 %v2110_v15, %s9909_s21 }
  0xbd   : > { %8779 = vmatmul.msk.f32.vlgmr.msra.gmra.mxu2 %vm380_vm2, %v10101_v54  ;;  %8785 = vmatmul.msk.f32.vlgmr.msra.gmra.mxu0 %vm380_vm2, %v10101_v54 }
  0xbe   : > { %8782 = vmatmul.msk.f32.vlgmr.msra.gmra.mxu3 %vm380_vm2, %v10101_v54  ;;  %8788 = vmatmul.msk.f32.vlgmr.msra.gmra.mxu1 %vm380_vm2, %v10101_v54 }
  0xc0   : > { %v694_v27 = vpop.permute.xlu1 %693 }
  0xc1   : > { %v692_v28 = vpop.permute.xlu0 %691  ;;  %v711_v29 = vsel %vm15129_vm3, %v694_v27, %v696_v24 }
  0xc2   : > { %v709_v30 = vsel %vm15129_vm3, %v690_v16, %v692_v28  ;;  %v710_v31 = vsel %vm15129_vm3, %v692_v28, %v694_v27  ;;  %8808 = vmatpush.msk.msra.mxu0 %vm15026_vm1, %v711_v29  ;;  %v2109_v16 = vld.sshfl [vmem:[#allocation1 + $0x30] sm:$0xff pattern:$0x75316420]  ;;  %v2086_v28 = vld [vmem:[%s10020_s22 + $0x2c] sm:$0xf] }
  0xc3   : > { %8802 = vmatpush.msk.msra.mxu2 %vm15026_vm1, %v709_v30  ;;  %8805 = vmatpush.msk.msra.mxu3 %vm15026_vm1, %v710_v31  ;;  %v1041_v56 = vpop.permute.xlu2 %1040  ;;  %2473 = vst [vmem:[#allocation1 + $0x30] ss:$2 sm:$0xff] %v10127_v62  ;;  %v2105_v27 = vld.sshfl [vmem:[#allocation1 + $0x10] sm:$0xff pattern:$0x75316420]  ;;  %v10353_v29 = vld [vmem:[%s15016_s1 + $0x28] sm:$0xff] }
  0xc4   : > { %2128 = vrot.lane.b32.xlu0 %v2109_v16, %s9909_s21  ;;  %2120 = vrot.lane.b32.xlu2 %v2105_v27, %s9909_s21  ;;  %2112 = vst [vmem:[#allocation1 + $0x10] ss:$2 sm:$0xff] %v2086_v28  ;;  %v2114_v31 = vld.sshfl [vmem:[#allocation1 + $0x8] sm:$0xff pattern:$0x75316420] }
  0xc5   : > { %8780 = vmatmul.msk.f32.gmra.mxu2 %vm380_vm2, %v10106_v55  ;;  %8786 = vmatmul.msk.f32.gmra.mxu0 %vm380_vm2, %v10106_v55 }
  0xc6   : > { %8783 = vmatmul.msk.f32.gmra.mxu3 %vm380_vm2, %v10106_v55  ;;  %8789 = vmatmul.msk.f32.gmra.mxu1 %vm380_vm2, %v10106_v55 }
  0xc8   : > { %v700_v36 = vpop.permute.xlu1 %699 }
  0xc9   : > { %v698_v37 = vpop.permute.xlu0 %697  ;;  %v714_v41 = vsel %vm15129_vm3, %v700_v36, %v702_v35 }
  0xca   : > { %v712_v39 = vsel %vm15129_vm3, %v696_v24, %v698_v37  ;;  %v713_v40 = vsel %vm15129_vm3, %v698_v37, %v700_v36 }
  0xcb   : > { %8811 = vmatpush.msk.msra.mxu1 %vm15026_vm1, %v712_v39  ;;  %v1047_v4 = vpop.permute.xlu2 %1046  ;;  %v2115_v36 = vld.sshfl [vmem:[#allocation1 + $0x10] sm:$0xff pattern:$0x75316420] }
  0xcc   : > { %2134 = vrot.lane.b32.xlu0 %v2114_v31, %s9909_s21  ;;  %2136 = vrot.lane.b32.xlu1 %v2115_v36, %s9909_s21  ;;  %2469 = vst [vmem:[#allocation1 + $0x10] ss:$2 sm:$0xff] %v10243_v45 }
  0xcd   : > { %8791 = vmatmul.msk.f32.vlgmr.msrb.gmra.mxu2 %vm380_vm2, %v10101_v54  ;;  %8797 = vmatmul.msk.f32.vlgmr.msrb.gmra.mxu0 %vm380_vm2, %v10222_v38 }
  0xce   : > { %8794 = vmatmul.msk.f32.vlgmr.msrb.gmra.mxu3 %vm380_vm2, %v10222_v38  ;;  %8800 = vmatmul.msk.f32.vlgmr.msrb.gmra.mxu1 %vm380_vm2, %v10222_v38 }
  0xcf   : > { %8814 = vmatpush.msk.msrb.mxu2 %vm15026_vm1, %v713_v40  ;;  %8817 = vmatpush.msk.msrb.mxu3 %vm15026_vm1, %v714_v41 }
  0xd0   : > { %v1033_v47 = vpop.permute.xlu1 %1032 }
  0xd1   : > { %v704_v48 = vpop.permute.xlu0 %703 }
  0xd2   : > { %v715_v50 = vsel %vm15129_vm3, %v702_v35, %v704_v48  ;;  %8823 = vmatpush.msk.msrb.mxu1 %vm15026_vm1, %v704_v48  ;;  %v2113_v35 = vld.sshfl [vmem:[#allocation1] sm:$0xff pattern:$0x75316420] }
  0xd3   : > { %8820 = vmatpush.msk.msrb.mxu0 %vm15026_vm1, %v715_v50  ;;  %v1053_v19 = vpop.permute.xlu2 %1052  ;;  %2467 = vst [vmem:[#allocation1] ss:$2 sm:$0xff] %v10193_v26  ;;  %v2476_v50 = vld.sshfl [vmem:[#allocation1 + $0x10] sm:$0xff pattern:$0x75316420] }
  0xd4   : > { %2491 = vrot.lane.b32.xlu1 %v2476_v50, %s9910_s14 }
  0xd5   : > { %8792 = vmatmul.msk.f32.gmra.mxu2 %vm380_vm2, %v10106_v55  ;;  %8798 = vmatmul.msk.f32.gmra.mxu0 %vm380_vm2, %v10251_v49  ;;  %v1055_v55 = vsel %vm1054_vm4, %v1033_v47, %v1035_v46  ;;  %v2108_v47 = vld.sshfl [vmem:[#allocation1 + $0x28] sm:$0xff pattern:$0x75316420] }
  0xd6   : > { %8795 = vmatmul.msk.f32.gmra.mxu3 %vm380_vm2, %v10251_v49  ;;  %8801 = vmatmul.msk.f32.gmra.mxu1 %vm380_vm2, %v10251_v49  ;;  %2471 = vst [vmem:[#allocation1 + $0x20] ss:$2 sm:$0xff] %v10150_v8 }
  0xd7   : > { %2126 = vrot.lane.b32.xlu2 %v2108_v47, %s9909_s21 }
  0xd8   : > { %v1039_v57 = vpop.permute.xlu1 %1038 }
  0xd9   : > { %v1037_v54 = vpop.permute.xlu0 %1036  ;;  %v1058_v60 = vsel %vm1054_vm4, %v1039_v57, %v1041_v56 }
  0xda   : > { %v1056_v58 = vsel %vm1054_vm4, %v1035_v46, %v1037_v54  ;;  %v1057_v59 = vsel %vm1054_vm4, %v1037_v54, %v1039_v57  ;;  %v2475_v48 = vld.sshfl [vmem:[#allocation1 + $0x8] sm:$0xff pattern:$0x75316420]  ;;  %v2474_v1 = vld.sshfl [vmem:[#allocation1] sm:$0xff pattern:$0x75316420] }
  0xdb   : > { %v1409_v30 = vpop.permute.xlu2 %1408  ;;  %2489 = vrot.lane.b32.xlu0 %v2475_v48, %s9910_s14  ;;  %2482 = vst [vmem:[#allocation1] ss:$2 sm:$0xff] %v10204_v32 }
  0xdd   : > { %8803 = vmatmul.msk.f32.vlgmr.msra.gmra.mxu2 %vm380_vm2, %v10222_v38  ;;  %8809 = vmatmul.msk.f32.vlgmr.msra.gmra.mxu0 %vm380_vm2, %v10222_v38  ;;  %v2478_v51 = vld.sshfl [vmem:[#allocation1 + $0x20] sm:$0xff pattern:$0x75316420] }
  0xde   : > { %8806 = vmatmul.msk.f32.vlgmr.msra.gmra.mxu3 %vm380_vm2, %v10222_v38  ;;  %8812 = vmatmul.msk.f32.vlgmr.msra.gmra.mxu1 %vm380_vm2, %v10222_v38 }
  0xdf   : > { %8828 = vmatpush.msk.msra.mxu2 %vm15026_vm1, %v1055_v55  ;;  %8831 = vmatpush.msk.msra.mxu3 %vm15026_vm1, %v1056_v58 }
  0xe0   : > { %8834 = vmatpush.msk.msra.mxu0 %vm15026_vm1, %v1057_v59  ;;  %8837 = vmatpush.msk.msra.mxu1 %vm15026_vm1, %v1058_v60  ;;  %v1045_v2 = vpop.permute.xlu1 %1044 }
  0xe1   : > { %v1043_v63 = vpop.permute.xlu0 %1042  ;;  %v1061_v11 = vsel %vm1054_vm4, %v1045_v2, %v1047_v4  ;;  %2132 = vrot.lane.b32.xlu2 %v2113_v35, %s9909_s21  ;;  %v2480_v35 = vld.sshfl [vmem:[#allocation1 + $0x30] sm:$0xff pattern:$0x75316420] }
  0xe2   : > { %v1059_v6 = vsel %vm1054_vm4, %v1041_v56, %v1043_v63  ;;  %v1060_v7 = vsel %vm1054_vm4, %v1043_v63, %v1045_v2  ;;  %v10400_v56 = vld [vmem:[%s15016_s1 + $0x30] sm:$0xff]  ;;  %v2479_v63 = vld.sshfl [vmem:[#allocation1 + $0x28] sm:$0xff pattern:$0x75316420] }
  0xe3   : > { %v1415_v37 = vpop.permute.xlu2 %1414  ;;  %2495 = vrot.lane.b32.xlu0 %v2478_v51, %s9910_s14  ;;  %2842 = vst [vmem:[#allocation1 + $0x20] ss:$2 sm:$0xff] %v10150_v8  ;;  %2497 = vrot.lane.b32.xlu1 %v2479_v63, %s9910_s14  ;;  %v10444_v13 = vld.sshfl [vmem:[#allocation1 + $0x8] sm:$0xff pattern:$0x75316420] }
  0xe5   : > { %8804 = vmatmul.msk.f32.gmra.mxu2 %vm380_vm2, %v10251_v49  ;;  %8810 = vmatmul.msk.f32.gmra.mxu0 %vm380_vm2, %v10251_v49 }
  0xe6   : > { %8807 = vmatmul.msk.f32.gmra.mxu3 %vm380_vm2, %v10251_v49  ;;  %8813 = vmatmul.msk.f32.gmra.mxu1 %vm380_vm2, %v10251_v49 }
  0xe8   : > { %v1051_v14 = vpop.permute.xlu1 %1050 }
  0xe9   : > { %v1049_v5 = vpop.permute.xlu0 %1048  ;;  %v1064_v24 = vsel %vm1054_vm4, %v1051_v14, %v1053_v19  ;;  %2487 = vrot.lane.b32.xlu2 %v2474_v1, %s9910_s14 }
  0xea   : > { %v1062_v12 = vsel %vm1054_vm4, %v1047_v4, %v1049_v5  ;;  %v1063_v23 = vsel %vm1054_vm4, %v1049_v5, %v1051_v14  ;;  %v10429_v4 = vld [vmem:[%s15016_s1 + $0x38] sm:$0xff] }
  0xeb   : > { %v1421_v54 = vpop.permute.xlu2 %1420  ;;  %v2481_v5 = vld.sshfl [vmem:[#allocation1 + $0x38] sm:$0xff pattern:$0x75316420] }
  0xec   : > { %2501 = vrot.lane.b32.xlu0 %v2481_v5, %s9910_s14  ;;  %2844 = vst [vmem:[#allocation1 + $0x30] ss:$2 sm:$0xff] %v10127_v62 }
  0xed   : > { %8815 = vmatmul.msk.f32.vlgmr.msrb.gmra.mxu2 %vm380_vm2, %v10222_v38  ;;  %8821 = vmatmul.msk.f32.vlgmr.msrb.gmra.mxu0 %vm380_vm2, %v10222_v38 }
  0xee   : > { %8818 = vmatmul.msk.f32.vlgmr.msrb.gmra.mxu3 %vm380_vm2, %v10222_v38  ;;  %8824 = vmatmul.msk.f32.vlgmr.msrb.gmra.mxu1 %vm380_vm2, %v10222_v38 }
  0xef   : > { %8840 = vmatpush.msk.msrb.mxu2 %vm15026_vm1, %v1059_v6  ;;  %8843 = vmatpush.msk.msrb.mxu3 %vm15026_vm1, %v1060_v7 }
  0xf0   : > { %8846 = vmatpush.msk.msrb.mxu0 %vm15026_vm1, %v1061_v11  ;;  %8849 = vmatpush.msk.msrb.mxu1 %vm15026_vm1, %v1062_v12  ;;  %v1407_v21 = vpop.permute.xlu1 %1406  ;;  %v2484_v12 = vld.sshfl [vmem:[#allocation1] sm:$0xff pattern:$0x75316420] }
  0xf1   : > { %v1405_v22 = vpop.permute.xlu0 %1404  ;;  %v1430_v39 = vsel %vm15109_vm5, %v1407_v21, %v1409_v30  ;;  %2503 = vrot.lane.b32.xlu1 %v2484_v12, %s9910_s14  ;;  %2838 = vst [vmem:[#allocation1] ss:$2 sm:$0xff] %v10193_v26 }
  0xf2   : > { %v1429_v25 = vsel %vm15109_vm5, %v1405_v22, %v1407_v21  ;;  %v2477_v21 = vld.sshfl [vmem:[#allocation1 + $0x18] sm:$0xff pattern:$0x75316420] }
  0xf3   : > { %2493 = vrot.lane.b32.xlu2 %v2477_v21, %s9910_s14  ;;  %v2851_v48 = vld.sshfl [vmem:[#allocation1 + $0x30] sm:$0xff pattern:$0x75316420] }
  0xf5   : > { %8816 = vmatmul.msk.f32.gmra.mxu2 %vm380_vm2, %v10251_v49  ;;  %8822 = vmatmul.msk.f32.gmra.mxu0 %vm380_vm2, %v10251_v49 }
  0xf6   : > { %8819 = vmatmul.msk.f32.gmra.mxu3 %vm380_vm2, %v10251_v49  ;;  %8825 = vmatmul.msk.f32.gmra.mxu1 %vm380_vm2, %v10251_v49 }
  0xf8   : > { %v1413_v38 = vpop.permute.xlu1 %1412 }
  0xf9   : > { %v1411_v40 = vpop.permute.xlu0 %1410  ;;  %v1433_v41 = vsel %vm15109_vm5, %v1413_v38, %v1415_v37 }
  0xfa   : > { %v1431_v44 = vsel %vm15109_vm5, %v1409_v30, %v1411_v40  ;;  %v1432_v46 = vsel %vm15109_vm5, %v1411_v40, %v1413_v38 }
  0xfb   : > { %2499 = vrot.lane.b32.xlu2 %v2480_v35, %s9910_s14 }
  0xfd   : > { %8829 = vmatmul.msk.f32.vlgmr.msra.gmra.mxu2 %vm380_vm2, %v10331_v20  ;;  %8835 = vmatmul.msk.f32.vlgmr.msra.gmra.mxu0 %vm380_vm2, %v10331_v20 }
  0xfe   : > { %8832 = vmatmul.msk.f32.vlgmr.msra.gmra.mxu3 %vm380_vm2, %v10331_v20  ;;  %8838 = vmatmul.msk.f32.vlgmr.msra.gmra.mxu1 %vm380_vm2, %v10331_v20 }
  0xff   : > { %8852 = vmatpush.msk.msra.mxu2 %vm15026_vm1, %v1063_v23  ;;  %8855 = vmatpush.msk.msra.mxu3 %vm15026_vm1, %v1064_v24  ;;  %v2457_v24 = vld [vmem:[%s10020_s22 + $0x2c] sm:$0xf] }
 0x100   : > { %8858 = vmatpush.msk.msra.mxu0 %vm15026_vm1, %v1053_v19  ;;  %8863 = vmatpush.msk.msra.mxu1 %vm15026_vm1, %v1429_v25  ;;  %v1419_v57 = vpop.permute.xlu1 %1418  ;;  %v1427_v19 = vpop.permute.xlu2 %1426  ;;  %2483 = vst [vmem:[#allocation1 + $0x10] ss:$2 sm:$0xff] %v2457_v24 }
 0x101   : > { %v1417_v49 = vpop.permute.xlu0 %1416  ;;  %v1436_v60 = vsel %vm15109_vm5, %v1419_v57, %v1421_v54 }
 0x102   : > { %v1434_v55 = vsel %vm15109_vm5, %v1415_v37, %v1417_v49  ;;  %v1435_v58 = vsel %vm15109_vm5, %v1417_v49, %v1419_v57 }
 0x103   : > { %2505 = vrot.lane.b32.xlu2 %v10444_v13, %s9910_s14 }
 0x105   : > { %8830 = vmatmul.msk.f32.gmra.mxu2 %vm380_vm2, %v10353_v29  ;;  %8836 = vmatmul.msk.f32.gmra.mxu0 %vm380_vm2, %v10353_v29 }
 0x106   : > { %8833 = vmatmul.msk.f32.gmra.mxu3 %vm380_vm2, %v10353_v29  ;;  %8839 = vmatmul.msk.f32.gmra.mxu1 %vm380_vm2, %v10353_v29 }
 0x107   : > { %v2486_v28 = vld.sshfl [vmem:[#allocation1 + $0x10] sm:$0xff pattern:$0x75316420] }
 0x108   : > { %v1425_v11 = vpop.permute.xlu1 %1424  ;;  %2507 = vrot.lane.b32.xlu0 %v2486_v28, %s9910_s14  ;;  %2840 = vst [vmem:[#allocation1 + $0x10] ss:$2 sm:$0xff] %v10243_v45 }
 0x109   : > { %v1423_v59 = vpop.permute.xlu0 %1422 }
 0x10a   : > { %v1437_v61 = vsel %vm15109_vm5, %v1421_v54, %v1423_v59  ;;  %v1438_v16 = vsel %vm15109_vm5, %v1423_v59, %v1425_v11  ;;  %v2846_v54 = vld.sshfl [vmem:[#allocation1 + $0x8] sm:$0xff pattern:$0x75316420] }
 0x10b   : > { %2860 = vrot.lane.b32.xlu2 %v2846_v54, %s9911_s28 }
 0x10d   : > { %8841 = vmatmul.msk.f32.vlgmr.msrb.gmra.mxu2 %vm380_vm2, %v10331_v20  ;;  %8847 = vmatmul.msk.f32.vlgmr.msrb.gmra.mxu0 %vm380_vm2, %v10331_v20 }
 0x10e   : > { %8844 = vmatmul.msk.f32.vlgmr.msrb.gmra.mxu3 %vm380_vm2, %v10331_v20  ;;  %8850 = vmatmul.msk.f32.vlgmr.msrb.gmra.mxu1 %vm380_vm2, %v10331_v20 }
 0x10f   : > { %8866 = vmatpush.msk.msrb.mxu2 %vm15026_vm1, %v1430_v39  ;;  %8869 = vmatpush.msk.msrb.mxu3 %vm15026_vm1, %v1431_v44  ;;  %v2847_v38 = vld.sshfl [vmem:[#allocation1 + $0x10] sm:$0xff pattern:$0x75316420]  ;;  %v2848_v39 = vld.sshfl [vmem:[#allocation1 + $0x18] sm:$0xff pattern:$0x75316420] }
 0x110   : > { %8872 = vmatpush.msk.msrb.mxu0 %vm15026_vm1, %v1432_v46  ;;  %8875 = vmatpush.msk.msrb.mxu1 %vm15026_vm1, %v1433_v41  ;;  %v10545_v46 = vld [vmem:[%s15016_s1 + $0x40] sm:$0xff] }
 0x111   : > { %2862 = vrot.lane.b32.xlu0 %v2847_v38, %s9911_s28 }
 0x115   : > { %8842 = vmatmul.msk.f32.gmra.mxu2 %vm380_vm2, %v10353_v29  ;;  %8848 = vmatmul.msk.f32.gmra.mxu0 %vm380_vm2, %v10353_v29 }
 0x116   : > { %8845 = vmatmul.msk.f32.gmra.mxu3 %vm380_vm2, %v10353_v29  ;;  %8851 = vmatmul.msk.f32.gmra.mxu1 %vm380_vm2, %v10353_v29 }
 0x11d   : > { %8853 = vmatmul.msk.f32.vlgmr.msra.gmra.mxu2 %vm380_vm2, %v10331_v20  ;;  %8859 = vmatmul.msk.f32.vlgmr.msra.gmra.mxu0 %vm380_vm2, %v10331_v20 }
 0x11e   : > { %8856 = vmatmul.msk.f32.vlgmr.msra.gmra.mxu3 %vm380_vm2, %v10331_v20  ;;  %8864 = vmatmul.msk.f32.vlgmr.msra.gmra.mxu1 %vm380_vm2, %v10400_v56  ;;  %v1439_v20 = vsel %vm15109_vm5, %v1425_v11, %v1427_v19  ;;  %v2121_v1 = vpop.permute.xlu2 %2120 }
 0x11f   : > { %8878 = vmatpush.msk.msra.mxu2 %vm15026_vm1, %v1434_v55  ;;  %8881 = vmatpush.msk.msra.mxu3 %vm15026_vm1, %v1435_v58 }
 0x120   : > { %8884 = vmatpush.msk.msra.mxu0 %vm15026_vm1, %v1436_v60  ;;  %8887 = vmatpush.msk.msra.mxu1 %vm15026_vm1, %v1437_v61  ;;  %v2119_v61 = vpop.permute.xlu1 %2118 }
 0x122   : > { %v10420_v2 = vpop.f32.mrf.mxu0 }
 0x123   : > { %v10424_v3 = vpop.f32.mrf.mxu1 }
 0x125   : > { %8854 = vmatmul.msk.f32.gmra.mxu2 %vm380_vm2, %v10353_v29  ;;  %8860 = vmatmul.msk.f32.gmra.mxu0 %vm380_vm2, %v10353_v29 }
 0x126   : > { %8857 = vmatmul.msk.f32.gmra.mxu3 %vm380_vm2, %v10353_v29  ;;  %8865 = vmatmul.msk.f32.gmra.mxu1 %vm380_vm2, %v10429_v4  ;;  %v2845_v29 = vld.sshfl [vmem:[#allocation1] sm:$0xff pattern:$0x75316420] }
 0x127   : > { %2858 = vrot.lane.b32.xlu1 %v2845_v29, %s9911_s28  ;;  %2853 = vst [vmem:[#allocation1] ss:$2 sm:$0xff] %v10204_v32 }
 0x128   : > { %v10440_v6 = vpop.f32.mrf.mxu2 }
 0x129   : > { %v10442_v7 = vpop.f32.mrf.mxu3 }
 0x12a   : > { %v10446_v14 = vpop.f32.mrf.mxu0 }
 0x12b   : > { %v10450_v15 = vpop.f32.mrf.mxu1 }
 0x12d   : > { %8867 = vmatmul.msk.f32.vlgmr.msrb.gmra.mxu2 %vm380_vm2, %v10400_v56  ;;  %8873 = vmatmul.msk.f32.vlgmr.msrb.gmra.mxu0 %vm380_vm2, %v10400_v56 }
 0x12e   : > { %8870 = vmatmul.msk.f32.vlgmr.msrb.gmra.mxu3 %vm380_vm2, %v10400_v56  ;;  %8876 = vmatmul.msk.f32.vlgmr.msrb.gmra.mxu1 %vm380_vm2, %v10400_v56  ;;  %v2856_v55 = vld.sshfl [vmem:[#allocation1 + $0x8] sm:$0xff pattern:$0x75316420]  ;;  %v2855_v58 = vld.sshfl [vmem:[#allocation1] sm:$0xff pattern:$0x75316420] }
 0x12f   : > { %8890 = vmatpush.msk.msrb.mxu2 %vm15026_vm1, %v1438_v16  ;;  %8898 = vmatpush.msk.msrb.mxu0 %vm15026_vm1, %v10214_v33  ;;  %3209 = vst [vmem:[#allocation1] ss:$2 sm:$0xff] %v10193_v26  ;;  %v2849_v26 = vld.sshfl [vmem:[#allocation1 + $0x20] sm:$0xff pattern:$0x75316420] }
 0x130   : > { %v10465_v22 = vpop.f32.mrf.mxu2  ;;  %8893 = vmatpush.msk.msrb.mxu3 %vm15026_vm1, %v1439_v20  ;;  %8901 = vmatpush.msk.msrb.mxu1 %vm15026_vm1, %v10216_v34 }
 0x131   : > { %v10470_v23 = vpop.f32.mrf.mxu3  ;;  %2864 = vrot.lane.b32.xlu1 %v2848_v39, %s9911_s28  ;;  %2866 = vrot.lane.b32.xlu2 %v2849_v26, %s9911_s28  ;;  %v10706_v26 = vld [vmem:[%s15016_s1 + $0x50] sm:$0xff] }
 0x132   : > { %v10474_v25 = vpop.f32.mrf.mxu0 }
 0x133   : > { %v10476_v27 = vpop.f32.mrf.mxu1 }
 0x135   : > { %8868 = vmatmul.msk.f32.gmra.mxu2 %vm380_vm2, %v10429_v4  ;;  %8874 = vmatmul.msk.f32.gmra.mxu0 %vm380_vm2, %v10429_v4 }
 0x136   : > { %8871 = vmatmul.msk.f32.gmra.mxu3 %vm380_vm2, %v10429_v4  ;;  %8877 = vmatmul.msk.f32.gmra.mxu1 %vm380_vm2, %v10429_v4 }
 0x138   : > { %v10486_v33 = vpop.f32.mrf.mxu2 }
 0x139   : > { %v10488_v34 = vpop.f32.mrf.mxu3  ;;  %2870 = vrot.lane.b32.xlu1 %v2851_v48, %s9911_s28 }
 0x13a   : > { %v10490_v30 = vpop.f32.mrf.mxu0 }
 0x13b   : > { %v10495_v31 = vpop.f32.mrf.mxu1 }
 0x13d   : > { %8879 = vmatmul.msk.f32.vlgmr.msra.gmra.mxu2 %vm380_vm2, %v10400_v56  ;;  %8885 = vmatmul.msk.f32.vlgmr.msra.gmra.mxu0 %vm380_vm2, %v10400_v56 }
 0x13e   : > { %8882 = vmatmul.msk.f32.vlgmr.msra.gmra.mxu3 %vm380_vm2, %v10400_v56  ;;  %8888 = vmatmul.msk.f32.vlgmr.msra.gmra.mxu1 %vm380_vm2, %v10400_v56 }
 0x13f   : > { %8910 = vmatpush.msk.msra.mxu0 %vm15026_vm1, %v10173_v17  ;;  %8904 = vmatpush.msk.msra.mxu2 %vm15026_vm1, %v10265_v52 }
 0x140   : > { %v10510_v36 = vpop.f32.mrf.mxu2  ;;  %8907 = vmatpush.msk.msra.mxu3 %vm15026_vm1, %v10267_v53  ;;  %8913 = vmatpush.msk.msra.mxu1 %vm15026_vm1, %v10175_v18  ;;  %v2828_v18 = vld [vmem:[%s10020_s22 + $0x2c] sm:$0xf] }
 0x141   : > { %v10516_v37 = vpop.f32.mrf.mxu3  ;;  %v2850_v53 = vld.sshfl [vmem:[#allocation1 + $0x28] sm:$0xff pattern:$0x75316420]  ;;  %2854 = vst [vmem:[#allocation1 + $0x10] ss:$2 sm:$0xff] %v2828_v18  ;;  %2876 = vrot.lane.b32.xlu1 %v2856_v55, %s9911_s28  ;;  %v2127_v18 = vpop.permute.xlu2 %2126 }
 0x142   : > { %v10519_v17 = vpop.f32.mrf.mxu0  ;;  %2868 = vrot.lane.b32.xlu0 %v2850_v53, %s9911_s28  ;;  %3213 = vst [vmem:[#allocation1 + $0x20] ss:$2 sm:$0xff] %v10150_v8  ;;  %v2125_v8 = vpop.permute.xlu1 %2124 }
 0x143   : > { %v10522_v52 = vpop.f32.mrf.mxu1  ;;  %v2143_v39 = vsel %vm15030_vm6, %v2125_v8, %v2127_v18 }
 0x145   : > { %8880 = vmatmul.msk.f32.gmra.mxu2 %vm380_vm2, %v10429_v4  ;;  %8886 = vmatmul.msk.f32.gmra.mxu0 %vm380_vm2, %v10429_v4 }
 0x146   : > { %8883 = vmatmul.msk.f32.gmra.mxu3 %vm380_vm2, %v10429_v4  ;;  %8889 = vmatmul.msk.f32.gmra.mxu1 %vm380_vm2, %v10429_v4 }
 0x148   : > { %v10533_v40 = vpop.f32.mrf.mxu2  ;;  %v10558_v49 = vld.sshfl [vmem:[#allocation1 + $0x10] sm:$0xff pattern:$0x75316420] }
 0x149   : > { %v10536_v41 = vpop.f32.mrf.mxu3  ;;  %3211 = vst [vmem:[#allocation1 + $0x10] ss:$2 sm:$0xff] %v10243_v45 }
 0x14a   : > { %v10540_v44 = vpop.f32.mrf.mxu0  ;;  %2874 = vrot.lane.b32.xlu0 %v2855_v58, %s9911_s28  ;;  %v2131_v48 = vpop.permute.xlu1 %2130 }
 0x14b   : > { %v10548_v47 = vpop.f32.mrf.mxu1 }
 0x14d   : > { %8891 = vmatmul.msk.f32.vlgmr.msrb.gmra.mxu2 %vm380_vm2, %v10400_v56  ;;  %8899 = vmatmul.msk.f32.vlgmr.msrb.gmra.mxu0 %vm380_vm2, %v10545_v46 }
 0x14e   : > { %8894 = vmatmul.msk.f32.vlgmr.msrb.gmra.mxu3 %vm380_vm2, %v10400_v56  ;;  %8902 = vmatmul.msk.f32.vlgmr.msrb.gmra.mxu1 %vm380_vm2, %v10545_v46 }
 0x14f   : > { %8922 = vmatpush.msk.msrb.mxu0 %vm15026_vm1, %v10236_v42  ;;  %8916 = vmatpush.msk.msrb.mxu2 %vm15026_vm1, %v10152_v9  ;;  %v10580_v9 = vld [vmem:[%s15016_s1 + $0x48] sm:$0xff] }
 0x150   : > { %v10564_v50 = vpop.f32.mrf.mxu2  ;;  %8919 = vmatpush.msk.msrb.mxu3 %vm15026_vm1, %v10154_v10  ;;  %8925 = vmatpush.msk.msrb.mxu1 %vm15026_vm1, %v10238_v43  ;;  %v2117_v43 = vpop.permute.xlu0 %2116 }
 0x151   : > { %v761_v51 = vpop.f32.mrf.mxu3 }
 0x152   : > { %v10573_v56 = vadd.f32 %v761_v51, %v10420_v2  ;;  %v10575_v42 = vpop.f32.mrf.mxu0  ;;  %v2139_v2 = vsel %vm15030_vm6, %v2117_v43, %v2119_v61  ;;  %v3219_v51 = vld.sshfl [vmem:[#allocation1 + $0x18] sm:$0xff pattern:$0x75316420] }
 0x153   : > { %v10584_v10 = vpop.f32.mrf.mxu1 }
 0x155   : > { %8892 = vmatmul.msk.f32.gmra.mxu2 %vm380_vm2, %v10429_v4  ;;  %8900 = vmatmul.msk.f32.gmra.mxu0 %vm380_vm2, %v10580_v9 }
 0x156   : > { %8895 = vmatmul.msk.f32.gmra.mxu3 %vm380_vm2, %v10429_v4  ;;  %8903 = vmatmul.msk.f32.gmra.mxu1 %vm380_vm2, %v10580_v9  ;;  %v2140_v4 = vsel %vm15030_vm6, %v2119_v61, %v2121_v1 }
 0x158   : > { %v10594_v45 = vpop.f32.mrf.mxu2  ;;  %v2123_v5 = vpop.permute.xlu0 %2122 }
 0x159   : > { %v764_v57 = vpop.f32.mrf.mxu3  ;;  %v2142_v53 = vsel %vm15030_vm6, %v2123_v5, %v2125_v8  ;;  %v2137_v8 = vpop.permute.xlu1 %2136 }
 0x15a   : > { %v10597_v59 = vadd.f32 %v764_v57, %v10440_v6  ;;  %v10599_v60 = vpop.f32.mrf.mxu0  ;;  %v2141_v6 = vsel %vm15030_vm6, %v2121_v1, %v2123_v5 }
 0x15b   : > { %v10604_v63 = vpop.f32.mrf.mxu1 }
 0x15d   : > { %8905 = vmatmul.msk.f32.vlgmr.msra.gmra.mxu2 %vm380_vm2, %v10545_v46  ;;  %8911 = vmatmul.msk.f32.vlgmr.msra.gmra.mxu0 %vm380_vm2, %v10545_v46 }
 0x15e   : > { %8908 = vmatmul.msk.f32.vlgmr.msra.gmra.mxu3 %vm380_vm2, %v10545_v46  ;;  %8914 = vmatmul.msk.f32.vlgmr.msra.gmra.mxu1 %vm380_vm2, %v10545_v46 }
 0x15f   : > { %8933 = vmatpush.msk.msra.mxu3 %vm15026_vm1, %v2139_v2  ;;  %8936 = vmatpush.msk.msra.mxu0 %vm15026_vm1, %v2140_v4  ;;  %v2133_v2 = vpop.permute.xlu2 %2132 }
 0x160   : > { %v830_v11 = vpop.f32.mrf.mxu2  ;;  %8939 = vmatpush.msk.msra.mxu1 %vm15026_vm1, %v2141_v6  ;;  %8928 = vmatpush.msk.msra.mxu2 %vm15026_vm1, %v10286_v0  ;;  %v3217_v0 = vld.sshfl [vmem:[#allocation1 + $0x8] sm:$0xff pattern:$0x75316420]  ;;  %v2129_v35 = vpop.permute.xlu0 %2128 }
 0x161   : > { %v10624_v12 = vadd.f32 %v830_v11, %v10470_v23  ;;  %v853_v13 = vpop.f32.mrf.mxu3  ;;  %3231 = vrot.lane.b32.xlu1 %v3217_v0, %s9912_s20  ;;  %v3218_v0 = vld.sshfl [vmem:[#allocation1 + $0x10] sm:$0xff pattern:$0x75316420] }
 0x162   : > { %v10628_v16 = vadd.f32 %v853_v13, %v10446_v14  ;;  %v10630_v19 = vpop.f32.mrf.mxu0  ;;  %v3216_v14 = vld.sshfl [vmem:[#allocation1] sm:$0xff pattern:$0x75316420]  ;;  %v2146_v13 = vsel %vm15030_vm6, %v2131_v48, %v2133_v2 }
 0x163   : > { %v10632_v20 = vpop.f32.mrf.mxu1  ;;  %3229 = vrot.lane.b32.xlu0 %v3216_v14, %s9912_s20  ;;  %3224 = vst [vmem:[#allocation1] ss:$2 sm:$0xff] %v10204_v32  ;;  %v2144_v32 = vsel %vm15030_vm6, %v2127_v18, %v2129_v35  ;;  %v3199_v18 = vld [vmem:[%s10020_s22 + $0x2c] sm:$0xf]  ;;  %s9916_s22 = smov 92  }
 0x164   : > { %3225 = vst [vmem:[#allocation1 + $0x10] ss:$2 sm:$0xff] %v3199_v18 }
 0x165   : > { %8906 = vmatmul.msk.f32.gmra.mxu2 %vm380_vm2, %v10580_v9  ;;  %8912 = vmatmul.msk.f32.gmra.mxu0 %vm380_vm2, %v10580_v9 }
 0x166   : > { %8909 = vmatmul.msk.f32.gmra.mxu3 %vm380_vm2, %v10580_v9  ;;  %8915 = vmatmul.msk.f32.gmra.mxu1 %vm380_vm2, %v10580_v9 }
 0x168   : > { %v833_v21 = vpop.f32.mrf.mxu2  ;;  %v2135_v11 = vpop.permute.xlu0 %2134 }
 0x169   : > { %v10646_v23 = vadd.f32 %v833_v21, %v10488_v34  ;;  %v856_v24 = vpop.f32.mrf.mxu3  ;;  %v2852_v34 = vld.sshfl [vmem:[#allocation1 + $0x38] sm:$0xff pattern:$0x75316420] }
 0x16a   : > { %v10649_v28 = vadd.f32 %v856_v24, %v10474_v25  ;;  %v10651_v29 = vpop.f32.mrf.mxu0  ;;  %v2145_v25 = vsel %vm15030_vm6, %v2129_v35, %v2131_v48  ;;  %3215 = vst [vmem:[#allocation1 + $0x30] ss:$2 sm:$0xff] %v10127_v62  ;;  %2872 = vrot.lane.b32.xlu2 %v2852_v34, %s9911_s28  ;;  %v3220_v62 = vld.sshfl [vmem:[#allocation1 + $0x20] sm:$0xff pattern:$0x75316420] }
 0x16b   : > { %v10653_v38 = vpop.f32.mrf.mxu1  ;;  %3235 = vrot.lane.b32.xlu0 %v3219_v51, %s9912_s20  ;;  %3237 = vrot.lane.b32.xlu1 %v3220_v62, %s9912_s20 }
 0x16d   : > { %8917 = vmatmul.msk.f32.vlgmr.msrb.gmra.mxu2 %vm380_vm2, %v10545_v46  ;;  %8923 = vmatmul.msk.f32.vlgmr.msrb.gmra.mxu0 %vm380_vm2, %v10545_v46 }
 0x16e   : > { %8920 = vmatmul.msk.f32.vlgmr.msrb.gmra.mxu3 %vm380_vm2, %v10545_v46  ;;  %8926 = vmatmul.msk.f32.vlgmr.msrb.gmra.mxu1 %vm380_vm2, %v10545_v46 }
 0x16f   : > { %8942 = vmatpush.msk.msrb.mxu2 %vm15026_vm1, %v2142_v53  ;;  %8945 = vmatpush.msk.msrb.mxu3 %vm15026_vm1, %v2143_v39 }
 0x170   : > { %v922_v54 = vpop.f32.mrf.mxu2  ;;  %8948 = vmatpush.msk.msrb.mxu0 %vm15026_vm1, %v2144_v32  ;;  %8951 = vmatpush.msk.msrb.mxu1 %vm15026_vm1, %v2145_v25  ;;  %v788_v32 = vadd.f32 %v10575_v42, %v10442_v7 }
 0x171   : > { %v10673_v43 = vadd.f32 %v922_v54, %v10516_v37  ;;  %v945_v57 = vpop.f32.mrf.mxu3  ;;  %v3222_v4 = vld.sshfl [vmem:[#allocation1 + $0x30] sm:$0xff pattern:$0x75316420]  ;;  %v3223_v14 = vld.sshfl [vmem:[#allocation1 + $0x38] sm:$0xff pattern:$0x75316420] }
 0x172   : > { %v10678_v55 = vadd.f32 %v945_v57, %v10490_v30  ;;  %v10680_v58 = vpop.f32.mrf.mxu0  ;;  %2878 = vrot.lane.b32.xlu2 %v10558_v49, %s9911_s28  ;;  %v2148_v49 = vsel %vm15030_vm6, %v2135_v11, %v2137_v8  ;;  %v3228_v54 = vld.sshfl [vmem:[#allocation1 + $0x10] sm:$0xff pattern:$0x75316420] }
 0x173   : > { %v10682_v61 = vpop.f32.mrf.mxu1  ;;  %3241 = vrot.lane.b32.xlu0 %v3222_v4, %s9912_s20  ;;  %3243 = vrot.lane.b32.xlu1 %v3223_v14, %s9912_s20 }
 0x175   : > { %8918 = vmatmul.msk.f32.gmra.mxu2 %vm380_vm2, %v10580_v9  ;;  %8924 = vmatmul.msk.f32.gmra.mxu0 %vm380_vm2, %v10580_v9 }
 0x176   : > { %8921 = vmatmul.msk.f32.gmra.mxu3 %vm380_vm2, %v10580_v9  ;;  %8927 = vmatmul.msk.f32.gmra.mxu1 %vm380_vm2, %v10580_v9 }
 0x178   : > { %v925_v30 = vpop.f32.mrf.mxu2 }
 0x179   : > { %v10694_v37 = vadd.f32 %v925_v30, %v10536_v41  ;;  %v948_v1 = vpop.f32.mrf.mxu3  ;;  %v2492_v30 = vpop.permute.xlu1 %2491 }
 0x17a   : > { %v10699_v5 = vadd.f32 %v948_v1, %v10519_v17  ;;  %v10701_v6 = vpop.f32.mrf.mxu0  ;;  %v2147_v17 = vsel %vm15030_vm6, %v2133_v2, %v2135_v11  ;;  %3233 = vrot.lane.b32.xlu2 %v3218_v0, %s9912_s20  ;;  %v3221_v0 = vld.sshfl [vmem:[#allocation1 + $0x28] sm:$0xff pattern:$0x75316420]  ;;  %vm3677_vm6 = vcmask 130048  }
 0x17b   : > { %v10709_v41 = vpop.f32.mrf.mxu1  ;;  %3249 = vrot.lane.b32.xlu1 %v3228_v54, %s9912_s20 }
 0x17d   : > { %8929 = vmatmul.msk.f32.vlgmr.msra.gmra.mxu2 %vm380_vm2, %v10545_v46  ;;  %8937 = vmatmul.msk.f32.vlgmr.msra.gmra.mxu0 %vm380_vm2, %v10706_v26  ;;  %v785_v46 = vadd.f32 %v10540_v44, %v10424_v3  ;;  %v10741_v3 = vld [vmem:[%s15016_s1 + $0x58] sm:$0xff]  ;;  %v2488_v44 = vpop.permute.xlu2 %2487 }
 0x17e   : > { %8934 = vmatmul.msk.f32.vlgmr.msra.gmra.mxu3 %vm380_vm2, %v10706_v26  ;;  %8940 = vmatmul.msk.f32.vlgmr.msra.gmra.mxu1 %vm380_vm2, %v10706_v26 }
 0x17f   : > { %8954 = vmatpush.msk.msra.mxu2 %vm15026_vm1, %v2146_v13  ;;  %8963 = vmatpush.msk.msra.mxu1 %vm15026_vm1, %v2137_v8  ;;  %v877_v13 = vadd.f32 %v10599_v60, %v10450_v15  ;;  %v880_v15 = vadd.f32 %v10630_v19, %v10476_v27 }
 0x180   : > { %v1110_v21 = vpop.f32.mrf.mxu2  ;;  %8957 = vmatpush.msk.msra.mxu3 %vm15026_vm1, %v2147_v17  ;;  %8960 = vmatpush.msk.msra.mxu0 %vm15026_vm1, %v2148_v49 }
 0x181   : > { %v10729_v24 = vadd.f32 %v1110_v21, %v10573_v56  ;;  %v1133_v35 = vpop.f32.mrf.mxu3  ;;  %v2490_v56 = vpop.permute.xlu0 %2489 }
 0x182   : > { %v10734_v53 = vadd.f32 %v1133_v35, %v785_v46  ;;  %v10736_v39 = vpop.f32.mrf.mxu0  ;;  %v2510_v42 = vsel %vm15029_vm7, %v2488_v44, %v2490_v56  ;;  %3239 = vrot.lane.b32.xlu2 %v3221_v0, %s9912_s20  ;;  %v2498_v35 = vpop.permute.xlu1 %2497 }
 0x183   : > { %v10743_v48 = vpop.f32.mrf.mxu1 }
 0x185   : > { %8930 = vmatmul.msk.f32.gmra.mxu2 %vm380_vm2, %v10580_v9  ;;  %8938 = vmatmul.msk.f32.gmra.mxu0 %vm380_vm2, %v10741_v3  ;;  %v3227_v9 = vld.sshfl [vmem:[#allocation1 + $0x8] sm:$0xff pattern:$0x75316420]  ;;  %v2494_v2 = vpop.permute.xlu2 %2493 }
 0x186   : > { %8935 = vmatmul.msk.f32.gmra.mxu3 %vm380_vm2, %v10741_v3  ;;  %8941 = vmatmul.msk.f32.gmra.mxu1 %vm380_vm2, %v10741_v3  ;;  %v2512_v4 = vsel %vm15029_vm7, %v2492_v30, %v2494_v2 }
 0x187   : > { %3247 = vrot.lane.b32.xlu0 %v3227_v9, %s9912_s20 }
 0x188   : > { %v1113_v25 = vpop.f32.mrf.mxu2 }
 0x189   : > { %v10756_v34 = vadd.f32 %v1113_v25, %v10597_v59  ;;  %v1136_v51 = vpop.f32.mrf.mxu3  ;;  %v2496_v7 = vpop.permute.xlu0 %2495  ;;  %v2511_v59 = vsel %vm15029_vm7, %v2490_v56, %v2492_v30 }
 0x18a   : > { %v10758_v57 = vadd.f32 %v1136_v51, %v788_v32  ;;  %v10760_v62 = vpop.f32.mrf.mxu0  ;;  %v2513_v11 = vsel %vm15029_vm7, %v2494_v2, %v2496_v7  ;;  %v2514_v54 = vsel %vm15029_vm7, %v2496_v7, %v2498_v35  ;;  %v2504_v30 = vpop.permute.xlu1 %2503  ;;  %v3226_v2 = vld.sshfl [vmem:[#allocation1] sm:$0xff pattern:$0x75316420] }
 0x18b   : > { %v10764_v1 = vpop.f32.mrf.mxu1  ;;  %3245 = vrot.lane.b32.xlu2 %v3226_v2, %s9912_s20 }
 0x18d   : > { %8943 = vmatmul.msk.f32.vlgmr.msrb.gmra.mxu2 %vm380_vm2, %v10706_v26  ;;  %8949 = vmatmul.msk.f32.vlgmr.msrb.gmra.mxu0 %vm380_vm2, %v10706_v26  ;;  %v2500_v51 = vpop.permute.xlu2 %2499 }
 0x18e   : > { %8946 = vmatmul.msk.f32.vlgmr.msrb.gmra.mxu3 %vm380_vm2, %v10706_v26  ;;  %8952 = vmatmul.msk.f32.vlgmr.msrb.gmra.mxu1 %vm380_vm2, %v10706_v26  ;;  %v2515_v9 = vsel %vm15029_vm7, %v2498_v35, %v2500_v51  ;;  %v10861_v35 = vld [vmem:[%s15016_s1 + $0x60] sm:$0xff] }
 0x18f   : > { %8968 = vmatpush.msk.msrb.mxu2 %vm15026_vm1, %v2510_v42  ;;  %8971 = vmatpush.msk.msrb.mxu3 %vm15026_vm1, %v2511_v59 }
 0x190   : > { %v1202_v8 = vpop.f32.mrf.mxu2  ;;  %8974 = vmatpush.msk.msrb.mxu0 %vm15026_vm1, %v2512_v4  ;;  %8977 = vmatpush.msk.msrb.mxu1 %vm15026_vm1, %v2513_v11 }
 0x191   : > { %v10785_v17 = vadd.f32 %v1202_v8, %v10628_v16  ;;  %v1225_v49 = vpop.f32.mrf.mxu3  ;;  %v2502_v32 = vpop.permute.xlu0 %2501 }
 0x192   : > { %v10787_v14 = vadd.f32 %v1225_v49, %v877_v13  ;;  %v10789_v46 = vpop.f32.mrf.mxu0  ;;  %v2516_v27 = vsel %vm15029_vm7, %v2500_v51, %v2502_v32  ;;  %v2517_v19 = vsel %vm15029_vm7, %v2502_v32, %v2504_v30 }
 0x193   : > { %v10792_v21 = vpop.f32.mrf.mxu1 }
 0x195   : > { %8944 = vmatmul.msk.f32.gmra.mxu2 %vm380_vm2, %v10741_v3  ;;  %8950 = vmatmul.msk.f32.gmra.mxu0 %vm380_vm2, %v10741_v3  ;;  %v2506_v13 = vpop.permute.xlu2 %2505 }
 0x196   : > { %8947 = vmatmul.msk.f32.gmra.mxu3 %vm380_vm2, %v10741_v3  ;;  %8953 = vmatmul.msk.f32.gmra.mxu1 %vm380_vm2, %v10741_v3 }
 0x198   : > { %v1205_v60 = vpop.f32.mrf.mxu2 }
 0x199   : > { %v10805_v16 = vadd.f32 %v1205_v60, %v10649_v28  ;;  %v1228_v18 = vpop.f32.mrf.mxu3  ;;  %v969_v28 = vadd.f32 %v10651_v29, %v10495_v31  ;;  %v972_v31 = vadd.f32 %v10680_v58, %v10522_v52  ;;  %v2508_v60 = vpop.permute.xlu0 %2507 }
 0x19a   : > { %v10807_v44 = vadd.f32 %v1228_v18, %v880_v15  ;;  %v10809_v56 = vpop.f32.mrf.mxu0  ;;  %v2519_v58 = vsel %vm15029_vm7, %v2506_v13, %v2508_v60  ;;  %v808_v18 = vadd.f32 %v10548_v47, %v10465_v22 }
 0x19b   : > { %v10811_v25 = vpop.f32.mrf.mxu1 }
 0x19c   : > { %v1348_v51 = vadd.f32 %v10701_v6, %v808_v18 }
 0x19d   : > { %8955 = vmatmul.msk.f32.vlgmr.msra.gmra.mxu2 %vm380_vm2, %v10706_v26  ;;  %8961 = vmatmul.msk.f32.vlgmr.msra.gmra.mxu0 %vm380_vm2, %v10706_v26  ;;  %v2861_v52 = vpop.permute.xlu2 %2860 }
 0x19e   : > { %8958 = vmatmul.msk.f32.vlgmr.msra.gmra.mxu3 %vm380_vm2, %v10706_v26  ;;  %8964 = vmatmul.msk.f32.vlgmr.msra.gmra.mxu1 %vm380_vm2, %v10706_v26 }
 0x19f   : > { %8980 = vmatpush.msk.msra.mxu2 %vm15026_vm1, %v2514_v54  ;;  %8983 = vmatpush.msk.msra.mxu3 %vm15026_vm1, %v2515_v9 }
 0x1a0   : > { %v1294_v7 = vpop.f32.mrf.mxu2  ;;  %8986 = vmatpush.msk.msra.mxu0 %vm15026_vm1, %v2516_v27  ;;  %8989 = vmatpush.msk.msra.mxu1 %vm15026_vm1, %v2517_v19  ;;  %v10893_v27 = vld [vmem:[%s15016_s1 + $0x68] sm:$0xff] }
 0x1a1   : > { %v10832_v42 = vadd.f32 %v1294_v7, %v10678_v55  ;;  %v1317_v59 = vpop.f32.mrf.mxu3  ;;  %v2863_v6 = vpop.permute.xlu0 %2862 }
 0x1a2   : > { %v10834_v4 = vadd.f32 %v1317_v59, %v969_v28  ;;  %v10836_v26 = vpop.f32.mrf.mxu0 }
 0x1a3   : > { %v10839_v11 = vpop.f32.mrf.mxu1 }
 0x1a5   : > { %8956 = vmatmul.msk.f32.gmra.mxu2 %vm380_vm2, %v10741_v3  ;;  %8962 = vmatmul.msk.f32.gmra.mxu0 %vm380_vm2, %v10741_v3 }
 0x1a6   : > { %8959 = vmatmul.msk.f32.gmra.mxu3 %vm380_vm2, %v10741_v3  ;;  %8965 = vmatmul.msk.f32.gmra.mxu1 %vm380_vm2, %v10741_v3  ;;  %v2518_v3 = vsel %vm15029_vm7, %v2504_v30, %v2506_v13 }
 0x1a8   : > { %v1297_v29 = vpop.f32.mrf.mxu2 }
 0x1a9   : > { %v10852_v55 = vadd.f32 %v1297_v29, %v10699_v5  ;;  %v1320_v8 = vpop.f32.mrf.mxu3  ;;  %v2859_v5 = vpop.permute.xlu1 %2858 }
 0x1aa   : > { %v10854_v49 = vadd.f32 %v1320_v8, %v972_v31  ;;  %v10856_v0 = vpop.f32.mrf.mxu0  ;;  %v2881_v32 = vsel %vm15028_vm8, %v2859_v5, %v2861_v52 }
 0x1ab   : > { %v10863_v15 = vpop.f32.mrf.mxu1 }
 0x1ad   : > { %8969 = vmatmul.msk.f32.vlgmr.msrb.gmra.mxu2 %vm380_vm2, %v10861_v35  ;;  %8975 = vmatmul.msk.f32.vlgmr.msrb.gmra.mxu0 %vm380_vm2, %v10861_v35 }
 0x1ae   : > { %8972 = vmatmul.msk.f32.vlgmr.msrb.gmra.mxu3 %vm380_vm2, %v10861_v35  ;;  %8978 = vmatmul.msk.f32.vlgmr.msrb.gmra.mxu1 %vm380_vm2, %v10861_v35 }
 0x1af   : > { %8992 = vmatpush.msk.msrb.mxu2 %vm15026_vm1, %v2518_v3  ;;  %8995 = vmatpush.msk.msrb.mxu3 %vm15026_vm1, %v2519_v58  ;;  %v900_v58 = vadd.f32 %v10604_v63, %v10510_v36 }
 0x1b0   : > { %v1508_v54 = vpop.f32.mrf.mxu2  ;;  %8998 = vmatpush.msk.msrb.mxu0 %vm15026_vm1, %v2508_v60  ;;  %9003 = vmatpush.msk.msrb.mxu1 %vm15026_vm1, %v2881_v32 }
 0x1b1   : > { %v10884_v22 = vadd.f32 %v1508_v54, %v10734_v53  ;;  %v1531_v47 = vpop.f32.mrf.mxu3  ;;  %v811_v53 = vadd.f32 %v10584_v10, %v10486_v33  ;;  %v2865_v29 = vpop.permute.xlu1 %2864  ;;  %v2882_v10 = vsel %vm15028_vm8, %v2861_v52, %v2863_v6  ;;  %v1352_v52 = vadd.f32 %v10760_v62, %v900_v58 }
 0x1b2   : > { %v10886_v9 = vadd.f32 %v1531_v47, %v1348_v51  ;;  %v10888_v30 = vpop.f32.mrf.mxu0  ;;  %v2867_v33 = vpop.permute.xlu2 %2866  ;;  %v2883_v60 = vsel %vm15028_vm8, %v2863_v6, %v2865_v29  ;;  %v903_v62 = vadd.f32 %v10632_v20, %v10533_v40  ;;  %v10968_v40 = vld [vmem:[%s15016_s1 + $0x70] sm:$0xff] }
 0x1b3   : > { %v10895_v19 = vpop.f32.mrf.mxu1  ;;  %v1359_v28 = vadd.f32 %v10736_v39, %v811_v53 }
 0x1b4   : > { %v2869_v3 = vpop.permute.xlu0 %2868 }
 0x1b5   : > { %8970 = vmatmul.msk.f32.gmra.mxu2 %vm380_vm2, %v10893_v27  ;;  %8976 = vmatmul.msk.f32.gmra.mxu0 %vm380_vm2, %v10893_v27  ;;  %v2885_v39 = vsel %vm15028_vm8, %v2867_v33, %v2869_v3 }
 0x1b6   : > { %8973 = vmatmul.msk.f32.gmra.mxu3 %vm380_vm2, %v10893_v27  ;;  %8979 = vmatmul.msk.f32.gmra.mxu1 %vm380_vm2, %v10893_v27 }
 0x1b8   : > { %v1511_v7 = vpop.f32.mrf.mxu2 }
 0x1b9   : > { %v10909_v59 = vadd.f32 %v1511_v7, %v10758_v57  ;;  %v1534_v2 = vpop.f32.mrf.mxu3  ;;  %v2884_v57 = vsel %vm15028_vm8, %v2865_v29, %v2867_v33  ;;  %v2871_v54 = vpop.permute.xlu1 %2870 }
 0x1ba   : > { %v10911_v13 = vadd.f32 %v1534_v2, %v1359_v28  ;;  %v10913_v31 = vpop.f32.mrf.mxu0  ;;  %v2886_v29 = vsel %vm15028_vm8, %v2869_v3, %v2871_v54 }
 0x1bb   : > { %v10915_v8 = vpop.f32.mrf.mxu1 }
 0x1bd   : > { %8981 = vmatmul.msk.f32.vlgmr.msra.gmra.mxu2 %vm380_vm2, %v10861_v35  ;;  %8987 = vmatmul.msk.f32.vlgmr.msra.gmra.mxu0 %vm380_vm2, %v10861_v35 }
 0x1be   : > { %8984 = vmatmul.msk.f32.vlgmr.msra.gmra.mxu3 %vm380_vm2, %v10861_v35  ;;  %8990 = vmatmul.msk.f32.vlgmr.msra.gmra.mxu1 %vm380_vm2, %v10861_v35 }
 0x1bf   : > { %9006 = vmatpush.msk.msra.mxu2 %vm15026_vm1, %v2882_v10  ;;  %9009 = vmatpush.msk.msra.mxu3 %vm15026_vm1, %v2883_v60 }
 0x1c0   : > { %v1600_v5 = vpop.f32.mrf.mxu2  ;;  %9012 = vmatpush.msk.msra.mxu0 %vm15026_vm1, %v2884_v57  ;;  %9015 = vmatpush.msk.msra.mxu1 %vm15026_vm1, %v2885_v39  ;;  %v992_v39 = vadd.f32 %v10653_v38, %v10564_v50 }
 0x1c1   : > { %v10937_v18 = vadd.f32 %v1600_v5, %v10787_v14  ;;  %v1623_v36 = vpop.f32.mrf.mxu3  ;;  %v1363_v14 = vadd.f32 %v10789_v46, %v903_v62  ;;  %v2877_v33 = vpop.permute.xlu1 %2876  ;;  %v11001_v5 = vld [vmem:[%s15016_s1 + $0x78] sm:$0xff] }
 0x1c2   : > { %v10939_v63 = vadd.f32 %v1623_v36, %v1352_v52  ;;  %v10941_v32 = vpop.f32.mrf.mxu0  ;;  %v1356_v3 = vadd.f32 %v10809_v56, %v992_v39 }
 0x1c3   : > { %v10943_v51 = vpop.f32.mrf.mxu1 }
 0x1c4   : > { %v2873_v20 = vpop.permute.xlu2 %2872 }
 0x1c5   : > { %8982 = vmatmul.msk.f32.gmra.mxu2 %vm380_vm2, %v10893_v27  ;;  %8988 = vmatmul.msk.f32.gmra.mxu0 %vm380_vm2, %v10893_v27  ;;  %v2887_v46 = vsel %vm15028_vm8, %v2871_v54, %v2873_v20 }
 0x1c6   : > { %8985 = vmatmul.msk.f32.gmra.mxu3 %vm380_vm2, %v10893_v27  ;;  %8991 = vmatmul.msk.f32.gmra.mxu1 %vm380_vm2, %v10893_v27 }
 0x1c8   : > { %v1603_v47 = vpop.f32.mrf.mxu2 }
 0x1c9   : > { %v10957_v6 = vadd.f32 %v1603_v47, %v10807_v44  ;;  %v1626_v53 = vpop.f32.mrf.mxu3  ;;  %v2875_v44 = vpop.permute.xlu0 %2874 }
 0x1ca   : > { %v10959_v28 = vadd.f32 %v1626_v53, %v1363_v14  ;;  %v10961_v7 = vpop.f32.mrf.mxu0  ;;  %v2888_v10 = vsel %vm15028_vm8, %v2873_v20, %v2875_v44  ;;  %v2889_v60 = vsel %vm15028_vm8, %v2875_v44, %v2877_v33 }
 0x1cb   : > { %v10963_v2 = vpop.f32.mrf.mxu1 }
 0x1cc   : > { %v2879_v56 = vpop.permute.xlu2 %2878 }
 0x1cd   : > { %8993 = vmatmul.msk.f32.vlgmr.msrb.gmra.mxu2 %vm380_vm2, %v10861_v35  ;;  %8999 = vmatmul.msk.f32.vlgmr.msrb.gmra.mxu0 %vm380_vm2, %v10861_v35 }
 0x1ce   : > { %8996 = vmatmul.msk.f32.vlgmr.msrb.gmra.mxu3 %vm380_vm2, %v10861_v35  ;;  %9004 = vmatmul.msk.f32.vlgmr.msrb.gmra.mxu1 %vm380_vm2, %v10968_v40 }
 0x1cf   : > { %9018 = vmatpush.msk.msrb.mxu2 %vm15026_vm1, %v2886_v29  ;;  %9021 = vmatpush.msk.msrb.mxu3 %vm15026_vm1, %v2887_v46  ;;  %v1349_v46 = vadd.f32 %v10709_v41, %v10624_v12 }
 0x1d0   : > { %v1692_v57 = vpop.f32.mrf.mxu2  ;;  %9024 = vmatpush.msk.msrb.mxu0 %vm15026_vm1, %v2888_v10  ;;  %9027 = vmatpush.msk.msrb.mxu1 %vm15026_vm1, %v2889_v60 }
 0x1d1   : > { %v10990_v58 = vadd.f32 %v1692_v57, %v10834_v4  ;;  %v1715_v50 = vpop.f32.mrf.mxu3  ;;  %v995_v4 = vadd.f32 %v10682_v61, %v10594_v45 }
 0x1d2   : > { %v10992_v38 = vadd.f32 %v1715_v50, %v1356_v3  ;;  %v10994_v35 = vpop.f32.mrf.mxu0 }
 0x1d3   : > { %v10996_v52 = vpop.f32.mrf.mxu1  ;;  %v1367_v36 = vadd.f32 %v10836_v26, %v995_v4  ;;  %v3232_v20 = vpop.permute.xlu1 %3231 }
 0x1d4   : > { %15204 = vst [vmem:[#allocation8_spill] sm:$0xff] %v10992_v38  ;;  %v3234_v61 = vpop.permute.xlu2 %3233 }
 0x1d5   : > { %8994 = vmatmul.msk.f32.gmra.mxu2 %vm380_vm2, %v10893_v27  ;;  %9000 = vmatmul.msk.f32.gmra.mxu0 %vm380_vm2, %v10893_v27  ;;  %v3230_v29 = vpop.permute.xlu0 %3229  ;;  %v3253_v26 = vsel %vm15027_vm9, %v3232_v20, %v3234_v61 }
 0x1d6   : > { %8997 = vmatmul.msk.f32.gmra.mxu3 %vm380_vm2, %v10893_v27  ;;  %9005 = vmatmul.msk.f32.gmra.mxu1 %vm380_vm2, %v11001_v5  ;;  %v2890_v27 = vsel %vm15028_vm8, %v2877_v33, %v2879_v56  ;;  %v1724_v33 = vadd.f32 %v10856_v0, %v1349_v46  ;;  %v1360_v0 = vadd.f32 %v10743_v48, %v10646_v23 }
 0x1d8   : > { %v1695_v54 = vpop.f32.mrf.mxu2 }
 0x1d9   : > { %v11015_v62 = vadd.f32 %v1695_v54, %v10854_v49  ;;  %v1718_v14 = vpop.f32.mrf.mxu3  ;;  %v3252_v49 = vsel %vm15027_vm9, %v3230_v29, %v3232_v20 }
 0x1da   : > { %v11017_v47 = vadd.f32 %v1718_v14, %v1367_v36  ;;  %v11019_v53 = vpop.f32.mrf.mxu0 }
 0x1db   : > { %v11021_v45 = vpop.f32.mrf.mxu1 }
 0x1dc   : > { %15205 = vst [vmem:[#allocation9_spill] sm:$0xff] %v11017_v47  ;;  %v3240_v20 = vpop.permute.xlu2 %3239 }
 0x1dd   : > { %9007 = vmatmul.msk.f32.vlgmr.msra.gmra.mxu2 %vm380_vm2, %v10968_v40  ;;  %9013 = vmatmul.msk.f32.vlgmr.msra.gmra.mxu0 %vm380_vm2, %v10968_v40  ;;  %v3236_v3 = vpop.permute.xlu0 %3235  ;;  %v3238_v54 = vpop.permute.xlu1 %3237 }
 0x1de   : > { %9010 = vmatmul.msk.f32.vlgmr.msra.gmra.mxu3 %vm380_vm2, %v10968_v40  ;;  %9016 = vmatmul.msk.f32.vlgmr.msra.gmra.mxu1 %vm380_vm2, %v10968_v40  ;;  %v3254_v23 = vsel %vm15027_vm9, %v3234_v61, %v3236_v3  ;;  %v3255_v48 = vsel %vm15027_vm9, %v3236_v3, %v3238_v54 }
 0x1df   : > { %9030 = vmatpush.msk.msra.mxu2 %vm15026_vm1, %v2890_v27  ;;  %9033 = vmatpush.msk.msra.mxu3 %vm15026_vm1, %v2879_v56 }
 0x1e0   : > { %v1869_v44 = vpop.f32.mrf.mxu2  ;;  %9038 = vmatpush.msk.msra.mxu0 %vm15026_vm1, %v3252_v49  ;;  %9041 = vmatpush.msk.msra.mxu1 %vm15026_vm1, %v3253_v26 }
 0x1e1   : > { %v11042_v10 = vadd.f32 %v1869_v44, %v10886_v9  ;;  %v1892_v12 = vpop.f32.mrf.mxu3  ;;  %v1735_v9 = vadd.f32 %v10888_v30, %v1360_v0  ;;  %v3256_v30 = vsel %vm15027_vm9, %v3238_v54, %v3240_v20  ;;  %v15024_v44 = vmov 0  }
 0x1e2   : > { %v11044_v41 = vadd.f32 %v1892_v12, %v1724_v33  ;;  %v11046_v60 = vpop.f32.mrf.mxu0  ;;  %9362 = vset.pattern.permute.xlu0 %v15024_v44  ;;  %v3566_v12 = vld [vmem:[%s15017_s2 + $0x8] sm:$0xff]  ;;  %9361 = vset.pattern.permute.xlu2 %v15024_v44 }
 0x1e3   : > { %15206 = vst [vmem:[#allocation10_spill] sm:$0xff] %v11042_v10  ;;  %v11048_v39 = vpop.f32.mrf.mxu1  ;;  %3574 = vperm.xlu0 %9362, %v3566_v12   ;;  %9363 = vset.pattern.permute.xlu1 %v15024_v44 }
 0x1e4   : > { %15207 = vst [vmem:[#allocation11_spill] sm:$0xff] %v11044_v41 }
 0x1e5   : > { %9008 = vmatmul.msk.f32.gmra.mxu2 %vm380_vm2, %v11001_v5  ;;  %9014 = vmatmul.msk.f32.gmra.mxu0 %vm380_vm2, %v11001_v5  ;;  %v3242_v27 = vpop.permute.xlu0 %3241  ;;  %v3244_v33 = vpop.permute.xlu1 %3243 }
 0x1e6   : > { %9011 = vmatmul.msk.f32.gmra.mxu3 %vm380_vm2, %v11001_v5  ;;  %9017 = vmatmul.msk.f32.gmra.mxu1 %vm380_vm2, %v11001_v5  ;;  %v3258_v54 = vsel %vm15027_vm9, %v3242_v27, %v3244_v33 }
 0x1e8   : > { %v1872_v57 = vpop.f32.mrf.mxu2 }
 0x1e9   : > { %v11062_v50 = vadd.f32 %v1872_v57, %v10911_v13  ;;  %v1895_v56 = vpop.f32.mrf.mxu3  ;;  %v3257_v13 = vsel %vm15027_vm9, %v3240_v20, %v3242_v27  ;;  %v11119_v57 = vld [vmem:[%s15016_s1 + $0x80] sm:$0xff]  ;;  %v3246_v20 = vpop.permute.xlu2 %3245 }
 0x1ea   : > { %v11064_v4 = vadd.f32 %v1895_v56, %v1735_v9  ;;  %v11066_v36 = vpop.f32.mrf.mxu0 }
 0x1eb   : > { %15208 = vst [vmem:[#allocation12_spill] sm:$0xff] %v11062_v50  ;;  %v11068_v14 = vpop.f32.mrf.mxu1 }
 0x1ec   : > { %15209 = vst [vmem:[#allocation13_spill] sm:$0xff] %v11064_v4 }
 0x1ed   : > { %9019 = vmatmul.msk.f32.vlgmr.msrb.gmra.mxu2 %vm380_vm2, %v10968_v40  ;;  %9025 = vmatmul.msk.f32.vlgmr.msrb.gmra.mxu0 %vm380_vm2, %v10968_v40 }
 0x1ee   : > { %9022 = vmatmul.msk.f32.vlgmr.msrb.gmra.mxu3 %vm380_vm2, %v10968_v40  ;;  %9028 = vmatmul.msk.f32.vlgmr.msrb.gmra.mxu1 %vm380_vm2, %v10968_v40 }
 0x1ef   : > { %9044 = vmatpush.msk.msrb.mxu2 %vm15026_vm1, %v3254_v23  ;;  %9047 = vmatpush.msk.msrb.mxu3 %vm15026_vm1, %v3255_v48  ;;  %v3250_v23 = vpop.permute.xlu1 %3249 }
 0x1f0   : > { %v1961_v61 = vpop.f32.mrf.mxu2  ;;  %9050 = vmatpush.msk.msrb.mxu0 %vm15026_vm1, %v3256_v30  ;;  %9053 = vmatpush.msk.msrb.mxu1 %vm15026_vm1, %v3257_v13  ;;  %v3259_v30 = vsel %vm15027_vm9, %v3244_v33, %v3246_v20  ;;  %v9037_v33 = vld [vmem:[%s15016_s1 + $0x88] sm:$0xff] }
 0x1f1   : > { %v11087_v29 = vadd.f32 %v1961_v61, %v10939_v63  ;;  %v11089_v26 = vpop.f32.mrf.mxu3 }
 0x1f2   : > { %v11091_v49 = vpop.f32.mrf.mxu0 }
 0x1f3   : > { %15210 = vst [vmem:[#allocation14_spill] sm:$0xff] %v11087_v29  ;;  %v11093_v46 = vpop.f32.mrf.mxu1 }
 0x1f5   : > { %9020 = vmatmul.msk.f32.gmra.mxu2 %vm380_vm2, %v11001_v5  ;;  %9026 = vmatmul.msk.f32.gmra.mxu0 %vm380_vm2, %v11001_v5 }
 0x1f6   : > { %9023 = vmatmul.msk.f32.gmra.mxu3 %vm380_vm2, %v11001_v5  ;;  %9029 = vmatmul.msk.f32.gmra.mxu1 %vm380_vm2, %v11001_v5 }
 0x1f8   : > { %v1964_v63 = vpop.f32.mrf.mxu2 }
 0x1f9   : > { %v11110_v3 = vadd.f32 %v1964_v63, %v10959_v28  ;;  %v11112_v0 = vpop.f32.mrf.mxu3  ;;  %v3248_v48 = vpop.permute.xlu0 %3247  ;;  %v3565_v63 = vld [vmem:[%s15017_s2] sm:$0xff] }
 0x1fa   : > { %15212 = vst [vmem:[#allocation16_spill] sm:$0xff] %v11112_v0  ;;  %v11114_v9 = vpop.f32.mrf.mxu0  ;;  %v3261_v28 = vsel %vm15027_vm9, %v3248_v48, %v3250_v23  ;;  %v3260_v27 = vsel %vm15027_vm9, %v3246_v20, %v3248_v48  ;;  %3569 = vperm.xlu2 %9361, %v3565_v63  }
 0x1fb   : > { %15211 = vst [vmem:[#allocation15_spill] sm:$0xff] %v11110_v3  ;;  %v11121_v56 = vpop.f32.mrf.mxu1 }
 0x1fc   : > { %15213 = vst [vmem:[#allocation17_spill] sm:$0xff] %v11121_v56  ;;  %v1721_v56 = vadd.f32 %v10811_v25, %v10729_v24  ;;  %v15258_v25 = vmov 0  }
 0x1fd   : > { %9031 = vmatmul.msk.f32.vlgmr.msra.gmra.mxu2 %vm380_vm2, %v10968_v40  ;;  %9039 = vmatmul.msk.f32.vlgmr.msra.gmra.mxu0 %vm380_vm2, %v11119_v57 }
 0x1fe   : > { %9034 = vmatmul.msk.f32.vlgmr.msra.gmra.mxu3 %vm380_vm2, %v10968_v40  ;;  %9042 = vmatmul.msk.f32.vlgmr.msra.gmra.mxu1 %vm380_vm2, %v11119_v57 }
 0x1ff   : > { %9056 = vmatpush.msk.msra.mxu2 %vm15026_vm1, %v3258_v54  ;;  %9059 = vmatpush.msk.msra.mxu3 %vm15026_vm1, %v3259_v30 }
 0x200   : > { %v11137_v13 = vpop.f32.mrf.mxu2  ;;  %9062 = vmatpush.msk.msra.mxu0 %vm15026_vm1, %v3260_v27  ;;  %9065 = vmatpush.msk.msra.mxu1 %vm15026_vm1, %v3261_v28 }
 0x201   : > { %15214 = vst [vmem:[#allocation18_spill] sm:$0xff] %v11137_v13  ;;  %v11141_v61 = vpop.f32.mrf.mxu3 }
 0x202   : > { %v11143_v40 = vpop.f32.mrf.mxu0 }
 0x203   : > { %v11148_v12 = vpop.f32.mrf.mxu1 }
 0x204   : > { %15215 = vst [vmem:[#allocation19_spill] sm:$0xff] %v11148_v12 }
 0x205   : > { %9032 = vmatmul.msk.f32.gmra.mxu2 %vm380_vm2, %v11001_v5  ;;  %9040 = vmatmul.msk.f32.gmra.mxu0 %vm380_vm2, %v9037_v33 }
 0x206   : > { %9035 = vmatmul.msk.f32.gmra.mxu3 %vm380_vm2, %v11001_v5  ;;  %9043 = vmatmul.msk.f32.gmra.mxu1 %vm380_vm2, %v9037_v33 }
 0x208   : > { %v11159_v54 = vpop.f32.mrf.mxu2 }
 0x209   : > { %15216 = vst [vmem:[#allocation20_spill] sm:$0xff] %v11159_v54  ;;  %v11161_v48 = vpop.f32.mrf.mxu3 }
 0x20a   : > { %v11163_v28 = vpop.f32.mrf.mxu0 }
 0x20b   : > { %v11165_v20 = vpop.f32.mrf.mxu1 }
 0x20c   : > { %15217 = vst [vmem:[#allocation21_spill] sm:$0xff] %v11165_v20 }
 0x20d   : > { %9045 = vmatmul.msk.f32.vlgmr.msrb.gmra.mxu2 %vm380_vm2, %v11119_v57  ;;  %9051 = vmatmul.msk.f32.vlgmr.msrb.gmra.mxu0 %vm380_vm2, %v11119_v57 }
 0x20e   : > { %9048 = vmatmul.msk.f32.vlgmr.msrb.gmra.mxu3 %vm380_vm2, %v11119_v57  ;;  %9054 = vmatmul.msk.f32.vlgmr.msrb.gmra.mxu1 %vm380_vm2, %v11119_v57 }
 0x20f   : > { %9068 = vmatpush.msk.msrb.mxu2 %vm15026_vm1, %v3250_v23 }
 0x210   : > { %v11176_v5 = vpop.f32.mrf.mxu2 }
 0x211   : > { %15218 = vst [vmem:[#allocation22_spill] sm:$0xff] %v11176_v5  ;;  %v11178_v30 = vpop.f32.mrf.mxu3 }
 0x212   : > { %v11180_v27 = vpop.f32.mrf.mxu0 }
 0x213   : > { %15219 = vst [vmem:[#allocation23_spill] sm:$0xff] %v11180_v27  ;;  %v11182_v63 = vpop.f32.mrf.mxu1 }
 0x214   : > { %15220 = vst [vmem:[#allocation24_spill] sm:$0xff] %v11182_v63 }
 0x215   : > { %9046 = vmatmul.msk.f32.gmra.mxu2 %vm380_vm2, %v9037_v33  ;;  %9052 = vmatmul.msk.f32.gmra.mxu0 %vm380_vm2, %v9037_v33 }
 0x216   : > { %9049 = vmatmul.msk.f32.gmra.mxu3 %vm380_vm2, %v9037_v33  ;;  %9055 = vmatmul.msk.f32.gmra.mxu1 %vm380_vm2, %v9037_v33 }
 0x218   : > { %v11188_v44 = vpop.f32.mrf.mxu2 }
 0x219   : > { %15221 = vst [vmem:[#allocation25_spill] sm:$0xff] %v11188_v44  ;;  %v11190_v54 = vpop.f32.mrf.mxu3 }
 0x21a   : > { %15222 = vst [vmem:[#allocation26_spill] sm:$0xff] %v11190_v54  ;;  %v11192_v23 = vpop.f32.mrf.mxu0 }
 0x21b   : > { %15223 = vst [vmem:[#allocation27_spill] sm:$0xff] %v11192_v23  ;;  %v11194_v47 = vpop.f32.mrf.mxu1 }
 0x21c   : > { %15224 = vst [vmem:[#allocation28_spill] sm:$0xff] %v11194_v47 }
 0x21d   : > { %9057 = vmatmul.msk.f32.vlgmr.msra.gmra.mxu2 %vm380_vm2, %v11119_v57  ;;  %9063 = vmatmul.msk.f32.vlgmr.msra.gmra.mxu0 %vm380_vm2, %v11119_v57 }
 0x21e   : > { %9060 = vmatmul.msk.f32.vlgmr.msra.gmra.mxu3 %vm380_vm2, %v11119_v57  ;;  %9066 = vmatmul.msk.f32.vlgmr.msra.gmra.mxu1 %vm380_vm2, %v11119_v57 }
 0x220   : > { %v11204_v13 = vpop.f32.mrf.mxu2 }
 0x221   : > { %15225 = vst [vmem:[#allocation29_spill] sm:$0xff] %v11204_v13  ;;  %v11206_v38 = vpop.f32.mrf.mxu3 }
 0x222   : > { %15226 = vst [vmem:[#allocation30_spill] sm:$0xff] %v11206_v38  ;;  %v11208_v63 = vpop.f32.mrf.mxu0 }
 0x223   : > { %15227 = vst [vmem:[#allocation31_spill] sm:$0xff] %v11208_v63  ;;  %v11210_v3 = vpop.f32.mrf.mxu1 }
 0x224   : > { %15228 = vst [vmem:[#allocation32_spill] sm:$0xff] %v11210_v3 }
 0x225   : > { %9058 = vmatmul.msk.f32.gmra.mxu2 %vm380_vm2, %v9037_v33  ;;  %9064 = vmatmul.msk.f32.gmra.mxu0 %vm380_vm2, %v9037_v33 }
 0x226   : > { %9061 = vmatmul.msk.f32.gmra.mxu3 %vm380_vm2, %v9037_v33  ;;  %9067 = vmatmul.msk.f32.gmra.mxu1 %vm380_vm2, %v9037_v33 }
 0x228   : > { %v11216_v47 = vpop.f32.mrf.mxu2 }
 0x229   : > { %15229 = vst [vmem:[#allocation33_spill] sm:$0xff] %v11216_v47  ;;  %v11218_v23 = vpop.f32.mrf.mxu3 }
 0x22a   : > { %15230 = vst [vmem:[#allocation34_spill] sm:$0xff] %v11218_v23  ;;  %v11220_v54 = vpop.f32.mrf.mxu0 }
 0x22b   : > { %15231 = vst [vmem:[#allocation35_spill] sm:$0xff] %v11220_v54  ;;  %v11222_v13 = vpop.f32.mrf.mxu1 }
 0x22c   : > { %15232 = vst [vmem:[#allocation36_spill] sm:$0xff] %v11222_v13 }
 0x22d   : > { %9069 = vmatmul.msk.f32.vlgmr.msrb.gmra.mxu2 %vm380_vm2, %v11119_v57 }
 0x230   : > { %v2565_v3 = vpop.f32.mrf.mxu2 }
 0x231   : > { %v2588_v63 = vpop.f32.mrf.mxu3 }
 0x232   : > { %v11226_v38 = vpop.f32.mrf.mxu0 }
 0x233   : > { %15233 = vst [vmem:[#allocation37_spill] sm:$0xff] %v11226_v38  ;;  %v11228_v44 = vpop.f32.mrf.mxu1 }
 0x234   : > { %15234 = vst [vmem:[#allocation38_spill] sm:$0xff] %v11228_v44 }
 0x235   : > { %9070 = vmatmul.msk.f32.gmra.mxu2 %vm380_vm2, %v9037_v33 }
 0x238   : > { %v11231_v4 = vpop.f32.mrf.mxu2 }
 0x239   : > { %v11233_v47 = vpop.f32.mrf.mxu3 }
 0x23a   : > { %v11235_v23 = vpop.f32.mrf.mxu0 }
 0x23b   : > { %15235 = vst [vmem:[#allocation39_spill] sm:$0xff] %v11235_v23  ;;  %v11237_v54 = vpop.f32.mrf.mxu1 }
 0x23c   : > { %15236 = vst [vmem:[#allocation40_spill] sm:$0xff] %v11237_v54 }
 0x240   : > { %v11239_v13 = vpop.f32.mrf.mxu2 }
 0x241   : > { %v11241_v27 = vpop.f32.mrf.mxu3 }
 0x242   : > { %v11243_v57 = vpop.f32.mrf.mxu0 }
 0x243   : > { %15237 = vst [vmem:[#allocation41_spill] sm:$0xff] %v11243_v57  ;;  %v11245_v5 = vpop.f32.mrf.mxu1 }
 0x244   : > { %15238 = vst [vmem:[#allocation42_spill] sm:$0xff] %v11245_v5 }
 0x248   : > { %v11247_v38 = vpop.f32.mrf.mxu2 }
 0x249   : > { %15239 = vst [vmem:[#allocation43_spill] sm:$0xff] %v11247_v38  ;;  %v11249_v44 = vpop.f32.mrf.mxu3 }
 0x24a   : > { %15240 = vst [vmem:[#allocation44_spill] sm:$0xff] %v11249_v44  ;;  %v11251_v33 = vpop.f32.mrf.mxu0 }
 0x24b   : > { %15241 = vst [vmem:[#allocation45_spill] sm:$0xff] %v11251_v33  ;;  %v2936_v41 = vpop.f32.mrf.mxu1  ;;  %v6987_v33 = vld [vmem:[%s15019_s4] sm:$0xff] }
 0x24c   : > { %6991 = vperm.xlu1 %9363, %v6987_v33   ;;  %v306_v33 = vld [vmem:[%s15022_s7] sm:$0xff] }
 0x24d   : > { %vm308_vm10 = vcmp.gt.f32.partialorder %v306_v33, 0.5 }
 0x250   : > { %v11253_v20 = vpop.f32.mrf.mxu2 }
 0x251   : > { %15242 = vst [vmem:[#allocation46_spill] sm:$0xff] %v11253_v20  ;;  %v11255_v23 = vpop.f32.mrf.mxu3 }
 0x252   : > { %15243 = vst [vmem:[#allocation47_spill] sm:$0xff] %v11255_v23  ;;  %v11257_v54 = vpop.f32.mrf.mxu0 }
 0x253   : > { %15244 = vst [vmem:[#allocation48_spill] sm:$0xff] %v11257_v54  ;;  %v2939_v29 = vpop.f32.mrf.mxu1 }
 0x258   : > { %v11259_v12 = vpop.f32.mrf.mxu2 }
 0x259   : > { %15245 = vst [vmem:[#allocation49_spill] sm:$0xff] %v11259_v12  ;;  %v11261_v50 = vpop.f32.mrf.mxu3 }
 0x25a   : > { %15246 = vst [vmem:[#allocation50_spill] sm:$0xff] %v11261_v50  ;;  %v11263_v57 = vpop.f32.mrf.mxu0 }
 0x25b   : > { %15247 = vst [vmem:[#allocation51_spill] sm:$0xff] %v11263_v57  ;;  %v11265_v5 = vpop.f32.mrf.mxu1 }
 0x25c   : > { %15248 = vst [vmem:[#allocation52_spill] sm:$0xff] %v11265_v5 }
 0x260   : > { %v2959_v44 = vpop.f32.mrf.mxu2 }
 0x261   : > { %v11270_v20 = vpop.f32.mrf.mxu3 }
 0x262   : > { %15249 = vst [vmem:[#allocation53_spill] sm:$0xff] %v11270_v20  ;;  %v11272_v23 = vpop.f32.mrf.mxu0 }
 0x263   : > { %15250 = vst [vmem:[#allocation54_spill] sm:$0xff] %v11272_v23  ;;  %v11274_v54 = vpop.f32.mrf.mxu1 }
 0x264   : > { %15251 = vst [vmem:[#allocation55_spill] sm:$0xff] %v11274_v54  ;;  %v2059_v54 = vadd.f32 %v10961_v7, %v1721_v56  ;;  %v1732_v7 = vadd.f32 %v10839_v11, %v10756_v34 }
 0x268   : > { %v2962_v38 = vpop.f32.mrf.mxu2 }
 0x269   : > { %v11276_v12 = vpop.f32.mrf.mxu3 }
 0x26a   : > { %15252 = vst [vmem:[#allocation56_spill] sm:$0xff] %v11276_v12  ;;  %v11278_v50 = vpop.f32.mrf.mxu0 }
 0x26b   : > { %15253 = vst [vmem:[#allocation57_spill] sm:$0xff] %v11278_v50  ;;  %v11280_v57 = vpop.f32.mrf.mxu1  ;;  %v2060_v50 = vadd.f32 %v10963_v2, %v10884_v22 }
 0x26c   : > { %15254 = vst [vmem:[#allocation58_spill] sm:$0xff] %v11280_v57  ;;  %v2430_v57 = vadd.f32 %v11141_v61, %v2059_v54  ;;  %v11310_v61 = vpop.permute.xlu2 %3569 }
 0x26d   : > { %v2431_v24 = vadd.f32 %v11114_v9, %v2060_v50  ;;  %v2070_v50 = vadd.f32 %v10994_v35, %v1732_v7 }
 0x26e   : > { %v2801_v10 = vadd.f32 %v2565_v3, %v2430_v57 }
 0x26f   : > { %v2802_v0 = vadd.f32 %v2588_v63, %v2431_v24  ;;  %v2071_v63 = vadd.f32 %v10996_v52, %v10909_v59  ;;  %v2441_v34 = vadd.f32 %v11161_v48, %v2070_v50  ;;  %v4799_v52 = vld [vmem:[#allocation2] sm:$0xff]  ;;  %v1353_v48 = vadd.f32 %v10764_v1, %v10673_v43 }
 0x270   : > { %v11282_v5 = vpop.f32.mrf.mxu2  ;;  %v3172_v56 = vadd.f32 %v2936_v41, %v2801_v10  ;;  %v15259_v41 = vmov 0 }
 0x271   : > { %15255 = vst [vmem:[#allocation59_spill] sm:$0xff] %v11282_v5  ;;  %v11289_v20 = vpop.f32.mrf.mxu3  ;;  %v11301_v5 = vsel %vm308_vm10, 1, %v15258_v25  ;;  %v3173_v2 = vadd.f32 %v2959_v44, %v2802_v0  ;;  %v2442_v10 = vadd.f32 %v11143_v40, %v2071_v63  ;;  %v15262_v44 = vmov 0 }
 0x272   : > { %15256 = vst [vmem:[#allocation60_spill] sm:$0xff] %v11289_v20  ;;  %v11291_v23 = vpop.f32.mrf.mxu0  ;;  %v3623_v22 = vperm.slane %v11301_v5, 0  ;;  %v3624_v9 = vperm.slane %v11301_v5, 1  ;;  %v2812_v0 = vadd.f32 %v11231_v4, %v2441_v34  ;;  %v1364_v40 = vadd.f32 %v10792_v21, %v10694_v37  ;;  %v15267_v34 = vld [vmem:[#allocation17_spill] sm:$0xff] }
 0x273   : > { %15257 = vst [vmem:[#allocation61_spill] sm:$0xff] %v11291_v23  ;;  %v11294_v12 = vpop.f32.mrf.mxu1  ;;  %v2813_v24 = vadd.f32 %v11233_v47, %v2442_v10  ;;  %v1728_v43 = vadd.f32 %v10913_v31, %v1353_v48  ;;  %v11349_v47 = vpop.permute.xlu0 %3574  ;;  %v11385_v63 = vadd.f32 %v11093_v46, %v11015_v62  ;;  %v15270_v48 = vld [vmem:[#allocation12_spill] sm:$0xff] }
 0x274   : > { %vm11319_vm11 = vcmp.eq.s32.totalorder %v3623_v22, 1  ;;  %vm11324_vm12 = vcmp.eq.s32.totalorder %v3624_v9, 1  ;;  %v1725_v22 = vadd.f32 %v10863_v15, %v10785_v17  ;;  %v3183_v4 = vadd.f32 %v2939_v29, %v2812_v0 }
 0x275   : > { %v15260_v41 = vsel %vm11319_vm11, 4294967295, %v15259_v41  ;;  %v15263_v44 = vsel %vm11324_vm12, 4294967295, %v15262_v44  ;;  %v3184_v37 = vadd.f32 %v2962_v38, %v2813_v24  ;;  %v1739_v15 = vadd.f32 %v10941_v32, %v1364_v40  ;;  %v15271_v40 = vld [vmem:[#allocation19_spill] sm:$0xff] }
 0x276   : > { %15261 = vst [vmem:[#allocation62_spill] sm:$0xff] %v15260_v41  ;;  %v1740_v29 = vadd.f32 %v10943_v51, %v10852_v55  ;;  %v2064_v9 = vadd.f32 %v11021_v45, %v10937_v18  ;;  %v2068_v51 = vadd.f32 %v11068_v14, %v10990_v58  ;;  %v3627_v0 = vperm.slane %v11301_v5, 4 }
 0x277   : > { %15264 = vst [vmem:[#allocation63_spill] sm:$0xff] %v15263_v44  ;;  %v2443_v24 = vadd.f32 %v15271_v40, %v15270_v48  ;;  %v15293_v48 = vld [vmem:[#allocation55_spill] sm:$0xff] }
 0x278   : > { %v11303_v20 = vpop.f32.mrf.mxu2  ;;  %v2435_v45 = vadd.f32 %v11163_v28, %v2064_v9  ;;  %v15265_v28 = vld [vmem:[#allocation16_spill] sm:$0xff]  ;;  %v15269_v46 = vld [vmem:[#allocation59_spill] sm:$0xff]  ;;  %v15278_v9 = vld [vmem:[#allocation25_spill] sm:$0xff]  ;;  %vm11435_vm14 = vcmp.eq.s32.totalorder %v3627_v0, 1  ;;  %v3625_v0 = vperm.slane %v11301_v5, 2 }
 0x279   : > { %v11307_v23 = vpop.f32.mrf.mxu3 }
 0x27a   : > { %v3307_v33 = vpop.f32.mrf.mxu0  ;;  %vm11470_vm2 = vcmp.eq.s32.totalorder %v3625_v0, 1  ;;  %v15308_v0 = vld [vmem:[#allocation47_spill] sm:$0xff] }
 0x27b   : > { %v3543_v3 = vadd.f32 %v3307_v33, %v3172_v56  ;;  %v3330_v54 = vpop.f32.mrf.mxu1 }
 0x27c   : > { %v3544_v57 = vadd.f32 %v3330_v54, %v3173_v2  ;;  %v1736_v2 = vadd.f32 %v10895_v19, %v10805_v16  ;;  %v1729_v16 = vadd.f32 %v10915_v8, %v10832_v42  ;;  %v2063_v19 = vadd.f32 %v11019_v53, %v1725_v22  ;;  %v307_v53 = vld [vmem:[%s15022_s7 + $0x8] sm:$0x7] }
 0x27d   : > { %v3577_v11 = vadd.f32 %v11310_v61, %v3543_v3  ;;  %v2075_v8 = vadd.f32 %v11048_v39, %v10957_v6  ;;  %v11380_v39 = vadd.f32 %v11091_v49, %v1740_v29  ;;  %vm309_vm13 = vcmp.gt.f32.partialorder %v307_v53, 0.5  ;;  %v15273_v22 = vld [vmem:[#allocation21_spill] sm:$0xff] }
 0x27e   : > { %v3578_v35 = vadd.f32 %v11310_v61, %v3544_v57  ;;  %v2074_v42 = vadd.f32 %v11046_v60, %v1736_v2  ;;  %v2434_v32 = vadd.f32 %v11178_v30, %v2063_v19  ;;  %v11372_v18 = vadd.f32 %v11066_v36, %v1729_v16  ;;  %v15276_v19 = vld [vmem:[#allocation23_spill] sm:$0xff]  ;;  %v15277_v29 = vld [vmem:[#allocation13_spill] sm:$0xff] }
 0x27f   : > { %v3599_v59 = vmax.f32 %v3577_v11, 0.0  ;;  %v2066_v60 = vadd.f32 %v11089_v26, %v1728_v43  ;;  %v2806_v36 = vadd.f32 %v11241_v27, %v2435_v45  ;;  %v11391_v57 = vadd.f32 %v15265_v28, %v1739_v15  ;;  %v15266_v26 = vld [vmem:[#allocation10_spill] sm:$0xff]  ;;  %v15268_v11 = vld [vmem:[#allocation52_spill] sm:$0xff]  ;;  %v15280_v45 = vld [vmem:[#allocation35_spill] sm:$0xff] }
 0x280   : > { %v3600_v7 = vmax.f32 %v3578_v35, 0.0  ;;  %v11334_v56 = vpop.f32.mrf.mxu2  ;;  %v2805_v30 = vadd.f32 %v11239_v13, %v2434_v32  ;;  %v2432_v49 = vadd.f32 %v15267_v34, %v15266_v26  ;;  %v11422_v15 = vsel %vm309_vm13, 1, %v15258_v25  ;;  %v15279_v32 = vld [vmem:[#allocation26_spill] sm:$0xff]  ;;  %v15281_v25 = vld [vmem:[#allocation27_spill] sm:$0xff]  ;;  %v15287_v34 = vld [vmem:[#allocation53_spill] sm:$0xff] }
 0x281   : > { %v3645_v33 = vsel %vm11319_vm11, %v3599_v59, 0.0  ;;  %v11342_v50 = vpop.f32.mrf.mxu3  ;;  %v3177_v35 = vadd.f32 %v15269_v46, %v2806_v36  ;;  %v2439_v53 = vadd.f32 %v15281_v25, %v2068_v51  ;;  %v15283_v36 = vmov 0  ;;  %v15286_v28 = vld [vmem:[#allocation43_spill] sm:$0xff] }
 0x282   : > { %v11347_v1 = vsel %vm11324_vm12, %v3600_v7, 0.0  ;;  %3667 = vst [vmem:[#allocation2 + $0x8] sm:$0xff] %v3645_v33  ;;  %v3310_v21 = vpop.f32.mrf.mxu0  ;;  %v9379_v17 = vpack.i.bf16 %v3645_v33, %v4799_v52  ;;  %v3176_v10 = vadd.f32 %v15268_v11, %v2805_v30  ;;  %v15272_v7 = vld [vmem:[#allocation14_spill] sm:$0xff]  ;;  %v15284_v36 = vsel %vm11435_vm14, 4294967295, %v15283_v36  ;;  %v15292_v51 = vld [vmem:[#allocation51_spill] sm:$0xff] }
 0x283   : > { %3668 = vst [vmem:[#allocation2 + $0x10] sm:$0xff] %v11347_v1  ;;  %v3554_v31 = vadd.f32 %v3310_v21, %v3183_v4  ;;  %v3333_v38 = vpop.f32.mrf.mxu1  ;;  %v9384_v59 = vpack.i.bf16 %v11347_v1, %v3645_v33  ;;  %v11414_v2 = vadd.f32 %v15273_v22, %v15272_v7  ;;  %v15274_v33 = vld [vmem:[#allocation11_spill] sm:$0xff]  ;;  %v15275_v21 = vld [vmem:[#allocation22_spill] sm:$0xff] }
 0x284   : > { %v3555_v3 = vadd.f32 %v3333_v38, %v3184_v37  ;;  %9380 = vrot.lane.b32.xlu2 %v9379_v17, %s9908_s26  ;;  %9375 = vrot.lane.b32.xlu0 %v9379_v17, %s9907_s25  ;;  %v3628_v37 = vperm.slane %v11301_v5, 5  ;;  %v2433_v16 = vadd.f32 %v15275_v21, %v15274_v33  ;;  %15285 = vst [vmem:[#allocation16_spill] sm:$0xff] %v15284_v36 }
 0x285   : > { %9365 = vrot.lane.b32.xlu1 %v9379_v17, %s9905_s23  ;;  %v3588_v55 = vadd.f32 %v11349_v47, %v3554_v31  ;;  %v2446_v31 = vadd.f32 %v15276_v19, %v2075_v8 }
 0x286   : > { %v3589_v6 = vadd.f32 %v11349_v47, %v3555_v3  ;;  %v2444_v3 = vadd.f32 %v15278_v9, %v15277_v29  ;;  %vm11442_vm15 = vcmp.eq.s32.totalorder %v3628_v37, 1  ;;  %v15295_v29 = vld [vmem:[#allocation30_spill] sm:$0xff] }
 0x287   : > { %v3610_v54 = vmax.f32 %v3588_v55, 0.0  ;;  %v2445_v55 = vadd.f32 %v15279_v32, %v2074_v42  ;;  %v2438_v9 = vadd.f32 %v15295_v29, %v11372_v18  ;;  %v15300_v18 = vld [vmem:[#allocation37_spill] sm:$0xff] }
 0x288   : > { %v11388_v58 = vpop.f32.mrf.mxu2  ;;  %v3611_v14 = vmax.f32 %v3589_v6, 0.0  ;;  %v2803_v6 = vadd.f32 %v15280_v45, %v2432_v49  ;;  %v15288_v49 = vmov 0  ;;  %v15296_v45 = vld [vmem:[#allocation31_spill] sm:$0xff] }
 0x289   : > { %v11396_v13 = vpop.f32.mrf.mxu3  ;;  %v11400_v62 = vsel %vm11319_vm11, %v3610_v54, 0.0  ;;  %v15282_v54 = vld [vmem:[#allocation36_spill] sm:$0xff]  ;;  %v2816_v26 = vadd.f32 %v15286_v28, %v2445_v55  ;;  %v15289_v49 = vsel %vm11442_vm15, 4294967295, %v15288_v49  ;;  %v15304_v28 = vld [vmem:[#allocation34_spill] sm:$0xff] }
 0x28a   : > { %v3399_v27 = vpop.f32.mrf.mxu0  ;;  %v11407_v52 = vsel %vm11324_vm12, %v3611_v14, 0.0  ;;  %3679 = vst [vmem:[#allocation2 + $0x70] sm:$0xff] %v11400_v62  ;;  %v2804_v8 = vadd.f32 %v15282_v54, %v2433_v16  ;;  %v3174_v42 = vadd.f32 %v15287_v34, %v2803_v6  ;;  %v2450_v6 = vadd.f32 %v15296_v45, %v11385_v63  ;;  %v15305_v34 = vld [vmem:[#allocation38_spill] sm:$0xff] }
 0x28b   : > { %v3547_v4 = vadd.f32 %v3399_v27, %v3176_v10  ;;  %v3422_v43 = vpop.f32.mrf.mxu1  ;;  %3680 = vst [vmem:[#allocation2 + $0x78] sm:$0xff] %v11407_v52  ;;  %v3187_v40 = vadd.f32 %v15293_v48, %v2816_v26  ;;  %v9414_v19 = vpack.i.bf16 %v11407_v52, %v11400_v62  ;;  %v2449_v26 = vadd.f32 %v15304_v28, %v11380_v39 }
 0x28c   : > { %v3548_v38 = vadd.f32 %v3422_v43, %v3177_v35  ;;  %9385 = vrot.lane.b32.xlu2 %v9384_v59, %s9909_s21  ;;  %9395 = vrot.lane.b32.xlu0 %v9384_v59, %s9911_s28  ;;  %15290 = vst [vmem:[#allocation10_spill] sm:$0xff] %v15289_v49  ;;  %v3175_v46 = vadd.f32 %v15292_v51, %v2804_v8  ;;  %v3626_v43 = vperm.slane %v11301_v5, 3 }
 0x28d   : > { %v3581_v30 = vadd.f32 %v11310_v61, %v3547_v4  ;;  %9370 = vrot.lane.b32.xlu1 %v9379_v17, %s9906_s24  ;;  %v15291_v17 = vld [vmem:[#allocation44_spill] sm:$0xff]  ;;  %v2810_v48 = vadd.f32 %v15308_v0, %v2439_v53 }
 0x28e   : > { %v3582_v14 = vadd.f32 %v11310_v61, %v3548_v38  ;;  %v2817_v10 = vadd.f32 %v15291_v17, %v2446_v31  ;;  %v15294_v31 = vld [vmem:[#allocation29_spill] sm:$0xff]  ;;  %vm11478_vm10 = vcmp.eq.s32.totalorder %v3626_v43, 1  ;;  %v15319_v0 = vld [vmem:[#allocation60_spill] sm:$0xff] }
 0x28f   : > { %v3603_v11 = vmax.f32 %v3581_v30, 0.0  ;;  %v2437_v38 = vadd.f32 %v15294_v31, %v2066_v60  ;;  %v15297_v30 = vmov 0  ;;  %v2814_v60 = vadd.f32 %v15300_v18, %v2443_v24  ;;  %v15307_v24 = vld [vmem:[#allocation56_spill] sm:$0xff] }
 0x290   : > { %v3604_v35 = vmax.f32 %v3582_v14, 0.0  ;;  %v3353_v27 = vpop.f32.mrf.mxu2  ;;  %v3188_v37 = vadd.f32 %v11303_v20, %v2817_v10  ;;  %v15298_v30 = vsel %vm11470_vm2, 4294967295, %v15297_v30  ;;  %v15301_v14 = vmov 0  ;;  %v15306_v10 = vld [vmem:[#allocation46_spill] sm:$0xff] }
 0x291   : > { %v11452_v7 = vsel %vm11435_vm14, %v3603_v11, 0.0  ;;  %v3545_v22 = vadd.f32 %v3353_v27, %v3174_v42  ;;  %v3376_v4 = vpop.f32.mrf.mxu3  ;;  %15299 = vst [vmem:[#allocation17_spill] sm:$0xff] %v15298_v30  ;;  %v15302_v14 = vsel %vm11478_vm10, 4294967295, %v15301_v14  ;;  %v2815_v42 = vadd.f32 %v15305_v34, %v2444_v3  ;;  %v15313_v34 = vld [vmem:[#allocation49_spill] sm:$0xff] }
 0x292   : > { %3671 = vst [vmem:[#allocation2 + $0x28] sm:$0xff] %v11452_v7  ;;  %v11459_v33 = vsel %vm11442_vm15, %v3604_v35, 0.0  ;;  %v3546_v21 = vadd.f32 %v3376_v4, %v3175_v46  ;;  %v3402_v16 = vpop.f32.mrf.mxu0  ;;  %v2809_v51 = vadd.f32 %v15306_v10, %v2438_v9  ;;  %v3185_v46 = vadd.f32 %v15307_v24, %v2814_v60  ;;  %v15310_v4 = vld [vmem:[#allocation58_spill] sm:$0xff]  ;;  %v15312_v60 = vld [vmem:[#allocation40_spill] sm:$0xff] }
 0x293   : > { %3672 = vst [vmem:[#allocation2 + $0x30] sm:$0xff] %v11459_v33  ;;  %v3579_v20 = vadd.f32 %v11310_v61, %v3545_v22  ;;  %v3558_v32 = vadd.f32 %v3402_v16, %v3187_v40  ;;  %v3425_v55 = vpop.f32.mrf.mxu1  ;;  %v3631_v16 = vperm.slane %v11422_v15, 0  ;;  %v3181_v31 = vadd.f32 %v11334_v56, %v2810_v48 }
 0x294   : > { %v3580_v25 = vadd.f32 %v11310_v61, %v3546_v21  ;;  %v3559_v54 = vadd.f32 %v3425_v55, %v3188_v37  ;;  %9400 = vrot.lane.b32.xlu2 %v9384_v59, %s9912_s20  ;;  %9415 = vrot.lane.b32.xlu0 %v9414_v19, %s9907_s25  ;;  %15303 = vst [vmem:[#allocation52_spill] sm:$0xff] %v15302_v14  ;;  %v15311_v55 = vld [vmem:[#allocation39_spill] sm:$0xff]  ;;  %v3632_v18 = vperm.slane %v11422_v15, 1 }
 0x295   : > { %v3601_v8 = vmax.f32 %v3579_v20, 0.0  ;;  %v3592_v63 = vadd.f32 %v11349_v47, %v3558_v32  ;;  %9390 = vrot.lane.b32.xlu1 %v9384_v59, %s9910_s14  ;;  %v15309_v59 = vld [vmem:[#allocation54_spill] sm:$0xff]  ;;  %v3180_v43 = vadd.f32 %v15310_v4, %v2809_v51  ;;  %v11516_v32 = vpack.i.bf16 %v11459_v33, %v11452_v7  ;;  %v15315_v51 = vld [vmem:[#allocation57_spill] sm:$0xff] }
 0x296   : > { %v3602_v11 = vmax.f32 %v3580_v25, 0.0  ;;  %v3593_v17 = vadd.f32 %v11349_v47, %v3559_v54  ;;  %v3186_v40 = vadd.f32 %v15309_v59, %v2815_v42  ;;  %v2807_v45 = vadd.f32 %v15311_v55, %v11414_v2  ;;  %v15314_v42 = vld [vmem:[#allocation50_spill] sm:$0xff] }
 0x297   : > { %v11492_v35 = vsel %vm11470_vm2, %v3601_v8, 0.0  ;;  %v3614_v27 = vmax.f32 %v3592_v63, 0.0  ;;  %v2808_v8 = vadd.f32 %v15312_v60, %v2437_v38  ;;  %v2820_v2 = vadd.f32 %v15313_v34, %v2449_v26  ;;  %v11892_v14 = vld [vmem:[%s15018_s3 + $0x10] sm:$0xff] }
 0x298   : > { %3669 = vst [vmem:[#allocation2 + $0x18] sm:$0xff] %v11492_v35  ;;  %v11499_v39 = vsel %vm11478_vm10, %v3602_v11, 0.0  ;;  %v3615_v3 = vmax.f32 %v3593_v17, 0.0  ;;  %v3356_v22 = vpop.f32.mrf.mxu2  ;;  %v2821_v11 = vadd.f32 %v15314_v42, %v2450_v6  ;;  %vm11535_vm13 = vcmp.eq.s32.totalorder %v3631_v16, 1 }
 0x299   : > { %3670 = vst [vmem:[#allocation2 + $0x20] sm:$0xff] %v11499_v39  ;;  %v11505_v37 = vsel %vm11435_vm14, %v3614_v27, 0.0  ;;  %v3556_v21 = vadd.f32 %v3356_v22, %v3185_v46  ;;  %v3379_v53 = vpop.f32.mrf.mxu3  ;;  %v3179_v38 = vadd.f32 %v15315_v51, %v2808_v8  ;;  %v15316_v46 = vmov 0  ;;  %v15325_v8 = vld [vmem:[#allocation33_spill] sm:$0xff]  ;;  %v15333_v51 = vld [vmem:[#allocation42_spill] sm:$0xff] }
 0x29a   : > { %3683 = vst [vmem:[#allocation2 + $0x90] sm:$0xff] %v11505_v37  ;;  %v11512_v29 = vsel %vm11442_vm15, %v3615_v3, 0.0  ;;  %v3557_v9 = vadd.f32 %v3379_v53, %v3186_v40  ;;  %v3491_v20 = vpop.f32.mrf.mxu0  ;;  %v15317_v46 = vsel %vm11535_vm13, 4294967295, %v15316_v46  ;;  %v3178_v48 = vadd.f32 %v15319_v0, %v2807_v45 }
 0x29b   : > { %3684 = vst [vmem:[#allocation2 + $0x98] sm:$0xff] %v11512_v29  ;;  %v3590_v25 = vadd.f32 %v11349_v47, %v3556_v21  ;;  %v3551_v56 = vadd.f32 %v3491_v20, %v3180_v43  ;;  %v3514_v54 = vpop.f32.mrf.mxu1  ;;  %vm11546_vm1 = vcmp.eq.s32.totalorder %v3632_v18, 1  ;;  %v15320_v59 = vmov 0 }
 0x29c   : > { %v3591_v63 = vadd.f32 %v11349_v47, %v3557_v9  ;;  %v3552_v28 = vadd.f32 %v3514_v54, %v3181_v31  ;;  %9405 = vrot.lane.b32.xlu2 %v9414_v19, %s9905_s23  ;;  %9430 = vrot.lane.b32.xlu0 %v11516_v32, %s9910_s14  ;;  %15318 = vst [vmem:[#allocation59_spill] sm:$0xff] %v15317_v46  ;;  %v15321_v59 = vsel %vm11546_vm1, 4294967295, %v15320_v59  ;;  %v3629_v43 = vperm.slane %v11301_v5, 6 }
 0x29d   : > { %v3612_v17 = vmax.f32 %v3590_v25, 0.0  ;;  %v11531_v10 = vadd.f32 %v11310_v61, %v3551_v56  ;;  %9410 = vrot.lane.b32.xlu1 %v9414_v19, %s9906_s24  ;;  %15322 = vst [vmem:[#allocation12_spill] sm:$0xff] %v15321_v59  ;;  %v11550_v19 = vld [vmem:[#allocation2 + $0x68] sm:$0xff]  ;;  %v3191_v40 = vadd.f32 %v11294_v12, %v2820_v2  ;;  %v3192_v21 = vadd.f32 %v11388_v58, %v2821_v11  ;;  %v15324_v56 = vld [vmem:[#allocation24_spill] sm:$0xff]  ;;  %v15329_v2 = vld [vmem:[#allocation41_spill] sm:$0xff] }
 0x29e   : > { %v3613_v24 = vmax.f32 %v3591_v63, 0.0  ;;  %v3586_v27 = vadd.f32 %v11310_v61, %v3552_v28  ;;  %v3630_v31 = vperm.slane %v11301_v5, 7  ;;  %v9419_v58 = vpack.i.bf16 %v11400_v62, %v11550_v19  ;;  %v15323_v25 = vld [vmem:[#allocation15_spill] sm:$0xff] }
 0x29f   : > { %v11543_v6 = vsel %vm11470_vm2, %v3612_v17, 0.0  ;;  %v15031_v26 = vmax.f32 %v11531_v10, 0.0  ;;  %v11576_v45 = vpack.i.bf16 %v11452_v7, %v11499_v39  ;;  %v2447_v54 = vadd.f32 %v15324_v56, %v15323_v25 }
 0x2a0   : > { %3681 = vst [vmem:[#allocation2 + $0x80] sm:$0xff] %v11543_v6  ;;  %v11556_v3 = vsel %vm11478_vm10, %v3613_v24, 0.0  ;;  %v3608_v22 = vmax.f32 %v3586_v27, 0.0  ;;  %v3445_v4 = vpop.f32.mrf.mxu2  ;;  %v2448_v63 = vadd.f32 %v15325_v8, %v11391_v57  ;;  %vm11584_vm9 = vcmp.eq.s32.totalorder %v3629_v43, 1 }
 0x2a1   : > { %3682 = vst [vmem:[#allocation2 + $0x88] sm:$0xff] %v11556_v3  ;;  %v11565_v53 = vsel %vm11535_vm13, %v15031_v26, 0.0  ;;  %v3549_v12 = vadd.f32 %v3445_v4, %v3178_v48  ;;  %v3468_v16 = vpop.f32.mrf.mxu3  ;;  %v15326_v28 = vmov 0  ;;  %v2818_v42 = vadd.f32 %v15329_v2, %v2447_v54 }
 0x2a2   : > { %v11570_v9 = vsel %vm11546_vm1, %v3608_v22, 0.0  ;;  %v3550_v20 = vadd.f32 %v3468_v16, %v3179_v38  ;;  %v3494_v55 = vpop.f32.mrf.mxu0  ;;  %v15327_v28 = vsel %vm11584_vm9, 4294967295, %v15326_v28  ;;  %vm11593_vm8 = vcmp.eq.s32.totalorder %v3630_v31, 1  ;;  %v15334_v22 = vld [vmem:[#allocation61_spill] sm:$0xff]  ;;  %v15335_v16 = vld [vmem:[#allocation8_spill] sm:$0xff]  ;;  %v15336_v31 = vld [vmem:[#allocation18_spill] sm:$0xff] }
 0x2a3   : > { %3676 = vst [vmem:[#allocation2 + $0x50] sm:$0xff] %v11570_v9  ;;  %v3583_v5 = vadd.f32 %v11310_v61, %v3549_v12  ;;  %v3562_v18 = vadd.f32 %v3494_v55, %v3191_v40  ;;  %v3517_v60 = vpop.f32.mrf.mxu1  ;;  %v15330_v17 = vmov 0  ;;  %v2819_v38 = vadd.f32 %v15333_v51, %v2448_v63  ;;  %v15338_v63 = vld [vmem:[#allocation45_spill] sm:$0xff] }
 0x2a4   : > { %15328 = vst [vmem:[#allocation19_spill] sm:$0xff] %v15327_v28  ;;  %v3584_v34 = vadd.f32 %v11310_v61, %v3550_v20  ;;  %v3563_v7 = vadd.f32 %v3517_v60, %v3192_v21  ;;  %9420 = vrot.lane.b32.xlu2 %v9419_v58, %s9908_s26  ;;  %9460 = vrot.lane.b32.xlu0 %v11576_v45, %s9906_s24  ;;  %v15331_v17 = vsel %vm11593_vm8, 4294967295, %v15330_v17 }
 0x2a5   : > { %v3605_v11 = vmax.f32 %v3583_v5, 0.0  ;;  %15332 = vst [vmem:[#allocation14_spill] sm:$0xff] %v15331_v17  ;;  %v11598_v57 = vadd.f32 %v11349_v47, %v3562_v18  ;;  %9425 = vrot.lane.b32.xlu1 %v11516_v32, %s9909_s21  ;;  %v3189_v0 = vadd.f32 %v11307_v23, %v2818_v42  ;;  %v3190_v4 = vadd.f32 %v15334_v22, %v2819_v38  ;;  %v15337_v5 = vld [vmem:[#allocation28_spill] sm:$0xff] }
 0x2a6   : > { %v3606_v24 = vmax.f32 %v3584_v34, 0.0  ;;  %v3597_v27 = vadd.f32 %v11349_v47, %v3563_v7  ;;  %v2069_v20 = vadd.f32 %v15336_v31, %v15335_v16  ;;  %v9474_v54 = vpack.i.bf16 %v11492_v35, %v11347_v1  ;;  %v15341_v22 = vld [vmem:[#allocation32_spill] sm:$0xff] }
 0x2a7   : > { %v11607_v48 = vsel %vm11584_vm9, %v3605_v11, 0.0  ;;  %v15032_v40 = vmax.f32 %v11598_v57, 0.0  ;;  %v3633_v38 = vperm.slane %v11422_v15, 2  ;;  %v15345_v15 = vld [vmem:[#allocation48_spill] sm:$0xff] }
 0x2a8   : > { %3673 = vst [vmem:[#allocation2 + $0x38] sm:$0xff] %v11607_v48  ;;  %v11614_v43 = vsel %vm11593_vm8, %v3606_v24, 0.0  ;;  %v3619_v21 = vmax.f32 %v3597_v27, 0.0  ;;  %v3448_v12 = vpop.f32.mrf.mxu2  ;;  %v2440_v18 = vadd.f32 %v15337_v5, %v2069_v20  ;;  %v15339_v24 = vld [vmem:[#allocation9_spill] sm:$0xff]  ;;  %v15340_v27 = vld [vmem:[#allocation20_spill] sm:$0xff] }
 0x2a9   : > { %3674 = vst [vmem:[#allocation2 + $0x40] sm:$0xff] %v11614_v43  ;;  %v11623_v23 = vsel %vm11535_vm13, %v15032_v40, 0.0  ;;  %v3560_v55 = vadd.f32 %v3448_v12, %v3189_v0  ;;  %v3471_v58 = vpop.f32.mrf.mxu3  ;;  %v2080_v0 = vadd.f32 %v15340_v27, %v15339_v24  ;;  %vm11659_vm7 = vcmp.eq.s32.totalorder %v3633_v38, 1 }
 0x2aa   : > { %v11627_v25 = vsel %vm11546_vm1, %v3619_v21, 0.0  ;;  %v3561_v56 = vadd.f32 %v3471_v58, %v3190_v4  ;;  %v2811_v34 = vadd.f32 %v15338_v63, %v2440_v18  ;;  %v15342_v12 = vmov 0 }
 0x2ab   : > { %3688 = vst [vmem:[#allocation2 + $0xb8] sm:$0xff] %v11627_v25  ;;  %v3594_v60 = vadd.f32 %v11349_v47, %v3560_v55  ;;  %v2451_v4 = vadd.f32 %v15341_v22, %v2080_v0  ;;  %v15343_v12 = vsel %vm11659_vm7, 4294967295, %v15342_v12  ;;  %v9629_v0 = vpack.i.bf16 %v11607_v48, %v11459_v33 }
 0x2ac   : > { %v3595_v8 = vadd.f32 %v11349_v47, %v3561_v56  ;;  %9435 = vrot.lane.b32.xlu2 %v11516_v32, %s9911_s28  ;;  %9475 = vrot.lane.b32.xlu0 %v9474_v54, %s9908_s26  ;;  %v3182_v2 = vadd.f32 %v11342_v50, %v2811_v34  ;;  %v9484_v50 = vpack.i.bf16 %v11499_v39, %v11492_v35 }
 0x2ad   : > { %v3616_v7 = vmax.f32 %v3594_v60, 0.0  ;;  %9440 = vrot.lane.b32.xlu1 %v11516_v32, %s9912_s20  ;;  %15344 = vst [vmem:[#allocation21_spill] sm:$0xff] %v15343_v12  ;;  %v2822_v16 = vadd.f32 %v15345_v15, %v2451_v4 }
 0x2ae   : > { %v3617_v1 = vmax.f32 %v3595_v8, 0.0 }
 0x2af   : > { %v11644_v42 = vsel %vm11584_vm9, %v3616_v7, 0.0  ;;  %v3193_v35 = vadd.f32 %v11396_v13, %v2822_v16  ;;  %v9509_v13 = vpack.i.bf16 %v11512_v29, %v11505_v37  ;;  %v9599_v7 = vpack.i.bf16 %v11570_v9, %v11565_v53 }
 0x2b0   : > { %3685 = vst [vmem:[#allocation2 + $0xa0] sm:$0xff] %v11644_v42  ;;  %v11649_v11 = vsel %vm11593_vm8, %v3617_v1, 0.0  ;;  %v3537_v51 = vpop.f32.mrf.mxu2 }
 0x2b1   : > { %3686 = vst [vmem:[#allocation2 + $0xa8] sm:$0xff] %v11649_v11  ;;  %v3553_v32 = vadd.f32 %v3537_v51, %v3182_v2 }
 0x2b3   : > { %v3587_v21 = vadd.f32 %v11310_v61, %v3553_v32  ;;  %v9624_v32 = vpack.i.bf16 %v11565_v53, %v11614_v43 }
 0x2b4   : > { %9445 = vrot.lane.b32.xlu2 %v9474_v54, %s9905_s23  ;;  %9485 = vrot.lane.b32.xlu0 %v9484_v50, %s9909_s21 }
 0x2b5   : > { %v3609_v31 = vmax.f32 %v3587_v21, 0.0  ;;  %9450 = vrot.lane.b32.xlu1 %v11576_v45, %s9905_s23 }
 0x2b7   : > { %v3655_v61 = vsel %vm11659_vm7, %v3609_v31, 0.0 }
 0x2b8   : > { %3678 = vst.msk [vmem:[#allocation2 + $0x58] sm:$0xff] %vm3677_vm6, %v3655_v61  ;;  %v3540_v39 = vpop.f32.mrf.mxu2 }
 0x2b9   : > { %v3564_v20 = vadd.f32 %v3540_v39, %v3193_v35  ;;  %v9664_v35 = vpack.i.bf16 %v11614_v43, %v11607_v48 }
 0x2bb   : > { %v3598_v55 = vadd.f32 %v11349_v47, %v3564_v20  ;;  %v9519_v47 = vpack.i.bf16 %v11556_v3, %v11543_v6 }
 0x2bc   : > { %9455 = vrot.lane.b32.xlu2 %v9474_v54, %s9906_s24  ;;  %9500 = vrot.lane.b32.xlu0 %v9484_v50, %s9912_s20 }
 0x2bd   : > { %v3620_v58 = vmax.f32 %v3598_v55, 0.0  ;;  %9465 = vrot.lane.b32.xlu1 %v9474_v54, %s9907_s25  ;;  %v9534_v54 = vpack.i.bf16 %v11543_v6, %v11407_v52  ;;  %v9689_v55 = vpack.i.bf16 %v11627_v25, %v11623_v23 }
 0x2bf   : > { %v3666_v56 = vsel %vm11659_vm7, %v3620_v58, 0.0 }
 0x2c0   : > { %3689 = vst.msk [vmem:[#allocation2 + $0xc0] sm:$0xff] %vm3677_vm6, %v3666_v56 }
 0x2c4   : > { %9470 = vrot.lane.b32.xlu2 %v11576_v45, %s9907_s25  ;;  %9510 = vrot.lane.b32.xlu0 %v9509_v13, %s9906_s24 }
 0x2c5   : > { %9480 = vrot.lane.b32.xlu1 %v11576_v45, %s9908_s26  ;;  %v9549_v45 = vpack.i.bf16 %v11505_v37, %v11556_v3  ;;  %v11711_v37 = vpop.permute.xlu1 %6991  ;;  %v9589_v3 = vpack.i.bf16 %v11550_v19, %v11570_v9 }
 0x2c6   : > { %15346 = vst [vmem:[#allocation11_spill] sm:$0xff] %v11711_v37  ;;  %v9294_v37 = vld [vmem:[%s15020_s5 + $0x58] sm:$0xff] }
 0x2cc   : > { %9490 = vrot.lane.b32.xlu2 %v9484_v50, %s9910_s14  ;;  %9520 = vrot.lane.b32.xlu0 %v9519_v47, %s9905_s23 }
 0x2cd   : > { %9495 = vrot.lane.b32.xlu1 %v9484_v50, %s9911_s28 }
 0x2d4   : > { %9515 = vrot.lane.b32.xlu2 %v9509_v13, %s9907_s25  ;;  %9535 = vrot.lane.b32.xlu0 %v9534_v54, %s9908_s26 }
 0x2d5   : > { %9505 = vrot.lane.b32.xlu1 %v9509_v13, %s9905_s23 }
 0x2dc   : > { %9525 = vrot.lane.b32.xlu2 %v9519_v47, %s9906_s24  ;;  %9550 = vrot.lane.b32.xlu0 %v9549_v45, %s9909_s21 }
 0x2dd   : > { %9530 = vrot.lane.b32.xlu1 %v9519_v47, %s9907_s25 }
 0x2de   : > { %v11701_v5 = vpop.permute.xlu2 %9380 }
 0x2e4   : > { %9545 = vrot.lane.b32.xlu2 %v9534_v54, %s9909_s21  ;;  %9565 = vrot.lane.b32.xlu0 %v9534_v54, %s9911_s28 }
 0x2e5   : > { %9540 = vrot.lane.b32.xlu1 %v9549_v45, %s9908_s26 }
 0x2e6   : > { %v11706_v52 = vpop.permute.xlu2 %9385 }
 0x2ec   : > { %9560 = vrot.lane.b32.xlu2 %v9549_v45, %s9910_s14  ;;  %9580 = vrot.lane.b32.xlu0 %v9549_v45, %s9912_s20 }
 0x2ed   : > { %9555 = vrot.lane.b32.xlu1 %v9534_v54, %s9910_s14 }
 0x2ee   : > { %v11713_v6 = vpop.permute.xlu2 %9400 }
 0x2ef   : > { %15347 = vst [vmem:[#allocation22_spill] sm:$0xff] %v11713_v6 }
 0x2f4   : > { %9575 = vrot.lane.b32.xlu2 %v9534_v54, %s9912_s20  ;;  %9590 = vrot.lane.b32.xlu0 %v9589_v3, %s9906_s24  ;;  %v7109_v54 = vld [vmem:[%s15020_s5] sm:$0xff] }
 0x2f5   : > { %9570 = vrot.lane.b32.xlu1 %v9549_v45, %s9911_s28 }
 0x2f6   : > { %v11720_v18 = vpop.permute.xlu0 %9375  ;;  %v11722_v60 = vpop.permute.xlu2 %9405 }
 0x2f7   : > { %v11724_v8 = vpop.permute.xlu1 %9365  ;;  %v9408_v63 = vunpack.i.h.bf16 %v11722_v60  ;;  %v15034_v34 = vunpack.i.l.bf16 %v11722_v60 }
 0x2f8   : > { %v15033_v4 = vunpack.i.h.bf16 %v11724_v8 }
 0x2f9   : > { %v3794_v19 = vsel %vm369_vm0, %v15034_v34, %v9408_v63 }
 0x2fa   : > { %3868 = vmatpush.msrb.mxu0 %v3794_v19 }
 0x2fc   : > { %9595 = vrot.lane.b32.xlu2 %v9589_v3, %s9907_s25  ;;  %9600 = vrot.lane.b32.xlu0 %v9599_v7, %s9909_s21 }
 0x2fd   : > { %9585 = vrot.lane.b32.xlu1 %v9589_v3, %s9905_s23 }
 0x2fe   : > { %v11738_v1 = vpop.permute.xlu0 %9395  ;;  %v11740_v2 = vpop.permute.xlu2 %9420 }
 0x2ff   : > { %15348 = vst [vmem:[#allocation23_spill] sm:$0xff] %v11738_v1  ;;  %v11742_v51 = vpop.permute.xlu1 %9370 }
 0x304   : > { %9605 = vrot.lane.b32.xlu2 %v9599_v7, %s9910_s14  ;;  %9615 = vrot.lane.b32.xlu0 %v9599_v7, %s9912_s20 }
 0x305   : > { %9610 = vrot.lane.b32.xlu1 %v9599_v7, %s9911_s28  ;;  %v9286_v7 = vld [vmem:[%s15020_s5 + $0x18] sm:$0xff] }
 0x306   : > { %v11747_v38 = vpop.permute.xlu0 %9415  ;;  %v11749_v24 = vpop.permute.xlu2 %9435 }
 0x307   : > { %15349 = vst [vmem:[#allocation13_spill] sm:$0xff] %v11749_v24  ;;  %v11751_v27 = vpop.permute.xlu1 %9390 }
 0x308   : > { %15350 = vst [vmem:[#allocation25_spill] sm:$0xff] %v11751_v27  ;;  %v9296_v27 = vld [vmem:[%s15020_s5 + $0x68] sm:$0xff] }
 0x30c   : > { %9620 = vrot.lane.b32.xlu2 %v9629_v0, %s9905_s23  ;;  %9625 = vrot.lane.b32.xlu0 %v9624_v32, %s9905_s23 }
 0x30d   : > { %9630 = vrot.lane.b32.xlu1 %v9629_v0, %s9906_s24 }
 0x30e   : > { %v9446_v50 = vpop.permute.xlu2 %9445  ;;  %v11760_v22 = vpop.permute.xlu0 %9430 }
 0x30f   : > { %15351 = vst [vmem:[#allocation26_spill] sm:$0xff] %v11760_v22  ;;  %v11763_v21 = vpop.permute.xlu1 %9410  ;;  %v9447_v15 = vunpack.i.l.bf16 %v9446_v50 }
 0x311   : > { %v3784_v33 = vsel %vm369_vm0, %v15033_v4, %v9447_v15 }
 0x312   : > { %3869 = vmatpush.msrb.mxu0 %v3784_v33 }
 0x313   : > { %9075 = vmatmul.msk.f32.vlgmr.msrb.gmra.mxu0 %vm3677_vm6, %v11892_v14 }
 0x314   : > { %9635 = vrot.lane.b32.xlu2 %v9624_v32, %s9906_s24  ;;  %9640 = vrot.lane.b32.xlu0 %v9629_v0, %s9907_s25 }
 0x315   : > { %9645 = vrot.lane.b32.xlu1 %v9624_v32, %s9907_s25 }
 0x316   : > { %v11771_v53 = vpop.permute.xlu2 %9455  ;;  %v11773_v16 = vpop.permute.xlu0 %9460 }
 0x317   : > { %v11775_v31 = vpop.permute.xlu1 %9425 }
 0x31c   : > { %9650 = vrot.lane.b32.xlu2 %v9629_v0, %s9908_s26  ;;  %9655 = vrot.lane.b32.xlu0 %v9624_v32, %s9908_s26  ;;  %v11822_v0 = vpack.i.bf16 %v11649_v11, %v11644_v42 }
 0x31d   : > { %9665 = vrot.lane.b32.xlu1 %v9664_v35, %s9910_s14 }
 0x31e   : > { %v11782_v61 = vpop.permute.xlu2 %9470  ;;  %v11784_v39 = vpop.permute.xlu0 %9475 }
 0x31f   : > { %v11786_v20 = vpop.permute.xlu1 %9440 }
 0x320   : > { %15352 = vst [vmem:[#allocation35_spill] sm:$0xff] %v11786_v20  ;;  %v15362_v20 = vunpack.i.h.bf16 %v11724_v8 }
 0x324   : > { %9660 = vrot.lane.b32.xlu2 %v9664_v35, %s9909_s21  ;;  %9670 = vrot.lane.b32.xlu0 %v9664_v35, %s9911_s28 }
 0x325   : > { %9690 = vrot.lane.b32.xlu1 %v9689_v55, %s9907_s25 }
 0x326   : > { %v11793_v48 = vpop.permute.xlu2 %9490  ;;  %v11795_v43 = vpop.permute.xlu0 %9485 }
 0x327   : > { %v11797_v58 = vpop.permute.xlu1 %9450 }
 0x32c   : > { %9675 = vrot.lane.b32.xlu2 %v9664_v35, %s9912_s20  ;;  %9680 = vrot.lane.b32.xlu0 %v9689_v55, %s9905_s23  ;;  %v9448_v35 = vunpack.i.h.bf16 %v9446_v50  ;;  %v6988_v50 = vld [vmem:[%s15019_s4 + $0x8] sm:$0xff] }
 0x32e   : > { %v11801_v56 = vpop.permute.xlu0 %9500  ;;  %v11803_v13 = vpop.permute.xlu2 %9515  ;;  %v3785_v34 = vsel %vm369_vm0, %v9447_v15, %v9448_v35 }
 0x32f   : > { %15353 = vst [vmem:[#allocation27_spill] sm:$0xff] %v11801_v56  ;;  %v11805_v47 = vpop.permute.xlu1 %9465  ;;  %v11917_v56 = vld [vmem:[%s15018_s3 + $0x18] sm:$0xff] }
 0x330   : > { %9076 = vmatmul.msk.f32.gmra.mxu0 %vm3677_vm6, %v11917_v56 }
 0x334   : > { %9685 = vrot.lane.b32.xlu2 %v9689_v55, %s9906_s24  ;;  %7113 = vperm.xlu0 %9362, %v7109_v54   ;;  %v15039_v55 = vunpack.i.l.bf16 %v11797_v58 }
 0x336   : > { %v11811_v45 = vpop.permute.xlu2 %9525  ;;  %v11813_v3 = vpop.permute.xlu0 %9510  ;;  %v3786_v12 = vsel %vm369_vm0, %v9448_v35, %v15039_v55  ;;  %v9287_v55 = vld [vmem:[%s15020_s5 + $0x20] sm:$0xff] }
 0x337   : > { %v11815_v19 = vpop.permute.xlu1 %9480 }
 0x33c   : > { %9695 = vrot.lane.b32.xlu2 %v11822_v0, %s9905_s23  ;;  %7175 = vperm.xlu0 %9362, %v9286_v7  }
 0x33e   : > { %v11826_v32 = vpop.permute.xlu2 %9545  ;;  %v11828_v33 = vpop.permute.xlu0 %9520 }
 0x33f   : > { %v11831_v54 = vpop.permute.xlu1 %9495  ;;  %v15040_v26 = vunpack.i.h.bf16 %v11828_v33  ;;  %v9522_v40 = vunpack.i.l.bf16 %v11828_v33  ;;  %v15363_v6 = vunpack.i.h.bf16 %v11828_v33 }
 0x340   : > { %15354 = vst [vmem:[#allocation36_spill] sm:$0xff] %v11831_v54  ;;  %v15371_v54 = vunpack.i.h.bf16 %v11742_v51 }
 0x341   : > { %v3795_v4 = vsel %vm369_vm0, %v9408_v63, %v9522_v40  ;;  %v3796_v7 = vsel %vm369_vm0, %v9522_v40, %v15040_v26 }
 0x342   : > { %3891 = vmatpush.msrb.mxu1 %v3795_v4  ;;  %3914 = vmatpush.msra.mxu2 %v3796_v7 }
 0x344   : > { %3892 = vmatpush.msrb.mxu1 %v3785_v34  ;;  %3915 = vmatpush.msra.mxu2 %v3786_v12  ;;  %v9285_v34 = vld [vmem:[%s15020_s5 + $0x10] sm:$0xff] }
 0x345   : > { %6996 = vperm.xlu2 %9361, %v6988_v50   ;;  %9079 = vmatmul.msk.f32.vlgmr.msra.gmra.mxu2 %vm3677_vm6, %v11892_v14 }
 0x346   : > { %v11848_v63 = vpop.permute.xlu2 %9560  ;;  %v11850_v59 = vpop.permute.xlu0 %9535  ;;  %9077 = vmatmul.msk.f32.vlgmr.msrb.gmra.mxu1 %vm3677_vm6, %v11892_v14 }
 0x347   : > { %v11852_v40 = vpop.permute.xlu1 %9505 }
 0x348   : > { %v15041_v4 = vunpack.i.h.bf16 %v11852_v40  ;;  %v9507_v7 = vunpack.i.l.bf16 %v11852_v40 }
 0x34a   : > { %v3798_v15 = vsel %vm369_vm0, %v9507_v7, %v15041_v4 }
 0x34b   : > { %3960 = vmatpush.msra.mxu0 %v3798_v15  ;;  %v9289_v15 = vld [vmem:[%s15020_s5 + $0x30] sm:$0xff] }
 0x34d   : > { %7170 = vperm.xlu2 %9361, %v9285_v34   ;;  %9080 = vmatmul.msk.f32.gmra.mxu2 %vm3677_vm6, %v11917_v56 }
 0x34e   : > { %v11862_v12 = vpop.permute.xlu2 %9575  ;;  %v11864_v35 = vpop.permute.xlu0 %9550  ;;  %9078 = vmatmul.msk.f32.gmra.mxu1 %vm3677_vm6, %v11917_v56 }
 0x34f   : > { %15355 = vst [vmem:[#allocation43_spill] sm:$0xff] %v11862_v12  ;;  %v11866_v50 = vpop.permute.xlu1 %9530 }
 0x350   : > { %15356 = vst [vmem:[#allocation53_spill] sm:$0xff] %v11864_v35  ;;  %v3797_v35 = vsel %vm369_vm0, %v15363_v6, %v9507_v7  ;;  %v9298_v6 = vld [vmem:[%s15020_s5 + $0x78] sm:$0xff]  ;;  %v11984_v7 = vpack.i.bf16 %v11623_v23, %v11649_v11 }
 0x355   : > { %7335 = vperm.xlu2 %9361, %v9287_v55   ;;  %v9292_v55 = vld [vmem:[%s15020_s5 + $0x48] sm:$0xff] }
 0x356   : > { %v11871_v26 = vpop.permute.xlu2 %9595  ;;  %v11873_v4 = vpop.permute.xlu0 %9565 }
 0x357   : > { %15357 = vst [vmem:[#allocation44_spill] sm:$0xff] %v11873_v4  ;;  %v11875_v17 = vpop.permute.xlu1 %9540 }
 0x35d   : > { %7525 = vperm.xlu2 %9361, %v9289_v15   ;;  %v9453_v15 = vunpack.i.h.bf16 %v11797_v58 }
 0x35e   : > { %v11880_v34 = vpop.permute.xlu0 %9580  ;;  %v11882_v28 = vpop.permute.xlu2 %9605 }
 0x35f   : > { %15358 = vst [vmem:[#allocation51_spill] sm:$0xff] %v11880_v34  ;;  %v11884_v49 = vpop.permute.xlu1 %9555 }
 0x360   : > { %15359 = vst [vmem:[#allocation55_spill] sm:$0xff] %v11882_v28  ;;  %v15361_v28 = vunpack.i.l.bf16 %v11722_v60 }
 0x365   : > { %7705 = vperm.xlu2 %9361, %v9292_v55  }
 0x366   : > { %v11894_v30 = vpop.permute.xlu0 %9590  ;;  %v11896_v44 = vpop.permute.xlu2 %9620 }
 0x367   : > { %v11903_v36 = vpop.permute.xlu1 %9570  ;;  %v15062_v55 = vunpack.i.l.bf16 %v11896_v44 }
 0x368   : > { %15360 = vst [vmem:[#allocation29_spill] sm:$0xff] %v11903_v36 }
 0x369   : > { %v3788_v41 = vsel %vm369_vm0, %v9453_v15, %v15062_v55 }
 0x36a   : > { %3961 = vmatpush.msra.mxu0 %v3788_v41 }
 0x36b   : > { %9083 = vmatmul.msk.f32.vlgmr.msra.gmra.mxu0 %vm3677_vm6, %v11892_v14 }
 0x36d   : > { %7870 = vperm.xlu2 %9361, %v9294_v37   ;;  %v9367_v37 = vunpack.i.l.bf16 %v11724_v8 }
 0x36e   : > { %v11919_v1 = vpop.permute.xlu0 %9600  ;;  %v11921_v4 = vpop.permute.xlu2 %9635 }
 0x36f   : > { %v11927_v41 = vpop.permute.xlu1 %9585  ;;  %v3783_v34 = vsel %vm369_vm0, %v9367_v37, %v15362_v20  ;;  %v11972_v20 = vpack.i.bf16 %v11644_v42, %v11512_v29 }
 0x370   : > { %v9588_v55 = vunpack.i.h.bf16 %v11927_v41 }
 0x372   : > { %v3793_v22 = vsel %vm369_vm0, %v9588_v55, %v15361_v28  ;;  %v15365_v28 = vunpack.i.l.bf16 %v11797_v58 }
 0x373   : > { %3845 = vmatpush.msrb.mxu3 %v3793_v22  ;;  %9084 = vmatmul.msk.f32.gmra.mxu0 %vm3677_vm6, %v11917_v56  ;;  %v7110_v22 = vld [vmem:[%s15020_s5 + $0x8] sm:$0xff] }
 0x374   : > { %v3787_v55 = vsel %vm369_vm0, %v15365_v28, %v9453_v15  ;;  %7118 = vperm.xlu1 %9363, %v7110_v22   ;;  %v9623_v15 = vunpack.i.h.bf16 %v11896_v44  ;;  %v9593_v28 = vunpack.i.h.bf16 %v11894_v30 }
 0x375   : > { %3846 = vmatpush.msrb.mxu3 %v3783_v34  ;;  %8036 = vperm.xlu2 %9361, %v9296_v27  }
 0x376   : > { %v11945_v12 = vpop.permute.xlu0 %9615  ;;  %v11947_v60 = vpop.permute.xlu2 %9650  ;;  %9073 = vmatmul.msk.f32.vlgmr.msrb.gmra.mxu3 %vm3677_vm6, %v11892_v14 }
 0x377   : > { %3937 = vmatpush.msra.mxu3 %v3797_v35  ;;  %15364 = vst [vmem:[#allocation30_spill] sm:$0xff] %v11945_v12  ;;  %v9372_v12 = vunpack.i.l.bf16 %v11742_v51  ;;  %v12008_v24 = vpop.permute.xlu1 %9610 }
 0x378   : > { %15369 = vst [vmem:[#allocation34_spill] sm:$0xff] %v12008_v24 }
 0x379   : > { %3938 = vmatpush.msra.mxu3 %v3787_v55  ;;  %v15368_v55 = vunpack.i.h.bf16 %v11852_v40  ;;  %v15370_v40 = vunpack.i.l.bf16 %v11896_v44  ;;  %v4128_v44 = vsel %vm15129_vm3, %v9372_v12, %v15371_v54  ;;  %v12035_v54 = vld [vmem:[#allocation2 + $0x58] sm:$0xff]  ;;  %v9587_v12 = vunpack.i.l.bf16 %v11927_v41 }
 0x37a   : > { %v12046_v41 = vpack.i.bf16 %v11400_v62, %v12035_v54  ;;  %v7087_v62 = vld [vmem:[#allocation3] sm:$0xff] }
 0x37d   : > { %8202 = vperm.xlu2 %9361, %v9298_v6  }
 0x37e   : > { %v11959_v8 = vpop.permute.xlu2 %9660  ;;  %v11961_v27 = vpop.permute.xlu0 %9625  ;;  %9074 = vmatmul.msk.f32.gmra.mxu3 %vm3677_vm6, %v11917_v56 }
 0x37f   : > { %v9627_v23 = vunpack.i.l.bf16 %v11961_v27 }
 0x385   : > { %9710 = vrot.lane.b32.xlu2 %v11972_v20, %s9908_s26 }
 0x386   : > { %v11976_v58 = vpop.permute.xlu2 %9675  ;;  %v11978_v33 = vpop.permute.xlu0 %9640  ;;  %9081 = vmatmul.msk.f32.vlgmr.msra.gmra.mxu3 %vm3677_vm6, %v11892_v14 }
 0x387   : > { %15366 = vst [vmem:[#allocation31_spill] sm:$0xff] %v11976_v58 }
 0x38d   : > { %9725 = vrot.lane.b32.xlu2 %v11984_v7, %s9909_s21 }
 0x38e   : > { %v11988_v35 = vpop.permute.xlu0 %9655  ;;  %v11990_v29 = vpop.permute.xlu2 %9685  ;;  %9082 = vmatmul.msk.f32.gmra.mxu3 %vm3677_vm6, %v11917_v56 }
 0x395   : > { %9740 = vrot.lane.b32.xlu2 %v11972_v20, %s9911_s28 }
 0x396   : > { %v11996_v42 = vpop.permute.xlu0 %9670  ;;  %v9696_v34 = vpop.permute.xlu2 %9695 }
 0x397   : > { %15367 = vst [vmem:[#allocation37_spill] sm:$0xff] %v11996_v42  ;;  %v9698_v11 = vunpack.i.h.bf16 %v9696_v34  ;;  %v9697_v37 = vunpack.i.l.bf16 %v9696_v34  ;;  %v9412_v42 = vunpack.i.l.bf16 %v11763_v21  ;;  %v9528_v34 = vunpack.i.h.bf16 %v11811_v45 }
 0x399   : > { %v3799_v6 = vsel %vm369_vm0, %v15368_v55, %v9697_v37  ;;  %v3800_v22 = vsel %vm369_vm0, %v9697_v37, %v9698_v11  ;;  %v3789_v55 = vsel %vm369_vm0, %v15370_v40, %v9623_v15  ;;  %v3790_v37 = vsel %vm369_vm0, %v9623_v15, %v9627_v23 }
 0x39a   : > { %3983 = vmatpush.msra.mxu1 %v3799_v6  ;;  %4006 = vmatpush.msrb.mxu2 %v3800_v22  ;;  %v4138_v58 = vsel %vm15129_vm3, %v9593_v28, %v9412_v42  ;;  %v9463_v6 = vunpack.i.h.bf16 %v11773_v16  ;;  %v9462_v22 = vunpack.i.l.bf16 %v11773_v16  ;;  %v9628_v15 = vunpack.i.h.bf16 %v11961_v27 }
 0x39b   : > { %v15373_v16 = vunpack.i.l.bf16 %v11813_v3 }
 0x39c   : > { %3984 = vmatpush.msra.mxu1 %v3789_v55  ;;  %4007 = vmatpush.msrb.mxu2 %v3790_v37  ;;  %v9527_v37 = vunpack.i.l.bf16 %v11811_v45  ;;  %v9457_v45 = vunpack.i.l.bf16 %v11771_v53 }
 0x39d   : > { %9755 = vrot.lane.b32.xlu2 %v11984_v7, %s9912_s20  ;;  %9087 = vmatmul.msk.f32.vlgmr.msrb.gmra.mxu2 %vm3677_vm6, %v11892_v14  ;;  %v4142_v55 = vsel %vm15129_vm3, %v9528_v34, %v15373_v16 }
 0x39e   : > { %4190 = vmatpush.msra.mxu2 %v4138_v58  ;;  %v9681_v24 = vpop.permute.xlu0 %9680  ;;  %9085 = vmatmul.msk.f32.vlgmr.msra.gmra.mxu1 %vm3677_vm6, %v11892_v14 }
 0x39f   : > { %v12029_v28 = vpop.permute.xlu2 %6996  ;;  %v9683_v58 = vunpack.i.h.bf16 %v9681_v24  ;;  %v9682_v40 = vunpack.i.l.bf16 %v9681_v24  ;;  %v9458_v24 = vunpack.i.h.bf16 %v11771_v53 }
 0x3a0   : > { %15372 = vst [vmem:[#allocation38_spill] sm:$0xff] %v12029_v28  ;;  %4191 = vmatpush.msra.mxu2 %v4128_v44  ;;  %v9413_v28 = vunpack.i.h.bf16 %v11763_v21  ;;  %v4132_v44 = vsel %vm15129_vm3, %v9462_v22, %v9463_v6  ;;  %v15088_v21 = vunpack.i.h.bf16 %v11813_v3 }
 0x3a1   : > { %4075 = vmatpush.msrb.mxu1 %v9683_v58  ;;  %v3801_v36 = vsel %vm369_vm0, %v9698_v11, %v9682_v40  ;;  %v3802_v27 = vsel %vm369_vm0, %v9682_v40, %v9683_v58  ;;  %v3791_v11 = vsel %vm369_vm0, %v9627_v23, %v9628_v15  ;;  %v3792_v58 = vsel %vm369_vm0, %v9628_v15, %v9587_v12  ;;  %v12050_v40 = vpop.permute.xlu1 %9630 }
 0x3a2   : > { %4282 = vmatpush.msrb.mxu2 %v4142_v55  ;;  %4029 = vmatpush.msrb.mxu3 %v3801_v36  ;;  %v4141_v36 = vsel %vm15129_vm3, %v9527_v37, %v9528_v34  ;;  %v4140_v53 = vsel %vm15129_vm3, %v9413_v28, %v9527_v37  ;;  %v4139_v23 = vsel %vm15129_vm3, %v9412_v42, %v9413_v28  ;;  %v15086_v34 = vunpack.i.l.bf16 %v12050_v40  ;;  %v12071_v28 = vld [vmem:[#allocation2 + $0xc0] sm:$0xff] }
 0x3a3   : > { %4052 = vmatpush.msrb.mxu0 %v3802_v27  ;;  %4076 = vmatpush.msrb.mxu1 %v9587_v12  ;;  %v4131_v16 = vsel %vm15129_vm3, %v9458_v24, %v9462_v22  ;;  %v4130_v12 = vsel %vm15129_vm3, %v9457_v45, %v9458_v24  ;;  %v15376_v37 = vunpack.i.h.bf16 %v11742_v51  ;;  %v15377_v22 = vunpack.i.l.bf16 %v11813_v3 }
 0x3a4   : > { %4283 = vmatpush.msrb.mxu2 %v4132_v44  ;;  %4030 = vmatpush.msrb.mxu3 %v3791_v11  ;;  %v4133_v51 = vsel %vm15129_vm3, %v9463_v6, %v15086_v34  ;;  %v12088_v24 = vpack.i.bf16 %v12071_v28, %v11627_v25  ;;  %vm15396_vm0 = vcmask 1039360  }
 0x3a5   : > { %4053 = vmatpush.msrb.mxu0 %v3792_v58  ;;  %9775 = vrot.lane.b32.xlu2 %v12046_v41, %s9911_s28  ;;  %v4129_v27 = vsel %vm15129_vm3, %v15376_v37, %v9457_v45  ;;  %v4143_v44 = vsel %vm15129_vm3, %v15377_v22, %v15088_v21  ;;  %v12092_v45 = vld [vmem:[#allocation3 + $0x68] sm:$0xff]  ;;  %v9288_v37 = vld [vmem:[%s15020_s5 + $0x28] sm:$0xff] }
 0x3a6   : > { %4259 = vmatpush.msra.mxu1 %v4141_v36  ;;  %9089 = vmatmul.msk.f32.vlgmr.msrb.gmra.mxu3 %vm3677_vm6, %v11892_v14  ;;  %v12060_v15 = vpop.permute.xlu0 %7113  ;;  %v12108_v36 = vld [vmem:[%s15018_s3] sm:$0xff] }
 0x3a7   : > { %4236 = vmatpush.msra.mxu0 %v4140_v53  ;;  %15374 = vst [vmem:[#allocation46_spill] sm:$0xff] %v12060_v15  ;;  %4213 = vmatpush.msra.mxu3 %v4139_v23  ;;  %v12064_v55 = vpop.permute.xlu2 %7170  ;;  %v15084_v53 = vunpack.i.h.bf16 %v11990_v29  ;;  %v15087_v23 = vunpack.i.l.bf16 %v11990_v29 }
 0x3a8   : > { %15375 = vst [vmem:[#allocation56_spill] sm:$0xff] %v12064_v55  ;;  %4260 = vmatpush.msra.mxu1 %v4131_v16  ;;  %v7178_v42 = vmul.f32 %v12064_v55, %v7087_v62  ;;  %9088 = vmatmul.msk.f32.gmra.mxu2 %vm3677_vm6, %v11917_v56  ;;  %v15085_v16 = vunpack.i.h.bf16 %v11921_v4  ;;  %v9417_v55 = vunpack.i.l.bf16 %v11747_v38 }
 0x3a9   : > { %4237 = vmatpush.msra.mxu0 %v4130_v12  ;;  %9086 = vmatmul.msk.f32.gmra.mxu1 %vm3677_vm6, %v11917_v56  ;;  %v15082_v12 = vunpack.i.l.bf16 %v11894_v30 }
 0x3aa   : > { %4214 = vmatpush.msra.mxu3 %v4129_v27  ;;  %7222 = vrot.lane.b32.xlu1 %v7178_v42, %s9909_s21 }
 0x3ab   : > { %9091 = vmatmul.msk.f32.vlgmr.msrb.gmra.mxu0 %vm3677_vm6, %v11892_v14  ;;  %v4137_v42 = vsel %vm15129_vm3, %v15085_v16, %v15082_v12  ;;  %v9291_v16 = vld [vmem:[%s15020_s5 + $0x40] sm:$0xff] }
 0x3ac   : > { %4305 = vmatpush.msrb.mxu3 %v4143_v44  ;;  %v12145_v44 = vld [vmem:[%s15018_s3 + $0x8] sm:$0xff] }
 0x3ad   : > { %9795 = vrot.lane.b32.xlu2 %v12088_v24, %s9910_s14 }
 0x3ae   : > { %4306 = vmatpush.msrb.mxu3 %v4133_v51  ;;  %v12098_v11 = vpop.permute.xlu0 %7175  ;;  %v15079_v51 = vunpack.i.h.bf16 %v11805_v47 }
 0x3af   : > { %9090 = vmatmul.msk.f32.gmra.mxu3 %vm3677_vm6, %v11917_v56  ;;  %15378 = vst [vmem:[#allocation47_spill] sm:$0xff] %v12098_v11  ;;  %v12100_v58 = vpop.permute.xlu2 %7335  ;;  %v7189_v25 = vmul.f32 %v12098_v11, %v12092_v45  ;;  %v9598_v11 = vunpack.i.h.bf16 %v11871_v26 }
 0x3b0   : > { %15379 = vst [vmem:[#allocation54_spill] sm:$0xff] %v12100_v58  ;;  %v7343_v6 = vmul.f32 %v12100_v58, %v7087_v62  ;;  %9095 = vmatmul.msk.f32.vlgmr.msra.gmra.mxu2 %vm3677_vm6, %v12108_v36  ;;  %v15406_v58 = vunpack.i.l.bf16 %v11990_v29 }
 0x3b1   : > { %9093 = vmatmul.msk.f32.vlgmr.msrb.gmra.mxu1 %vm3677_vm6, %v11892_v14  ;;  %7244 = vrot.lane.b32.xlu0 %v7189_v25, %s9909_s21  ;;  %v4147_v14 = vsel %vm15129_vm3, %v15087_v23, %v15084_v53  ;;  %v15081_v25 = vunpack.i.l.bf16 %v11805_v47 }
 0x3b2   : > { %7387 = vrot.lane.b32.xlu1 %v7343_v6, %s9914_s13 }
 0x3b3   : > { %9092 = vmatmul.msk.f32.gmra.mxu0 %vm3677_vm6, %v11917_v56 }
 0x3b7   : > { %9097 = vmatmul.msk.f32.vlgmr.msra.gmra.mxu3 %vm3677_vm6, %v12108_v36  ;;  %v12132_v27 = vpop.permute.xlu2 %7525 }
 0x3b8   : > { %4397 = vmatpush.msra.mxu3 %v4147_v14  ;;  %15380 = vst [vmem:[#allocation58_spill] sm:$0xff] %v12132_v27  ;;  %v7533_v22 = vmul.f32 %v12132_v27, %v7087_v62  ;;  %9096 = vmatmul.msk.f32.gmra.mxu2 %vm3677_vm6, %v12145_v44  ;;  %v15083_v62 = vunpack.i.h.bf16 %v11747_v38  ;;  %v4478_v14 = vsel %vm1054_vm4, %v15081_v25, %v15079_v51 }
 0x3b9   : > { %9094 = vmatmul.msk.f32.gmra.mxu1 %vm3677_vm6, %v11917_v56  ;;  %7340 = vperm.xlu0 %9362, %v9288_v37   ;;  %v15080_v56 = vunpack.i.l.bf16 %v11866_v50 }
 0x3ba   : > { %4398 = vmatpush.msra.mxu3 %v4137_v42  ;;  %7581 = vrot.lane.b32.xlu1 %v7533_v22, %s9911_s28 }
 0x3bb   : > { %9099 = vmatmul.msk.f32.vlgmr.msra.gmra.mxu0 %vm3677_vm6, %v12108_v36  ;;  %v4488_v6 = vsel %vm1054_vm4, %v15083_v62, %v15080_v56  ;;  %v12231_v56 = vpop.permute.xlu1 %9645 }
 0x3bf   : > { %9098 = vmatmul.msk.f32.gmra.mxu3 %vm3677_vm6, %v12145_v44  ;;  %v12229_v51 = vpop.permute.xlu2 %7705 }
 0x3c0   : > { %9103 = vmatmul.msk.f32.vlgmr.msrb.gmra.mxu2 %vm3677_vm6, %v12108_v36  ;;  %15384 = vst [vmem:[#allocation50_spill] sm:$0xff] %v12229_v51  ;;  %v15100_v51 = vunpack.i.l.bf16 %v11875_v17 }
 0x3c1   : > { %9101 = vmatmul.msk.f32.vlgmr.msra.gmra.mxu1 %vm3677_vm6, %v12108_v36 }
 0x3c3   : > { %9100 = vmatmul.msk.f32.gmra.mxu0 %vm3677_vm6, %v12145_v44  ;;  %v12245_v34 = vpop.permute.xlu1 %9665 }
 0x3c4   : > { %v15462_v46 = vunpack.i.h.bf16 %v12245_v34 }
 0x3c7   : > { %9105 = vmatmul.msk.f32.vlgmr.msrb.gmra.mxu3 %vm3677_vm6, %v12108_v36  ;;  %v12238_v62 = vpop.permute.xlu2 %7870 }
 0x3c8   : > { %4584 = vmatpush.msrb.mxu3 %v4488_v6  ;;  %9104 = vmatmul.msk.f32.gmra.mxu2 %vm3677_vm6, %v12145_v44  ;;  %v9290_v6 = vld [vmem:[%s15020_s5 + $0x38] sm:$0xff]  ;;  %15386 = vst [vmem:[#allocation60_spill] sm:$0xff] %v12238_v62 }
 0x3c9   : > { %9102 = vmatmul.msk.f32.gmra.mxu1 %vm3677_vm6, %v12145_v44 }
 0x3ca   : > { %4585 = vmatpush.msrb.mxu3 %v4478_v14  ;;  %v9299_v14 = vld [vmem:[%s15020_s5 + $0x80] sm:$0xff] }
 0x3cb   : > { %v12258_v62 = vpop.permute.xlu1 %9690 }
 0x3cf   : > { %9106 = vmatmul.msk.f32.gmra.mxu3 %vm3677_vm6, %v12145_v44  ;;  %v12247_v23 = vpop.permute.xlu2 %8036 }
 0x3d0   : > { %15388 = vst [vmem:[#allocation24_spill] sm:$0xff] %v12247_v23 }
 0x3d7   : > { %9113 = vmatmul.msk.f32.vlgmr.msra.gmra.mxu3 %vm3677_vm6, %v12108_v36 }
 0x3df   : > { %9114 = vmatmul.msk.f32.gmra.mxu3 %vm3677_vm6, %v12145_v44 }
 0x423   : > { %v12186_v37 = vpop.permute.xlu0 %7244 }
 0x424   : > { %15381 = vst [vmem:[#allocation39_spill] sm:$0xff] %v12186_v37  ;;  %v15102_v37 = vunpack.i.l.bf16 %v11978_v33 }
 0x42b   : > { %v12188_v42 = vpop.permute.xlu0 %7340 }
 0x42c   : > { %15382 = vst [vmem:[#allocation40_spill] sm:$0xff] %v12188_v42  ;;  %v7354_v22 = vmul.f32 %v12188_v42, %v12092_v45 }
 0x42e   : > { %7409 = vrot.lane.b32.xlu0 %v7354_v22, %s9914_s13  ;;  %v12216_v22 = vld [vmem:[%s15018_s3 + $0x20] sm:$0xff] }
 0x42f   : > { %9123 = vmatmul.msk.f32.vlgmr.msrb.gmra.mxu3 %vm3677_vm6, %v12216_v22 }
 0x436   : > { %7530 = vperm.xlu0 %9362, %v9290_v6   ;;  %v12223_v6 = vld [vmem:[%s15018_s3 + $0x28] sm:$0xff] }
 0x437   : > { %9124 = vmatmul.msk.f32.gmra.mxu3 %vm3677_vm6, %v12223_v6 }
 0x43e   : > { %8363 = vperm.xlu0 %9362, %v9299_v14  }
 0x446   : > { %9705 = vrot.lane.b32.xlu0 %v11822_v0, %s9907_s25 }
 0x44e   : > { %9715 = vrot.lane.b32.xlu0 %v11984_v7, %s9908_s26 }
 0x456   : > { %9730 = vrot.lane.b32.xlu0 %v11972_v20, %s9910_s14 }
 0x45e   : > { %9745 = vrot.lane.b32.xlu0 %v11984_v7, %s9911_s28 }
 0x466   : > { %9770 = vrot.lane.b32.xlu0 %v12046_v41, %s9910_s14 }
 0x46e   : > { %9790 = vrot.lane.b32.xlu0 %v12088_v24, %s9909_s21 }
 0x476   : > { %9805 = vrot.lane.b32.xlu0 %v12088_v24, %s9912_s20 }
 0x4a0   : > { %v12227_v14 = vpop.permute.xlu0 %7409 }
 0x4a1   : > { %15383 = vst [vmem:[#allocation49_spill] sm:$0xff] %v12227_v14  ;;  %v15097_v14 = vunpack.i.h.bf16 %v11978_v33 }
 0x4a3   : > { %v4482_v23 = vsel %vm1054_vm4, %v15102_v37, %v15097_v14  ;;  %v15104_v14 = vunpack.i.h.bf16 %v11784_v39 }
 0x4a8   : > { %v12233_v25 = vpop.permute.xlu0 %7530 }
 0x4a9   : > { %15385 = vst [vmem:[#allocation57_spill] sm:$0xff] %v12233_v25  ;;  %v7545_v12 = vmul.f32 %v12233_v25, %v12092_v45  ;;  %v9293_v45 = vld [vmem:[%s15020_s5 + $0x50] sm:$0xff]  ;;  %v15101_v25 = vunpack.i.h.bf16 %v11850_v59 }
 0x4ab   : > { %7605 = vrot.lane.b32.xlu1 %v7545_v12, %s9911_s28  ;;  %v15110_v12 = vunpack.i.h.bf16 %v11803_v13 }
 0x4b0   : > { %v12240_v53 = vpop.permute.xlu0 %8363 }
 0x4b1   : > { %15387 = vst [vmem:[#allocation15_spill] sm:$0xff] %v12240_v53  ;;  %v15098_v53 = vunpack.i.h.bf16 %v12258_v62 }
 0x4b3   : > { %7700 = vperm.xlu1 %9363, %v9291_v16  }
 0x4b8   : > { %v12249_v21 = vpop.permute.xlu0 %9705 }
 0x4b9   : > { %v15096_v15 = vunpack.i.l.bf16 %v12249_v21 }
 0x4bb   : > { %7865 = vperm.xlu1 %9363, %v9293_v45   ;;  %v4492_v16 = vsel %vm1054_vm4, %v15110_v12, %v15096_v15  ;;  %v15103_v45 = vunpack.i.l.bf16 %v11815_v19  ;;  %v12277_v15 = vpop.permute.xlu2 %8202 }
 0x4bc   : > { %4676 = vmatpush.msra.mxu3 %v4492_v16  ;;  %v15099_v16 = vunpack.i.l.bf16 %v11871_v26  ;;  %15389 = vst [vmem:[#allocation33_spill] sm:$0xff] %v12277_v15  ;;  %v15405_v15 = vunpack.i.h.bf16 %v11813_v3 }
 0x4be   : > { %4677 = vmatpush.msra.mxu3 %v4482_v23  ;;  %v4912_v23 = vsel %vm15109_vm5, %v15101_v25, %v15100_v51  ;;  %v9295_v51 = vld [vmem:[%s15020_s5 + $0x60] sm:$0xff]  ;;  %v15107_v25 = vunpack.i.l.bf16 %v11988_v35 }
 0x4bf   : > { %9131 = vmatmul.msk.f32.vlgmr.msra.gmra.mxu3 %vm3677_vm6, %v12216_v22 }
 0x4c0   : > { %4768 = vmatpush.msrb.mxu3 %v15098_v53  ;;  %v4901_v53 = vsel %vm15109_vm5, %v15104_v14, %v15103_v45 }
 0x4c2   : > { %4769 = vmatpush.msrb.mxu3 %v15099_v16  ;;  %v12298_v16 = vpop.permute.xlu0 %9715 }
 0x4c3   : > { %9700 = vrot.lane.b32.xlu1 %v11822_v0, %s9906_s24  ;;  %v15105_v0 = vunpack.i.l.bf16 %v12298_v16 }
 0x4c4   : > { %5031 = vmatpush.msra.mxu3 %v4912_v23  ;;  %v12303_v23 = vpop.permute.xlu2 %9710 }
 0x4c5   : > { %v15106_v37 = vunpack.i.h.bf16 %v12303_v23 }
 0x4c6   : > { %5032 = vmatpush.msra.mxu3 %v4901_v53  ;;  %v15108_v53 = vunpack.i.h.bf16 %v11947_v60 }
 0x4c7   : > { %9132 = vmatmul.msk.f32.gmra.mxu3 %vm3677_vm6, %v12223_v6  ;;  %v4916_v45 = vsel %vm15109_vm5, %v15106_v37, %v15105_v0  ;;  %v9300_v0 = vld [vmem:[%s15020_s5 + $0x88] sm:$0xff]  ;;  %v9809_v37 = vld [vmem:[#allocation2 + $0x70] sm:$0xff] }
 0x4c8   : > { %v4905_v14 = vsel %vm15109_vm5, %v15108_v53, %v15107_v25  ;;  %v9759_v25 = vpack.i.bf16 %v12035_v54, %v11570_v9  ;;  %v12380_v9 = vld [vmem:[%s15018_s3 + $0x48] sm:$0xff]  ;;  %v15114_v54 = vunpack.i.l.bf16 %v11826_v32  ;;  %vm15397_vm5 = vmmov %vm15396_vm0 }
 0x4cb   : > { %8031 = vperm.xlu1 %9363, %v9295_v51   ;;  %v9297_v51 = vld [vmem:[%s15020_s5 + $0x70] sm:$0xff] }
 0x4cf   : > { %9139 = vmatmul.msk.f32.vlgmr.msrb.gmra.mxu3 %vm3677_vm6, %v12216_v22 }
 0x4d0   : > { %5123 = vmatpush.msrb.mxu3 %v4916_v45  ;;  %v12332_v45 = vld [vmem:[%s15018_s3 + $0x30] sm:$0xff] }
 0x4d2   : > { %5124 = vmatpush.msrb.mxu3 %v4905_v14  ;;  %v9810_v14 = vld [vmem:[#allocation2 + $0x8] sm:$0xff] }
 0x4d3   : > { %8197 = vperm.xlu1 %9363, %v9297_v51   ;;  %v12341_v51 = vld [vmem:[%s15018_s3 + $0x38] sm:$0xff] }
 0x4d7   : > { %9140 = vmatmul.msk.f32.gmra.mxu3 %vm3677_vm6, %v12223_v6 }
 0x4db   : > { %8368 = vperm.xlu1 %9363, %v9300_v0   ;;  %v9812_v0 = vld [vmem:[#allocation2 + $0x28] sm:$0xff] }
 0x4df   : > { %9149 = vmatmul.msk.f32.vlgmr.msra.gmra.mxu3 %vm3677_vm6, %v12332_v45 }
 0x4e0   : > { %5246 = vmatpush.msra.mxu3 %v9809_v37  ;;  %v9811_v37 = vld [vmem:[#allocation2 + $0x90] sm:$0xff] }
 0x4e2   : > { %5247 = vmatpush.msra.mxu3 %v9810_v14  ;;  %v12351_v14 = vpop.permute.xlu1 %7118 }
 0x4e3   : > { %9720 = vrot.lane.b32.xlu1 %v11972_v20, %s9909_s21  ;;  %15390 = vst [vmem:[#allocation41_spill] sm:$0xff] %v12351_v14  ;;  %v9637_v14 = vunpack.i.l.bf16 %v11921_v4 }
 0x4e7   : > { %9150 = vmatmul.msk.f32.gmra.mxu3 %vm3677_vm6, %v12341_v51 }
 0x4eb   : > { %9735 = vrot.lane.b32.xlu1 %v11984_v7, %s9910_s14  ;;  %v12361_v7 = vld [vmem:[%s15018_s3 + $0x40] sm:$0xff] }
 0x4ef   : > { %9157 = vmatmul.msk.f32.vlgmr.msrb.gmra.mxu3 %vm3677_vm6, %v12332_v45 }
 0x4f0   : > { %5338 = vmatpush.msrb.mxu3 %v9811_v37  ;;  %v12369_v37 = vpop.permute.xlu1 %7222 }
 0x4f1   : > { %15392 = vst [vmem:[#allocation42_spill] sm:$0xff] %v12369_v37 }
 0x4f2   : > { %5339 = vmatpush.msrb.mxu3 %v9812_v0  ;;  %v15393_v0 = vmax.f32 %v11531_v10, 0.0  ;;  %v15112_v10 = vunpack.i.l.bf16 %v11795_v43 }
 0x4f3   : > { %9750 = vrot.lane.b32.xlu1 %v11972_v20, %s9912_s20  ;;  %v15391_v20 = vmax.f32 %v11598_v57, 0.0  ;;  %v15111_v57 = vunpack.i.h.bf16 %v11826_v32 }
 0x4f5   : > { %v5565_v53 = vsel %vm15396_vm0, %v15114_v54, %v15111_v57  ;;  %v12431_v54 = vpop.permute.xlu0 %9730 }
 0x4f7   : > { %9158 = vmatmul.msk.f32.gmra.mxu3 %vm3677_vm6, %v12341_v51 }
 0x4fb   : > { %9760 = vrot.lane.b32.xlu1 %v9759_v25, %s9908_s26  ;;  %v12386_v25 = vpop.permute.xlu1 %7387 }
 0x4fc   : > { %15394 = vst [vmem:[#allocation61_spill] sm:$0xff] %v12386_v25 }
 0x4ff   : > { %9167 = vmatmul.msk.f32.vlgmr.msra.gmra.mxu3 %vm3677_vm6, %v12361_v7 }
 0x500   : > { %9839 = vmatpush.msk.msra.mxu3 %vm11535_vm13, %v15391_v20  ;;  %v12391_v20 = vpop.f32.mrf.mxu3 }
 0x501   : > { %15395 = vst [vmem:[#allocation8_spill] sm:$0xff] %v12391_v20 }
 0x502   : > { %9840 = vmatpush.msk.msra.mxu3 %vm11535_vm13, %v15393_v0  ;;  %v15113_v0 = vunpack.i.h.bf16 %v11706_v52 }
 0x503   : > { %9765 = vrot.lane.b32.xlu1 %v12046_v41, %s9909_s21  ;;  %v12408_v12 = vpop.permute.xlu1 %7581 }
 0x504   : > { %15398 = vst [vmem:[#allocation18_spill] sm:$0xff] %v12408_v12 }
 0x507   : > { %9168 = vmatmul.msk.f32.gmra.mxu3 %vm3677_vm6, %v12380_v9 }
 0x508   : > { %v12414_v37 = vpop.f32.mrf.mxu3 }
 0x509   : > { %15400 = vst [vmem:[#allocation45_spill] sm:$0xff] %v12414_v37 }
 0x50b   : > { %9780 = vrot.lane.b32.xlu1 %v12046_v41, %s9912_s20  ;;  %v5555_v41 = vsel %vm15397_vm5, %v15113_v0, %v15112_v10  ;;  %v9633_v0 = vunpack.i.h.bf16 %v12050_v40  ;;  %vm15428_vm5 = vmmov %vm15396_vm0 }
 0x50d   : > { %v4135_v3 = vsel %vm15129_vm3, %v9633_v0, %v9637_v14 }
 0x50f   : > { %9175 = vmatmul.msk.f32.vlgmr.msrb.gmra.mxu3 %vm3677_vm6, %v12361_v7 }
 0x510   : > { %5639 = vmatpush.msrb.mxu3 %v5565_v53  ;;  %v12420_v57 = vpop.f32.mrf.mxu3 }
 0x511   : > { %15402 = vst [vmem:[#allocation20_spill] sm:$0xff] %v12420_v57 }
 0x512   : > { %5640 = vmatpush.msrb.mxu3 %v5555_v41 }
 0x513   : > { %9785 = vrot.lane.b32.xlu1 %v12088_v24, %s9908_s26  ;;  %s9917_s26 = smov 91  }
 0x517   : > { %9176 = vmatmul.msk.f32.gmra.mxu3 %vm3677_vm6, %v12380_v9 }
 0x518   : > { %v12426_v10 = vpop.f32.mrf.mxu3 }
 0x519   : > { %15404 = vst [vmem:[#allocation48_spill] sm:$0xff] %v12426_v10  ;;  %v12759_v10 = vld [vmem:[%s15018_s3 + $0x60] sm:$0xff] }
 0x51b   : > { %9800 = vrot.lane.b32.xlu1 %v12088_v24, %s9911_s28 }
 0x51d   : > { %v12412_v25 = vpop.permute.xlu1 %7605 }
 0x51e   : > { %15399 = vst [vmem:[#allocation28_spill] sm:$0xff] %v12412_v25 }
 0x51f   : > { %9183 = vmatmul.msk.f32.vlgmr.msra.gmra.mxu3 %vm3677_vm6, %v12361_v7 }
 0x525   : > { %v12418_v53 = vpop.permute.xlu1 %7700 }
 0x526   : > { %15401 = vst [vmem:[#allocation9_spill] sm:$0xff] %v12418_v53 }
 0x527   : > { %9184 = vmatmul.msk.f32.gmra.mxu3 %vm3677_vm6, %v12380_v9 }
 0x52d   : > { %v12424_v41 = vpop.permute.xlu1 %7865 }
 0x52e   : > { %15403 = vst [vmem:[#allocation32_spill] sm:$0xff] %v12424_v41 }
 0x535   : > { %v9701_v24 = vpop.permute.xlu1 %9700 }
 0x536   : > { %v9703_v25 = vunpack.i.h.bf16 %v9701_v24  ;;  %v9702_v12 = vunpack.i.l.bf16 %v9701_v24  ;;  %v15407_v24 = vunpack.i.l.bf16 %v12050_v40  ;;  %v12455_v40 = vpop.f32.mrf.mxu3 }
 0x537   : > { %15409 = vst [vmem:[#allocation64_spill] sm:$0xff] %v12455_v40 }
 0x538   : > { %v4144_v27 = vsel %vm15129_vm3, %v15405_v15, %v9702_v12  ;;  %v4145_v42 = vsel %vm15129_vm3, %v9702_v12, %v9703_v25  ;;  %v4146_v41 = vsel %vm15129_vm3, %v9703_v25, %v15406_v58  ;;  %v4134_v53 = vsel %vm15129_vm3, %v15407_v24, %v9633_v0  ;;  %v12460_v25 = vld [vmem:[%s15018_s3 + $0x50] sm:$0xff] }
 0x539   : > { %4328 = vmatpush.msrb.mxu0 %v4144_v27  ;;  %4351 = vmatpush.msrb.mxu1 %v4145_v42  ;;  %v9378_v15 = vunpack.i.h.bf16 %v11720_v18  ;;  %v9377_v12 = vunpack.i.l.bf16 %v11720_v18  ;;  %v15408_v58 = vunpack.i.h.bf16 %v11921_v4  ;;  %v9533_v42 = vunpack.i.h.bf16 %v11866_v50 }
 0x53a   : > { %4374 = vmatpush.msra.mxu2 %v4146_v41  ;;  %v9517_v18 = vunpack.i.l.bf16 %v11803_v13  ;;  %v4486_v4 = vsel %vm1054_vm4, %v9598_v11, %v9417_v55  ;;  %v15411_v0 = vunpack.i.h.bf16 %v11990_v29  ;;  %v9473_v24 = vunpack.i.h.bf16 %v11782_v61  ;;  %9193 = vmatmul.msk.f32.vlgmr.msrb.gmra.mxu3 %vm3677_vm6, %v12460_v25  ;;  %v12480_v11 = vpop.permute.xlu0 %9745 }
 0x53b   : > { %4329 = vmatpush.msrb.mxu0 %v4134_v53  ;;  %4352 = vmatpush.msrb.mxu1 %v4135_v3  ;;  %v4136_v27 = vsel %vm15129_vm3, %v9637_v14, %v15408_v58  ;;  %v15412_v53 = vunpack.i.h.bf16 %v11747_v38  ;;  %v9472_v3 = vunpack.i.l.bf16 %v11782_v61  ;;  %v4476_v58 = vsel %vm1054_vm4, %v9377_v12, %v9378_v15  ;;  %15413 = vst [vmem:[#allocation66_spill] sm:$0xff] %v12480_v11 }
 0x53c   : > { %4375 = vmatpush.msra.mxu2 %v4136_v27  ;;  %9107 = vmatmul.msk.f32.vlgmr.msrb.gmra.mxu0 %vm3677_vm6, %v12108_v36  ;;  %v15414_v29 = vunpack.i.l.bf16 %v11894_v30  ;;  %v15415_v38 = vunpack.i.l.bf16 %v11805_v47  ;;  %v15416_v27 = vunpack.i.l.bf16 %v11866_v50  ;;  %v4490_v12 = vsel %vm1054_vm4, %v9533_v42, %v9517_v18 }
 0x53d   : > { %9109 = vmatmul.msk.f32.vlgmr.msrb.gmra.mxu1 %vm3677_vm6, %v12108_v36  ;;  %9111 = vmatmul.msk.f32.vlgmr.msra.gmra.mxu2 %vm3677_vm6, %v12108_v36  ;;  %v12468_v14 = vpop.permute.xlu1 %8031  ;;  %v4487_v41 = vsel %vm1054_vm4, %v9417_v55, %v15412_v53  ;;  %v15418_v30 = vunpack.i.h.bf16 %v11805_v47  ;;  %v15419_v50 = vunpack.i.l.bf16 %v11978_v33 }
 0x53e   : > { %15410 = vst [vmem:[#allocation65_spill] sm:$0xff] %v12468_v14  ;;  %4420 = vmatpush.msra.mxu0 %v15411_v0  ;;  %4538 = vmatpush.msra.mxu1 %v4486_v4  ;;  %v4477_v55 = vsel %vm1054_vm4, %v9378_v15, %v15415_v38  ;;  %v4489_v61 = vsel %vm1054_vm4, %v15416_v27, %v9533_v42  ;;  %v15417_v4 = vunpack.i.h.bf16 %v11803_v13  ;;  %v12501_v42 = vpop.f32.mrf.mxu3  ;;  %v12506_v13 = vld [vmem:[%s15018_s3 + $0x58] sm:$0xff] }
 0x53f   : > { %4561 = vmatpush.msrb.mxu2 %v4487_v41  ;;  %v4479_v53 = vsel %vm1054_vm4, %v15418_v30, %v9472_v3  ;;  %v4480_v15 = vsel %vm1054_vm4, %v9472_v3, %v9473_v24  ;;  %v4481_v41 = vsel %vm1054_vm4, %v9473_v24, %v15419_v50  ;;  %15420 = vst [vmem:[#allocation67_spill] sm:$0xff] %v12501_v42  ;;  %v9692_v24 = vunpack.i.l.bf16 %v12258_v62 }
 0x540   : > { %4421 = vmatpush.msra.mxu0 %v15414_v29  ;;  %4539 = vmatpush.msra.mxu1 %v4476_v58  ;;  %v4491_v0 = vsel %vm1054_vm4, %v9517_v18, %v15417_v4  ;;  %v9708_v18 = vunpack.i.h.bf16 %v12249_v21  ;;  %v9647_v58 = vunpack.i.l.bf16 %v12231_v56  ;;  %v9648_v29 = vunpack.i.h.bf16 %v12231_v56 }
 0x541   : > { %4562 = vmatpush.msrb.mxu2 %v4477_v55  ;;  %v15422_v55 = vunpack.i.l.bf16 %v12249_v21  ;;  %v15426_v30 = vunpack.i.l.bf16 %v11871_v26  ;;  %v15133_v50 = vunpack.i.l.bf16 %v11959_v8 }
 0x542   : > { %4607 = vmatpush.msrb.mxu0 %v4489_v61  ;;  %4630 = vmatpush.msrb.mxu1 %v4490_v12  ;;  %v12520_v3 = vpop.permute.xlu0 %9770  ;;  %v4494_v56 = vsel %vm1054_vm4, %v9708_v18, %v9692_v24  ;;  %v15424_v12 = vunpack.i.h.bf16 %v12258_v62 }
 0x543   : > { %4653 = vmatpush.msra.mxu2 %v4491_v0  ;;  %9194 = vmatmul.msk.f32.gmra.mxu3 %vm3677_vm6, %v12506_v13  ;;  %v4493_v27 = vsel %vm1054_vm4, %v15422_v55, %v9708_v18  ;;  %v4484_v0 = vsel %vm1054_vm4, %v9647_v58, %v9648_v29  ;;  %v9422_v55 = vunpack.i.l.bf16 %v11740_v2 }
 0x544   : > { %4608 = vmatpush.msrb.mxu0 %v4479_v53  ;;  %4631 = vmatpush.msrb.mxu1 %v4480_v15  ;;  %v4495_v4 = vsel %vm1054_vm4, %v9692_v24, %v15424_v12  ;;  %v4485_v53 = vsel %vm1054_vm4, %v9648_v29, %v15426_v30  ;;  %v9423_v29 = vunpack.i.h.bf16 %v11740_v2  ;;  %v9383_v12 = vunpack.i.h.bf16 %v11701_v5 }
 0x545   : > { %4654 = vmatpush.msra.mxu2 %v4481_v41  ;;  %9108 = vmatmul.msk.f32.gmra.mxu0 %vm3677_vm6, %v12145_v44  ;;  %v12512_v47 = vpop.permute.xlu1 %8197 }
 0x546   : > { %9110 = vmatmul.msk.f32.gmra.mxu1 %vm3677_vm6, %v12145_v44  ;;  %15421 = vst [vmem:[#allocation68_spill] sm:$0xff] %v12512_v47  ;;  %9112 = vmatmul.msk.f32.gmra.mxu2 %vm3677_vm6, %v12145_v44  ;;  %v12524_v38 = vpop.f32.mrf.mxu3  ;;  %v15460_v47 = vunpack.i.l.bf16 %v11988_v35 }
 0x54a   : > { %v12548_v15 = vpop.permute.xlu0 %9790 }
 0x54b   : > { %v15130_v18 = vunpack.i.h.bf16 %v12548_v15  ;;  %v15134_v24 = vunpack.i.l.bf16 %v12548_v15 }
 0x54d   : > { %9115 = vmatmul.msk.f32.vlgmr.msra.gmra.mxu0 %vm3677_vm6, %v12108_v36  ;;  %v12533_v61 = vpop.permute.xlu1 %8368  ;;  %v15425_v36 = vunpack.i.h.bf16 %v11978_v33  ;;  %v5573_v2 = vsel %vm15396_vm0, %v15134_v24, %v15130_v18  ;;  %v15435_v18 = vunpack.i.h.bf16 %v11784_v39 }
 0x54e   : > { %9119 = vmatmul.msk.f32.vlgmr.msra.gmra.mxu1 %vm3677_vm6, %v12216_v22  ;;  %15423 = vst [vmem:[#allocation69_spill] sm:$0xff] %v12533_v61  ;;  %9121 = vmatmul.msk.f32.vlgmr.msrb.gmra.mxu2 %vm3677_vm6, %v12216_v22  ;;  %v12550_v62 = vpop.f32.mrf.mxu3 }
 0x54f   : > { %4699 = vmatpush.msra.mxu0 %v4493_v27  ;;  %4722 = vmatpush.msra.mxu1 %v4494_v56  ;;  %v4483_v21 = vsel %vm1054_vm4, %v15425_v36, %v9647_v58  ;;  %vm15427_vm4 = vmmov %vm15396_vm0  ;;  %v9537_v27 = vunpack.i.l.bf16 %v11850_v59  ;;  %v9477_v36 = vunpack.i.l.bf16 %v11784_v39  ;;  %v9543_v39 = vunpack.i.h.bf16 %v11875_v17 }
 0x550   : > { %4745 = vmatpush.msrb.mxu2 %v4495_v4  ;;  %v9382_v4 = vunpack.i.l.bf16 %v11701_v5 }
 0x551   : > { %4700 = vmatpush.msra.mxu0 %v4483_v21  ;;  %4723 = vmatpush.msra.mxu1 %v4484_v0 }
 0x552   : > { %4746 = vmatpush.msrb.mxu2 %v4485_v53  ;;  %v15431_v53 = vunpack.i.h.bf16 %v11850_v59 }
 0x555   : > { %9116 = vmatmul.msk.f32.gmra.mxu0 %vm3677_vm6, %v12145_v44  ;;  %v12556_v33 = vpop.permute.xlu1 %9720  ;;  %v15136_v44 = vunpack.i.h.bf16 %v11775_v31 }
 0x556   : > { %9120 = vmatmul.msk.f32.gmra.mxu1 %vm3677_vm6, %v12223_v6  ;;  %9122 = vmatmul.msk.f32.gmra.mxu2 %vm3677_vm6, %v12223_v6  ;;  %v15135_v26 = vunpack.i.h.bf16 %v12556_v33  ;;  %v15139_v41 = vunpack.i.l.bf16 %v12556_v33  ;;  %v12587_v21 = vpop.f32.mrf.mxu3 }
 0x557   : > { %v5559_v56 = vsel %vm15428_vm5, %v15136_v44, %v15133_v50  ;;  %v15446_v44 = vunpack.i.h.bf16 %v11947_v60 }
 0x558   : > { %v5569_v58 = vsel %vm15427_vm4, %v15139_v41, %v15135_v26  ;;  %vm15429_vm4 = vcmask 7168   ;;  %v15444_v26 = vunpack.i.l.bf16 %v11815_v19  ;;  %v15454_v41 = vunpack.i.h.bf16 %v11793_v48 }
 0x559   : > { %5731 = vmatpush.msra.mxu3 %v5569_v58  ;;  %v4909_v5 = vsel %vm15429_vm4, %v9422_v55, %v9423_v29  ;;  %vm15430_vm5 = vmmov %vm15429_vm4 }
 0x55a   : > { %v4910_v30 = vsel %vm15430_vm5, %v9423_v29, %v9537_v27  ;;  %vm15432_vm0 = vmmov %vm15429_vm4 }
 0x55b   : > { %5732 = vmatpush.msra.mxu3 %v5559_v56  ;;  %v4911_v58 = vsel %vm15432_vm0, %v9537_v27, %v15431_v53  ;;  %v12602_v56 = vpop.permute.xlu2 %9725  ;;  %vm15433_vm3 = vmmov %vm15432_vm0  ;;  %v12627_v27 = vpop.f32.mrf.mxu1 }
 0x55c   : > { %vm15434_vm4 = vmmov %vm15432_vm0  ;;  %9201 = vmatmul.msk.f32.vlgmr.msra.gmra.mxu3 %vm3677_vm6, %v12460_v25 }
 0x55d   : > { %5823 = vmatpush.msrb.mxu3 %v5573_v2  ;;  %9125 = vmatmul.msk.f32.vlgmr.msrb.gmra.mxu0 %vm3677_vm6, %v12216_v22  ;;  %v12594_v0 = vpop.permute.xlu1 %9735  ;;  %v4898_v2 = vsel %vm15433_vm3, %v9382_v4, %v9383_v12  ;;  %v4899_v55 = vsel %vm15434_vm4, %v9383_v12, %v9477_v36  ;;  %vm15436_vm7 = vmmov %vm15432_vm0  ;;  %v9483_v12 = vunpack.i.h.bf16 %v11815_v19  ;;  %v12630_v4 = vpop.f32.mrf.mxu0 }
 0x55e   : > { %9127 = vmatmul.msk.f32.vlgmr.msrb.gmra.mxu1 %vm3677_vm6, %v12216_v22  ;;  %9129 = vmatmul.msk.f32.vlgmr.msra.gmra.mxu2 %vm3677_vm6, %v12216_v22  ;;  %v4900_v50 = vsel %vm15436_vm7, %v9477_v36, %v15435_v18  ;;  %v12611_v59 = vpop.f32.mrf.mxu3  ;;  %v9652_v36 = vunpack.i.l.bf16 %v11947_v60  ;;  %vm15440_vm3 = vmmov %vm15432_vm0  ;;  %v15457_v61 = vunpack.i.l.bf16 %v12594_v0 }
 0x55f   : > { %4962 = vmatpush.msrb.mxu0 %v4909_v5  ;;  %4985 = vmatpush.msrb.mxu1 %v4910_v30  ;;  %v15439_v30 = vunpack.i.l.bf16 %v11875_v17  ;;  %vm15441_vm7 = vmmov %vm15432_vm0  ;;  %v4902_v17 = vsel %vm15432_vm0, %v15444_v26, %v9483_v12  ;;  %v15141_v26 = vunpack.i.h.bf16 %v11884_v49 }
 0x560   : > { %5008 = vmatpush.msra.mxu2 %v4911_v58  ;;  %vm15443_vm5 = vmmov %vm15432_vm0 }
 0x561   : > { %4963 = vmatpush.msrb.mxu0 %v4898_v2  ;;  %4986 = vmatpush.msrb.mxu1 %v4899_v55  ;;  %v4913_v53 = vsel %vm15440_vm3, %v15439_v30, %v9543_v39  ;;  %v15442_v55 = vunpack.i.h.bf16 %v12303_v23  ;;  %vm15445_vm4 = vmmov %vm15432_vm0 }
 0x562   : > { %5009 = vmatpush.msra.mxu2 %v4900_v50  ;;  %v9712_v50 = vunpack.i.l.bf16 %v12303_v23  ;;  %v4903_v30 = vsel %vm15445_vm4, %v9483_v12, %v9652_v36  ;;  %vm15447_vm3 = vmmov %vm15432_vm0  ;;  %v15140_v12 = vunpack.i.l.bf16 %v11848_v63 }
 0x563   : > { %v12624_v18 = vpop.permute.xlu2 %9740 }
 0x564   : > { %9202 = vmatmul.msk.f32.gmra.mxu3 %vm3677_vm6, %v12506_v13  ;;  %15438 = vst [vmem:[#allocation71_spill] sm:$0xff] %v12624_v18  ;;  %v4914_v2 = vsel %vm15441_vm7, %v9543_v39, %v9712_v50  ;;  %v4915_v24 = vsel %vm15443_vm5, %v9712_v50, %v15442_v55  ;;  %v12661_v39 = vpop.f32.mrf.mxu1  ;;  %vm15449_vm7 = vcmask 1039360   ;;  %vm15450_vm5 = vcmask 908288   ;;  %v9823_v18 = vld [vmem:[#allocation2 + $0x38] sm:$0xff] }
 0x565   : > { %9126 = vmatmul.msk.f32.gmra.mxu0 %vm3677_vm6, %v12223_v6  ;;  %v12617_v29 = vpop.permute.xlu1 %9750  ;;  %v12671_v60 = vpop.f32.mrf.mxu0  ;;  %vm15456_vm4 = vmmov %vm15450_vm5 }
 0x566   : > { %9128 = vmatmul.msk.f32.gmra.mxu1 %vm3677_vm6, %v12223_v6  ;;  %15437 = vst [vmem:[#allocation70_spill] sm:$0xff] %v12617_v29  ;;  %9130 = vmatmul.msk.f32.gmra.mxu2 %vm3677_vm6, %v12223_v6  ;;  %v12633_v5 = vpop.f32.mrf.mxu3 }
 0x56b   : > { %v12659_v23 = vpop.permute.xlu2 %9755 }
 0x56d   : > { %9133 = vmatmul.msk.f32.vlgmr.msra.gmra.mxu0 %vm3677_vm6, %v12216_v22  ;;  %v12642_v58 = vpop.permute.xlu1 %9760 }
 0x56e   : > { %9135 = vmatmul.msk.f32.vlgmr.msra.gmra.mxu1 %vm3677_vm6, %v12216_v22  ;;  %9137 = vmatmul.msk.f32.vlgmr.msrb.gmra.mxu2 %vm3677_vm6, %v12216_v22  ;;  %v4904_v22 = vsel %vm15447_vm3, %v9652_v36, %v15446_v44  ;;  %v15138_v44 = vunpack.i.h.bf16 %v11919_v1  ;;  %vm15459_vm3 = vmmov %vm15456_vm4 }
 0x56f   : > { %5054 = vmatpush.msra.mxu0 %v4913_v53  ;;  %5077 = vmatpush.msra.mxu1 %v4914_v2  ;;  %v12657_v53 = vpop.f32.mrf.mxu2  ;;  %v9718_v2 = vunpack.i.h.bf16 %v12298_v16 }
 0x570   : > { %5100 = vmatpush.msrb.mxu2 %v4915_v24  ;;  %15448 = vst [vmem:[#allocation72_spill] sm:$0xff] %v12657_v53  ;;  %v12663_v24 = vpop.f32.mrf.mxu3  ;;  %v15479_v53 = vld [vmem:[#allocation13_spill] sm:$0xff] }
 0x571   : > { %5055 = vmatpush.msra.mxu0 %v4902_v17  ;;  %5078 = vmatpush.msra.mxu1 %v4903_v30  ;;  %v15152_v42 = vunpack.i.l.bf16 %v15479_v53  ;;  %v15494_v53 = vunpack.i.h.bf16 %v11706_v52 }
 0x572   : > { %5101 = vmatpush.msrb.mxu2 %v4904_v22  ;;  %v9658_v22 = vunpack.i.h.bf16 %v11988_v35 }
 0x573   : > { %v12702_v17 = vpop.permute.xlu2 %9775 }
 0x575   : > { %9134 = vmatmul.msk.f32.gmra.mxu0 %vm3677_vm6, %v12223_v6  ;;  %v12669_v19 = vpop.permute.xlu1 %9765 }
 0x576   : > { %9136 = vmatmul.msk.f32.gmra.mxu1 %vm3677_vm6, %v12223_v6  ;;  %9138 = vmatmul.msk.f32.gmra.mxu2 %vm3677_vm6, %v12223_v6  ;;  %v15137_v50 = vunpack.i.l.bf16 %v12669_v19  ;;  %v5936_v6 = vsel %vm15450_vm5, %v15141_v26, %v15140_v12  ;;  %v15452_v12 = vunpack.i.l.bf16 %v12298_v16  ;;  %v15458_v16 = vunpack.i.h.bf16 %v12431_v54  ;;  %vm15464_vm5 = vmmov %vm15459_vm3 }
 0x577   : > { %v12694_v30 = vpop.f32.mrf.mxu2 }
 0x578   : > { %v5563_v36 = vsel %vm15449_vm7, %v15138_v44, %v15137_v50  ;;  %15451 = vst [vmem:[#allocation73_spill] sm:$0xff] %v12694_v30  ;;  %v15455_v44 = vunpack.i.l.bf16 %v11793_v48  ;;  %v12721_v50 = vpop.f32.mrf.mxu1  ;;  %vm15461_vm7 = vmmov %vm15432_vm0 }
 0x579   : > { %5824 = vmatpush.msrb.mxu3 %v5563_v36  ;;  %v12698_v36 = vpop.f32.mrf.mxu3  ;;  %v4906_v14 = vsel %vm15461_vm7, %v15460_v47, %v9658_v22  ;;  %v9762_v47 = vunpack.i.l.bf16 %v12642_v58  ;;  %vm15469_vm7 = vmmov %vm15432_vm0 }
 0x57a   : > { %9209 = vmatmul.msk.f32.vlgmr.msrb.gmra.mxu3 %vm3677_vm6, %v12460_v25  ;;  %v5926_v55 = vsel %vm15456_vm4, %v15455_v44, %v15454_v41  ;;  %v15463_v41 = vunpack.i.l.bf16 %v12245_v34  ;;  %vm15466_vm4 = vmmov %vm15432_vm0 }
 0x57b   : > { %6032 = vmatpush.msra.mxu3 %v5936_v6  ;;  %v4917_v6 = vsel %vm15432_vm0, %v15452_v12, %v9718_v2  ;;  %v5940_v12 = vsel %vm15459_vm3, %v15458_v16, %v15457_v61  ;;  %v12751_v16 = vpop.permute.xlu2 %9795  ;;  %vm15468_vm3 = vmmov %vm15432_vm0 }
 0x57c   : > { %v5930_v44 = vsel %vm15464_vm5, %v15463_v41, %v15462_v46  ;;  %v4907_v20 = vsel %vm15468_vm3, %v9658_v22, %v9762_v47  ;;  %v9813_v22 = vld [vmem:[#allocation2 + $0x78] sm:$0xff]  ;;  %vm15477_vm5 = vcmask 900096   ;;  %vm15491_vm3 = vcmask 1039360  }
 0x57d   : > { %9143 = vmatmul.msk.f32.vlgmr.msrb.gmra.mxu0 %vm3677_vm6, %v12332_v45  ;;  %v12712_v26 = vpop.permute.xlu1 %9780  ;;  %6033 = vmatpush.msra.mxu3 %v5926_v55 }
 0x57e   : > { %9145 = vmatmul.msk.f32.vlgmr.msrb.gmra.mxu1 %vm3677_vm6, %v12332_v45  ;;  %15453 = vst [vmem:[#allocation74_spill] sm:$0xff] %v12712_v26  ;;  %9147 = vmatmul.msk.f32.vlgmr.msra.gmra.mxu2 %vm3677_vm6, %v12332_v45 }
 0x57f   : > { %5146 = vmatpush.msrb.mxu0 %v4917_v6  ;;  %v12731_v6 = vpop.f32.mrf.mxu0  ;;  %6124 = vmatpush.msrb.mxu3 %v5940_v12  ;;  %v12740_v55 = vpop.f32.mrf.mxu2  ;;  %v9763_v12 = vunpack.i.h.bf16 %v12642_v58 }
 0x580   : > { %15465 = vst [vmem:[#allocation75_spill] sm:$0xff] %v12740_v55  ;;  %v12761_v57 = vpop.f32.mrf.mxu1 }
 0x581   : > { %5147 = vmatpush.msrb.mxu0 %v4906_v14  ;;  %6125 = vmatpush.msrb.mxu3 %v5930_v44  ;;  %v12746_v14 = vpop.f32.mrf.mxu3  ;;  %15467 = vst [vmem:[#allocation76_spill] sm:$0xff] %v12761_v57  ;;  %v4908_v58 = vsel %vm15469_vm7, %v9762_v47, %v9763_v12  ;;  %v9814_v47 = vld [vmem:[#allocation2 + $0x80] sm:$0xff]  ;;  %v9816_v12 = vld [vmem:[#allocation2 + $0x10] sm:$0xff]  ;;  %v9827_v57 = vld [vmem:[#allocation2 + $0x58] sm:$0xff] }
 0x582   : > { %9210 = vmatmul.msk.f32.gmra.mxu3 %vm3677_vm6, %v12506_v13 }
 0x585   : > { %9144 = vmatmul.msk.f32.gmra.mxu0 %vm3677_vm6, %v12341_v51  ;;  %v9786_v35 = vpop.permute.xlu1 %9785 }
 0x586   : > { %9146 = vmatmul.msk.f32.gmra.mxu1 %vm3677_vm6, %v12341_v51  ;;  %9148 = vmatmul.msk.f32.gmra.mxu2 %vm3677_vm6, %v12341_v51  ;;  %v9788_v46 = vunpack.i.h.bf16 %v9786_v35  ;;  %v9787_v61 = vunpack.i.l.bf16 %v9786_v35  ;;  %v15148_v35 = vunpack.i.h.bf16 %v12751_v16 }
 0x587   : > { %v12763_v37 = vpop.f32.mrf.mxu0 }
 0x588   : > { %v4918_v41 = vsel %vm15432_vm0, %v9718_v2, %v9787_v61  ;;  %v4919_v44 = vsel %vm15466_vm4, %v9787_v61, %v9788_v46  ;;  %v15147_v2 = vunpack.i.l.bf16 %v12520_v3  ;;  %v9815_v46 = vld [vmem:[#allocation2 + $0x88] sm:$0xff]  ;;  %vm15481_vm0 = vmmov %vm15477_vm5 }
 0x589   : > { %5169 = vmatpush.msrb.mxu1 %v4918_v41  ;;  %5192 = vmatpush.msra.mxu2 %v4919_v44  ;;  %v12781_v61 = vpop.f32.mrf.mxu3  ;;  %v12788_v41 = vld [vmem:[%s15018_s3 + $0x68] sm:$0xff]  ;;  %v9817_v44 = vld [vmem:[#allocation2 + $0x18] sm:$0xff]  ;;  %vm15486_vm4 = vmmov %vm15481_vm0 }
 0x58a   : > { %9219 = vmatmul.msk.f32.vlgmr.msra.gmra.mxu3 %vm3677_vm6, %v12759_v10  ;;  %15471 = vst [vmem:[#allocation78_spill] sm:$0xff] %v12781_v61  ;;  %vm15493_vm7 = vmmov %vm15481_vm0 }
 0x58b   : > { %5170 = vmatpush.msrb.mxu1 %v4907_v20  ;;  %6216 = vmatpush.msra.mxu3 %v15148_v35  ;;  %v12779_v20 = vpop.f32.mrf.mxu2  ;;  %v15476_v35 = vld [vmem:[#allocation36_spill] sm:$0xff] }
 0x58c   : > { %5193 = vmatpush.msra.mxu2 %v4908_v58  ;;  %15470 = vst [vmem:[#allocation77_spill] sm:$0xff] %v12779_v20  ;;  %v9818_v58 = vld [vmem:[#allocation2 + $0x20] sm:$0xff] }
 0x58d   : > { %9151 = vmatmul.msk.f32.vlgmr.msra.gmra.mxu0 %vm3677_vm6, %v12332_v45  ;;  %6217 = vmatpush.msra.mxu3 %v15147_v2 }
 0x58e   : > { %9153 = vmatmul.msk.f32.vlgmr.msra.gmra.mxu1 %vm3677_vm6, %v12332_v45  ;;  %9155 = vmatmul.msk.f32.vlgmr.msrb.gmra.mxu2 %vm3677_vm6, %v12332_v45 }
 0x58f   : > { %5269 = vmatpush.msra.mxu0 %v9813_v22  ;;  %5292 = vmatpush.msra.mxu1 %v9814_v47  ;;  %v12790_v22 = vpop.f32.mrf.mxu1  ;;  %v12794_v47 = vpop.f32.mrf.mxu0 }
 0x590   : > { %5315 = vmatpush.msrb.mxu2 %v9815_v46  ;;  %15472 = vst [vmem:[#allocation79_spill] sm:$0xff] %v12790_v22  ;;  %v15473_v46 = vld [vmem:[#allocation29_spill] sm:$0xff] }
 0x591   : > { %5270 = vmatpush.msra.mxu0 %v9816_v12  ;;  %5293 = vmatpush.msra.mxu1 %v9817_v44  ;;  %v15149_v12 = vunpack.i.h.bf16 %v15473_v46  ;;  %v15150_v44 = vunpack.i.l.bf16 %v15473_v46  ;;  %v12806_v2 = vpop.f32.mrf.mxu3  ;;  %v9820_v22 = vld [vmem:[#allocation2 + $0xa0] sm:$0xff] }
 0x592   : > { %5316 = vmatpush.msrb.mxu2 %v9818_v58  ;;  %9220 = vmatmul.msk.f32.gmra.mxu3 %vm3677_vm6, %v12788_v41  ;;  %15475 = vst [vmem:[#allocation80_spill] sm:$0xff] %v12806_v2  ;;  %v9824_v2 = vld [vmem:[#allocation2 + $0x40] sm:$0xff] }
 0x593   : > { %v12804_v58 = vpop.f32.mrf.mxu2  ;;  %v6307_v55 = vsel %vm15477_vm5, %v15150_v44, %v15149_v12  ;;  %v15480_v12 = vunpack.i.h.bf16 %v15476_v35  ;;  %vm15495_vm5 = vmmov %vm15491_vm3 }
 0x594   : > { %15474 = vst [vmem:[#allocation29_spill] sm:$0xff] %v12804_v58  ;;  %v9819_v58 = vld [vmem:[#allocation2 + $0x98] sm:$0xff] }
 0x595   : > { %9152 = vmatmul.msk.f32.gmra.mxu0 %vm3677_vm6, %v12341_v51  ;;  %v6297_v44 = vsel %vm15481_vm0, %v15480_v12, %v15152_v42  ;;  %v9387_v42 = vunpack.i.l.bf16 %v11706_v52  ;;  %vm15503_vm0 = vcmask 891904  }
 0x596   : > { %9154 = vmatmul.msk.f32.gmra.mxu1 %vm3677_vm6, %v12341_v51  ;;  %9156 = vmatmul.msk.f32.gmra.mxu2 %vm3677_vm6, %v12341_v51 }
 0x597   : > { %v12816_v30 = vpop.f32.mrf.mxu1  ;;  %v12823_v20 = vpop.f32.mrf.mxu0 }
 0x598   : > { %15478 = vst [vmem:[#allocation36_spill] sm:$0xff] %v12816_v30  ;;  %v9822_v30 = vld [vmem:[#allocation2 + $0x30] sm:$0xff] }
 0x59a   : > { %9227 = vmatmul.msk.f32.vlgmr.msrb.gmra.mxu3 %vm3677_vm6, %v12759_v10 }
 0x59b   : > { %6425 = vmatpush.msrb.mxu3 %v6307_v55  ;;  %v9821_v55 = vld [vmem:[#allocation2 + $0xa8] sm:$0xff] }
 0x59d   : > { %9159 = vmatmul.msk.f32.vlgmr.msrb.gmra.mxu0 %vm3677_vm6, %v12332_v45  ;;  %6426 = vmatpush.msrb.mxu3 %v6297_v44  ;;  %v9768_v44 = vunpack.i.h.bf16 %v12669_v19 }
 0x59e   : > { %9161 = vmatmul.msk.f32.vlgmr.msrb.gmra.mxu1 %vm3677_vm6, %v12332_v45  ;;  %9163 = vmatmul.msk.f32.vlgmr.msra.gmra.mxu2 %vm3677_vm6, %v12332_v45  ;;  %v12832_v45 = vpop.f32.mrf.mxu2 }
 0x59f   : > { %5361 = vmatpush.msrb.mxu0 %v9819_v58  ;;  %5384 = vmatpush.msrb.mxu1 %v9820_v22  ;;  %15482 = vst [vmem:[#allocation81_spill] sm:$0xff] %v12832_v45  ;;  %v12836_v22 = vpop.f32.mrf.mxu3  ;;  %v12848_v12 = vpop.f32.mrf.mxu0  ;;  %v15485_v58 = vld [vmem:[#allocation37_spill] sm:$0xff] }
 0x5a0   : > { %5407 = vmatpush.msra.mxu2 %v9821_v55  ;;  %15483 = vst [vmem:[#allocation82_spill] sm:$0xff] %v12836_v22 }
 0x5a1   : > { %5362 = vmatpush.msrb.mxu0 %v9822_v30  ;;  %5385 = vmatpush.msrb.mxu1 %v9823_v18  ;;  %v12844_v30 = vpop.f32.mrf.mxu1  ;;  %v15155_v18 = vunpack.i.h.bf16 %v12480_v11 }
 0x5a2   : > { %5408 = vmatpush.msra.mxu2 %v9824_v2  ;;  %9228 = vmatmul.msk.f32.gmra.mxu3 %vm3677_vm6, %v12788_v41  ;;  %15484 = vst [vmem:[#allocation83_spill] sm:$0xff] %v12844_v30  ;;  %v15156_v2 = vunpack.i.l.bf16 %v12480_v11  ;;  %v15488_v30 = vld [vmem:[#allocation34_spill] sm:$0xff]  ;;  %v9825_v11 = vld [vmem:[#allocation2 + $0xb8] sm:$0xff] }
 0x5a3   : > { %v15158_v22 = vunpack.i.l.bf16 %v15488_v30  ;;  %v9427_v30 = vunpack.i.l.bf16 %v11775_v31 }
 0x5a5   : > { %9160 = vmatmul.msk.f32.gmra.mxu0 %vm3677_vm6, %v12341_v51 }
 0x5a6   : > { %9162 = vmatmul.msk.f32.gmra.mxu1 %vm3677_vm6, %v12341_v51  ;;  %9164 = vmatmul.msk.f32.gmra.mxu2 %vm3677_vm6, %v12341_v51  ;;  %v6311_v51 = vsel %vm15486_vm4, %v15156_v2, %v15155_v18  ;;  %v12860_v45 = vpop.f32.mrf.mxu2  ;;  %v15490_v18 = vunpack.i.l.bf16 %v11826_v32  ;;  %v15492_v2 = vunpack.i.h.bf16 %v15485_v58  ;;  %vm15505_vm4 = vmmov %vm15491_vm3 }
 0x5a7   : > { %15487 = vst [vmem:[#allocation84_spill] sm:$0xff] %v12860_v45  ;;  %v12867_v55 = vpop.f32.mrf.mxu3 }
 0x5a8   : > { %15489 = vst [vmem:[#allocation85_spill] sm:$0xff] %v12867_v55  ;;  %v6301_v45 = vsel %vm15493_vm7, %v15492_v2, %v15158_v22  ;;  %v9826_v55 = vld [vmem:[#allocation2 + $0x50] sm:$0xff]  ;;  %v15500_v2 = vld [vmem:[#allocation53_spill] sm:$0xff]  ;;  %v15502_v22 = vld [vmem:[#allocation22_spill] sm:$0xff] }
 0x5a9   : > { %v12883_v40 = vpop.f32.mrf.mxu1  ;;  %vm15507_vm7 = vmmov %vm15491_vm3 }
 0x5aa   : > { %9235 = vmatmul.msk.f32.vlgmr.msra.gmra.mxu3 %vm3677_vm6, %v12759_v10  ;;  %15496 = vst [vmem:[#allocation86_spill] sm:$0xff] %v12883_v40  ;;  %v9488_v40 = vunpack.i.h.bf16 %v11795_v43 }
 0x5ab   : > { %6517 = vmatpush.msra.mxu3 %v6311_v51  ;;  %v5564_v51 = vsel %vm15491_vm3, %v9768_v44, %v15490_v18  ;;  %v9552_v44 = vunpack.i.l.bf16 %v15500_v2 }
 0x5ad   : > { %9169 = vmatmul.msk.f32.vlgmr.msra.gmra.mxu0 %vm3677_vm6, %v12361_v7  ;;  %6518 = vmatpush.msra.mxu3 %v6301_v45  ;;  %v15499_v45 = vld [vmem:[#allocation43_spill] sm:$0xff] }
 0x5ae   : > { %9171 = vmatmul.msk.f32.vlgmr.msra.gmra.mxu1 %vm3677_vm6, %v12361_v7  ;;  %9173 = vmatmul.msk.f32.vlgmr.msrb.gmra.mxu2 %vm3677_vm6, %v12361_v7  ;;  %v12895_v52 = vpop.f32.mrf.mxu2  ;;  %v15161_v18 = vunpack.i.l.bf16 %v15499_v45 }
 0x5af   : > { %5453 = vmatpush.msra.mxu0 %v9825_v11  ;;  %5476 = vmatpush.msra.mxu1 %v12071_v28  ;;  %v5554_v11 = vsel %vm15495_vm5, %v9387_v42, %v15494_v53  ;;  %v12885_v28 = vpop.f32.mrf.mxu0  ;;  %15497 = vst [vmem:[#allocation87_spill] sm:$0xff] %v12895_v52  ;;  %v9783_v42 = vunpack.i.h.bf16 %v12712_v26  ;;  %v12903_v53 = vld [vmem:[%s15018_s3 + $0x70] sm:$0xff]  ;;  %v9402_v26 = vunpack.i.l.bf16 %v15502_v22  ;;  %vm15509_vm5 = vmmov %vm15503_vm0 }
 0x5b0   : > { %5616 = vmatpush.msrb.mxu2 %v5564_v51  ;;  %v9553_v51 = vunpack.i.h.bf16 %v15500_v2  ;;  %v15504_v2 = vunpack.i.h.bf16 %v11826_v32  ;;  %v15510_v32 = vunpack.i.l.bf16 %v11795_v43 }
 0x5b1   : > { %5454 = vmatpush.msra.mxu0 %v9826_v55  ;;  %5477 = vmatpush.msra.mxu1 %v9827_v57  ;;  %v12898_v57 = vpop.f32.mrf.mxu3 }
 0x5b2   : > { %5617 = vmatpush.msrb.mxu2 %v5554_v11  ;;  %9236 = vmatmul.msk.f32.gmra.mxu3 %vm3677_vm6, %v12788_v41  ;;  %15498 = vst [vmem:[#allocation88_spill] sm:$0xff] %v12898_v57  ;;  %v6674_v57 = vsel %vm15503_vm0, %v9783_v42, %v15161_v18  ;;  %v5566_v52 = vsel %vm15505_vm4, %v15504_v2, %v9552_v44  ;;  %v15506_v42 = vunpack.i.l.bf16 %v12556_v33  ;;  %v15508_v18 = vunpack.i.h.bf16 %v15502_v22  ;;  %vm15511_vm0 = vmmov %vm15491_vm3 }
 0x5b3   : > { %v5556_v2 = vsel %vm15511_vm0, %v15510_v32, %v9488_v40  ;;  %vm15512_vm4 = vmmov %vm15511_vm0  ;;  %v15518_v32 = vld [vmem:[#allocation35_spill] sm:$0xff]  ;;  %v9602_v22 = vunpack.i.l.bf16 %v11919_v1 }
 0x5b4   : > { %v6664_v45 = vsel %vm15509_vm5, %v9402_v26, %v15508_v18  ;;  %v9728_v18 = vunpack.i.h.bf16 %v12602_v56 }
 0x5b5   : > { %9170 = vmatmul.msk.f32.gmra.mxu0 %vm3677_vm6, %v12380_v9 }
 0x5b6   : > { %9172 = vmatmul.msk.f32.gmra.mxu1 %vm3677_vm6, %v12380_v9  ;;  %9174 = vmatmul.msk.f32.gmra.mxu2 %vm3677_vm6, %v12380_v9 }
 0x5b9   : > { %v12907_v55 = vpop.f32.mrf.mxu0  ;;  %v12951_v43 = vpop.f32.mrf.mxu3 }
 0x5ba   : > { %v12910_v11 = vpop.f32.mrf.mxu1  ;;  %9245 = vmatmul.msk.f32.vlgmr.msrb.gmra.mxu3 %vm3677_vm6, %v12903_v53 }
 0x5bb   : > { %15501 = vst [vmem:[#allocation53_spill] sm:$0xff] %v12910_v11  ;;  %6726 = vmatpush.msrb.mxu3 %v6674_v57  ;;  %v5567_v11 = vsel %vm15491_vm3, %v9552_v44, %v9553_v51  ;;  %v5568_v57 = vsel %vm15507_vm7, %v9553_v51, %v15506_v42  ;;  %v15513_v44 = vunpack.i.h.bf16 %v11775_v31  ;;  %vm15514_vm3 = vmmov %vm15511_vm0  ;;  %v12949_v51 = vld [vmem:[%s15018_s3 + $0x78] sm:$0xff]  ;;  %v15165_v31 = vunpack.i.l.bf16 %v12617_v29 }
 0x5bc   : > { %vm15519_vm7 = vmmov %vm15509_vm5 }
 0x5bd   : > { %9177 = vmatmul.msk.f32.vlgmr.msrb.gmra.mxu0 %vm3677_vm6, %v12361_v7  ;;  %6727 = vmatpush.msrb.mxu3 %v6664_v45  ;;  %v5558_v58 = vsel %vm15514_vm3, %v9427_v30, %v15513_v44  ;;  %v9663_v44 = vunpack.i.h.bf16 %v11959_v8  ;;  %vm15521_vm5 = vmmov %vm15511_vm0 }
 0x5be   : > { %9179 = vmatmul.msk.f32.vlgmr.msrb.gmra.mxu1 %vm3677_vm6, %v12361_v7  ;;  %9181 = vmatmul.msk.f32.vlgmr.msra.gmra.mxu2 %vm3677_vm6, %v12361_v7  ;;  %vm15526_vm3 = vmmov %vm15519_vm7 }
 0x5bf   : > { %5662 = vmatpush.msrb.mxu0 %v5566_v52  ;;  %5685 = vmatpush.msrb.mxu1 %v5567_v11  ;;  %v5557_v52 = vsel %vm15512_vm4, %v9488_v40, %v9427_v30  ;;  %v15516_v40 = vld [vmem:[#allocation51_spill] sm:$0xff]  ;;  %v9727_v11 = vunpack.i.l.bf16 %v12602_v56  ;;  %vm15523_vm4 = vmmov %vm15511_vm0 }
 0x5c0   : > { %5708 = vmatpush.msra.mxu2 %v5568_v57  ;;  %v12944_v61 = vpop.f32.mrf.mxu2  ;;  %v15166_v30 = vunpack.i.h.bf16 %v15516_v40 }
 0x5c1   : > { %5663 = vmatpush.msrb.mxu0 %v5556_v2  ;;  %5686 = vmatpush.msrb.mxu1 %v5557_v52  ;;  %v12985_v56 = vpop.f32.mrf.mxu3  ;;  %v15520_v52 = vunpack.i.h.bf16 %v12556_v33 }
 0x5c2   : > { %5709 = vmatpush.msra.mxu2 %v5558_v58  ;;  %v12953_v26 = vpop.f32.mrf.mxu0  ;;  %9246 = vmatmul.msk.f32.gmra.mxu3 %vm3677_vm6, %v12949_v51 }
 0x5c3   : > { %v12955_v45 = vpop.f32.mrf.mxu1  ;;  %v5570_v2 = vsel %vm15521_vm5, %v15520_v52, %v9727_v11  ;;  %v15527_v52 = vunpack.i.l.bf16 %v11959_v8  ;;  %vm15529_vm5 = vmmov %vm15511_vm0 }
 0x5c4   : > { %15515 = vst [vmem:[#allocation89_spill] sm:$0xff] %v12955_v45  ;;  %v6678_v45 = vsel %vm15519_vm7, %v15166_v30, %v15165_v31  ;;  %v5571_v31 = vsel %vm15511_vm0, %v9727_v11, %v9728_v18  ;;  %v15522_v30 = vunpack.i.l.bf16 %v12548_v15  ;;  %vm15528_vm7 = vmmov %vm15511_vm0  ;;  %v5561_v11 = vsel %vm15529_vm5, %v9663_v44, %v9602_v22 }
 0x5c5   : > { %9178 = vmatmul.msk.f32.gmra.mxu0 %vm3677_vm6, %v12380_v9  ;;  %v5560_v29 = vsel %vm15528_vm7, %v15527_v52, %v9663_v44  ;;  %v15170_v44 = vunpack.i.h.bf16 %v12659_v23 }
 0x5c6   : > { %9180 = vmatmul.msk.f32.gmra.mxu1 %vm3677_vm6, %v12380_v9  ;;  %9182 = vmatmul.msk.f32.gmra.mxu2 %vm3677_vm6, %v12380_v9 }
 0x5c9   : > { %v12967_v58 = vpop.f32.mrf.mxu2 }
 0x5ca   : > { %v12971_v42 = vpop.f32.mrf.mxu0  ;;  %9253 = vmatmul.msk.f32.vlgmr.msra.gmra.mxu3 %vm3677_vm6, %v12903_v53 }
 0x5cb   : > { %v12973_v57 = vpop.f32.mrf.mxu1  ;;  %6818 = vmatpush.msra.mxu3 %v6678_v45  ;;  %v5572_v45 = vsel %vm15523_vm4, %v9728_v18, %v15522_v30  ;;  %vm15535_vm4 = vmmov %vm15526_vm3 }
 0x5cc   : > { %15517 = vst [vmem:[#allocation51_spill] sm:$0xff] %v12973_v57  ;;  %v15524_v57 = vunpack.i.h.bf16 %v15518_v32  ;;  %vm15543_vm5 = vmmov %vm15535_vm4 }
 0x5cd   : > { %9185 = vmatmul.msk.f32.vlgmr.msra.gmra.mxu0 %vm3677_vm6, %v12361_v7 }
 0x5ce   : > { %9187 = vmatmul.msk.f32.vlgmr.msra.gmra.mxu1 %vm3677_vm6, %v12361_v7  ;;  %9191 = vmatmul.msk.f32.vlgmr.msrb.gmra.mxu2 %vm3677_vm6, %v12460_v25  ;;  %v15525_v7 = vunpack.i.l.bf16 %v15518_v32 }
 0x5cf   : > { %5754 = vmatpush.msra.mxu0 %v5570_v2  ;;  %5777 = vmatpush.msra.mxu1 %v5571_v31  ;;  %v4217_v2 = vadd.f32 %v12524_v38, %v12630_v4  ;;  %v15530_v31 = vunpack.i.h.bf16 %v11919_v1  ;;  %v13023_v38 = vpop.f32.mrf.mxu3  ;;  %v4220_v4 = vadd.f32 %v12550_v62, %v12671_v60  ;;  %v15537_v60 = vunpack.i.h.bf16 %v12548_v15 }
 0x5d0   : > { %5800 = vmatpush.msrb.mxu2 %v5572_v45  ;;  %v6668_v33 = vsel %vm15526_vm3, %v15525_v7, %v15524_v57  ;;  %vm15538_vm3 = vcmask 908288   ;;  %v15544_v15 = vunpack.i.l.bf16 %v12669_v19  ;;  %v4312_v19 = vadd.f32 %v12611_v59, %v12763_v37 }
 0x5d1   : > { %6819 = vmatpush.msra.mxu3 %v6668_v33  ;;  %5755 = vmatpush.msra.mxu0 %v5560_v29  ;;  %v5562_v30 = vsel %vm15511_vm0, %v9602_v22, %v15530_v31  ;;  %v4564_v18 = vpop.f32.mrf.mxu2  ;;  %v13025_v29 = vpop.permute.xlu0 %9805  ;;  %v13039_v22 = vld [vmem:[%s15018_s3 + $0x80] sm:$0xff]  ;;  %v9557_v33 = vunpack.i.l.bf16 %v11884_v49  ;;  %v15534_v31 = vld [vmem:[#allocation30_spill] sm:$0xff]  ;;  %vm15540_vm7 = vmmov %vm15538_vm3  ;;  %v15549_v37 = vunpack.i.l.bf16 %v11848_v63 }
 0x5d2   : > { %5778 = vmatpush.msra.mxu1 %v5561_v11  ;;  %5801 = vmatpush.msrb.mxu2 %v5562_v30  ;;  %v13015_v45 = vadd.f32 %v4564_v18, %v4217_v2  ;;  %v13017_v57 = vpop.f32.mrf.mxu0  ;;  %15532 = vst [vmem:[#allocation90_spill] sm:$0xff] %v13025_v29  ;;  %v15169_v1 = vunpack.i.l.bf16 %v13025_v29  ;;  %v4309_v29 = vadd.f32 %v12587_v21, %v12731_v6  ;;  %vm15545_vm0 = vmmov %vm15538_vm3  ;;  %v9563_v6 = vunpack.i.h.bf16 %v11848_v63 }
 0x5d3   : > { %v13019_v8 = vpop.f32.mrf.mxu1  ;;  %9254 = vmatmul.msk.f32.gmra.mxu3 %vm3677_vm6, %v12949_v51  ;;  %v4401_v63 = vadd.f32 %v12633_v5, %v12794_v47  ;;  %v4404_v5 = vadd.f32 %v12663_v24, %v12823_v20  ;;  %v9738_v47 = vunpack.i.h.bf16 %v12594_v0  ;;  %v4240_v24 = vadd.f32 %v12848_v12, %v12627_v27 }
 0x5d4   : > { %15531 = vst [vmem:[#allocation35_spill] sm:$0xff] %v13019_v8  ;;  %v6682_v30 = vsel %vm15535_vm4, %v15170_v44, %v15169_v1  ;;  %v15539_v44 = vunpack.i.h.bf16 %v11884_v49  ;;  %v15546_v49 = vunpack.i.l.bf16 %v11793_v48  ;;  %vm15547_vm4 = vmmov %vm15545_vm0  ;;  %v15560_v20 = vunpack.i.l.bf16 %v12594_v0 }
 0x5d5   : > { %9186 = vmatmul.msk.f32.gmra.mxu0 %vm3677_vm6, %v12380_v9 }
 0x5d6   : > { %9188 = vmatmul.msk.f32.gmra.mxu1 %vm3677_vm6, %v12380_v9  ;;  %9192 = vmatmul.msk.f32.gmra.mxu2 %vm3677_vm6, %v12506_v13  ;;  %v9773_v9 = vunpack.i.h.bf16 %v12520_v3  ;;  %v5935_v62 = vsel %vm15540_vm7, %v9557_v33, %v15539_v44  ;;  %vm15551_vm7 = vmmov %vm15545_vm0 }
 0x5d7   : > { %v13059_v18 = vpop.f32.mrf.mxu3 }
 0x5d8   : > { %v5934_v1 = vsel %vm15538_vm3, %v9773_v9, %v9557_v33  ;;  %vm15550_vm3 = vmmov %vm15545_vm0 }
 0x5d9   : > { %v4567_v7 = vpop.f32.mrf.mxu2  ;;  %v5937_v59 = vsel %vm15550_vm3, %v15549_v37, %v9563_v6  ;;  %vm15557_vm3 = vmmov %vm15545_vm0 }
 0x5da   : > { %v13044_v52 = vadd.f32 %v4567_v7, %v4220_v4  ;;  %v13046_v2 = vpop.f32.mrf.mxu0  ;;  %v15536_v4 = vld [vmem:[#allocation25_spill] sm:$0xff] }
 0x5db   : > { %v13048_v11 = vpop.f32.mrf.mxu1  ;;  %9263 = vmatmul.msk.f32.vlgmr.msrb.gmra.mxu3 %vm3677_vm6, %v13039_v22  ;;  %v9393_v7 = vunpack.i.h.bf16 %v15536_v4  ;;  %v9392_v8 = vunpack.i.l.bf16 %v15536_v4  ;;  %v15542_v4 = vunpack.i.l.bf16 %v15534_v31 }
 0x5dc   : > { %15533 = vst [vmem:[#allocation91_spill] sm:$0xff] %v13048_v11  ;;  %6910 = vmatpush.msrb.mxu3 %v6682_v30  ;;  %v15541_v30 = vunpack.i.h.bf16 %v15534_v31 }
 0x5dd   : > { %9195 = vmatmul.msk.f32.vlgmr.msrb.gmra.mxu0 %vm3677_vm6, %v12460_v25  ;;  %v5924_v9 = vsel %vm15545_vm0, %v9392_v8, %v9393_v7 }
 0x5de   : > { %9197 = vmatmul.msk.f32.vlgmr.msrb.gmra.mxu1 %vm3677_vm6, %v12460_v25  ;;  %9199 = vmatmul.msk.f32.vlgmr.msra.gmra.mxu2 %vm3677_vm6, %v12460_v25  ;;  %v6672_v11 = vsel %vm15543_vm5, %v15542_v4, %v15541_v30  ;;  %vm15553_vm5 = vmmov %vm15545_vm0 }
 0x5df   : > { %5846 = vmatpush.msrb.mxu0 %v15537_v60  ;;  %5986 = vmatpush.msrb.mxu1 %v5934_v1  ;;  %v5925_v1 = vsel %vm15547_vm4, %v9393_v7, %v15546_v49  ;;  %v13094_v21 = vpop.f32.mrf.mxu3  ;;  %vm15555_vm4 = vmmov %vm15545_vm0 }
 0x5e0   : > { %6009 = vmatpush.msra.mxu2 %v5935_v62  ;;  %6911 = vmatpush.msrb.mxu3 %v6672_v11 }
 0x5e1   : > { %5847 = vmatpush.msrb.mxu0 %v15544_v15  ;;  %5987 = vmatpush.msrb.mxu1 %v5924_v9  ;;  %v4656_v44 = vpop.f32.mrf.mxu2  ;;  %v15548_v15 = vld [vmem:[#allocation26_spill] sm:$0xff] }
 0x5e2   : > { %6010 = vmatpush.msra.mxu2 %v5925_v1  ;;  %v13088_v33 = vadd.f32 %v4656_v44, %v4309_v29  ;;  %v13090_v62 = vpop.f32.mrf.mxu0  ;;  %v9732_v29 = vunpack.i.l.bf16 %v12431_v54  ;;  %v9433_v9 = vunpack.i.h.bf16 %v15548_v15  ;;  %v9432_v49 = vunpack.i.l.bf16 %v15548_v15 }
 0x5e3   : > { %v13092_v60 = vpop.f32.mrf.mxu1  ;;  %v15552_v44 = vunpack.i.h.bf16 %v12431_v54 }
 0x5e4   : > { %v5938_v1 = vsel %vm15551_vm7, %v9563_v6, %v9732_v29  ;;  %v5928_v37 = vsel %vm15555_vm4, %v9432_v49, %v9433_v9  ;;  %vm15561_vm7 = vmmov %vm15545_vm0 }
 0x5e5   : > { %9196 = vmatmul.msk.f32.gmra.mxu0 %vm3677_vm6, %v12506_v13  ;;  %vm15565_vm4 = vmmov %vm15545_vm0 }
 0x5e6   : > { %9198 = vmatmul.msk.f32.gmra.mxu1 %vm3677_vm6, %v12506_v13  ;;  %9200 = vmatmul.msk.f32.gmra.mxu2 %vm3677_vm6, %v12506_v13 }
 0x5e7   : > { %v13112_v4 = vpop.f32.mrf.mxu3 }
 0x5e9   : > { %v4659_v8 = vpop.f32.mrf.mxu2 }
 0x5ea   : > { %v13106_v11 = vadd.f32 %v4659_v8, %v4312_v19  ;;  %v13108_v7 = vpop.f32.mrf.mxu0  ;;  %v5939_v19 = vsel %vm15553_vm5, %v9732_v29, %v15552_v44  ;;  %v15554_v8 = vunpack.i.h.bf16 %v11793_v48  ;;  %vm15562_vm5 = vmmov %vm15545_vm0 }
 0x5eb   : > { %v13110_v30 = vpop.f32.mrf.mxu1 }
 0x5ec   : > { %v5927_v15 = vsel %vm15545_vm0, %v15554_v8, %v9432_v49  ;;  %v9797_v49 = vunpack.i.l.bf16 %v12751_v16 }
 0x5ed   : > { %9203 = vmatmul.msk.f32.vlgmr.msra.gmra.mxu0 %vm3677_vm6, %v12460_v25 }
 0x5ee   : > { %9205 = vmatmul.msk.f32.vlgmr.msra.gmra.mxu1 %vm3677_vm6, %v12460_v25  ;;  %9207 = vmatmul.msk.f32.vlgmr.msrb.gmra.mxu2 %vm3677_vm6, %v12460_v25 }
 0x5ef   : > { %6055 = vmatpush.msra.mxu0 %v5937_v59  ;;  %6078 = vmatpush.msra.mxu1 %v5938_v1  ;;  %v15556_v59 = vunpack.i.l.bf16 %v12245_v34  ;;  %v13144_v44 = vpop.f32.mrf.mxu3 }
 0x5f0   : > { %6101 = vmatpush.msrb.mxu2 %v5939_v19  ;;  %15558 = vst [vmem:[#allocation30_spill] sm:$0xff] %v13144_v44 }
 0x5f1   : > { %6056 = vmatpush.msra.mxu0 %v5927_v15  ;;  %v5929_v6 = vsel %vm15557_vm3, %v9433_v9, %v15556_v59  ;;  %6079 = vmatpush.msra.mxu1 %v5928_v37  ;;  %v4748_v54 = vpop.f32.mrf.mxu2  ;;  %v15559_v37 = vld [vmem:[#allocation55_spill] sm:$0xff]  ;;  %vm15566_vm3 = vmmov %vm15545_vm0 }
 0x5f2   : > { %6102 = vmatpush.msrb.mxu2 %v5929_v6  ;;  %v13138_v29 = vadd.f32 %v4748_v54, %v4401_v63  ;;  %v13140_v1 = vpop.f32.mrf.mxu0  ;;  %v9608_v59 = vunpack.i.h.bf16 %v15559_v37  ;;  %v9607_v6 = vunpack.i.l.bf16 %v15559_v37  ;;  %v5941_v54 = vsel %vm15561_vm7, %v15560_v20, %v9738_v47  ;;  %vm15568_vm7 = vmmov %vm15545_vm0 }
 0x5f3   : > { %v13142_v48 = vpop.f32.mrf.mxu1  ;;  %v15567_v37 = vunpack.i.l.bf16 %v12520_v3 }
 0x5f4   : > { %v5932_v0 = vsel %vm15566_vm3, %v9607_v6, %v9608_v59 }
 0x5f5   : > { %9204 = vmatmul.msk.f32.gmra.mxu0 %vm3677_vm6, %v12506_v13  ;;  %v5933_v20 = vsel %vm15568_vm7, %v9608_v59, %v15567_v37 }
 0x5f6   : > { %9206 = vmatmul.msk.f32.gmra.mxu1 %vm3677_vm6, %v12506_v13  ;;  %9208 = vmatmul.msk.f32.gmra.mxu2 %vm3677_vm6, %v12506_v13 }
 0x5f7   : > { %v13162_v63 = vpop.f32.mrf.mxu3 }
 0x5f9   : > { %v4751_v9 = vpop.f32.mrf.mxu2 }
 0x5fa   : > { %v13156_v19 = vadd.f32 %v4751_v9, %v4404_v5  ;;  %v13158_v8 = vpop.f32.mrf.mxu0  ;;  %v5942_v5 = vsel %vm15562_vm5, %v9738_v47, %v9797_v49  ;;  %v15563_v9 = vunpack.i.h.bf16 %v12751_v16  ;;  %vm15571_vm5 = vcmask 900096  }
 0x5fb   : > { %v13160_v15 = vpop.f32.mrf.mxu1 }
 0x5fc   : > { %v5943_v27 = vsel %vm15545_vm0, %v9797_v49, %v15563_v9  ;;  %vm15572_vm0 = vmmov %vm15571_vm5 }
 0x5fd   : > { %9211 = vmatmul.msk.f32.vlgmr.msrb.gmra.mxu0 %vm3677_vm6, %v12460_v25  ;;  %v15564_v25 = vunpack.i.h.bf16 %v12245_v34  ;;  %vm15575_vm3 = vmmov %vm15572_vm0 }
 0x5fe   : > { %9215 = vmatmul.msk.f32.vlgmr.msrb.gmra.mxu1 %vm3677_vm6, %v12759_v10  ;;  %9217 = vmatmul.msk.f32.vlgmr.msra.gmra.mxu2 %vm3677_vm6, %v12759_v10  ;;  %vm15576_vm7 = vmmov %vm15572_vm0 }
 0x5ff   : > { %6147 = vmatpush.msrb.mxu0 %v5941_v54  ;;  %6170 = vmatpush.msrb.mxu1 %v5942_v5  ;;  %v5931_v12 = vsel %vm15565_vm4, %v15564_v25, %v9607_v6  ;;  %v4779_v54 = vadd.f32 %v12698_v36, %v4240_v24  ;;  %v13195_v34 = vpop.f32.mrf.mxu3  ;;  %v4243_v6 = vadd.f32 %v12885_v28, %v12661_v39  ;;  %v9778_v36 = vunpack.i.h.bf16 %v12702_v17  ;;  %v15569_v24 = vld [vmem:[#allocation44_spill] sm:$0xff]  ;;  %v15570_v28 = vld [vmem:[#allocation23_spill] sm:$0xff]  ;;  %vm15574_vm4 = vmmov %vm15572_vm0 }
 0x600   : > { %6193 = vmatpush.msra.mxu2 %v5943_v27  ;;  %v9568_v9 = vunpack.i.h.bf16 %v15569_v24  ;;  %v9567_v27 = vunpack.i.l.bf16 %v15569_v24  ;;  %v15579_v24 = vld [vmem:[#allocation78_spill] sm:$0xff] }
 0x601   : > { %6148 = vmatpush.msrb.mxu0 %v5931_v12  ;;  %6171 = vmatpush.msrb.mxu1 %v5932_v0  ;;  %v5011_v16 = vpop.f32.mrf.mxu2  ;;  %v4790_v3 = vadd.f32 %v12746_v14, %v4243_v6  ;;  %v9398_v12 = vunpack.i.h.bf16 %v15570_v28  ;;  %v9397_v0 = vunpack.i.l.bf16 %v15570_v28  ;;  %v9497_v14 = vunpack.i.l.bf16 %v15476_v35 }
 0x602   : > { %6194 = vmatpush.msra.mxu2 %v5933_v20  ;;  %v13189_v47 = vadd.f32 %v5011_v16, %v4779_v54  ;;  %v13191_v49 = vpop.f32.mrf.mxu0  ;;  %v4332_v20 = vadd.f32 %v12907_v55, %v12721_v50  ;;  %v6304_v54 = vsel %vm15571_vm5, %v9778_v36, %v9567_v27  ;;  %v6305_v16 = vsel %vm15572_vm0, %v9567_v27, %v9568_v9  ;;  %vm15578_vm5 = vmmov %vm15572_vm0 }
 0x603   : > { %v13193_v5 = vpop.f32.mrf.mxu1  ;;  %v15573_v6 = vunpack.i.l.bf16 %v15473_v46  ;;  %v6294_v50 = vsel %vm15575_vm3, %v9397_v0, %v9398_v12  ;;  %v6295_v55 = vsel %vm15576_vm7, %v9398_v12, %v9497_v14  ;;  %v13248_v0 = vld [vmem:[%s15018_s3 + $0x88] sm:$0xff]  ;;  %v15582_v12 = vld [vmem:[#allocation76_spill] sm:$0xff]  ;;  %vm15594_vm3 = vmmov %vm15572_vm0 }
 0x604   : > { %v4783_v28 = vadd.f32 %v15579_v24, %v4332_v20  ;;  %9264 = vmatmul.msk.f32.gmra.mxu3 %vm3677_vm6, %v13248_v0  ;;  %v15583_v20 = vld [vmem:[#allocation64_spill] sm:$0xff]  ;;  %vm15597_vm7 = vmmov %vm15572_vm0 }
 0x605   : > { %9212 = vmatmul.msk.f32.gmra.mxu0 %vm3677_vm6, %v12506_v13 }
 0x606   : > { %9216 = vmatmul.msk.f32.gmra.mxu1 %vm3677_vm6, %v12788_v41  ;;  %9218 = vmatmul.msk.f32.gmra.mxu2 %vm3677_vm6, %v12788_v41 }
 0x607   : > { %v13217_v37 = vpop.f32.mrf.mxu3 }
 0x609   : > { %v5014_v59 = vpop.f32.mrf.mxu2 }
 0x60a   : > { %v13209_v25 = vadd.f32 %v5014_v59, %v4790_v3  ;;  %v13211_v39 = vpop.f32.mrf.mxu0  ;;  %v6306_v3 = vsel %vm15574_vm4, %v9568_v9, %v15573_v6  ;;  %v15577_v59 = vunpack.i.h.bf16 %v15476_v35  ;;  %v15584_v6 = vld [vmem:[#allocation80_spill] sm:$0xff]  ;;  %vm15591_vm4 = vmmov %vm15572_vm0 }
 0x60b   : > { %v13213_v13 = vpop.f32.mrf.mxu1 }
 0x60c   : > { %v6296_v36 = vsel %vm15578_vm5, %v9497_v14, %v15577_v59  ;;  %v4335_v14 = vadd.f32 %v12953_v26, %v15582_v12  ;;  %v15586_v12 = vld [vmem:[#allocation13_spill] sm:$0xff]  ;;  %9271 = vmatmul.msk.f32.vlgmr.msra.gmra.mxu3 %vm3677_vm6, %v13039_v22  ;;  %vm15598_vm5 = vmmov %vm15572_vm0 }
 0x60d   : > { %9221 = vmatmul.msk.f32.vlgmr.msra.gmra.mxu0 %vm3677_vm6, %v12759_v10 }
 0x60e   : > { %9223 = vmatmul.msk.f32.vlgmr.msra.gmra.mxu1 %vm3677_vm6, %v12759_v10  ;;  %9225 = vmatmul.msk.f32.vlgmr.msrb.gmra.mxu2 %vm3677_vm6, %v12759_v10 }
 0x60f   : > { %6356 = vmatpush.msra.mxu0 %v6304_v54  ;;  %6379 = vmatpush.msra.mxu1 %v6305_v16  ;;  %v13252_v35 = vpop.f32.mrf.mxu3  ;;  %v4378_v16 = vadd.f32 %v12944_v61, %v15583_v20 }
 0x610   : > { %6402 = vmatpush.msrb.mxu2 %v6306_v3  ;;  %v4794_v3 = vadd.f32 %v15584_v6, %v4335_v14  ;;  %v15587_v14 = vld [vmem:[#allocation37_spill] sm:$0xff]  ;;  %v15588_v6 = vld [vmem:[#allocation79_spill] sm:$0xff] }
 0x611   : > { %6357 = vmatpush.msra.mxu0 %v6294_v50  ;;  %6380 = vmatpush.msra.mxu1 %v6295_v55  ;;  %v5103_v27 = vpop.f32.mrf.mxu2  ;;  %v15585_v50 = vld [vmem:[#allocation71_spill] sm:$0xff]  ;;  %v4785_v59 = vadd.f32 %v13110_v30, %v4378_v16  ;;  %v9672_v20 = vunpack.i.l.bf16 %v15587_v14  ;;  %v4424_v30 = vadd.f32 %v12971_v42, %v15588_v6  ;;  %v15592_v42 = vld [vmem:[#allocation66_spill] sm:$0xff]  ;;  %v15596_v6 = vunpack.i.l.bf16 %v15586_v12 }
 0x612   : > { %6403 = vmatpush.msrb.mxu2 %v6296_v36  ;;  %v13239_v54 = vadd.f32 %v5103_v27, %v4783_v28  ;;  %v13241_v44 = vpop.f32.mrf.mxu0  ;;  %v9742_v55 = vunpack.i.l.bf16 %v15585_v50  ;;  %v9743_v26 = vunpack.i.h.bf16 %v15585_v50 }
 0x613   : > { %15581 = vst [vmem:[#allocation26_spill] sm:$0xff] %v13241_v44  ;;  %v13243_v9 = vpop.f32.mrf.mxu1 }
 0x614   : > { %15580 = vst [vmem:[#allocation25_spill] sm:$0xff] %v13239_v54  ;;  %v9438_v54 = vunpack.i.h.bf16 %v15586_v12  ;;  %9272 = vmatmul.msk.f32.gmra.mxu3 %vm3677_vm6, %v13248_v0 }
 0x615   : > { %9222 = vmatmul.msk.f32.gmra.mxu0 %vm3677_vm6, %v12788_v41 }
 0x616   : > { %9224 = vmatmul.msk.f32.gmra.mxu1 %vm3677_vm6, %v12788_v41  ;;  %9226 = vmatmul.msk.f32.gmra.mxu2 %vm3677_vm6, %v12788_v41 }
 0x617   : > { %v13275_v61 = vpop.f32.mrf.mxu3 }
 0x619   : > { %v5106_v36 = vpop.f32.mrf.mxu2 }
 0x61a   : > { %v13268_v24 = vadd.f32 %v5106_v36, %v4794_v3  ;;  %v5149_v28 = vpop.f32.mrf.mxu0  ;;  %v15590_v3 = vunpack.i.h.bf16 %v15473_v46  ;;  %v15593_v36 = vunpack.i.l.bf16 %v15592_v42  ;;  %v6298_v46 = vsel %vm15597_vm7, %v15596_v6, %v9438_v54  ;;  %vm15610_vm7 = vmmov %vm15572_vm0 }
 0x61b   : > { %v13270_v27 = vpop.f32.mrf.mxu1  ;;  %v5209_v44 = vadd.f32 %v5149_v28, %v4785_v59  ;;  %v6309_v59 = vsel %vm15591_vm4, %v9742_v55, %v9743_v26  ;;  %v5202_v6 = vadd.f32 %v13160_v15, %v13015_v45  ;;  %v9777_v45 = vunpack.i.l.bf16 %v12702_v17  ;;  %vm15607_vm4 = vmmov %vm15572_vm0 }
 0x61c   : > { %v6308_v50 = vsel %vm15572_vm0, %v15590_v3, %v9742_v55  ;;  %v6299_v3 = vsel %vm15598_vm5, %v9438_v54, %v9672_v20  ;;  %9279 = vmatmul.msk.f32.vlgmr.msrb.gmra.mxu3 %vm3677_vm6, %v13039_v22  ;;  %vm15611_vm5 = vmmov %vm15572_vm0 }
 0x61d   : > { %v13281_v16 = vadd.f32 %v13162_v63, %v5209_v44  ;;  %9229 = vmatmul.msk.f32.vlgmr.msrb.gmra.mxu0 %vm3677_vm6, %v12759_v10  ;;  %v6310_v44 = vsel %vm15594_vm3, %v9743_v26, %v15593_v36  ;;  %v15595_v63 = vld [vmem:[#allocation67_spill] sm:$0xff]  ;;  %vm15608_vm3 = vmmov %vm15572_vm0 }
 0x61e   : > { %9231 = vmatmul.msk.f32.vlgmr.msrb.gmra.mxu1 %vm3677_vm6, %v12759_v10  ;;  %9233 = vmatmul.msk.f32.vlgmr.msra.gmra.mxu2 %vm3677_vm6, %v12759_v10  ;;  %v4381_v28 = vadd.f32 %v12967_v58, %v15595_v63  ;;  %v15599_v10 = vunpack.i.h.bf16 %v15587_v14  ;;  %v15601_v14 = vld [vmem:[#allocation36_spill] sm:$0xff] }
 0x61f   : > { %15589 = vst [vmem:[#allocation55_spill] sm:$0xff] %v13281_v16  ;;  %6448 = vmatpush.msrb.mxu0 %v6308_v50  ;;  %6471 = vmatpush.msrb.mxu1 %v6309_v59  ;;  %v15600_v50 = vld [vmem:[#allocation82_spill] sm:$0xff]  ;;  %v13313_v54 = vpop.f32.mrf.mxu3 }
 0x620   : > { %6494 = vmatpush.msra.mxu2 %v6310_v44  ;;  %v6300_v55 = vsel %vm15572_vm0, %v9672_v20, %v15599_v10  ;;  %v4787_v16 = vadd.f32 %v15600_v50, %v4424_v30  ;;  %v4796_v26 = vadd.f32 %v13142_v48, %v4381_v28  ;;  %v4427_v20 = vadd.f32 %v13017_v57, %v15601_v14  ;;  %v9801_v48 = vpop.permute.xlu1 %9800 }
 0x621   : > { %6449 = vmatpush.msrb.mxu0 %v6298_v46  ;;  %6472 = vmatpush.msrb.mxu1 %v6299_v3  ;;  %v5195_v58 = vpop.f32.mrf.mxu2  ;;  %v9802_v28 = vunpack.i.l.bf16 %v9801_v48  ;;  %v9803_v46 = vunpack.i.h.bf16 %v9801_v48  ;;  %v15604_v3 = vld [vmem:[#allocation83_spill] sm:$0xff]  ;;  %vm15620_vm0 = vcmask 891904  }
 0x622   : > { %6495 = vmatpush.msra.mxu2 %v6300_v55  ;;  %v13307_v59 = vadd.f32 %v5195_v58, %v4787_v16  ;;  %v5152_v36 = vpop.f32.mrf.mxu0  ;;  %v15602_v16 = vld [vmem:[#allocation85_spill] sm:$0xff]  ;;  %v15605_v58 = vld [vmem:[#allocation34_spill] sm:$0xff] }
 0x623   : > { %v13309_v12 = vpop.f32.mrf.mxu1  ;;  %v5220_v44 = vadd.f32 %v5152_v36, %v4796_v26  ;;  %v4798_v63 = vadd.f32 %v15602_v16, %v4427_v20  ;;  %v9613_v36 = vunpack.i.h.bf16 %v15605_v58  ;;  %v15606_v20 = vunpack.i.h.bf16 %v15592_v42 }
 0x624   : > { %v6313_v17 = vsel %vm15608_vm3, %v9802_v28, %v9803_v46  ;;  %v5213_v42 = vadd.f32 %v13193_v5, %v13044_v52  ;;  %9280 = vmatmul.msk.f32.gmra.mxu3 %vm3677_vm6, %v13248_v0  ;;  %vm15623_vm3 = vmmov %vm15620_vm0 }
 0x625   : > { %v13318_v30 = vadd.f32 %v13195_v34, %v5220_v44  ;;  %9230 = vmatmul.msk.f32.gmra.mxu0 %vm3677_vm6, %v12788_v41  ;;  %v15603_v34 = vld [vmem:[#allocation72_spill] sm:$0xff]  ;;  %v6312_v48 = vsel %vm15607_vm4, %v15606_v20, %v9802_v28  ;;  %v6303_v16 = vsel %vm15611_vm5, %v9613_v36, %v9777_v45  ;;  %v5206_v20 = vadd.f32 %v13213_v13, %v13088_v33  ;;  %vm15621_vm4 = vmmov %vm15620_vm0 }
 0x626   : > { %9232 = vmatmul.msk.f32.gmra.mxu1 %vm3677_vm6, %v12788_v41  ;;  %9234 = vmatmul.msk.f32.gmra.mxu2 %vm3677_vm6, %v12788_v41  ;;  %v4263_v10 = vadd.f32 %v15604_v3, %v15603_v34  ;;  %v15613_v34 = vld [vmem:[#allocation73_spill] sm:$0xff]  ;;  %v15614_v3 = vld [vmem:[#allocation86_spill] sm:$0xff]  ;;  %vm15627_vm5 = vmmov %vm15620_vm0 }
 0x627   : > { %v13338_v41 = vpop.f32.mrf.mxu3  ;;  %v4266_v28 = vadd.f32 %v15614_v3, %v15613_v34 }
 0x628   : > { %v4780_v15 = vadd.f32 %v13046_v2, %v4263_v10  ;;  %v15609_v2 = vunpack.i.l.bf16 %v15605_v58 }
 0x629   : > { %v5198_v57 = vpop.f32.mrf.mxu2 }
 0x62a   : > { %v13331_v55 = vadd.f32 %v5198_v57, %v4798_v63  ;;  %v5272_v50 = vpop.f32.mrf.mxu0  ;;  %v15612_v63 = vld [vmem:[#allocation88_spill] sm:$0xff] }
 0x62b   : > { %v13333_v26 = vpop.f32.mrf.mxu1  ;;  %v5486_v44 = vadd.f32 %v5272_v50, %v5202_v6  ;;  %v5204_v6 = vadd.f32 %v15612_v63, %v4780_v15 }
 0x62d   : > { %v13343_v14 = vadd.f32 %v13217_v37, %v5486_v44  ;;  %9239 = vmatmul.msk.f32.vlgmr.msra.gmra.mxu0 %vm3677_vm6, %v12903_v53  ;;  %v6302_v37 = vsel %vm15610_vm7, %v15609_v2, %v9613_v36  ;;  %v4791_v44 = vadd.f32 %v13090_v62, %v4266_v28  ;;  %vm15626_vm7 = vmmov %vm15620_vm0 }
 0x62e   : > { %9241 = vmatmul.msk.f32.vlgmr.msra.gmra.mxu1 %vm3677_vm6, %v12903_v53  ;;  %9243 = vmatmul.msk.f32.vlgmr.msrb.gmra.mxu2 %vm3677_vm6, %v12903_v53 }
 0x62f   : > { %6540 = vmatpush.msra.mxu0 %v6312_v48  ;;  %6563 = vmatpush.msra.mxu1 %v6313_v17  ;;  %v13370_v36 = vpop.f32.mrf.mxu3  ;;  %v5215_v5 = vadd.f32 %v12951_v43, %v4791_v44  ;;  %v15616_v48 = vld [vmem:[#allocation75_spill] sm:$0xff]  ;;  %v15617_v17 = vld [vmem:[#allocation53_spill] sm:$0xff] }
 0x630   : > { %6586 = vmatpush.msrb.mxu2 %v9803_v46  ;;  %v4355_v2 = vadd.f32 %v15617_v17, %v15616_v48  ;;  %v15630_v17 = vld [vmem:[#allocation89_spill] sm:$0xff] }
 0x631   : > { %6541 = vmatpush.msra.mxu0 %v6302_v37  ;;  %6564 = vmatpush.msra.mxu1 %v6303_v16  ;;  %v5318_v57 = vpop.f32.mrf.mxu2 }
 0x632   : > { %6587 = vmatpush.msrb.mxu2 %v9777_v45  ;;  %v13364_v10 = vadd.f32 %v5318_v57, %v5204_v6  ;;  %v5275_v46 = vpop.f32.mrf.mxu0  ;;  %v15615_v45 = vld [vmem:[#allocation43_spill] sm:$0xff]  ;;  %v4784_v33 = vadd.f32 %v13108_v7, %v4355_v2  ;;  %v15622_v7 = vunpack.i.h.bf16 %v15516_v40 }
 0x633   : > { %v13366_v50 = vpop.f32.mrf.mxu1  ;;  %v5497_v58 = vadd.f32 %v5275_v46, %v5213_v42  ;;  %v9578_v15 = vunpack.i.h.bf16 %v15615_v45  ;;  %v15618_v6 = vld [vmem:[#allocation27_spill] sm:$0xff]  ;;  %v15619_v3 = vunpack.i.l.bf16 %v15615_v45 }
 0x634   : > { %v9502_v42 = vunpack.i.l.bf16 %v15618_v6  ;;  %v9503_v34 = vunpack.i.h.bf16 %v15618_v6  ;;  %v5208_v48 = vadd.f32 %v12985_v56, %v4784_v33 }
 0x635   : > { %v13374_v52 = vadd.f32 %v13252_v35, %v5497_v58  ;;  %9240 = vmatmul.msk.f32.gmra.mxu0 %vm3677_vm6, %v12949_v51  ;;  %v9582_v35 = vunpack.i.l.bf16 %v15516_v40  ;;  %v6675_v28 = vsel %vm15620_vm0, %v15619_v3, %v9578_v15  ;;  %v15624_v58 = vld [vmem:[#allocation22_spill] sm:$0xff]  ;;  %v5217_v40 = vadd.f32 %v13243_v9, %v13106_v11  ;;  %v15631_v11 = vld [vmem:[#allocation8_spill] sm:$0xff]  ;;  %v15632_v9 = vld [vmem:[#allocation29_spill] sm:$0xff] }
 0x636   : > { %9242 = vmatmul.msk.f32.gmra.mxu1 %vm3677_vm6, %v12949_v51  ;;  %9244 = vmatmul.msk.f32.gmra.mxu2 %vm3677_vm6, %v12949_v51  ;;  %v15625_v44 = vunpack.i.h.bf16 %v15624_v58  ;;  %v6666_v45 = vsel %vm15627_vm5, %v9502_v42, %v9503_v34  ;;  %v4194_v33 = vadd.f32 %v15632_v9, %v15631_v11  ;;  %v15634_v58 = vld [vmem:[#allocation51_spill] sm:$0xff]  ;;  %vm15642_vm5 = vmmov %vm15620_vm0  ;;  %v15644_v11 = vld [vmem:[#allocation81_spill] sm:$0xff] }
 0x637   : > { %v13394_v43 = vpop.f32.mrf.mxu3  ;;  %v6676_v46 = vsel %vm15621_vm4, %v9578_v15, %v9582_v35  ;;  %vm15637_vm4 = vmmov %vm15620_vm0 }
 0x639   : > { %v5321_v62 = vpop.f32.mrf.mxu2 }
 0x63a   : > { %v13389_v37 = vadd.f32 %v5321_v62, %v5215_v5  ;;  %v5364_v16 = vpop.f32.mrf.mxu0  ;;  %v6665_v5 = vsel %vm15626_vm7, %v15625_v44, %v9502_v42  ;;  %v4777_v44 = vadd.f32 %v15634_v58, %v4194_v33  ;;  %vm15640_vm7 = vmmov %vm15620_vm0 }
 0x63b   : > { %v13391_v63 = vpop.f32.mrf.mxu1  ;;  %v5490_v57 = vadd.f32 %v5364_v16, %v5206_v20  ;;  %v15628_v20 = vunpack.i.l.bf16 %v15518_v32 }
 0x63d   : > { %v13399_v13 = vadd.f32 %v13275_v61, %v5490_v57  ;;  %9247 = vmatmul.msk.f32.vlgmr.msrb.gmra.mxu0 %vm3677_vm6, %v12903_v53  ;;  %v6677_v61 = vsel %vm15623_vm3, %v9582_v35, %v15622_v7  ;;  %v6667_v62 = vsel %vm15620_vm0, %v9503_v34, %v15628_v20  ;;  %v15629_v35 = vld [vmem:[#allocation77_spill] sm:$0xff]  ;;  %vm15638_vm3 = vmmov %vm15620_vm0 }
 0x63e   : > { %9249 = vmatmul.msk.f32.vlgmr.msrb.gmra.mxu1 %vm3677_vm6, %v12903_v53  ;;  %9251 = vmatmul.msk.f32.vlgmr.msra.gmra.mxu2 %vm3677_vm6, %v12903_v53  ;;  %v4358_v2 = vadd.f32 %v15630_v17, %v15629_v35  ;;  %v5201_v35 = vadd.f32 %v13158_v8, %v4777_v44  ;;  %v15639_v8 = vunpack.i.h.bf16 %v12659_v23 }
 0x63f   : > { %6749 = vmatpush.msrb.mxu0 %v6675_v28  ;;  %6772 = vmatpush.msrb.mxu1 %v6676_v46  ;;  %v13438_v56 = vpop.f32.mrf.mxu3 }
 0x640   : > { %6795 = vmatpush.msra.mxu2 %v6677_v61  ;;  %v4795_v3 = vadd.f32 %v13140_v1, %v4358_v2  ;;  %v15633_v1 = vld [vmem:[#allocation70_spill] sm:$0xff]  ;;  %v9757_v61 = vunpack.i.l.bf16 %v12659_v23  ;;  %v15641_v2 = vunpack.i.h.bf16 %v15518_v32  ;;  %v15645_v23 = vunpack.i.l.bf16 %v15534_v31 }
 0x641   : > { %6750 = vmatpush.msrb.mxu0 %v6665_v5  ;;  %6773 = vmatpush.msrb.mxu1 %v6666_v45  ;;  %v5410_v15 = vpop.f32.mrf.mxu2  ;;  %v9753_v46 = vunpack.i.h.bf16 %v15633_v1 }
 0x642   : > { %6796 = vmatpush.msra.mxu2 %v6667_v62  ;;  %v13426_v16 = vadd.f32 %v5410_v15, %v5208_v48  ;;  %v5367_v6 = vpop.f32.mrf.mxu0  ;;  %v5219_v28 = vadd.f32 %v13023_v38, %v4795_v3  ;;  %v15635_v62 = vld [vmem:[#allocation31_spill] sm:$0xff]  ;;  %v15643_v3 = vld [vmem:[#allocation45_spill] sm:$0xff] }
 0x643   : > { %v13428_v57 = vpop.f32.mrf.mxu1  ;;  %v5501_v42 = vadd.f32 %v5367_v6, %v5217_v40  ;;  %v9677_v48 = vunpack.i.l.bf16 %v15635_v62  ;;  %v9678_v38 = vunpack.i.h.bf16 %v15635_v62  ;;  %v4197_v9 = vadd.f32 %v15644_v11, %v15643_v3  ;;  %v15658_v11 = vld [vmem:[#allocation87_spill] sm:$0xff] }
 0x645   : > { %v13432_v34 = vadd.f32 %v13313_v54, %v5501_v42  ;;  %9248 = vmatmul.msk.f32.gmra.mxu0 %vm3677_vm6, %v12949_v51  ;;  %v5210_v54 = vadd.f32 %v13270_v27, %v13138_v29  ;;  %v15636_v27 = vunpack.i.l.bf16 %v15633_v1  ;;  %v6669_v6 = vsel %vm15642_vm5, %v15641_v2, %v9677_v48 }
 0x646   : > { %9250 = vmatmul.msk.f32.gmra.mxu1 %vm3677_vm6, %v12949_v51  ;;  %9252 = vmatmul.msk.f32.gmra.mxu2 %vm3677_vm6, %v12949_v51  ;;  %v6670_v33 = vsel %vm15620_vm0, %v9677_v48, %v9678_v38  ;;  %v5221_v1 = vadd.f32 %v13309_v12, %v13156_v19  ;;  %v15648_v19 = vld [vmem:[#allocation20_spill] sm:$0xff]  ;;  %v15650_v48 = vld [vmem:[#allocation90_spill] sm:$0xff] }
 0x647   : > { %v6679_v17 = vsel %vm15637_vm4, %v15636_v27, %v9753_v46  ;;  %v13477_v42 = vpop.f32.mrf.mxu3  ;;  %vm15646_vm4 = vmmov %vm15620_vm0  ;;  %v15649_v12 = vld [vmem:[#allocation84_spill] sm:$0xff] }
 0x648   : > { %v4286_v62 = vadd.f32 %v15649_v12, %v15648_v19 }
 0x649   : > { %v5413_v7 = vpop.f32.mrf.mxu2 }
 0x64a   : > { %v13450_v5 = vadd.f32 %v5413_v7, %v5219_v28  ;;  %v5456_v45 = vpop.f32.mrf.mxu0  ;;  %v6671_v28 = vsel %vm15646_vm4, %v9678_v38, %v15645_v23 }
 0x64b   : > { %v5479_v20 = vpop.f32.mrf.mxu1  ;;  %v5494_v40 = vadd.f32 %v5456_v45, %v5210_v54 }
 0x64c   : > { %v13454_v15 = vadd.f32 %v5479_v20, %v13307_v59  ;;  %v6680_v59 = vsel %vm15638_vm3, %v9753_v46, %v9757_v61  ;;  %v15647_v46 = vld [vmem:[#allocation35_spill] sm:$0xff]  ;;  %vm15654_vm3 = vmmov %vm15620_vm0 }
 0x64d   : > { %v13459_v29 = vadd.f32 %v13338_v41, %v5494_v40  ;;  %9255 = vmatmul.msk.f32.vlgmr.msra.gmra.mxu0 %vm3677_vm6, %v12903_v53  ;;  %v6681_v41 = vsel %vm15640_vm7, %v9757_v61, %v15639_v8  ;;  %v4788_v54 = vadd.f32 %v15647_v46, %v4197_v9  ;;  %v9808_v40 = vunpack.i.h.bf16 %v15650_v48  ;;  %vm15656_vm7 = vmmov %vm15620_vm0 }
 0x64e   : > { %9257 = vmatmul.msk.f32.vlgmr.msra.gmra.mxu1 %vm3677_vm6, %v12903_v53  ;;  %9259 = vmatmul.msk.f32.vlgmr.msrb.gmra.mxu2 %vm3677_vm6, %v12903_v53  ;;  %v5485_v53 = vadd.f32 %v13059_v18, %v5201_v35  ;;  %v15651_v35 = vld [vmem:[#allocation91_spill] sm:$0xff]  ;;  %vm15723_vm4 = vmmov %vm15654_vm3 }
 0x64f   : > { %6841 = vmatpush.msra.mxu0 %v6679_v17  ;;  %6864 = vmatpush.msra.mxu1 %v6680_v59  ;;  %v5212_v45 = vadd.f32 %v13191_v49, %v4788_v54  ;;  %v5487_v49 = vadd.f32 %v13333_v26, %v13189_v47  ;;  %v6130_v38 = vpop.f32.mrf.mxu3  ;;  %v4781_v27 = vadd.f32 %v15651_v35, %v4286_v62  ;;  %v15653_v47 = vunpack.i.l.bf16 %v15650_v48 }
 0x650   : > { %6887 = vmatpush.msrb.mxu2 %v6681_v41  ;;  %v15652_v41 = vld [vmem:[#allocation74_spill] sm:$0xff] }
 0x651   : > { %6842 = vmatpush.msra.mxu0 %v6669_v6  ;;  %6865 = vmatpush.msra.mxu1 %v6670_v33  ;;  %v5619_v32 = vpop.f32.mrf.mxu2  ;;  %v6683_v26 = vsel %vm15654_vm3, %v15653_v47, %v9808_v40  ;;  %v5498_v33 = vadd.f32 %v13366_v50, %v13209_v25  ;;  %v15661_v50 = vld [vmem:[#allocation25_spill] sm:$0xff]  ;;  %vm8293_vm3 = vcmask 744448  }
 0x652   : > { %6888 = vmatpush.msrb.mxu2 %v6671_v28  ;;  %v13489_v7 = vadd.f32 %v5619_v32, %v5485_v53  ;;  %v5459_v61 = vpop.f32.mrf.mxu0 }
 0x653   : > { %v5482_v58 = vpop.f32.mrf.mxu1  ;;  %v5505_v18 = vadd.f32 %v5459_v61, %v5221_v1 }
 0x654   : > { %v13492_v44 = vadd.f32 %v5482_v58, %v13331_v55  ;;  %v5496_v55 = vadd.f32 %v13094_v21, %v5212_v45  ;;  %v5205_v21 = vadd.f32 %v13211_v39, %v4781_v27  ;;  %v15655_v39 = vunpack.i.h.bf16 %v15534_v31  ;;  %v15659_v58 = vld [vmem:[#allocation26_spill] sm:$0xff] }
 0x655   : > { %v13496_v20 = vadd.f32 %v13370_v36, %v5505_v18  ;;  %9256 = vmatmul.msk.f32.gmra.mxu0 %vm3677_vm6, %v12949_v51 }
 0x656   : > { %9258 = vmatmul.msk.f32.gmra.mxu1 %vm3677_vm6, %v12949_v51  ;;  %9260 = vmatmul.msk.f32.gmra.mxu2 %vm3677_vm6, %v12949_v51  ;;  %v9782_v51 = vunpack.i.l.bf16 %v15652_v41  ;;  %v5489_v53 = vadd.f32 %v13112_v4, %v5205_v21 }
 0x657   : > { %v6219_v61 = vpop.f32.mrf.mxu3 }
 0x659   : > { %v5622_v36 = vpop.f32.mrf.mxu2 }
 0x65a   : > { %v13511_v17 = vadd.f32 %v5622_v36, %v5496_v55  ;;  %v5665_v59 = vpop.f32.mrf.mxu0  ;;  %v15662_v36 = vld [vmem:[#allocation55_spill] sm:$0xff] }
 0x65b   : > { %v5688_v8 = vpop.f32.mrf.mxu1  ;;  %v5857_v2 = vadd.f32 %v5665_v59, %v5487_v49 }
 0x65c   : > { %v13515_v6 = vadd.f32 %v5688_v8, %v13364_v10  ;;  %v6673_v10 = vsel %vm15656_vm7, %v15655_v39, %v9782_v51  ;;  %vm8459_vm7 = vcmask 736256  }
 0x65d   : > { %v13519_v3 = vadd.f32 %v13394_v43, %v5857_v2  ;;  %9265 = vmatmul.msk.f32.vlgmr.msrb.gmra.mxu0 %vm3677_vm6, %v13039_v22  ;;  %v15657_v43 = vld [vmem:[#allocation48_spill] sm:$0xff] }
 0x65e   : > { %9267 = vmatmul.msk.f32.vlgmr.msrb.gmra.mxu1 %vm3677_vm6, %v13039_v22  ;;  %9269 = vmatmul.msk.f32.vlgmr.msra.gmra.mxu2 %vm3677_vm6, %v13039_v22  ;;  %v4289_v9 = vadd.f32 %v15658_v11, %v15657_v43 }
 0x65f   : > { %6933 = vmatpush.msrb.mxu0 %v6683_v26  ;;  %6956 = vmatpush.msrb.mxu1 %v9808_v40  ;;  %v6222_v40 = vpop.f32.mrf.mxu3 }
 0x660   : > { %v4792_v28 = vadd.f32 %v13092_v60, %v4289_v9  ;;  %v15660_v60 = vld [vmem:[#allocation30_spill] sm:$0xff] }
 0x661   : > { %6934 = vmatpush.msrb.mxu0 %v6673_v10  ;;  %6957 = vmatpush.msrb.mxu1 %v9782_v51  ;;  %v5711_v23 = vpop.f32.mrf.mxu2 }
 0x662   : > { %v13539_v1 = vadd.f32 %v5711_v23, %v5489_v53  ;;  %v5668_v32 = vpop.f32.mrf.mxu0  ;;  %v5216_v18 = vadd.f32 %v15659_v58, %v4792_v28 }
 0x663   : > { %v5691_v46 = vpop.f32.mrf.mxu1  ;;  %v5868_v31 = vadd.f32 %v5668_v32, %v5498_v33 }
 0x664   : > { %v5869_v54 = vadd.f32 %v5691_v46, %v13389_v37  ;;  %v5500_v25 = vadd.f32 %v15660_v60, %v5216_v18  ;;  %v5491_v37 = vadd.f32 %v13391_v63, %v15661_v50  ;;  %v5502_v63 = vadd.f32 %v13428_v57, %v13268_v24 }
 0x665   : > { %v13544_v4 = vadd.f32 %v13438_v56, %v5868_v31  ;;  %9266 = vmatmul.msk.f32.gmra.mxu0 %vm3677_vm6, %v13248_v0 }
 0x666   : > { %9268 = vmatmul.msk.f32.gmra.mxu1 %vm3677_vm6, %v13248_v0  ;;  %9270 = vmatmul.msk.f32.gmra.mxu2 %vm3677_vm6, %v13248_v0 }
 0x667   : > { %v6428_v24 = vpop.f32.mrf.mxu3 }
 0x669   : > { %v5714_v45 = vpop.f32.mrf.mxu2 }
 0x66a   : > { %v13555_v19 = vadd.f32 %v5714_v45, %v5500_v25  ;;  %v5757_v12 = vpop.f32.mrf.mxu0 }
 0x66b   : > { %v5780_v56 = vpop.f32.mrf.mxu1  ;;  %v5861_v62 = vadd.f32 %v5757_v12, %v5491_v37 }
 0x66c   : > { %v5862_v55 = vadd.f32 %v5780_v56, %v13426_v16 }
 0x66d   : > { %v13559_v48 = vadd.f32 %v13477_v42, %v5861_v62  ;;  %9273 = vmatmul.msk.f32.vlgmr.msra.gmra.mxu0 %vm3677_vm6, %v13039_v22 }
 0x66e   : > { %9275 = vmatmul.msk.f32.vlgmr.msra.gmra.mxu1 %vm3677_vm6, %v13039_v22  ;;  %9277 = vmatmul.msk.f32.vlgmr.msrb.gmra.mxu2 %vm3677_vm6, %v13039_v22 }
 0x66f   : > { %v6431_v47 = vpop.f32.mrf.mxu3 }
 0x671   : > { %v5803_v49 = vpop.f32.mrf.mxu2 }
 0x672   : > { %v13570_v35 = vadd.f32 %v5803_v49, %v15662_v36  ;;  %v5760_v16 = vpop.f32.mrf.mxu0 }
 0x673   : > { %v5783_v42 = vpop.f32.mrf.mxu1  ;;  %v5872_v27 = vadd.f32 %v5760_v16, %v5502_v63  ;;  %v15663_v16 = vld [vmem:[#allocation11_spill] sm:$0xff] }
 0x674   : > { %v5873_v59 = vadd.f32 %v5783_v42, %v13450_v5 }
 0x675   : > { %v13573_v8 = vadd.f32 %v6130_v38, %v5872_v27  ;;  %9274 = vmatmul.msk.f32.gmra.mxu0 %vm3677_vm6, %v13248_v0 }
 0x676   : > { %9276 = vmatmul.msk.f32.gmra.mxu1 %vm3677_vm6, %v13248_v0  ;;  %9278 = vmatmul.msk.f32.gmra.mxu2 %vm3677_vm6, %v13248_v0 }
 0x677   : > { %v6520_v53 = vpop.f32.mrf.mxu3 }
 0x679   : > { %v5806_v57 = vpop.f32.mrf.mxu2 }
 0x67a   : > { %v13582_v41 = vadd.f32 %v5806_v57, %v13318_v30  ;;  %v5849_v51 = vpop.f32.mrf.mxu0 }
 0x67b   : > { %v5989_v2 = vpop.f32.mrf.mxu1  ;;  %v5865_v5 = vadd.f32 %v5849_v51, %v13454_v15 }
 0x67c   : > { %v6225_v56 = vadd.f32 %v5989_v2, %v13489_v7 }
 0x67d   : > { %v13585_v38 = vadd.f32 %v6219_v61, %v5865_v5  ;;  %9281 = vmatmul.msk.f32.vlgmr.msrb.gmra.mxu0 %vm3677_vm6, %v13039_v22 }
 0x67e   : > { %9283 = vmatmul.msk.f32.vlgmr.msrb.gmra.mxu1 %vm3677_vm6, %v13039_v22 }
 0x681   : > { %v6012_v21 = vpop.f32.mrf.mxu2 }
 0x682   : > { %v13592_v26 = vadd.f32 %v6012_v21, %v13343_v14  ;;  %v5852_v39 = vpop.f32.mrf.mxu0  ;;  %v15665_v21 = vld [vmem:[#allocation38_spill] sm:$0xff] }
 0x683   : > { %v5992_v30 = vpop.f32.mrf.mxu1  ;;  %v5876_v10 = vadd.f32 %v5852_v39, %v13492_v44 }
 0x685   : > { %v13595_v43 = vadd.f32 %v6222_v40, %v5876_v10  ;;  %9282 = vmatmul.msk.f32.gmra.mxu0 %vm3677_vm6, %v13248_v0 }
 0x686   : > { %9284 = vmatmul.msk.f32.gmra.mxu1 %vm3677_vm6, %v13248_v0  ;;  %v6523_v0 = vpop.f32.mrf.mxu3 }
 0x689   : > { %v6015_v15 = vpop.f32.mrf.mxu2 }
 0x68a   : > { %v13602_v22 = vadd.f32 %v6015_v15, %v13374_v52  ;;  %v6058_v11 = vpop.f32.mrf.mxu0 }
 0x68b   : > { %v6081_v9 = vpop.f32.mrf.mxu1  ;;  %v6228_v14 = vadd.f32 %v6058_v11, %v13515_v6 }
 0x68c   : > { %v6229_v39 = vadd.f32 %v6081_v9, %v13539_v1 }
 0x68d   : > { %v13605_v33 = vadd.f32 %v6428_v24, %v6228_v14 }
 0x68e   : > { %v6729_v25 = vpop.f32.mrf.mxu3 }
 0x691   : > { %v6104_v44 = vpop.f32.mrf.mxu2 }
 0x692   : > { %v13608_v23 = vadd.f32 %v6104_v44, %v13399_v13  ;;  %v6061_v28 = vpop.f32.mrf.mxu0 }
 0x693   : > { %v6084_v32 = vpop.f32.mrf.mxu1  ;;  %v6239_v46 = vadd.f32 %v6061_v28, %v5869_v54 }
 0x695   : > { %v13610_v31 = vadd.f32 %v6431_v47, %v6239_v46  ;;  %v6240_v46 = vadd.f32 %v6084_v32, %v13555_v19 }
 0x699   : > { %v6107_v61 = vpop.f32.mrf.mxu2 }
 0x69a   : > { %v13613_v52 = vadd.f32 %v6107_v61, %v13432_v34  ;;  %v6150_v58 = vpop.f32.mrf.mxu0  ;;  %v6732_v34 = vpop.f32.mrf.mxu3 }
 0x69b   : > { %v6173_v18 = vpop.f32.mrf.mxu1  ;;  %v6232_v6 = vadd.f32 %v6150_v58, %v5862_v55 }
 0x69d   : > { %v13615_v60 = vadd.f32 %v6520_v53, %v6232_v6 }
 0x6a1   : > { %v6196_v50 = vpop.f32.mrf.mxu2 }
 0x6a2   : > { %v13618_v13 = vadd.f32 %v6196_v50, %v13459_v29  ;;  %v6153_v37 = vpop.f32.mrf.mxu0  ;;  %v6236_v29 = vadd.f32 %v5992_v30, %v13511_v17  ;;  %v6821_v5 = vpop.f32.mrf.mxu3 }
 0x6a3   : > { %v6176_v45 = vpop.f32.mrf.mxu1  ;;  %v6243_v54 = vadd.f32 %v6153_v37, %v5873_v59 }
 0x6a5   : > { %v13620_v12 = vadd.f32 %v6523_v0, %v6243_v54 }
 0x6a9   : > { %v6199_v62 = vpop.f32.mrf.mxu2 }
 0x6aa   : > { %v13624_v40 = vadd.f32 %v6199_v62, %v13496_v20  ;;  %v6359_v55 = vpop.f32.mrf.mxu0  ;;  %v6824_v44 = vpop.f32.mrf.mxu3 }
 0x6ab   : > { %v6382_v63 = vpop.f32.mrf.mxu1  ;;  %v6595_v49 = vadd.f32 %v6359_v55, %v6225_v56  ;;  %v6233_v56 = vadd.f32 %v6173_v18, %v13570_v35 }
 0x6ad   : > { %v6965_v36 = vadd.f32 %v6729_v25, %v6595_v49 }
 0x6af   : > { %v6999_v42 = vadd.f32 %v15663_v16, %v6965_v36 }
 0x6b1   : > { %v7021_v27 = vmax.f32 %v6999_v42, 0.0  ;;  %v6405_v24 = vpop.f32.mrf.mxu2 }
 0x6b2   : > { %v6362_v59 = vpop.f32.mrf.mxu0  ;;  %v6913_v54 = vpop.f32.mrf.mxu3 }
 0x6b3   : > { %v6385_v57 = vpop.f32.mrf.mxu1  ;;  %v13630_v7 = vsel %vm11319_vm11, %v7021_v27, 0.0  ;;  %v6606_v2 = vadd.f32 %v6362_v59, %v6236_v29  ;;  %v6244_v29 = vadd.f32 %v6176_v45, %v13582_v41 }
 0x6b5   : > { %v6976_v20 = vadd.f32 %v6732_v34, %v6606_v2 }
 0x6b7   : > { %v7010_v47 = vadd.f32 %v15665_v21, %v6976_v20 }
 0x6b9   : > { %v7032_v10 = vmax.f32 %v7010_v47, 0.0  ;;  %v6408_v15 = vpop.f32.mrf.mxu2 }
 0x6ba   : > { %v6451_v11 = vpop.f32.mrf.mxu0  ;;  %v6916_v18 = vpop.f32.mrf.mxu3 }
 0x6bb   : > { %v13634_v14 = vpop.f32.mrf.mxu1  ;;  %v13638_v17 = vsel %vm11319_vm11, %v7032_v10, 0.0  ;;  %v6599_v30 = vadd.f32 %v6451_v11, %v6229_v39  ;;  %v6596_v10 = vadd.f32 %v6382_v63, %v13592_v26  ;;  %v6597_v11 = vadd.f32 %v6405_v24, %v13519_v3 }
 0x6bc   : > { %v6607_v26 = vadd.f32 %v6385_v57, %v13602_v22  ;;  %v6608_v3 = vadd.f32 %v6408_v15, %v13544_v4  ;;  %v15672_v22 = vld [vmem:[#allocation56_spill] sm:$0xff] }
 0x6bd   : > { %v6969_v53 = vadd.f32 %v6821_v5, %v6599_v30 }
 0x6bf   : > { %v7003_v28 = vadd.f32 %v15663_v16, %v6969_v53 }
 0x6c1   : > { %v7025_v0 = vmax.f32 %v7003_v28, 0.0  ;;  %v13642_v61 = vpop.f32.mrf.mxu2 }
 0x6c2   : > { %v6454_v1 = vpop.f32.mrf.mxu0 }
 0x6c3   : > { %v13644_v9 = vpop.f32.mrf.mxu1  ;;  %v13648_v6 = vsel %vm11435_vm14, %v7025_v0, 0.0  ;;  %v6610_v25 = vadd.f32 %v6454_v1, %v6240_v46 }
 0x6c5   : > { %v6980_v50 = vadd.f32 %v6824_v44, %v6610_v25 }
 0x6c7   : > { %v7014_v37 = vadd.f32 %v15665_v21, %v6980_v50  ;;  %v6611_v50 = vadd.f32 %v13644_v9, %v13613_v52  ;;  %v15681_v9 = vld [vmem:[#allocation40_spill] sm:$0xff] }
 0x6c9   : > { %v7036_v62 = vmax.f32 %v7014_v37, 0.0  ;;  %v13652_v34 = vpop.f32.mrf.mxu2 }
 0x6ca   : > { %v6543_v19 = vpop.f32.mrf.mxu0 }
 0x6cb   : > { %v13654_v32 = vpop.f32.mrf.mxu1  ;;  %v13658_v55 = vsel %vm11435_vm14, %v7036_v62, 0.0  ;;  %v6603_v49 = vadd.f32 %v6543_v19, %v6233_v56  ;;  %vm15716_vm14 = vcmask 900096  }
 0x6cc   : > { %7080 = vst [vmem:[#allocation3 + $0x90] sm:$0xff] %v13658_v55 }
 0x6cd   : > { %v6973_v36 = vadd.f32 %v6913_v54, %v6603_v49  ;;  %v15671_v49 = vld [vmem:[#allocation9_spill] sm:$0xff] }
 0x6cf   : > { %v7007_v42 = vadd.f32 %v15663_v16, %v6973_v36 }
 0x6d1   : > { %v7029_v27 = vmax.f32 %v7007_v42, 0.0  ;;  %v13663_v35 = vpop.f32.mrf.mxu2 }
 0x6d2   : > { %v6546_v59 = vpop.f32.mrf.mxu0 }
 0x6d3   : > { %v13665_v51 = vpop.f32.mrf.mxu1  ;;  %v7051_v5 = vsel %vm11535_vm13, %v7029_v27, 0.0  ;;  %v6614_v20 = vadd.f32 %v6546_v59, %v6244_v29 }
 0x6d4   : > { %7073 = vst [vmem:[#allocation3 + $0x48] sm:$0xff] %v7051_v5 }
 0x6d5   : > { %v6984_v47 = vadd.f32 %v6916_v18, %v6614_v20  ;;  %v6600_v20 = vadd.f32 %v13634_v14, %v13608_v23  ;;  %v15675_v23 = vld [vmem:[#allocation47_spill] sm:$0xff] }
 0x6d7   : > { %v7018_v39 = vadd.f32 %v15665_v21, %v6984_v47  ;;  %v6601_v47 = vadd.f32 %v13642_v61, %v13559_v48  ;;  %v15676_v48 = vld [vmem:[#allocation32_spill] sm:$0xff] }
 0x6d9   : > { %v7040_v41 = vmax.f32 %v7018_v39, 0.0  ;;  %v13672_v45 = vpop.f32.mrf.mxu2 }
 0x6da   : > { %v6752_v30 = vpop.f32.mrf.mxu0 }
 0x6db   : > { %v6775_v53 = vpop.f32.mrf.mxu1  ;;  %v7062_v44 = vsel %vm11535_vm13, %v7040_v41, 0.0  ;;  %v6966_v28 = vadd.f32 %v6752_v30, %v6596_v10  ;;  %vm15721_vm13 = vmmov %vm15716_vm14 }
 0x6dc   : > { %v6967_v46 = vadd.f32 %v6775_v53, %v6597_v11  ;;  %7084 = vst [vmem:[#allocation3 + $0xb0] sm:$0xff] %v7062_v44  ;;  %vm15722_vm5 = vmmov %vm15721_vm13 }
 0x6dd   : > { %v7000_v0 = vadd.f32 %v15663_v16, %v6966_v28 }
 0x6de   : > { %v7001_v1 = vadd.f32 %v15663_v16, %v6967_v46  ;;  %v15677_v46 = vld [vmem:[#allocation54_spill] sm:$0xff] }
 0x6df   : > { %v7022_v58 = vmax.f32 %v7000_v0, 0.0 }
 0x6e0   : > { %v7023_v25 = vmax.f32 %v7001_v1, 0.0 }
 0x6e1   : > { %v13682_v24 = vsel %vm11324_vm12, %v7022_v58, 0.0  ;;  %v6798_v54 = vpop.f32.mrf.mxu2 }
 0x6e2   : > { %v13686_v37 = vsel %vm11470_vm2, %v7023_v25, 0.0  ;;  %v6968_v56 = vadd.f32 %v6798_v54, %v13605_v33  ;;  %v6755_v62 = vpop.f32.mrf.mxu0  ;;  %v7709_v36 = vmul.f32 %v15671_v49, %v13682_v24  ;;  %v7180_v57 = vmul.f32 %v15672_v22, %v13682_v24 }
 0x6e3   : > { %15670 = vst [vmem:[#allocation44_spill] sm:$0xff] %v13686_v37  ;;  %v6778_v19 = vpop.f32.mrf.mxu1  ;;  %v6977_v4 = vadd.f32 %v6755_v62, %v6607_v26  ;;  %v7874_v61 = vmul.f32 %v15676_v48, %v13682_v24  ;;  %v7345_v0 = vmul.f32 %v15677_v46, %v13682_v24  ;;  %v6612_v54 = vadd.f32 %v13652_v34, %v13573_v8  ;;  %v15682_v34 = vld [vmem:[#allocation65_spill] sm:$0xff] }
 0x6e4   : > { %v6978_v15 = vadd.f32 %v6778_v19, %v6608_v3  ;;  %v7002_v42 = vadd.f32 %v15663_v16, %v6968_v56  ;;  %7754 = vrot.lane.b32.xlu1 %v7709_v36, %s9912_s20  ;;  %7226 = vrot.lane.b32.xlu0 %v7180_v57, %s9909_s21 }
 0x6e5   : > { %v7011_v29 = vadd.f32 %v15665_v21, %v6977_v4 }
 0x6e6   : > { %v7012_v33 = vadd.f32 %v15665_v21, %v6978_v15  ;;  %v7024_v27 = vmax.f32 %v7002_v42, 0.0  ;;  %v8040_v42 = vmul.f32 %v15682_v34, %v13682_v24 }
 0x6e7   : > { %v7033_v18 = vmax.f32 %v7011_v29, 0.0 }
 0x6e8   : > { %v7034_v59 = vmax.f32 %v7012_v33, 0.0  ;;  %v13700_v5 = vsel %vm11478_vm10, %v7024_v27, 0.0  ;;  %v15683_v27 = vld [vmem:[#allocation58_spill] sm:$0xff] }
 0x6e9   : > { %15674 = vst [vmem:[#allocation23_spill] sm:$0xff] %v13700_v5  ;;  %v13708_v39 = vsel %vm11324_vm12, %v7033_v18, 0.0  ;;  %v6801_v11 = vpop.f32.mrf.mxu2  ;;  %v7535_v18 = vmul.f32 %v15683_v27, %v13682_v24 }
 0x6ea   : > { %v13712_v10 = vsel %vm11470_vm2, %v7034_v59, 0.0  ;;  %7077 = vst [vmem:[#allocation3 + $0x78] sm:$0xff] %v13708_v39  ;;  %v6979_v41 = vadd.f32 %v6801_v11, %v13610_v31  ;;  %v6844_v30 = vpop.f32.mrf.mxu0  ;;  %v7191_v14 = vmul.f32 %v15675_v23, %v13708_v39  ;;  %v7356_v8 = vmul.f32 %v15681_v9, %v13708_v39 }
 0x6eb   : > { %v6867_v53 = vpop.f32.mrf.mxu1  ;;  %7078 = vst [vmem:[#allocation3 + $0x80] sm:$0xff] %v13712_v10  ;;  %v6970_v44 = vadd.f32 %v6844_v30, %v6600_v20  ;;  %vm7961_vm2 = vcmask 883712  }
 0x6ec   : > { %v6971_v28 = vadd.f32 %v6867_v53, %v6601_v47  ;;  %v7013_v1 = vadd.f32 %v15665_v21, %v6979_v41  ;;  %7248 = vrot.lane.b32.xlu2 %v7191_v14, %s9909_s21  ;;  %7919 = vrot.lane.b32.xlu1 %v7874_v61, %s9915_s18  ;;  %v6604_v53 = vadd.f32 %v13654_v32, %v13618_v13  ;;  %v15685_v13 = vld [vmem:[#allocation33_spill] sm:$0xff] }
 0x6ed   : > { %v7004_v31 = vadd.f32 %v15663_v16, %v6970_v44  ;;  %7391 = vrot.lane.b32.xlu0 %v7345_v0, %s9914_s13  ;;  %v6605_v14 = vadd.f32 %v13663_v35, %v13585_v38  ;;  %v8217_v32 = vmul.f32 %v15685_v13, %v13708_v39  ;;  %v15686_v38 = vld [vmem:[#allocation68_spill] sm:$0xff] }
 0x6ee   : > { %v7005_v58 = vadd.f32 %v15663_v16, %v6971_v28  ;;  %v7035_v25 = vmax.f32 %v7013_v1, 0.0  ;;  %v8206_v35 = vmul.f32 %v15686_v38, %v13682_v24 }
 0x6ef   : > { %v7026_v26 = vmax.f32 %v7004_v31, 0.0 }
 0x6f0   : > { %v7027_v3 = vmax.f32 %v7005_v58, 0.0  ;;  %v13731_v63 = vsel %vm11478_vm10, %v7035_v25, 0.0  ;;  %vm15719_vm10 = vmmov %vm15620_vm0  ;;  %vm8127_vm0 = vcmask 752640  }
 0x6f1   : > { %7079 = vst [vmem:[#allocation3 + $0x88] sm:$0xff] %v13731_v63  ;;  %v13740_v62 = vsel %vm11442_vm15, %v7026_v26, 0.0  ;;  %v6890_v57 = vpop.f32.mrf.mxu2  ;;  %v15687_v26 = vld [vmem:[#allocation57_spill] sm:$0xff] }
 0x6f2   : > { %v13744_v36 = vsel %vm11584_vm9, %v7027_v3, 0.0  ;;  %7070 = vst [vmem:[#allocation3 + $0x30] sm:$0xff] %v13740_v62  ;;  %v6972_v4 = vadd.f32 %v6890_v57, %v13615_v60  ;;  %v6847_v15 = vpop.f32.mrf.mxu0  ;;  %v7547_v3 = vmul.f32 %v15687_v26, %v13708_v39 }
 0x6f3   : > { %15680 = vst [vmem:[#allocation78_spill] sm:$0xff] %v13744_v36  ;;  %v6870_v52 = vpop.f32.mrf.mxu1  ;;  %v6981_v29 = vadd.f32 %v6847_v15, %v6611_v50  ;;  %v6615_v15 = vadd.f32 %v13665_v51, %v13624_v40  ;;  %v15691_v40 = vld [vmem:[#allocation15_spill] sm:$0xff] }
 0x6f4   : > { %7071 = vst [vmem:[#allocation3 + $0x38] sm:$0xff] %v13744_v36  ;;  %v6982_v33 = vadd.f32 %v6870_v52, %v6612_v54  ;;  %v7006_v59 = vadd.f32 %v15663_v16, %v6972_v4  ;;  %7413 = vrot.lane.b32.xlu2 %v7356_v8, %s9914_s13  ;;  %8085 = vrot.lane.b32.xlu1 %v8040_v42, %s9916_s22 }
 0x6f5   : > { %v7015_v60 = vadd.f32 %v15665_v21, %v6981_v29  ;;  %7585 = vrot.lane.b32.xlu0 %v7535_v18, %s9911_s28  ;;  %v6616_v52 = vadd.f32 %v13672_v45, %v13595_v43  ;;  %v8372_v51 = vmul.f32 %v15691_v40, %v13682_v24  ;;  %v8216_v8 = vmul.f32 %v15685_v13, %v13638_v17 }
 0x6f6   : > { %v7016_v2 = vadd.f32 %v15665_v21, %v6982_v33  ;;  %v7028_v20 = vmax.f32 %v7006_v59, 0.0  ;;  %v7179_v59 = vmul.f32 %v15672_v22, %v13630_v7 }
 0x6f7   : > { %v7037_v47 = vmax.f32 %v7015_v60, 0.0  ;;  %v15692_v60 = vld [vmem:[#allocation50_spill] sm:$0xff] }
 0x6f8   : > { %v7038_v11 = vmax.f32 %v7016_v2, 0.0  ;;  %v7050_v30 = vsel %vm11593_vm8, %v7028_v20, 0.0  ;;  %v7720_v2 = vmul.f32 %v15692_v60, %v13708_v39 }
 0x6f9   : > { %7072 = vst [vmem:[#allocation3 + $0x40] sm:$0xff] %v7050_v30  ;;  %v13769_v61 = vsel %vm11442_vm15, %v7037_v47, 0.0  ;;  %v6893_v28 = vpop.f32.mrf.mxu2  ;;  %vm15717_vm15 = vmmov %vm15716_vm14 }
 0x6fa   : > { %v7060_v44 = vsel %vm11584_vm9, %v7038_v11, 0.0  ;;  %7081 = vst [vmem:[#allocation3 + $0x98] sm:$0xff] %v13769_v61  ;;  %v6983_v0 = vadd.f32 %v6893_v28, %v13620_v12  ;;  %v6936_v1 = vpop.f32.mrf.mxu0 }
 0x6fb   : > { %v6959_v31 = vpop.f32.mrf.mxu1  ;;  %7082 = vst [vmem:[#allocation3 + $0xa0] sm:$0xff] %v7060_v44  ;;  %v6974_v58 = vadd.f32 %v6936_v1, %v6604_v53  ;;  %v7184_v44 = vmul.f32 %v15672_v22, %v13740_v62  ;;  %v7349_v1 = vmul.f32 %v15677_v46, %v13740_v62 }
 0x6fc   : > { %v6975_v25 = vadd.f32 %v6959_v31, %v6605_v14  ;;  %v7017_v50 = vadd.f32 %v15665_v21, %v6983_v0  ;;  %8273 = vrot.lane.b32.xlu2 %v8217_v32, %s9917_s26  ;;  %8251 = vrot.lane.b32.xlu1 %v8206_v35, %s9917_s26  ;;  %v7344_v14 = vmul.f32 %v15677_v46, %v13630_v7  ;;  %v15695_v31 = vld [vmem:[#allocation24_spill] sm:$0xff] }
 0x6fd   : > { %v7008_v12 = vadd.f32 %v15663_v16, %v6974_v58  ;;  %7609 = vrot.lane.b32.xlu0 %v7547_v3, %s9911_s28  ;;  %v7534_v0 = vmul.f32 %v15683_v27, %v13630_v7  ;;  %v8051_v32 = vmul.f32 %v15695_v31, %v13708_v39  ;;  %v7713_v35 = vmul.f32 %v15671_v49, %v13740_v62 }
 0x6fe   : > { %v7009_v54 = vadd.f32 %v15663_v16, %v6975_v25  ;;  %v7039_v56 = vmax.f32 %v7017_v50, 0.0  ;;  %v15689_v16 = vld [vmem:[#allocation21_spill] sm:$0xff]  ;;  %v7539_v58 = vmul.f32 %v15683_v27, %v13740_v62  ;;  %v7878_v50 = vmul.f32 %v15676_v48, %v13740_v62 }
 0x6ff   : > { %v7030_v19 = vmax.f32 %v7008_v12, 0.0  ;;  %vm15690_vm9 = vnez %v15689_v16  ;;  %v15696_v25 = vld [vmem:[#allocation69_spill] sm:$0xff]  ;;  %v8210_v12 = vmul.f32 %v15686_v38, %v13740_v62  ;;  %v7719_v16 = vmul.f32 %v15692_v60, %v13638_v17 }
 0x700   : > { %v7031_v57 = vmax.f32 %v7009_v54, 0.0  ;;  %v7061_v4 = vsel %vm11593_vm8, %v7039_v56, 0.0  ;;  %v8383_v3 = vmul.f32 %v15696_v25, %v13708_v39  ;;  %v7708_v54 = vmul.f32 %v15671_v49, %v13630_v7 }
 0x701   : > { %7083 = vst [vmem:[#allocation3 + $0xa8] sm:$0xff] %v7061_v4  ;;  %v13795_v42 = vsel %vm11546_vm1, %v7030_v19, 0.0  ;;  %v7190_v56 = vmul.f32 %v15675_v23, %v13638_v17  ;;  %v7873_v19 = vmul.f32 %v15676_v48, %v13630_v7  ;;  %v7355_v4 = vmul.f32 %v15681_v9, %v13638_v17 }
 0x702   : > { %v7053_v29 = vsel %vm15690_vm9, %v7031_v57, 0.0  ;;  %7074 = vst [vmem:[#allocation3 + $0x50] sm:$0xff] %v13795_v42  ;;  %v6939_v33 = vpop.f32.mrf.mxu0  ;;  %v8376_v57 = vmul.f32 %v15691_v40, %v13740_v62 }
 0x703   : > { %v6962_v18 = vpop.f32.mrf.mxu1  ;;  %7075 = vst.msk [vmem:[#allocation3 + $0x58] sm:$0xff] %vm3677_vm6, %v7053_v29  ;;  %v6985_v43 = vadd.f32 %v6939_v33, %v6615_v15  ;;  %v8039_v15 = vmul.f32 %v15682_v34, %v13630_v7  ;;  %v7181_v29 = vmul.f32 %v15672_v22, %v13686_v37  ;;  %v8371_v33 = vmul.f32 %v15691_v40, %v13630_v7 }
 0x704   : > { %v6986_v45 = vadd.f32 %v6962_v18, %v6616_v52  ;;  %7224 = vrot.lane.b32.xlu2 %v7179_v59, %s9909_s21  ;;  %8417 = vrot.lane.b32.xlu1 %v8372_v51, %s9918_s19  ;;  %v7546_v52 = vmul.f32 %v15687_v26, %v13638_v17  ;;  %v7346_v51 = vmul.f32 %v15677_v46, %v13686_v37 }
 0x705   : > { %v7019_v20 = vadd.f32 %v15665_v21, %v6985_v43  ;;  %7776 = vrot.lane.b32.xlu0 %v7720_v2, %s9912_s20  ;;  %v7195_v43 = vmul.f32 %v15675_v23, %v13769_v61  ;;  %v8050_v2 = vmul.f32 %v15695_v31, %v13638_v17 }
 0x706   : > { %v7020_v47 = vadd.f32 %v15665_v21, %v6986_v45  ;;  %v15694_v21 = vld [vmem:[#allocation60_spill] sm:$0xff] }
 0x707   : > { %v7041_v11 = vmax.f32 %v7019_v20, 0.0  ;;  %v7885_v28 = vmul.f32 %v15694_v21, %v13708_v39  ;;  %v8044_v39 = vmul.f32 %v15682_v34, %v13740_v62  ;;  %v8205_v62 = vmul.f32 %v15686_v38, %v13630_v7 }
 0x708   : > { %v7042_v41 = vmax.f32 %v7020_v47, 0.0  ;;  %v7884_v59 = vmul.f32 %v15694_v21, %v13638_v17  ;;  %v7536_v20 = vmul.f32 %v15683_v27, %v13686_v37  ;;  %v7360_v47 = vmul.f32 %v15681_v9, %v13769_v61 }
 0x709   : > { %v13814_v30 = vsel %vm11546_vm1, %v7041_v11, 0.0  ;;  %vm7431_vm1 = vcmask 1031168  }
 0x70a   : > { %15693 = vst [vmem:[#allocation76_spill] sm:$0xff] %v13814_v30  ;;  %v7064_v53 = vsel %vm15690_vm9, %v7042_v41, 0.0  ;;  %vm8524_vm9 = vcmask 1048424  }
 0x70b   : > { %7085 = vst [vmem:[#allocation3 + $0xb8] sm:$0xff] %v13814_v30 }
 0x70c   : > { %7086 = vst.msk [vmem:[#allocation3 + $0xc0] sm:$0xff] %vm3677_vm6, %v7064_v53  ;;  %7389 = vrot.lane.b32.xlu2 %v7344_v14, %s9914_s13  ;;  %7234 = vrot.lane.b32.xlu1 %v7184_v44, %s9909_s21  ;;  %v8382_v14 = vmul.f32 %v15696_v25, %v13638_v17  ;;  %v7551_v44 = vmul.f32 %v15687_v26, %v13769_v61  ;;  %vm15707_vm6 = vcmask 1039360  }
 0x70d   : > { %7941 = vrot.lane.b32.xlu0 %v7885_v28, %s9915_s18  ;;  %v8221_v28 = vmul.f32 %v15685_v13, %v13769_v61  ;;  %vm15709_vm8 = vmmov %vm15707_vm6 }
 0x70e   : > { %vm15711_vm11 = vmmov %vm15707_vm6 }
 0x70f   : > { %vm15714_vm12 = vmmov %vm15707_vm6 }
 0x714   : > { %7583 = vrot.lane.b32.xlu2 %v7534_v0, %s9911_s28  ;;  %7399 = vrot.lane.b32.xlu1 %v7349_v1, %s9914_s13 }
 0x715   : > { %8107 = vrot.lane.b32.xlu0 %v8051_v32, %s9916_s22 }
 0x71c   : > { %7762 = vrot.lane.b32.xlu2 %v7713_v35, %s9912_s20  ;;  %7593 = vrot.lane.b32.xlu1 %v7539_v58, %s9911_s28  ;;  %v7710_v35 = vmul.f32 %v15671_v49, %v13686_v37  ;;  %v7724_v58 = vmul.f32 %v15692_v60, %v13769_v61 }
 0x71d   : > { %8439 = vrot.lane.b32.xlu0 %v8383_v3, %s9918_s19  ;;  %v7183_v3 = vmul.f32 %v15672_v22, %v13648_v6 }
 0x724   : > { %7927 = vrot.lane.b32.xlu2 %v7878_v50, %s9915_s18  ;;  %8259 = vrot.lane.b32.xlu1 %v8210_v12, %s9917_s26 }
 0x725   : > { %7752 = vrot.lane.b32.xlu0 %v7708_v54, %s9912_s20 }
 0x72c   : > { %8093 = vrot.lane.b32.xlu2 %v8044_v39, %s9916_s22  ;;  %7246 = vrot.lane.b32.xlu1 %v7190_v56, %s9909_s21  ;;  %v7875_v39 = vmul.f32 %v15676_v48, %v13686_v37  ;;  %v7889_v56 = vmul.f32 %v15694_v21, %v13769_v61 }
 0x72d   : > { %7917 = vrot.lane.b32.xlu0 %v7873_v19, %s9915_s18  ;;  %v7348_v19 = vmul.f32 %v15677_v46, %v13648_v6 }
 0x734   : > { %8425 = vrot.lane.b32.xlu2 %v8376_v57, %s9918_s19  ;;  %7411 = vrot.lane.b32.xlu1 %v7355_v4, %s9914_s13 }
 0x735   : > { %8083 = vrot.lane.b32.xlu0 %v8039_v15, %s9916_s22 }
 0x73c   : > { %7607 = vrot.lane.b32.xlu2 %v7546_v52, %s9911_s28  ;;  %8271 = vrot.lane.b32.xlu1 %v8216_v8, %s9917_s26  ;;  %v8041_v52 = vmul.f32 %v15682_v34, %v13686_v37  ;;  %v8055_v8 = vmul.f32 %v15695_v31, %v13769_v61 }
 0x73d   : > { %8249 = vrot.lane.b32.xlu0 %v8205_v62, %s9917_s26  ;;  %v7538_v62 = vmul.f32 %v15683_v27, %v13648_v6 }
 0x744   : > { %7774 = vrot.lane.b32.xlu2 %v7719_v16, %s9912_s20  ;;  %7228 = vrot.lane.b32.xlu1 %v7181_v29, %s9909_s21 }
 0x745   : > { %8415 = vrot.lane.b32.xlu0 %v8371_v33, %s9918_s19 }
 0x746   : > { %v13892_v18 = vpop.permute.xlu2 %7248 }
 0x747   : > { %15697 = vst [vmem:[#allocation64_spill] sm:$0xff] %v13892_v18 }
 0x74c   : > { %7939 = vrot.lane.b32.xlu2 %v7884_v59, %s9915_s18  ;;  %7393 = vrot.lane.b32.xlu1 %v7346_v51, %s9914_s13  ;;  %v8207_v59 = vmul.f32 %v15686_v38, %v13686_v37  ;;  %v8387_v51 = vmul.f32 %v15696_v25, %v13769_v61  ;;  %v7712_v61 = vmul.f32 %v15671_v49, %v13648_v6 }
 0x74d   : > { %7256 = vrot.lane.b32.xlu0 %v7195_v43, %s9909_s21  ;;  %v7711_v43 = vmul.f32 %v15671_v49, %v13700_v5 }
 0x74e   : > { %v13903_v45 = vpop.permute.xlu2 %7413 }
 0x754   : > { %8105 = vrot.lane.b32.xlu2 %v8050_v2, %s9916_s22  ;;  %7587 = vrot.lane.b32.xlu1 %v7536_v20, %s9911_s28 }
 0x755   : > { %7421 = vrot.lane.b32.xlu0 %v7360_v47, %s9914_s13 }
 0x756   : > { %v13914_v11 = vpop.permute.xlu2 %8273  ;;  %v13916_v41 = vpop.permute.xlu1 %7754 }
 0x757   : > { %v13918_v53 = vpop.permute.xlu0 %7226 }
 0x75c   : > { %8437 = vrot.lane.b32.xlu2 %v8382_v14, %s9918_s19  ;;  %7617 = vrot.lane.b32.xlu1 %v7551_v44, %s9911_s28  ;;  %v8373_v14 = vmul.f32 %v15691_v40, %v13686_v37  ;;  %v7876_v44 = vmul.f32 %v15676_v48, %v13700_v5  ;;  %v8208_v37 = vmul.f32 %v15686_v38, %v13700_v5 }
 0x75d   : > { %8281 = vrot.lane.b32.xlu0 %v8221_v28, %s9917_s26 }
 0x75e   : > { %v13929_v0 = vpop.permute.xlu2 %7224  ;;  %v13931_v1 = vpop.permute.xlu1 %7919 }
 0x75f   : > { %v13933_v32 = vpop.permute.xlu0 %7391 }
 0x764   : > { %7756 = vrot.lane.b32.xlu2 %v7710_v35, %s9912_s20  ;;  %7784 = vrot.lane.b32.xlu1 %v7724_v58, %s9912_s20 }
 0x765   : > { %7232 = vrot.lane.b32.xlu0 %v7183_v3, %s9909_s21  ;;  %v7182_v3 = vmul.f32 %v15672_v22, %v13700_v5 }
 0x766   : > { %v13944_v50 = vpop.permute.xlu2 %7389  ;;  %v13946_v12 = vpop.permute.xlu1 %8085 }
 0x767   : > { %v13948_v54 = vpop.permute.xlu0 %7585 }
 0x76c   : > { %7921 = vrot.lane.b32.xlu2 %v7875_v39, %s9915_s18  ;;  %7949 = vrot.lane.b32.xlu1 %v7889_v56, %s9915_s18  ;;  %v7877_v39 = vmul.f32 %v15676_v48, %v13648_v6  ;;  %v8042_v56 = vmul.f32 %v15682_v34, %v13700_v5 }
 0x76d   : > { %7397 = vrot.lane.b32.xlu0 %v7348_v19, %s9914_s13 }
 0x76e   : > { %v13959_v57 = vpop.permute.xlu2 %7583  ;;  %v13961_v4 = vpop.permute.xlu1 %8251 }
 0x76f   : > { %v13963_v15 = vpop.permute.xlu0 %7609 }
 0x774   : > { %8087 = vrot.lane.b32.xlu2 %v8041_v52, %s9916_s22  ;;  %8115 = vrot.lane.b32.xlu1 %v8055_v8, %s9916_s22 }
 0x775   : > { %7591 = vrot.lane.b32.xlu0 %v7538_v62, %s9911_s28  ;;  %v7347_v62 = vmul.f32 %v15677_v46, %v13700_v5 }
 0x776   : > { %v13974_v16 = vpop.permute.xlu2 %7762  ;;  %v13976_v29 = vpop.permute.xlu1 %8417 }
 0x777   : > { %15698 = vst [vmem:[#allocation80_spill] sm:$0xff] %v13974_v16  ;;  %v13978_v33 = vpop.permute.xlu0 %7776  ;;  %v15710_v16 = vld [vmem:[#allocation46_spill] sm:$0xff] }
 0x77c   : > { %8253 = vrot.lane.b32.xlu2 %v8207_v59, %s9917_s26  ;;  %8447 = vrot.lane.b32.xlu1 %v8387_v51, %s9918_s19  ;;  %v8043_v59 = vmul.f32 %v15682_v34, %v13648_v6  ;;  %v8209_v51 = vmul.f32 %v15686_v38, %v13648_v6 }
 0x77d   : > { %7758 = vrot.lane.b32.xlu0 %v7711_v43, %s9912_s20 }
 0x77e   : > { %v13989_v2 = vpop.permute.xlu2 %7927  ;;  %v13991_v20 = vpop.permute.xlu1 %7234 }
 0x77f   : > { %15699 = vst [vmem:[#allocation71_spill] sm:$0xff] %v13989_v2  ;;  %v13993_v47 = vpop.permute.xlu0 %7941 }
 0x780   : > { %15700 = vst [vmem:[#allocation13_spill] sm:$0xff] %v13991_v20 }
 0x784   : > { %8419 = vrot.lane.b32.xlu2 %v8373_v14, %s9918_s19  ;;  %7760 = vrot.lane.b32.xlu1 %v7712_v61, %s9912_s20 }
 0x785   : > { %7923 = vrot.lane.b32.xlu0 %v7876_v44, %s9915_s18  ;;  %v7537_v44 = vmul.f32 %v15683_v27, %v13700_v5 }
 0x786   : > { %v14004_v28 = vpop.permute.xlu2 %8093  ;;  %v14006_v35 = vpop.permute.xlu1 %7399 }
 0x787   : > { %15701 = vst [vmem:[#allocation37_spill] sm:$0xff] %v14004_v28  ;;  %v14008_v58 = vpop.permute.xlu0 %8107  ;;  %v15708_v28 = vld [vmem:[#allocation42_spill] sm:$0xff] }
 0x788   : > { %15702 = vst [vmem:[#allocation79_spill] sm:$0xff] %v14006_v35  ;;  %v7266_v2 = vsel %vm15709_vm8, %v15708_v28, %v13929_v0  ;;  %v7548_v28 = vmul.f32 %v15687_v26, %v13712_v10  ;;  %vm15727_vm8 = vmmov %vm15722_vm5 }
 0x78c   : > { %7230 = vrot.lane.b32.xlu2 %v7182_v3, %s9909_s21  ;;  %7925 = vrot.lane.b32.xlu1 %v7877_v39, %s9915_s18  ;;  %v8375_v3 = vmul.f32 %v15691_v40, %v13648_v6  ;;  %v8374_v39 = vmul.f32 %v15691_v40, %v13700_v5  ;;  %v9829_v5 = vld [vmem:[#allocation3 + $0x68] sm:$0xff] }
 0x78d   : > { %8089 = vrot.lane.b32.xlu0 %v8042_v56, %s9916_s22 }
 0x78e   : > { %v14019_v19 = vpop.permute.xlu2 %8425  ;;  %v14021_v52 = vpop.permute.xlu1 %7593 }
 0x78f   : > { %15703 = vst [vmem:[#allocation66_spill] sm:$0xff] %v14019_v19  ;;  %v14023_v8 = vpop.permute.xlu0 %8439 }
 0x790   : > { %15704 = vst [vmem:[#allocation67_spill] sm:$0xff] %v14021_v52  ;;  %v15712_v52 = vld [vmem:[#allocation61_spill] sm:$0xff] }
 0x794   : > { %7395 = vrot.lane.b32.xlu2 %v7347_v62, %s9914_s13  ;;  %8091 = vrot.lane.b32.xlu1 %v8043_v59, %s9916_s22  ;;  %v15706_v62 = vld [vmem:[#allocation41_spill] sm:$0xff] }
 0x795   : > { %8257 = vrot.lane.b32.xlu0 %v8209_v51, %s9917_s26  ;;  %v7133_v59 = vmul.f32 %v15706_v62, %v13638_v17  ;;  %v7122_v17 = vmul.f32 %v15710_v16, %v13630_v7  ;;  %v7192_v7 = vmul.f32 %v15675_v23, %v13712_v10  ;;  %v7132_v20 = vmul.f32 %v9829_v5, %v15706_v62  ;;  %v15718_v5 = vld [vmem:[#allocation49_spill] sm:$0xff] }
 0x796   : > { %v7608_v43 = vpop.permute.xlu2 %7607  ;;  %v14034_v14 = vpop.permute.xlu1 %8259 }
 0x797   : > { %15705 = vst [vmem:[#allocation82_spill] sm:$0xff] %v14034_v14  ;;  %v7753_v61 = vpop.permute.xlu0 %7752 }
 0x79c   : > { %7589 = vrot.lane.b32.xlu2 %v7537_v44, %s9911_s28  ;;  %8423 = vrot.lane.b32.xlu1 %v8375_v3, %s9918_s19  ;;  %v9828_v44 = vld [vmem:[#allocation3] sm:$0xff] }
 0x79d   : > { %8421 = vrot.lane.b32.xlu0 %v8374_v39, %s9918_s19  ;;  %v7121_v3 = vmul.f32 %v9828_v44, %v15710_v16  ;;  %v7267_v39 = vsel %vm15711_vm11, %v13929_v0, %v13918_v53  ;;  %v15713_v44 = vld [vmem:[#allocation39_spill] sm:$0xff]  ;;  %vm15729_vm11 = vmmov %vm15723_vm4 }
 0x79e   : > { %v7775_v56 = vpop.permute.xlu2 %7774  ;;  %v7247_v51 = vpop.permute.xlu1 %7246  ;;  %v7309_v30 = vadd.f32 %v7267_v39, %v7122_v17 }
 0x79f   : > { %v7277_v19 = vsel %vm15707_vm6, %v7247_v51, %v13892_v18  ;;  %v7918_v14 = vpop.permute.xlu0 %7917  ;;  %v7432_v18 = vsel %vm7431_vm1, %v15712_v52, %v13944_v50  ;;  %v7276_v0 = vsel %vm15714_vm12, %v15713_v44, %v7247_v51  ;;  %v15715_v52 = vld [vmem:[#allocation18_spill] sm:$0xff]  ;;  %v7721_v44 = vmul.f32 %v15692_v60, %v13712_v10  ;;  %vm15731_vm12 = vmmov %vm15707_vm6 }
 0x7a0   : > { %v7320_v36 = vadd.f32 %v7277_v19, %v7133_v59  ;;  %v7308_v19 = vadd.f32 %v7266_v2, %v7121_v3  ;;  %v7433_v59 = vsel %vm7431_vm1, %v13944_v50, %v13933_v32  ;;  %v7629_v35 = vsel %vm15716_vm14, %v15715_v52, %v13959_v57  ;;  %vm15736_vm14 = vmmov %vm15707_vm6 }
 0x7a1   : > { %v7630_v50 = vsel %vm15717_vm15, %v13959_v57, %v13948_v54  ;;  %v7475_v51 = vadd.f32 %v7433_v59, %v7309_v30  ;;  %v7319_v3 = vadd.f32 %v7276_v0, %v7132_v20  ;;  %v7796_v57 = vsel %vm15719_vm10, %v7753_v61, %v13916_v41  ;;  %v15720_v59 = vld [vmem:[#allocation28_spill] sm:$0xff]  ;;  %vm15737_vm15 = vmmov %vm15707_vm6 }
 0x7a2   : > { %v7474_v2 = vadd.f32 %v7432_v18, %v7308_v19  ;;  %v7640_v0 = vsel %vm15721_vm13, %v15720_v59, %v7608_v43  ;;  %vm15739_vm10 = vmmov %vm15722_vm5 }
 0x7a3   : > { %v7674_v19 = vadd.f32 %v7630_v50, %v7475_v51  ;;  %v7188_v50 = vmul.f32 %v15672_v22, %v13795_v42  ;;  %vm15740_vm13 = vmmov %vm15723_vm4 }
 0x7a4   : > { %8255 = vrot.lane.b32.xlu2 %v8208_v37, %s9917_s26  ;;  %7611 = vrot.lane.b32.xlu1 %v7548_v28, %s9911_s28  ;;  %v7673_v52 = vadd.f32 %v7629_v35, %v7474_v2  ;;  %v7641_v35 = vsel %vm15722_vm5, %v7608_v43, %v13963_v15  ;;  %v7962_v2 = vsel %vm7961_vm2, %v7918_v14, %v13931_v1 }
 0x7a5   : > { %7250 = vrot.lane.b32.xlu0 %v7192_v7, %s9909_s21  ;;  %v7839_v51 = vadd.f32 %v7796_v57, %v7674_v19 }
 0x7a6   : > { %v7940_v39 = vpop.permute.xlu2 %7939  ;;  %v7412_v17 = vpop.permute.xlu1 %7411  ;;  %v7838_v7 = vadd.f32 %v7753_v61, %v7673_v52 }
 0x7a7   : > { %v7442_v37 = vsel %vm7431_vm1, %v15718_v5, %v7412_v17  ;;  %v7443_v18 = vsel %vm7431_vm1, %v7412_v17, %v13903_v45  ;;  %v8084_v28 = vpop.permute.xlu0 %8083  ;;  %v7972_v19 = vsel %vm7961_vm2, %v7940_v39, %v13993_v47 }
 0x7a8   : > { %v7485_v30 = vadd.f32 %v7442_v37, %v7319_v3  ;;  %v7486_v20 = vadd.f32 %v7443_v18, %v7320_v36  ;;  %v7806_v36 = vsel %vm15723_vm4, %v7775_v56, %v13978_v33  ;;  %v8004_v3 = vadd.f32 %v7918_v14, %v7838_v7  ;;  %vm15741_vm4 = vmmov %vm15722_vm5 }
 0x7a9   : > { %v7357_v37 = vmul.f32 %v15681_v9, %v13712_v10  ;;  %v8128_v43 = vsel %vm8127_vm0, %v8084_v28, %v13946_v12  ;;  %v8005_v18 = vadd.f32 %v7962_v2, %v7839_v51 }
 0x7aa   : > { %v7684_v5 = vadd.f32 %v7640_v0, %v7485_v30  ;;  %v7685_v17 = vadd.f32 %v7641_v35, %v7486_v20  ;;  %v8170_v14 = vadd.f32 %v8084_v28, %v8004_v3  ;;  %v8218_v3 = vmul.f32 %v15685_v13, %v13712_v10 }
 0x7ab   : > { %v8171_v0 = vadd.f32 %v8128_v43, %v8005_v18 }
 0x7ac   : > { %7242 = vrot.lane.b32.xlu2 %v7188_v50, %s9909_s21  ;;  %7778 = vrot.lane.b32.xlu1 %v7721_v44, %s9912_s20  ;;  %v7849_v61 = vadd.f32 %v7775_v56, %v7684_v5  ;;  %v7850_v52 = vadd.f32 %v7806_v36, %v7685_v17  ;;  %v7886_v36 = vmul.f32 %v15694_v21, %v13712_v10 }
 0x7ad   : > { %7415 = vrot.lane.b32.xlu0 %v7357_v37, %s9914_s13 }
 0x7ae   : > { %v8106_v57 = vpop.permute.xlu2 %8105  ;;  %v8015_v30 = vadd.f32 %v7940_v39, %v7849_v61  ;;  %v8016_v20 = vadd.f32 %v7972_v19, %v7850_v52  ;;  %v8272_v59 = vpop.permute.xlu1 %8271  ;;  %v7353_v39 = vmul.f32 %v15677_v46, %v13795_v42  ;;  %v7123_v61 = vmul.f32 %v15710_v16, %v13682_v24 }
 0x7af   : > { %v8138_v35 = vsel %vm8127_vm0, %v8106_v57, %v14008_v58  ;;  %v8250_v7 = vpop.permute.xlu0 %8249  ;;  %v8304_v17 = vsel %vm8293_vm3, %v8272_v59, %v13914_v11  ;;  %v7543_v24 = vmul.f32 %v15683_v27, %v13795_v42 }
 0x7b0   : > { %v8181_v44 = vadd.f32 %v8106_v57, %v8015_v30  ;;  %v8182_v56 = vadd.f32 %v8138_v35, %v8016_v20  ;;  %v8294_v2 = vsel %vm8293_vm3, %v8250_v7, %v13961_v4  ;;  %v8336_v5 = vadd.f32 %v8250_v7, %v8170_v14 }
 0x7b1   : > { %v8337_v50 = vadd.f32 %v8294_v2, %v8171_v0 }
 0x7b2   : > { %v8347_v28 = vadd.f32 %v8272_v59, %v8181_v44  ;;  %v8348_v51 = vadd.f32 %v8304_v17, %v8182_v56  ;;  %v8052_v44 = vmul.f32 %v15695_v31, %v13712_v10 }
 0x7b4   : > { %7407 = vrot.lane.b32.xlu2 %v7353_v39, %s9914_s13  ;;  %7943 = vrot.lane.b32.xlu1 %v7886_v36, %s9915_s18  ;;  %v8214_v39 = vmul.f32 %v15686_v38, %v13795_v42  ;;  %v8384_v36 = vmul.f32 %v15696_v25, %v13712_v10 }
 0x7b5   : > { %8275 = vrot.lane.b32.xlu0 %v8218_v3, %s9917_s26  ;;  %v7882_v3 = vmul.f32 %v15676_v48, %v13795_v42 }
 0x7b6   : > { %v8438_v37 = vpop.permute.xlu2 %8437  ;;  %v14124_v43 = vpop.permute.xlu1 %7228 }
 0x7b7   : > { %v8470_v52 = vsel %vm8459_vm7, %v8438_v37, %v14023_v8  ;;  %v8513_v18 = vadd.f32 %v8438_v37, %v8347_v28  ;;  %v7268_v19 = vsel %vm15707_vm6, %v13918_v53, %v14124_v43  ;;  %v8416_v14 = vpop.permute.xlu0 %8415  ;;  %v7717_v53 = vmul.f32 %v15671_v49, %v13795_v42 }
 0x7b8   : > { %v8514_v57 = vadd.f32 %v8470_v52, %v8348_v51  ;;  %v7310_v30 = vadd.f32 %v7268_v19, %v7123_v61  ;;  %v8460_v20 = vsel %vm8459_vm7, %v8416_v14, %v13976_v29  ;;  %v8502_v59 = vadd.f32 %v8416_v14, %v8336_v5 }
 0x7b9   : > { %v8526_v0 = vsel %vm8524_vm9, %v8513_v18, 0.0  ;;  %v8503_v35 = vadd.f32 %v8460_v20, %v8337_v50  ;;  %v8380_v14 = vmul.f32 %v15691_v40, %v13795_v42 }
 0x7ba   : > { %v8525_v7 = vsel %vm8524_vm9, %v8502_v59, 0.0  ;;  %vm15742_vm9 = vmmov %vm15729_vm11 }
 0x7bb   : > { %v14139_v56 = vadd.f32 %v8526_v0, %v8525_v7  ;;  %v14141_v2 = vadd.f32 %v8514_v57, %v8503_v35  ;;  %v7193_v57 = vmul.f32 %v15675_v23, %v13731_v63  ;;  %v7358_v7 = vmul.f32 %v15681_v9, %v13731_v63  ;;  %vm15744_vm6 = vmmov %vm15742_vm9 }
 0x7bc   : > { %7601 = vrot.lane.b32.xlu2 %v7543_v24, %s9911_s28  ;;  %8109 = vrot.lane.b32.xlu1 %v8052_v44, %s9916_s22  ;;  %v7550_v24 = vmul.f32 %v15687_v26, %v13658_v55 }
 0x7bd   : > { %15724 = vst [vmem:[#allocation36_spill] sm:$0xff] %v14139_v56  ;;  %7770 = vrot.lane.b32.xlu0 %v7717_v53, %s9912_s20 }
 0x7be   : > { %15725 = vst [vmem:[#allocation85_spill] sm:$0xff] %v14141_v2  ;;  %v14148_v5 = vpop.permute.xlu2 %7756  ;;  %v14150_v17 = vpop.permute.xlu1 %7393  ;;  %v8054_v2 = vmul.f32 %v15695_v31, %v13658_v55 }
 0x7bf   : > { %v7434_v50 = vsel %vm7431_vm1, %v13933_v32, %v14150_v17  ;;  %v14155_v28 = vpop.permute.xlu0 %7256  ;;  %v7797_v18 = vsel %vm15729_vm11, %v13916_v41, %v14148_v5  ;;  %vm15754_vm11 = vmmov %vm15741_vm4 }
 0x7c0   : > { %15726 = vst [vmem:[#allocation72_spill] sm:$0xff] %v14155_v28  ;;  %v7476_v51 = vadd.f32 %v7434_v50, %v7310_v30  ;;  %v7126_v50 = vmul.f32 %v15710_v16, %v13648_v6 }
 0x7c4   : > { %8267 = vrot.lane.b32.xlu2 %v8214_v39, %s9917_s26  ;;  %8441 = vrot.lane.b32.xlu1 %v8384_v36, %s9918_s19  ;;  %v15730_v36 = vld [vmem:[#allocation13_spill] sm:$0xff] }
 0x7c5   : > { %7935 = vrot.lane.b32.xlu0 %v7882_v3, %s9915_s18 }
 0x7c6   : > { %v14166_v37 = vpop.permute.xlu2 %7921  ;;  %v14168_v32 = vpop.permute.xlu1 %7587 }
 0x7c7   : > { %v7631_v61 = vsel %vm15727_vm8, %v13948_v54, %v14168_v32  ;;  %v14173_v52 = vpop.permute.xlu0 %7421  ;;  %v7963_v30 = vsel %vm7961_vm2, %v13931_v1, %v14166_v37  ;;  %v8048_v54 = vmul.f32 %v15682_v34, %v13795_v42  ;;  %v7194_v42 = vmul.f32 %v15675_v23, %v13658_v55  ;;  %vm15752_vm8 = vmmov %vm15731_vm12 }
 0x7c8   : > { %15728 = vst [vmem:[#allocation83_spill] sm:$0xff] %v14173_v52  ;;  %v7675_v10 = vadd.f32 %v7631_v61, %v7476_v51 }
 0x7ca   : > { %v7840_v19 = vadd.f32 %v7797_v18, %v7675_v10  ;;  %v7359_v10 = vmul.f32 %v15681_v9, %v13658_v55  ;;  %v8219_v18 = vmul.f32 %v15685_v13, %v13731_v63 }
 0x7cc   : > { %8433 = vrot.lane.b32.xlu2 %v8380_v14, %s9918_s19  ;;  %7252 = vrot.lane.b32.xlu1 %v7193_v57, %s9909_s21  ;;  %v8006_v20 = vadd.f32 %v7963_v30, %v7840_v19  ;;  %v7723_v19 = vmul.f32 %v15692_v60, %v13658_v55 }
 0x7cd   : > { %8101 = vrot.lane.b32.xlu0 %v8048_v54, %s9916_s22  ;;  %v15732_v54 = vld [vmem:[#allocation79_spill] sm:$0xff] }
 0x7ce   : > { %v14190_v41 = vpop.permute.xlu2 %8087  ;;  %v14192_v59 = vpop.permute.xlu1 %7617 }
 0x7cf   : > { %v8129_v0 = vsel %vm8127_vm0, %v13946_v12, %v14190_v41  ;;  %v14197_v35 = vpop.permute.xlu0 %8281 }
 0x7d0   : > { %v8172_v1 = vadd.f32 %v8129_v0, %v8006_v20 }
 0x7d4   : > { %7254 = vrot.lane.b32.xlu2 %v7194_v42, %s9909_s21  ;;  %7417 = vrot.lane.b32.xlu1 %v7358_v7, %s9914_s13  ;;  %v15733_v42 = vld [vmem:[#allocation76_spill] sm:$0xff] }
 0x7d5   : > { %7615 = vrot.lane.b32.xlu0 %v7550_v24, %s9911_s28  ;;  %v7199_v7 = vmul.f32 %v15675_v23, %v15733_v42  ;;  %v7888_v24 = vmul.f32 %v15694_v21, %v13658_v55 }
 0x7d6   : > { %v14208_v44 = vpop.permute.xlu2 %8253  ;;  %v14210_v12 = vpop.permute.xlu1 %7784 }
 0x7d7   : > { %v8295_v53 = vsel %vm8293_vm3, %v13961_v4, %v14208_v44  ;;  %v7233_v51 = vpop.permute.xlu0 %7232 }
 0x7d8   : > { %v8338_v39 = vadd.f32 %v8295_v53, %v8172_v1  ;;  %v7271_v3 = vsel %vm15731_vm12, %v7233_v51, %v15730_v36  ;;  %v7549_v1 = vmul.f32 %v15687_v26, %v13731_v63  ;;  %vm15755_vm12 = vmmov %vm15744_vm6 }
 0x7d9   : > { %v7313_v61 = vadd.f32 %v7271_v3, %v7126_v50  ;;  %v15735_v50 = vld [vmem:[#allocation23_spill] sm:$0xff] }
 0x7dc   : > { %7419 = vrot.lane.b32.xlu2 %v7359_v10, %s9914_s13  ;;  %8277 = vrot.lane.b32.xlu1 %v8219_v18, %s9917_s26 }
 0x7dd   : > { %7782 = vrot.lane.b32.xlu0 %v7723_v19, %s9912_s20 }
 0x7de   : > { %v14228_v6 = vpop.permute.xlu2 %8419  ;;  %v14230_v4 = vpop.permute.xlu1 %7949 }
 0x7df   : > { %v8461_v14 = vsel %vm8459_vm7, %v13976_v29, %v14228_v6  ;;  %v7398_v57 = vpop.permute.xlu0 %7397  ;;  %v15734_v29 = vld [vmem:[#allocation44_spill] sm:$0xff] }
 0x7e0   : > { %v14235_v30 = vadd.f32 %v8461_v14, %v8338_v39  ;;  %v7437_v20 = vsel %vm7431_vm1, %v7398_v57, %v15732_v54  ;;  %v7124_v53 = vmul.f32 %v15710_v16, %v15734_v29  ;;  %v7125_v39 = vmul.f32 %v15710_v16, %v15735_v50 }
 0x7e1   : > { %v7479_v0 = vadd.f32 %v7437_v20, %v7313_v61  ;;  %v7722_v29 = vmul.f32 %v15692_v60, %v13731_v63  ;;  %v7364_v50 = vmul.f32 %v15681_v9, %v15733_v42 }
 0x7e4   : > { %7613 = vrot.lane.b32.xlu2 %v7549_v1, %s9911_s28  ;;  %7264 = vrot.lane.b32.xlu1 %v7199_v7, %s9909_s21  ;;  %v15738_v1 = vld [vmem:[#allocation67_spill] sm:$0xff] }
 0x7e5   : > { %7947 = vrot.lane.b32.xlu0 %v7888_v24, %s9915_s18 }
 0x7e6   : > { %v7231_v3 = vpop.permute.xlu2 %7230  ;;  %v14252_v61 = vpop.permute.xlu1 %8115 }
 0x7e7   : > { %v7269_v10 = vsel %vm15736_vm14, %v14124_v43, %v7231_v3  ;;  %v7270_v18 = vsel %vm15737_vm15, %v7231_v3, %v7233_v51  ;;  %v7592_v19 = vpop.permute.xlu0 %7591  ;;  %vm15757_vm14 = vmmov %vm15752_vm8 }
 0x7e8   : > { %v7311_v14 = vadd.f32 %v7269_v10, %v7124_v53  ;;  %v7312_v20 = vadd.f32 %v7270_v18, %v7125_v39  ;;  %v7634_v7 = vsel %vm15739_vm10, %v7592_v19, %v15738_v1  ;;  %vm15761_vm15 = vmmov %vm15741_vm4 }
 0x7e9   : > { %v7678_v24 = vadd.f32 %v7634_v7, %v7479_v0  ;;  %v7887_v7 = vmul.f32 %v15694_v21, %v13731_v63  ;;  %vm15762_vm10 = vmmov %vm15752_vm8 }
 0x7ec   : > { %7780 = vrot.lane.b32.xlu2 %v7722_v29, %s9912_s20  ;;  %7429 = vrot.lane.b32.xlu1 %v7364_v50, %s9914_s13  ;;  %v8386_v29 = vmul.f32 %v15696_v25, %v13658_v55  ;;  %v15743_v50 = vld [vmem:[#allocation80_spill] sm:$0xff] }
 0x7ed   : > { %8113 = vrot.lane.b32.xlu0 %v8054_v2, %s9916_s22  ;;  %v8225_v2 = vmul.f32 %v15685_v13, %v15733_v42  ;;  %v14290_v55 = vld [vmem:[#allocation3 + $0x48] sm:$0xff] }
 0x7ee   : > { %v7396_v43 = vpop.permute.xlu2 %7395  ;;  %v14268_v51 = vpop.permute.xlu1 %8447 }
 0x7ef   : > { %v7435_v0 = vsel %vm7431_vm1, %v14150_v17, %v7396_v43  ;;  %v7436_v53 = vsel %vm7431_vm1, %v7396_v43, %v7398_v57  ;;  %v7759_v39 = vpop.permute.xlu0 %7758 }
 0x7f0   : > { %v7477_v3 = vadd.f32 %v7435_v0, %v7311_v14  ;;  %v7478_v10 = vadd.f32 %v7436_v53, %v7312_v20  ;;  %v7798_v18 = vsel %vm15740_vm13, %v14148_v5, %v7759_v39  ;;  %vm15763_vm13 = vmmov %vm15752_vm8 }
 0x7f4   : > { %7945 = vrot.lane.b32.xlu2 %v7887_v7, %s9915_s18  ;;  %8289 = vrot.lane.b32.xlu1 %v8225_v2, %s9917_s26 }
 0x7f5   : > { %8445 = vrot.lane.b32.xlu0 %v8386_v29, %s9918_s19 }
 0x7f6   : > { %v7590_v17 = vpop.permute.xlu2 %7589  ;;  %v7761_v57 = vpop.permute.xlu1 %7760 }
 0x7f7   : > { %v7632_v5 = vsel %vm15722_vm5, %v14168_v32, %v7590_v17  ;;  %v7633_v14 = vsel %vm15741_vm4, %v7590_v17, %v7592_v19  ;;  %v7799_v20 = vsel %vm15742_vm9, %v7759_v39, %v7761_v57  ;;  %v7800_v43 = vsel %vm15744_vm6, %v7761_v57, %v15743_v50  ;;  %v7924_v0 = vpop.permute.xlu0 %7923  ;;  %v15745_v39 = vld [vmem:[#allocation78_spill] sm:$0xff]  ;;  %vm15765_vm5 = vmmov %vm15744_vm6 }
 0x7f8   : > { %v7676_v53 = vadd.f32 %v7632_v5, %v7477_v3  ;;  %v7677_v7 = vadd.f32 %v7633_v14, %v7478_v10  ;;  %v7843_v2 = vadd.f32 %v7800_v43, %v7678_v24  ;;  %v7964_v29 = vsel %vm7961_vm2, %v14166_v37, %v7924_v0  ;;  %vm15766_vm9 = vmmov %vm15741_vm4 }
 0x7f9   : > { %v8053_v32 = vmul.f32 %v15695_v31, %v13731_v63  ;;  %v7187_v19 = vmul.f32 %v15672_v22, %v14290_v55  ;;  %v7714_v17 = vmul.f32 %v15671_v49, %v15745_v39  ;;  %vm15767_vm6 = vmmov %vm15765_vm5 }
 0x7fa   : > { %v7842_v56 = vadd.f32 %v7799_v20, %v7677_v7  ;;  %v7841_v1 = vadd.f32 %v7798_v18, %v7676_v53  ;;  %v15746_v18 = vld [vmem:[#allocation71_spill] sm:$0xff]  ;;  %v14310_v7 = vld [vmem:[#allocation3 + $0x90] sm:$0xff] }
 0x7fc   : > { %v8007_v57 = vadd.f32 %v7964_v29, %v7841_v1  ;;  %8111 = vrot.lane.b32.xlu2 %v8053_v32, %s9916_s22  ;;  %7240 = vrot.lane.b32.xlu1 %v7187_v19, %s9909_s21  ;;  %v8220_v29 = vmul.f32 %v14310_v7, %v15685_v13  ;;  %v15747_v19 = vld [vmem:[#allocation37_spill] sm:$0xff] }
 0x7fd   : > { %7764 = vrot.lane.b32.xlu0 %v7714_v17, %s9912_s20 }
 0x7fe   : > { %v8256_v24 = vpop.permute.xlu2 %8255  ;;  %v7926_v37 = vpop.permute.xlu1 %7925 }
 0x7ff   : > { %v8296_v3 = vsel %vm8293_vm3, %v14208_v44, %v8256_v24  ;;  %v7965_v10 = vsel %vm7961_vm2, %v7924_v0, %v7926_v37  ;;  %v7966_v5 = vsel %vm7961_vm2, %v7926_v37, %v15746_v18  ;;  %v8090_v14 = vpop.permute.xlu0 %8089  ;;  %v7352_v44 = vmul.f32 %v15677_v46, %v14290_v55 }
 0x800   : > { %v8008_v20 = vadd.f32 %v7965_v10, %v7842_v56  ;;  %v8009_v43 = vadd.f32 %v7966_v5, %v7843_v2  ;;  %v8130_v1 = vsel %vm8127_vm0, %v14190_v41, %v8090_v14  ;;  %v7879_v0 = vmul.f32 %v15676_v48, %v15745_v39 }
 0x801   : > { %v8173_v53 = vadd.f32 %v8130_v1, %v8007_v57 }
 0x803   : > { %v8339_v32 = vadd.f32 %v8296_v3, %v8173_v53  ;;  %v15748_v3 = vld [vmem:[#allocation82_spill] sm:$0xff] }
 0x804   : > { %8279 = vrot.lane.b32.xlu2 %v8220_v29, %s9917_s26  ;;  %7405 = vrot.lane.b32.xlu1 %v7352_v44, %s9914_s13  ;;  %v8385_v44 = vmul.f32 %v15696_v25, %v13731_v63  ;;  %v14342_v63 = vld [vmem:[#allocation3 + $0x38] sm:$0xff] }
 0x805   : > { %7929 = vrot.lane.b32.xlu0 %v7879_v0, %s9915_s18  ;;  %v7542_v0 = vmul.f32 %v15683_v27, %v14290_v55  ;;  %15750 = vst [vmem:[#allocation34_spill] sm:$0xff] %v14342_v63 }
 0x806   : > { %v14321_v56 = vpop.permute.xlu2 %7242  ;;  %v8092_v41 = vpop.permute.xlu1 %8091 }
 0x807   : > { %v8131_v2 = vsel %vm8127_vm0, %v8090_v14, %v8092_v41  ;;  %v8132_v17 = vsel %vm8127_vm0, %v8092_v41, %v15747_v19  ;;  %v8258_v57 = vpop.permute.xlu0 %8257  ;;  %v8045_v14 = vmul.f32 %v15682_v34, %v15745_v39 }
 0x808   : > { %v8174_v37 = vadd.f32 %v8131_v2, %v8008_v20  ;;  %v8175_v10 = vadd.f32 %v8132_v17, %v8009_v43  ;;  %v8297_v5 = vsel %vm8293_vm3, %v8256_v24, %v8258_v57  ;;  %v8298_v1 = vsel %vm8293_vm3, %v8258_v57, %v15748_v3  ;;  %v15749_v43 = vld [vmem:[#allocation66_spill] sm:$0xff]  ;;  %v14344_v17 = vld [vmem:[#allocation3 + $0x40] sm:$0xff] }
 0x80a   : > { %v8340_v53 = vadd.f32 %v8297_v5, %v8174_v37  ;;  %v8341_v29 = vadd.f32 %v8298_v1, %v8175_v10 }
 0x80c   : > { %8443 = vrot.lane.b32.xlu2 %v8385_v44, %s9918_s19  ;;  %7599 = vrot.lane.b32.xlu1 %v7542_v0, %s9911_s28  ;;  %v7185_v44 = vmul.f32 %v15672_v22, %v14342_v63  ;;  %v7715_v0 = vmul.f32 %v15671_v49, %v14344_v17 }
 0x80d   : > { %8095 = vrot.lane.b32.xlu0 %v8045_v14, %s9916_s22  ;;  %v8377_v14 = vmul.f32 %v15691_v40, %v15745_v39 }
 0x80e   : > { %v14338_v24 = vpop.permute.xlu2 %7407  ;;  %v8424_v20 = vpop.permute.xlu1 %8423 }
 0x80f   : > { %v8464_v41 = vsel %vm8459_vm7, %v8424_v20, %v15749_v43  ;;  %v8422_v2 = vpop.permute.xlu0 %8421 }
 0x810   : > { %v14346_v57 = vadd.f32 %v8464_v41, %v8341_v29  ;;  %v8462_v37 = vsel %vm8459_vm7, %v14228_v6, %v8422_v2  ;;  %v8463_v10 = vsel %vm8459_vm7, %v8422_v2, %v8424_v20  ;;  %v15751_v41 = vld [vmem:[#allocation64_spill] sm:$0xff] }
 0x811   : > { %v14351_v5 = vadd.f32 %v8462_v37, %v8339_v32  ;;  %v14353_v1 = vadd.f32 %v8463_v10, %v8340_v53  ;;  %v9831_v53 = vld [vmem:[#allocation3 + $0x78] sm:$0xff]  ;;  %v7350_v10 = vmul.f32 %v15677_v46, %v14342_v63 }
 0x812   : > { %v7134_v29 = vmul.f32 %v9831_v53, %v15706_v62 }
 0x814   : > { %7236 = vrot.lane.b32.xlu2 %v7185_v44, %s9909_s21  ;;  %7766 = vrot.lane.b32.xlu1 %v7715_v0, %s9912_s20  ;;  %v7880_v44 = vmul.f32 %v15676_v48, %v14344_v17  ;;  %v7186_v0 = vmul.f32 %v14344_v17, %v15672_v22 }
 0x815   : > { %8427 = vrot.lane.b32.xlu0 %v8377_v14, %s9918_s19 }
 0x816   : > { %v14364_v6 = vpop.permute.xlu2 %7601  ;;  %v14366_v32 = vpop.permute.xlu1 %7611 }
 0x817   : > { %v14369_v20 = vpop.permute.xlu0 %7250  ;;  %v7642_v22 = vsel %vm15754_vm11, %v13963_v15, %v14366_v32  ;;  %vm15770_vm11 = vmmov %vm15762_vm10 }
 0x818   : > { %v7278_v2 = vsel %vm15752_vm8, %v15751_v41, %v14369_v20  ;;  %vm15768_vm8 = vmmov %vm15765_vm5 }
 0x819   : > { %v7321_v37 = vadd.f32 %v7278_v2, %v7134_v29 }
 0x81c   : > { %7401 = vrot.lane.b32.xlu2 %v7350_v10, %s9914_s13  ;;  %7931 = vrot.lane.b32.xlu1 %v7880_v44, %s9915_s18  ;;  %v7540_v10 = vmul.f32 %v15683_v27, %v15745_v39  ;;  %v8046_v44 = vmul.f32 %v15682_v34, %v14344_v17 }
 0x81d   : > { %7238 = vrot.lane.b32.xlu0 %v7186_v0, %s9909_s21 }
 0x81e   : > { %v14383_v14 = vpop.permute.xlu2 %8267  ;;  %v14385_v53 = vpop.permute.xlu1 %7778 }
 0x81f   : > { %15753 = vst [vmem:[#allocation88_spill] sm:$0xff] %v14383_v14  ;;  %v14387_v29 = vpop.permute.xlu0 %7415  ;;  %v7351_v14 = vmul.f32 %v14344_v17, %v15677_v46  ;;  %v7807_v63 = vsel %vm15755_vm12, %v13978_v33, %v14385_v53  ;;  %vm15771_vm12 = vmmov %vm15762_vm10 }
 0x820   : > { %v7444_v41 = vsel %vm7431_vm1, %v13903_v45, %v14387_v29 }
 0x821   : > { %v7487_v2 = vadd.f32 %v7444_v41, %v7321_v37 }
 0x823   : > { %v7686_v0 = vadd.f32 %v7642_v22, %v7487_v2  ;;  %v9832_v2 = vld [vmem:[#allocation3 + $0x38] sm:$0xff]  ;;  %v8213_v22 = vmul.f32 %v15686_v38, %v14290_v55 }
 0x824   : > { %7595 = vrot.lane.b32.xlu2 %v7540_v10, %s9911_s28  ;;  %8097 = vrot.lane.b32.xlu1 %v8046_v44, %s9916_s22  ;;  %v8211_v33 = vmul.f32 %v9832_v2, %v15686_v38 }
 0x825   : > { %7403 = vrot.lane.b32.xlu0 %v7351_v14, %s9914_s13  ;;  %v7851_v45 = vadd.f32 %v7807_v63, %v7686_v0  ;;  %v7541_v63 = vmul.f32 %v15683_v27, %v14344_v17 }
 0x826   : > { %v14407_v15 = vpop.permute.xlu2 %8433  ;;  %v14409_v39 = vpop.permute.xlu1 %7943 }
 0x827   : > { %15756 = vst [vmem:[#allocation73_spill] sm:$0xff] %v14407_v15  ;;  %v7973_v37 = vsel %vm7961_vm2, %v13993_v47, %v14409_v39  ;;  %v14414_v46 = vpop.permute.xlu0 %8275  ;;  %v7137_v47 = vmul.f32 %v14310_v7, %v15706_v62  ;;  %v7555_v7 = vmul.f32 %v15687_v26, %v15733_v42 }
 0x828   : > { %v8017_v41 = vadd.f32 %v7973_v37, %v7851_v45 }
 0x82c   : > { %8261 = vrot.lane.b32.xlu2 %v8211_v33, %s9917_s26  ;;  %8265 = vrot.lane.b32.xlu1 %v8213_v22, %s9917_s26  ;;  %v8305_v33 = vsel %vm8293_vm3, %v13914_v11, %v14414_v46  ;;  %v8378_v22 = vmul.f32 %v15691_v40, %v14344_v17 }
 0x82d   : > { %7597 = vrot.lane.b32.xlu0 %v7541_v63, %s9911_s28 }
 0x82e   : > { %v7255_v14 = vpop.permute.xlu2 %7254  ;;  %v14426_v10 = vpop.permute.xlu1 %8109 }
 0x82f   : > { %v7281_v44 = vsel %vm15757_vm14, %v7255_v14, %v14155_v28  ;;  %v8139_v0 = vsel %vm8127_vm0, %v14008_v58, %v14426_v10  ;;  %v14433_v45 = vpop.permute.xlu0 %7770  ;;  %v8212_v28 = vmul.f32 %v15686_v38, %v14344_v17  ;;  %vm15773_vm14 = vmmov %vm15741_vm4 }
 0x830   : > { %15758 = vst [vmem:[#allocation86_spill] sm:$0xff] %v14433_v45  ;;  %v7324_v37 = vadd.f32 %v7281_v44, %v7137_v47  ;;  %v8183_v2 = vadd.f32 %v8139_v0, %v8017_v41 }
 0x832   : > { %v8349_v63 = vadd.f32 %v8305_v33, %v8183_v2  ;;  %v14456_v33 = vld [vmem:[#allocation3 + $0xb0] sm:$0xff] }
 0x834   : > { %7625 = vrot.lane.b32.xlu2 %v7555_v7, %s9911_s28  ;;  %8429 = vrot.lane.b32.xlu1 %v8378_v22, %s9918_s19  ;;  %v8379_v22 = vmul.f32 %v15691_v40, %v14290_v55 }
 0x835   : > { %8263 = vrot.lane.b32.xlu0 %v8212_v28, %s9917_s26  ;;  %v7728_v28 = vmul.f32 %v15692_v60, %v15733_v42 }
 0x836   : > { %v7420_v58 = vpop.permute.xlu2 %7419  ;;  %v14447_v41 = vpop.permute.xlu1 %8441 }
 0x837   : > { %v7447_v11 = vsel %vm7431_vm1, %v7420_v58, %v14173_v52  ;;  %v8471_v47 = vsel %vm8459_vm7, %v14023_v8, %v14447_v41  ;;  %v14454_v44 = vpop.permute.xlu0 %7935  ;;  %v7198_v52 = vmul.f32 %v15675_v23, %v14456_v33 }
 0x838   : > { %15759 = vst [vmem:[#allocation43_spill] sm:$0xff] %v14454_v44  ;;  %v7490_v0 = vadd.f32 %v7447_v11, %v7324_v37  ;;  %v8515_v2 = vadd.f32 %v8471_v47, %v8349_v63  ;;  %v9833_v37 = vld [vmem:[#allocation3 + $0x80] sm:$0xff]  ;;  %v9834_v63 = vld [vmem:[#allocation3 + $0x88] sm:$0xff] }
 0x839   : > { %v7136_v11 = vmul.f32 %v9834_v63, %v15706_v62 }
 0x83a   : > { %v14459_v7 = vadd.f32 %v8515_v2, %v14235_v30  ;;  %v7135_v30 = vmul.f32 %v9833_v37, %v15706_v62  ;;  %v7893_v37 = vmul.f32 %v15694_v21, %v15733_v42 }
 0x83c   : > { %15760 = vst [vmem:[#allocation75_spill] sm:$0xff] %v14459_v7  ;;  %7792 = vrot.lane.b32.xlu2 %v7728_v28, %s9912_s20  ;;  %8431 = vrot.lane.b32.xlu1 %v8379_v22, %s9918_s19  ;;  %v14479_v22 = vld [vmem:[#allocation3 + $0xa0] sm:$0xff] }
 0x83d   : > { %7262 = vrot.lane.b32.xlu0 %v7198_v52, %s9909_s21  ;;  %v7196_v63 = vmul.f32 %v15675_v23, %v14479_v22  ;;  %v14500_v23 = vld [vmem:[#allocation3 + $0xb8] sm:$0xff] }
 0x83e   : > { %v7614_v8 = vpop.permute.xlu2 %7613  ;;  %v7253_v47 = vpop.permute.xlu1 %7252 }
 0x83f   : > { %v7643_v2 = vsel %vm15761_vm15, %v14366_v32, %v7614_v8  ;;  %v7279_v7 = vsel %vm15762_vm10, %v14369_v20, %v7253_v47  ;;  %v7280_v28 = vsel %vm15763_vm13, %v7253_v47, %v7255_v14  ;;  %v14477_v15 = vpop.permute.xlu0 %8101  ;;  %v7363_v32 = vmul.f32 %v15681_v9, %v14456_v33  ;;  %vm15774_vm15 = vmmov %vm15741_vm4 }
 0x840   : > { %15764 = vst [vmem:[#allocation53_spill] sm:$0xff] %v14477_v15  ;;  %v7322_v52 = vadd.f32 %v7279_v7, %v7135_v30  ;;  %v7323_v44 = vadd.f32 %v7280_v28, %v7136_v11  ;;  %vm15775_vm10 = vmmov %vm15765_vm5 }
 0x841   : > { %vm15776_vm13 = vmmov %vm15765_vm5 }
 0x844   : > { %7957 = vrot.lane.b32.xlu2 %v7893_v37, %s9915_s18  ;;  %7258 = vrot.lane.b32.xlu1 %v7196_v63, %s9909_s21  ;;  %v14498_v63 = vld [vmem:[#allocation3 + $0xa8] sm:$0xff] }
 0x845   : > { %7427 = vrot.lane.b32.xlu0 %v7363_v32, %s9914_s13 }
 0x846   : > { %v7781_v20 = vpop.permute.xlu2 %7780  ;;  %v7418_v14 = vpop.permute.xlu1 %7417 }
 0x847   : > { %v7808_v7 = vsel %vm15765_vm5, %v14385_v53, %v7781_v20  ;;  %v7445_v42 = vsel %vm7431_vm1, %v14387_v29, %v7418_v14  ;;  %v7446_v30 = vsel %vm7431_vm1, %v7418_v14, %v7420_v58  ;;  %v7616_v11 = vpop.permute.xlu0 %7615  ;;  %v8059_v53 = vmul.f32 %v14500_v23, %v15695_v31  ;;  %vm15778_vm5 = vmmov %vm15770_vm11 }
 0x848   : > { %v7488_v47 = vadd.f32 %v7445_v42, %v7322_v52  ;;  %v7489_v28 = vadd.f32 %v7446_v30, %v7323_v44  ;;  %v7644_v15 = vsel %vm15741_vm4, %v7614_v8, %v7616_v11  ;;  %v7645_v37 = vsel %vm15766_vm9, %v7616_v11, %v14192_v59  ;;  %vm15779_vm4 = vmmov %vm15778_vm5 }
 0x849   : > { %v7689_v32 = vadd.f32 %v7645_v37, %v7490_v0  ;;  %v7361_v29 = vmul.f32 %v15681_v9, %v14479_v22  ;;  %v7553_v58 = vmul.f32 %v15687_v26, %v14498_v63 }
 0x84a   : > { %v7687_v62 = vadd.f32 %v7643_v2, %v7488_v47  ;;  %v7688_v45 = vadd.f32 %v7644_v15, %v7489_v28 }
 0x84c   : > { %8123 = vrot.lane.b32.xlu2 %v8059_v53, %s9916_s22  ;;  %7423 = vrot.lane.b32.xlu1 %v7361_v29, %s9914_s13  ;;  %v7852_v44 = vadd.f32 %v7808_v7, %v7687_v62  ;;  %v7716_v62 = vmul.f32 %v15671_v49, %v14290_v55  ;;  %v8222_v7 = vmul.f32 %v15685_v13, %v14479_v22 }
 0x84d   : > { %7621 = vrot.lane.b32.xlu0 %v7553_v58, %s9911_s28 }
 0x84e   : > { %v7946_v0 = vpop.permute.xlu2 %7945  ;;  %v8278_v15 = vpop.permute.xlu1 %8277 }
 0x84f   : > { %v7974_v8 = vsel %vm7961_vm2, %v14409_v39, %v7946_v0  ;;  %v8306_v2 = vsel %vm8293_vm3, %v14414_v46, %v8278_v15  ;;  %v7783_v52 = vpop.permute.xlu0 %7782  ;;  %v7726_v39 = vmul.f32 %v15692_v60, %v14498_v63 }
 0x850   : > { %v8018_v14 = vadd.f32 %v7974_v8, %v7852_v44  ;;  %v7809_v42 = vsel %vm15767_vm6, %v7781_v20, %v7783_v52  ;;  %v7810_v30 = vsel %vm15768_vm8, %v7783_v52, %v14210_v12  ;;  %v7881_v44 = vmul.f32 %v15676_v48, %v14290_v55  ;;  %vm15781_vm6 = vmmov %vm15766_vm9 }
 0x851   : > { %v7853_v11 = vadd.f32 %v7809_v42, %v7688_v45  ;;  %v7854_v47 = vadd.f32 %v7810_v30, %v7689_v32  ;;  %v7554_v8 = vmul.f32 %v15687_v26, %v14456_v33  ;;  %v7891_v42 = vmul.f32 %v15694_v21, %v14498_v63 }
 0x854   : > { %7768 = vrot.lane.b32.xlu2 %v7716_v62, %s9912_s20  ;;  %8283 = vrot.lane.b32.xlu1 %v8222_v7, %s9917_s26 }
 0x855   : > { %7788 = vrot.lane.b32.xlu0 %v7726_v39, %s9912_s20  ;;  %v8047_v39 = vmul.f32 %v15682_v34, %v14290_v55 }
 0x856   : > { %v8112_v46 = vpop.permute.xlu2 %8111  ;;  %v14527_v20 = vpop.permute.xlu1 %7264 }
 0x857   : > { %v8140_v45 = vsel %vm8127_vm0, %v14426_v10, %v8112_v46  ;;  %v7948_v28 = vpop.permute.xlu0 %7947 }
 0x858   : > { %v8184_v37 = vadd.f32 %v8140_v45, %v8018_v14  ;;  %v7975_v32 = vsel %vm7961_vm2, %v7946_v0, %v7948_v28  ;;  %v7976_v53 = vsel %vm7961_vm2, %v7948_v28, %v14230_v4  ;;  %v7727_v45 = vmul.f32 %v15692_v60, %v14456_v33 }
 0x859   : > { %v8019_v29 = vadd.f32 %v7975_v32, %v7853_v11  ;;  %v8020_v58 = vadd.f32 %v7976_v53, %v7854_v47 }
 0x85a   : > { %v8350_v52 = vadd.f32 %v8306_v2, %v8184_v37 }
 0x85c   : > { %7933 = vrot.lane.b32.xlu2 %v7881_v44, %s9915_s18  ;;  %7623 = vrot.lane.b32.xlu1 %v7554_v8, %s9911_s28 }
 0x85d   : > { %7953 = vrot.lane.b32.xlu0 %v7891_v42, %s9915_s18 }
 0x85e   : > { %v8280_v10 = vpop.permute.xlu2 %8279  ;;  %v14543_v0 = vpop.permute.xlu1 %7429 }
 0x85f   : > { %v8307_v14 = vsel %vm8293_vm3, %v8278_v15, %v8280_v10  ;;  %v8114_v30 = vpop.permute.xlu0 %8113  ;;  %v8308_v7 = vsel %vm8293_vm3, %v8280_v10, %v14197_v35  ;;  %v8057_v15 = vmul.f32 %v15695_v31, %v14498_v63 }
 0x860   : > { %v8141_v11 = vsel %vm8127_vm0, %v8112_v46, %v8114_v30  ;;  %v8142_v2 = vsel %vm8127_vm0, %v8114_v30, %v14252_v61  ;;  %v7552_v30 = vmul.f32 %v15687_v26, %v14479_v22 }
 0x861   : > { %v8185_v47 = vadd.f32 %v8141_v11, %v8019_v29  ;;  %v8186_v62 = vadd.f32 %v8142_v2, %v8020_v58  ;;  %v7892_v11 = vmul.f32 %v15694_v21, %v14456_v33  ;;  %v8224_v2 = vmul.f32 %v15685_v13, %v14456_v33 }
 0x863   : > { %v8351_v28 = vadd.f32 %v8307_v14, %v8185_v47  ;;  %v8352_v37 = vadd.f32 %v8308_v7, %v8186_v62 }
 0x864   : > { %8099 = vrot.lane.b32.xlu2 %v8047_v39, %s9916_s22  ;;  %7790 = vrot.lane.b32.xlu1 %v7727_v45, %s9912_s20 }
 0x865   : > { %8119 = vrot.lane.b32.xlu0 %v8057_v15, %s9916_s22 }
 0x866   : > { %v8444_v46 = vpop.permute.xlu2 %8443  ;;  %v14560_v32 = vpop.permute.xlu1 %8289 }
 0x867   : > { %15769 = vst [vmem:[#allocation27_spill] sm:$0xff] %v14560_v32  ;;  %v8472_v53 = vsel %vm8459_vm7, %v14447_v41, %v8444_v46  ;;  %v8446_v29 = vpop.permute.xlu0 %8445 }
 0x868   : > { %v8516_v58 = vadd.f32 %v8472_v53, %v8350_v52  ;;  %v8473_v44 = vsel %vm8459_vm7, %v8444_v46, %v8446_v29  ;;  %v8474_v8 = vsel %vm8459_vm7, %v8446_v29, %v14268_v51  ;;  %v8058_v46 = vmul.f32 %v15695_v31, %v14456_v33 }
 0x869   : > { %v8517_v42 = vadd.f32 %v8473_v44, %v8351_v28  ;;  %v8518_v10 = vadd.f32 %v8474_v8, %v8352_v37  ;;  %v7725_v37 = vmul.f32 %v15692_v60, %v14479_v22  ;;  %v7507_v8 = vld [vmem:[#allocation3 + $0x58] sm:$0xff] }
 0x86a   : > { %v14568_v14 = vadd.f32 %v8516_v58, %v14351_v5  ;;  %v9836_v5 = vld [vmem:[#allocation3 + $0x30] sm:$0xff] }
 0x86b   : > { %v14575_v41 = vadd.f32 %v8517_v42, %v14353_v1  ;;  %v14578_v52 = vadd.f32 %v8518_v10, %v14346_v57  ;;  %v7127_v47 = vmul.f32 %v9836_v5, %v15710_v16  ;;  %v7130_v1 = vmul.f32 %v15710_v16, %v14290_v55 }
 0x86c   : > { %7619 = vrot.lane.b32.xlu2 %v7552_v30, %s9911_s28  ;;  %7955 = vrot.lane.b32.xlu1 %v7892_v11, %s9915_s18  ;;  %v8389_v55 = vmul.f32 %v15696_v25, %v14498_v63  ;;  %v7890_v30 = vmul.f32 %v15694_v21, %v14479_v22  ;;  %v7718_v11 = vmul.f32 %v15671_v49, %v7507_v8 }
 0x86d   : > { %8287 = vrot.lane.b32.xlu0 %v8224_v2, %s9917_s26  ;;  %v7544_v2 = vmul.f32 %v15683_v27, %v7507_v8 }
 0x86e   : > { %v14586_v62 = vpop.permute.xlu2 %7236  ;;  %v14590_v7 = vpop.permute.xlu1 %7240 }
 0x86f   : > { %v7272_v57 = vsel %vm15770_vm11, %v15730_v36, %v14586_v62  ;;  %v7275_v39 = vsel %vm15771_vm12, %v14590_v7, %v14321_v56  ;;  %v7765_v45 = vpop.permute.xlu0 %7764  ;;  %vm15783_vm11 = vmmov %vm15768_vm8 }
 0x870   : > { %v7314_v15 = vadd.f32 %v7272_v57, %v7127_v47  ;;  %v7317_v28 = vadd.f32 %v7275_v39, %v7130_v1  ;;  %v15772_v47 = vld [vmem:[#allocation67_spill] sm:$0xff]  ;;  %vm15785_vm12 = vmmov %vm15779_vm4 }
 0x874   : > { %7786 = vrot.lane.b32.xlu2 %v7725_v37, %s9912_s20  ;;  %8121 = vrot.lane.b32.xlu1 %v8058_v46, %s9916_s22  ;;  %v8056_v37 = vmul.f32 %v15695_v31, %v14479_v22  ;;  %v7883_v46 = vmul.f32 %v15676_v48, %v7507_v8 }
 0x875   : > { %8451 = vrot.lane.b32.xlu0 %v8389_v55, %s9918_s19 }
 0x876   : > { %v14607_v36 = vpop.permute.xlu2 %7401  ;;  %v14609_v53 = vpop.permute.xlu1 %7405 }
 0x877   : > { %v7438_v29 = vsel %vm7431_vm1, %v15732_v54, %v14607_v36  ;;  %v7441_v58 = vsel %vm7431_vm1, %v14609_v53, %v14338_v24  ;;  %v7930_v44 = vpop.permute.xlu0 %7929 }
 0x878   : > { %v7480_v42 = vadd.f32 %v7438_v29, %v7314_v15  ;;  %v7483_v10 = vadd.f32 %v7441_v58, %v7317_v28  ;;  %v7801_v15 = vsel %vm15775_vm10, %v15743_v50, %v7765_v45  ;;  %v7967_v55 = vsel %vm7961_vm2, %v15746_v18, %v7930_v44  ;;  %vm15793_vm10 = vmmov %vm15779_vm4 }
 0x879   : > { %v8215_v29 = vmul.f32 %v15686_v38, %v7507_v8 }
 0x87c   : > { %7951 = vrot.lane.b32.xlu2 %v7890_v30, %s9915_s18  ;;  %7772 = vrot.lane.b32.xlu1 %v7718_v11, %s9912_s20 }
 0x87d   : > { %7603 = vrot.lane.b32.xlu0 %v7544_v2, %s9911_s28 }
 0x87e   : > { %v14624_v54 = vpop.permute.xlu2 %7595  ;;  %v14626_v5 = vpop.permute.xlu1 %7599 }
 0x87f   : > { %v7635_v1 = vsel %vm15773_vm14, %v15772_v47, %v14624_v54  ;;  %v7638_v49 = vsel %vm15774_vm15, %v14626_v5, %v14364_v6  ;;  %v8096_v57 = vpop.permute.xlu0 %8095  ;;  %v8388_v47 = vmul.f32 %v15696_v25, %v14479_v22  ;;  %vm15789_vm14 = vmmov %vm15781_vm6 }
 0x880   : > { %v7679_v27 = vadd.f32 %v7635_v1, %v7480_v42  ;;  %v14634_v39 = vadd.f32 %v7638_v49, %v7483_v10  ;;  %v8133_v42 = vsel %vm8127_vm0, %v15747_v19, %v8096_v57  ;;  %v8049_v1 = vmul.f32 %v15682_v34, %v7507_v8  ;;  %vm15790_vm15 = vmmov %vm15781_vm6 }
 0x881   : > { %v8381_v49 = vmul.f32 %v15691_v40, %v7507_v8  ;;  %v7129_v34 = vmul.f32 %v14344_v17, %v15710_v16 }
 0x882   : > { %v7844_v28 = vadd.f32 %v7801_v15, %v7679_v27  ;;  %v15777_v27 = vld [vmem:[#allocation34_spill] sm:$0xff] }
 0x883   : > { %v7128_v15 = vmul.f32 %v15710_v16, %v15777_v27 }
 0x884   : > { %v8010_v58 = vadd.f32 %v7967_v55, %v7844_v28  ;;  %8117 = vrot.lane.b32.xlu2 %v8056_v37, %s9916_s22  ;;  %7937 = vrot.lane.b32.xlu1 %v7883_v46, %s9915_s18  ;;  %v7519_v37 = vld [vmem:[#allocation3 + $0xc0] sm:$0xff] }
 0x885   : > { %8269 = vrot.lane.b32.xlu0 %v8215_v29, %s9917_s26  ;;  %v15780_v29 = vld [vmem:[#allocation47_spill] sm:$0xff] }
 0x886   : > { %v8176_v50 = vadd.f32 %v8133_v42, %v8010_v58  ;;  %v14649_v10 = vpop.permute.xlu2 %8261  ;;  %v14651_v30 = vpop.permute.xlu1 %7766  ;;  %v7197_v58 = vmul.f32 %v14498_v63, %v15780_v29  ;;  %v7556_v42 = vmul.f32 %v15687_v26, %v7519_v37 }
 0x887   : > { %v8299_v48 = vsel %vm8293_vm3, %v15748_v3, %v14649_v10  ;;  %v7802_v38 = vsel %vm15776_vm13, %v7765_v45, %v14651_v30  ;;  %v8428_v18 = vpop.permute.xlu0 %8427  ;;  %vm15795_vm13 = vmmov %vm15768_vm8 }
 0x888   : > { %v8342_v11 = vadd.f32 %v8299_v48, %v8176_v50  ;;  %v8465_v2 = vsel %vm8459_vm7, %v15749_v43, %v8428_v18 }
 0x88a   : > { %v14660_v19 = vadd.f32 %v8465_v2, %v8342_v11 }
 0x88c   : > { %8449 = vrot.lane.b32.xlu2 %v8388_v47, %s9918_s19  ;;  %8103 = vrot.lane.b32.xlu1 %v8049_v1, %s9916_s22  ;;  %v8607_v47 = vld [vmem:[#allocation4] sm:$0x1]  ;;  %v7362_v1 = vmul.f32 %v14498_v63, %v15681_v9  ;;  %v8223_v9 = vmul.f32 %v15685_v13, %v14498_v63 }
 0x88d   : > { %8435 = vrot.lane.b32.xlu0 %v8381_v49, %s9918_s19  ;;  %v7729_v49 = vmul.f32 %v15692_v60, %v7519_v37 }
 0x88e   : > { %v14669_v3 = vpop.permute.xlu2 %7625  ;;  %v14671_v45 = vpop.permute.xlu1 %7931 }
 0x88f   : > { %v7968_v43 = vsel %vm7961_vm2, %v7930_v44, %v14671_v45  ;;  %v7239_v40 = vpop.permute.xlu0 %7238  ;;  %v8390_v44 = vmul.f32 %v15696_v25, %v14456_v33 }
 0x890   : > { %v7273_v8 = vsel %vm15778_vm5, %v14586_v62, %v7239_v40  ;;  %v7274_v28 = vsel %vm15779_vm4, %v7239_v40, %v14590_v7  ;;  %vm15796_vm5 = vmmov %vm15768_vm8 }
 0x891   : > { %v7315_v46 = vadd.f32 %v7273_v8, %v7128_v15  ;;  %v7316_v55 = vadd.f32 %v7274_v28, %v7129_v34  ;;  %v7894_v8 = vmul.f32 %v15694_v21, %v7519_v37  ;;  %v8226_v21 = vmul.f32 %v15685_v13, %v7519_v37  ;;  %v15784_v13 = vld [vmem:[#allocation41_spill] sm:$0xff]  ;;  %vm15797_vm4 = vmmov %vm15781_vm6 }
 0x894   : > { %7260 = vrot.lane.b32.xlu2 %v7197_v58, %s9909_s21  ;;  %8453 = vrot.lane.b32.xlu1 %v8390_v44, %s9918_s19  ;;  %s298_s21 = sand.u32 1, %s9895_s30  }
 0x895   : > { %7627 = vrot.lane.b32.xlu0 %v7556_v42, %s9911_s28  ;;  %s9305_s28 = smul.u32 11, %s298_s21 }
 0x896   : > { %v14691_v17 = vpop.permute.xlu2 %7792  ;;  %v14693_v62 = vpop.permute.xlu1 %8097 }
 0x897   : > { %v8134_v7 = vsel %vm8127_vm0, %v8096_v57, %v14693_v62  ;;  %v7404_v50 = vpop.permute.xlu0 %7403  ;;  %s300_s27 = scalar_lea.vmem [#allocation5], %s9305_s28 }
 0x898   : > { %v7439_v48 = vsel %vm7431_vm1, %v14607_v36, %v7404_v50  ;;  %v7440_v26 = vsel %vm7431_vm1, %v7404_v50, %v14609_v53  ;;  %v8060_v50 = vmul.f32 %v15695_v31, %v7519_v37  ;;  %s8691_s14 = sshll.u32 %s300_s27, 4  ;;  %s8692_s14 = int_to_ptr.vmem [resolvable:$true] %s8691_s14 }
 0x899   : > { %v7481_v11 = vadd.f32 %v7439_v48, %v7315_v46  ;;  %v7482_v2 = vadd.f32 %v7440_v26, %v7316_v55  ;;  %v15782_v48 = vld [vmem:[#allocation86_spill] sm:$0xff] }
 0x89c   : > { %7425 = vrot.lane.b32.xlu2 %v7362_v1, %s9914_s13  ;;  %8610 = vperm.xlu1 %9363, %v8607_v47  }
 0x89d   : > { %7794 = vrot.lane.b32.xlu0 %v7729_v49, %s9912_s20  ;;  %s9307_s20 = smul.u32 11, %s9988_s6  ;;  %s8679_s6 = scalar_lea.sflag [#allocation6], %s298_s21 }
 0x89e   : > { %v14706_v57 = vpop.permute.xlu2 %7957  ;;  %v8266_v27 = vpop.permute.xlu1 %8265 }
 0x89f   : > { %v7598_v36 = vpop.permute.xlu0 %7597  ;;  %s8689_s23 = scalar_lea.hbm %s15023_s8, %s9307_s20 }
 0x8a0   : > { %v7636_v53 = vsel %vm15766_vm9, %v14624_v54, %v7598_v36  ;;  %v7637_v15 = vsel %vm15781_vm6, %v7598_v36, %v14626_v5  ;;  %v8392_v36 = vmul.f32 %v15696_v25, %v7519_v37  ;;  %vm15798_vm9 = vmmov %vm15796_vm5  ;;  %s8693_s11 = sshll.u32 %s8689_s23, 4  ;;  %s8694_s11 = int_to_ptr.hbm [resolvable:$true] %s8693_s11 }
 0x8a1   : > { %v7680_v34 = vadd.f32 %v7636_v53, %v7481_v11  ;;  %v7681_v40 = vadd.f32 %v7637_v15, %v7482_v2  ;;  %v7141_v11 = vmul.f32 %v15784_v13, %v14456_v33  ;;  %v15786_v15 = vld [vmem:[#allocation43_spill] sm:$0xff]  ;;  %vm15799_vm6 = vmmov %vm15793_vm10 }
 0x8a3   : > { %v7845_v60 = vadd.f32 %v7802_v38, %v7680_v34 }
 0x8a4   : > { %8285 = vrot.lane.b32.xlu2 %v8223_v9, %s9917_s26 }
 0x8a5   : > { %7959 = vrot.lane.b32.xlu0 %v7894_v8, %s9915_s18  ;;  %v8011_v28 = vadd.f32 %v7968_v43, %v7845_v60 }
 0x8a6   : > { %v14717_v46 = vpop.permute.xlu2 %8123  ;;  %v8430_v55 = vpop.permute.xlu1 %8429 }
 0x8a7   : > { %v8466_v54 = vsel %vm8459_vm7, %v8428_v18, %v8430_v55  ;;  %v8177_v29 = vadd.f32 %v8134_v7, %v8011_v28  ;;  %v8264_v5 = vpop.permute.xlu0 %8263 }
 0x8a8   : > { %v8300_v58 = vsel %vm8293_vm3, %v14649_v10, %v8264_v5  ;;  %v8301_v44 = vsel %vm8293_vm3, %v8264_v5, %v8266_v27 }
 0x8a9   : > { %v8343_v38 = vadd.f32 %v8300_v58, %v8177_v29 }
 0x8ab   : > { %v14724_v42 = vadd.f32 %v8466_v54, %v8343_v38  ;;  %v15787_v54 = vld [vmem:[#allocation53_spill] sm:$0xff]  ;;  %v15788_v38 = vld [vmem:[#allocation88_spill] sm:$0xff] }
 0x8ac   : > { %8291 = vrot.lane.b32.xlu2 %v8226_v21, %s9917_s26  ;;  %v8302_v21 = vsel %vm8293_vm3, %v8266_v27, %v15788_v38 }
 0x8ad   : > { %8125 = vrot.lane.b32.xlu0 %v8060_v50, %s9916_s22 }
 0x8ae   : > { %v7769_v43 = vpop.permute.xlu2 %7768  ;;  %v8432_v18 = vpop.permute.xlu1 %8431 }
 0x8af   : > { %v7803_v7 = vsel %vm15768_vm8, %v14651_v30, %v7769_v43  ;;  %v7804_v10 = vsel %vm15783_vm11, %v7769_v43, %v15782_v48  ;;  %v8467_v26 = vsel %vm8459_vm7, %v8430_v55, %v8432_v18  ;;  %v14736_v2 = vpop.permute.xlu0 %7262  ;;  %v8391_v30 = vmul.f32 %v14500_v23, %v15696_v25  ;;  %vm15800_vm8 = vmmov %vm15799_vm6 }
 0x8b0   : > { %v7846_v31 = vadd.f32 %v7803_v7, %v7681_v40  ;;  %v7847_v47 = vadd.f32 %v7804_v10, %v14634_v39  ;;  %v7285_v1 = vsel %vm15785_vm12, %v14736_v2, %v14527_v20  ;;  %vm15805_vm11 = vmmov %vm15797_vm4 }
 0x8b1   : > { %v7328_v49 = vadd.f32 %v7285_v1, %v7141_v11  ;;  %vm15807_vm12 = vmmov %vm15797_vm4 }
 0x8b4   : > { %8455 = vrot.lane.b32.xlu2 %v8391_v30, %s9918_s19 }
 0x8b5   : > { %8457 = vrot.lane.b32.xlu0 %v8392_v36, %s9918_s19  ;;  %v15792_v36 = vld [vmem:[#allocation72_spill] sm:$0xff]  ;;  %s9861_s19 = scalar_lea.hbm %s15023_s8, 22 }
 0x8b6   : > { %v7934_v33 = vpop.permute.xlu2 %7933  ;;  %v14747_v53 = vpop.permute.xlu1 %7258 }
 0x8b7   : > { %v7969_v39 = vsel %vm7961_vm2, %v14671_v45, %v7934_v33  ;;  %v7970_v34 = vsel %vm7961_vm2, %v7934_v33, %v15786_v15  ;;  %v14753_v40 = vpop.permute.xlu0 %7427  ;;  %v7282_v33 = vsel %vm15793_vm10, %v15792_v36, %v14747_v53  ;;  %vm8649_vm10 = vcmask 1041408  }
 0x8b8   : > { %v8012_v9 = vadd.f32 %v7969_v39, %v7846_v31  ;;  %v8013_v60 = vadd.f32 %v7970_v34, %v7847_v47  ;;  %v7451_v25 = vsel %vm7431_vm1, %v14753_v40, %v14543_v0 }
 0x8b9   : > { %v7494_v37 = vadd.f32 %v7451_v25, %v7328_v49 }
 0x8be   : > { %v8100_v8 = vpop.permute.xlu2 %8099  ;;  %v14758_v28 = vpop.permute.xlu1 %7423 }
 0x8bf   : > { %v8135_v55 = vsel %vm8127_vm0, %v14693_v62, %v8100_v8  ;;  %v8136_v45 = vsel %vm8127_vm0, %v8100_v8, %v15787_v54  ;;  %v14764_v29 = vpop.permute.xlu0 %7621 }
 0x8c0   : > { %v8178_v5 = vadd.f32 %v8135_v55, %v8012_v9  ;;  %v8179_v58 = vadd.f32 %v8136_v45, %v8013_v60  ;;  %v9837_v9 = vld [vmem:[#allocation3 + $0x98] sm:$0xff] }
 0x8c1   : > { %v7138_v60 = vmul.f32 %v9837_v9, %v15784_v13  ;;  %v15794_v55 = vld [vmem:[#allocation83_spill] sm:$0xff] }
 0x8c2   : > { %v8344_v50 = vadd.f32 %v8301_v44, %v8178_v5  ;;  %v8345_v43 = vadd.f32 %v8302_v21, %v8179_v58  ;;  %v15791_v44 = vld [vmem:[#allocation73_spill] sm:$0xff] }
 0x8c3   : > { %v8468_v30 = vsel %vm8459_vm7, %v8432_v18, %v15791_v44  ;;  %v7325_v5 = vadd.f32 %v7282_v33, %v7138_v60 }
 0x8c4   : > { %v14789_v39 = vadd.f32 %v8467_v26, %v8344_v50  ;;  %v14791_v34 = vadd.f32 %v8468_v30, %v8345_v43 }
 0x8c6   : > { %v14768_v7 = vpop.permute.xlu2 %7619  ;;  %v14770_v10 = vpop.permute.xlu1 %8283 }
 0x8c7   : > { %v14772_v11 = vpop.permute.xlu0 %7788  ;;  %v7646_v21 = vsel %vm15797_vm4, %v14192_v59, %v14768_v7  ;;  %vm8655_vm4 = vcmask 1045508  }
 0x8ce   : > { %v14774_v31 = vpop.permute.xlu2 %7786  ;;  %v7624_v62 = vpop.permute.xlu1 %7623 }
 0x8cf   : > { %v14778_v47 = vsel %vm15789_vm14, %v14764_v29, %v7624_v62  ;;  %v7649_v1 = vsel %vm15790_vm15, %v7624_v62, %v14669_v3  ;;  %v14782_v49 = vpop.permute.xlu0 %7953  ;;  %v7811_v43 = vsel %vm15798_vm9, %v14210_v12, %v14774_v31  ;;  %vm8645_vm14 = vcmask 1040384  }
 0x8d0   : > { %v7693_v27 = vadd.f32 %v7649_v1, %v7494_v37  ;;  %v7448_v37 = vsel %vm7431_vm1, %v15794_v55, %v14758_v28  ;;  %vm8647_vm15 = vcmask 1042434  }
 0x8d1   : > { %v7491_v50 = vadd.f32 %v7448_v37, %v7325_v5 }
 0x8d3   : > { %v7690_v62 = vadd.f32 %v7646_v21, %v7491_v50 }
 0x8d5   : > { %v7855_v30 = vadd.f32 %v7811_v43, %v7690_v62 }
 0x8d6   : > { %v14794_v25 = vpop.permute.xlu2 %7951  ;;  %v7791_v8 = vpop.permute.xlu1 %7790 }
 0x8d7   : > { %v14801_v18 = vsel %vm15795_vm13, %v14772_v11, %v7791_v8  ;;  %v7814_v26 = vsel %vm15796_vm5, %v7791_v8, %v14691_v17  ;;  %v14805_v45 = vpop.permute.xlu0 %8119  ;;  %v7977_v1 = vsel %vm7961_vm2, %v14230_v4, %v14794_v25  ;;  %v8309_v4 = vsel %vm8293_vm3, %v14197_v35, %v14770_v10 }
 0x8d8   : > { %v7858_v58 = vadd.f32 %v7814_v26, %v7693_v27  ;;  %v8021_v60 = vadd.f32 %v7977_v1, %v7855_v30  ;;  %vm8651_vm13 = vcmask 1044484  }
 0x8de   : > { %v14816_v36 = vpop.permute.xlu2 %8117  ;;  %v7956_v9 = vpop.permute.xlu1 %7955 }
 0x8df   : > { %v8143_v27 = vsel %vm8127_vm0, %v14252_v61, %v14816_v36  ;;  %v7979_v59 = vsel %vm7961_vm2, %v14782_v49, %v7956_v9  ;;  %v7980_v33 = vsel %vm7961_vm2, %v7956_v9, %v14706_v57  ;;  %v14825_v12 = vpop.permute.xlu0 %8287 }
 0x8e0   : > { %v8024_v8 = vadd.f32 %v7980_v33, %v7858_v58  ;;  %v8187_v55 = vadd.f32 %v8143_v27, %v8021_v60  ;;  %v7140_v58 = vmul.f32 %v14498_v63, %v15784_v13  ;;  %v8312_v63 = vsel %vm8293_vm3, %v14825_v12, %v14560_v32 }
 0x8e1   : > { %v7647_v32 = vsel %vm15805_vm11, %v14768_v7, %v14764_v29  ;;  %v7978_v7 = vsel %vm7961_vm2, %v14794_v25, %v14782_v49 }
 0x8e2   : > { %v8353_v26 = vadd.f32 %v8309_v4, %v8187_v55 }
 0x8e6   : > { %v14830_v37 = vpop.permute.xlu2 %8449  ;;  %v8122_v5 = vpop.permute.xlu1 %8121 }
 0x8e7   : > { %v8475_v61 = vsel %vm8459_vm7, %v14268_v51, %v14830_v37  ;;  %v14835_v21 = vpop.permute.xlu0 %8451  ;;  %v8146_v35 = vsel %vm8127_vm0, %v8122_v5, %v14717_v46 }
 0x8e8   : > { %v8519_v50 = vadd.f32 %v8475_v61, %v8353_v26  ;;  %v8190_v27 = vadd.f32 %v8146_v35, %v8024_v8 }
 0x8ea   : > { %v8569_v43 = vadd.f32 %v8519_v50, %v14660_v19  ;;  %v7139_v19 = vmul.f32 %v15784_v13, %v14479_v22  ;;  %v14857_v26 = vadd.f32 %v8312_v63, %v8190_v27  ;;  %v15802_v50 = vld [vmem:[#allocation85_spill] sm:$0xff]  ;;  %v8556_v27 = vrot.slane %v14575_v41, 4 }
 0x8eb   : > { %v8535_v8 = vrot.slane %v15802_v50, 4  ;;  %v8563_v63 = vrot.slane %v14578_v52, 4 }
 0x8ec   : > { %v8557_v29 = vadd.f32 %v8556_v27, %v14575_v41  ;;  %v8145_v41 = vsel %vm8127_vm0, %v14805_v45, %v8122_v5 }
 0x8ed   : > { %v8536_v38 = vadd.f32 %v8535_v8, %v15802_v50 }
 0x8ee   : > { %v7261_v62 = vpop.permute.xlu2 %7260  ;;  %v14840_v1 = vpop.permute.xlu1 %7772 }
 0x8ef   : > { %v7284_v30 = vsel %vm15799_vm6, %v7261_v62, %v14736_v2  ;;  %v14846_v9 = vpop.permute.xlu0 %7603  ;;  %v7283_v33 = vsel %vm15800_vm8, %v14747_v53, %v7261_v62  ;;  %v15801_v2 = vld [vmem:[#allocation36_spill] sm:$0xff]  ;;  %v15804_v62 = vld [vmem:[#allocation75_spill] sm:$0xff]  ;;  %v8537_v8 = vrot.slane %v8536_v38, 2  ;;  %vm15809_vm6 = vmmov %vm15805_vm11  ;;  %vm15810_vm8 = vcmask 1043456  }
 0x8f0   : > { %v7327_v51 = vadd.f32 %v7284_v30, %v7140_v58  ;;  %v7326_v60 = vadd.f32 %v7283_v33, %v7139_v19  ;;  %v8528_v61 = vrot.slane %v15801_v2, 4  ;;  %v8542_v35 = vrot.slane %v15804_v62, 4 }
 0x8f1   : > { %v8549_v30 = vrot.slane %v14568_v14, 4  ;;  %v8538_v5 = vadd.f32 %v8537_v8, %v8536_v38 }
 0x8f6   : > { %v7426_v55 = vpop.permute.xlu2 %7425  ;;  %v14855_v4 = vpop.permute.xlu1 %7937 }
 0x8f7   : > { %v7449_v53 = vsel %vm7431_vm1, %v14758_v28, %v7426_v55  ;;  %v7450_v22 = vsel %vm7431_vm1, %v7426_v55, %v14753_v40  ;;  %v14865_v58 = vpop.permute.xlu0 %8269  ;;  %v8570_v28 = vrot.slane %v8569_v43, 4  ;;  %v8529_v55 = vadd.f32 %v8528_v61, %v15801_v2  ;;  %vm15806_vm1 = vmmov %vm15796_vm5 }
 0x8f8   : > { %15803 = vst [vmem:[#allocation22_spill] sm:$0xff] %v14865_v58  ;;  %v7492_v33 = vadd.f32 %v7449_v53, %v7326_v60  ;;  %v7493_v19 = vadd.f32 %v7450_v22, %v7327_v51  ;;  %v7812_v51 = vsel %vm15806_vm1, %v14774_v31, %v14772_v11  ;;  %v8543_v60 = vadd.f32 %v8542_v35, %v15804_v62  ;;  %vm15808_vm9 = vmmov %vm15806_vm1 }
 0x8f9   : > { %v8550_v53 = vadd.f32 %v8549_v30, %v14568_v14  ;;  %v8530_v31 = vrot.slane %v8529_v55, 2  ;;  %v8144_v14 = vsel %vm8127_vm0, %v14816_v36, %v14805_v45  ;;  %v8476_v45 = vsel %vm8459_vm7, %v14830_v37, %v14835_v21  ;;  %v9838_v37 = vld [vmem:[#allocation3 + $0x50] sm:$0xff]  ;;  %vm15811_vm11 = vmmov %vm15806_vm1 }
 0x8fa   : > { %v7691_v44 = vadd.f32 %v7647_v32, %v7492_v33  ;;  %v7692_v40 = vadd.f32 %v14778_v47, %v7493_v19  ;;  %v8564_v32 = vadd.f32 %v8563_v63, %v14578_v52  ;;  %v8571_v47 = vadd.f32 %v8570_v28, %v8569_v43 }
 0x8fb   : > { %v8558_v43 = vrot.slane %v8557_v29, 2  ;;  %v8531_v33 = vadd.f32 %v8530_v31, %v8529_v55  ;;  %v7131_v38 = vmul.f32 %v9838_v37, %v15710_v16  ;;  %vm8653_vm5 = vcmask 1046534  }
 0x8fc   : > { %v7856_v22 = vadd.f32 %v7812_v51, %v7691_v44  ;;  %v7857_v58 = vadd.f32 %v14801_v18, %v7692_v40  ;;  %v8544_v44 = vrot.slane %v8543_v60, 2  ;;  %v8551_v18 = vrot.slane %v8550_v53, 2 }
 0x8fd   : > { %v8565_v62 = vrot.slane %v8564_v32, 2  ;;  %v8572_v35 = vrot.slane %v8571_v47, 2  ;;  %v8559_v28 = vadd.f32 %v8558_v43, %v8557_v29 }
 0x8fe   : > { %v8286_v2 = vpop.permute.xlu2 %8285  ;;  %v8022_v61 = vadd.f32 %v7978_v7, %v7856_v22  ;;  %v8023_v50 = vadd.f32 %v7979_v59, %v7857_v58  ;;  %v14888_v11 = vpop.permute.xlu1 %8103  ;;  %v8545_v27 = vadd.f32 %v8544_v44, %v8543_v60  ;;  %v8552_v63 = vadd.f32 %v8551_v18, %v8550_v53 }
 0x8ff   : > { %v14895_v52 = vpop.permute.xlu0 %8435  ;;  %v8310_v59 = vsel %vm8293_vm3, %v14770_v10, %v8286_v2  ;;  %v8311_v58 = vsel %vm8293_vm3, %v8286_v2, %v14825_v12  ;;  %v8566_v40 = vadd.f32 %v8565_v62, %v8564_v32  ;;  %v8573_v51 = vadd.f32 %v8572_v35, %v8571_v47 }
 0x900   : > { %v8188_v49 = vadd.f32 %v8144_v14, %v8022_v61  ;;  %v8189_v25 = vadd.f32 %v8145_v41, %v8023_v50  ;;  %v8532_v7 = vrot.slane %v8531_v33, 1  ;;  %v8539_v61 = vrot.slane %v8538_v5, 1 }
 0x901   : > { %v8546_v29 = vrot.slane %v8545_v27, 1  ;;  %v8553_v32 = vrot.slane %v8552_v63, 1  ;;  %v8560_v47 = vrot.slane %v8559_v28, 1  ;;  %v8567_v50 = vrot.slane %v8566_v40, 1 }
 0x902   : > { %v8354_v30 = vadd.f32 %v8310_v59, %v8188_v49  ;;  %v8355_v36 = vadd.f32 %v8311_v58, %v8189_v25  ;;  %v8574_v31 = vrot.slane %v8573_v51, 1  ;;  %v8533_v41 = vadd.f32 %v8532_v7, %v8531_v33 }
 0x903   : > { %v8547_v25 = vadd.f32 %v8546_v29, %v8545_v27  ;;  %v8554_v16 = vadd.f32 %v8553_v32, %v8552_v63  ;;  %v8561_v43 = vadd.f32 %v8560_v47, %v8559_v28  ;;  %v8568_v62 = vadd.f32 %v8567_v50, %v8566_v40 }
 0x904   : > { %v8520_v19 = vadd.f32 %v8476_v45, %v8354_v30  ;;  %v8575_v59 = vadd.f32 %v8574_v31, %v8573_v51  ;;  %v7639_v58 = vsel %vm15807_vm12, %v14364_v6, %v14846_v9  ;;  %v7142_v50 = vmul.f32 %v14500_v23, %v15784_v13 }
 0x905   : > { %v7971_v23 = vsel %vm7961_vm2, %v15786_v15, %v14855_v4 }
 0x906   : > { %v8576_v10 = vadd.f32 %v8520_v19, %v14724_v42  ;;  %v14905_v22 = vpop.permute.xlu2 %8291  ;;  %v8454_v12 = vpop.permute.xlu1 %8453  ;;  %v7318_v42 = vadd.f32 %v14321_v56, %v7131_v38 }
 0x907   : > { %v8477_v55 = vsel %vm8459_vm7, %v14835_v21, %v8454_v12  ;;  %v14909_v2 = vpop.permute.xlu0 %7627  ;;  %v8540_v21 = vadd.f32 %v8539_v61, %v8538_v5 }
 0x908   : > { %v8577_v60 = vrot.slane %v8576_v10, 4  ;;  %v8521_v53 = vadd.f32 %v8477_v55, %v8355_v36  ;;  %v7484_v44 = vadd.f32 %v14338_v24, %v7318_v42 }
 0x90a   : > { %v8578_v8 = vadd.f32 %v8577_v60, %v8576_v10  ;;  %v8583_v14 = vadd.f32 %v8521_v53, %v14789_v39  ;;  %v7683_v42 = vadd.f32 %v7639_v58, %v7484_v44 }
 0x90c   : > { %v8579_v18 = vrot.slane %v8578_v8, 2  ;;  %v8584_v49 = vrot.slane %v8583_v14, 4 }
 0x90e   : > { %v8580_v56 = vadd.f32 %v8579_v18, %v8578_v8  ;;  %v8585_v35 = vadd.f32 %v8584_v49, %v8583_v14  ;;  %v14918_v30 = vpop.permute.xlu2 %8455  ;;  %v8611_v39 = vpop.permute.xlu1 %8610  ;;  %v7329_v49 = vadd.f32 %v14527_v20, %v7142_v50 }
 0x90f   : > { %v8478_v36 = vsel %vm8459_vm7, %v8454_v12, %v14918_v30  ;;  %v14922_v24 = vperm.slane %v8611_v39, 0  ;;  %v7795_v33 = vpop.permute.xlu0 %7794 }
 0x910   : > { %v8581_v45 = vrot.slane %v8580_v56, 1  ;;  %v8522_v5 = vadd.f32 %v8478_v36, %v14857_v26  ;;  %v8586_v19 = vrot.slane %v8585_v35, 2  ;;  %v7495_v20 = vadd.f32 %v14543_v0, %v7329_v49 }
 0x911   : > { %v8615_v6 = vadd.f32 %v14922_v24, %v8540_v21  ;;  %v8616_v9 = vadd.f32 %v14922_v24, %v8547_v25  ;;  %v8617_v28 = vadd.f32 %v14922_v24, %v8554_v16  ;;  %v8618_v40 = vadd.f32 %v14922_v24, %v8561_v43 }
 0x912   : > { %v8582_v27 = vadd.f32 %v8581_v45, %v8580_v56  ;;  %v8590_v63 = vadd.f32 %v8522_v5, %v14791_v34  ;;  %v8619_v51 = vadd.f32 %v14922_v24, %v8568_v62  ;;  %v8620_v26 = vadd.f32 %v14922_v24, %v8575_v59  ;;  %v15813_v5 = vld [vmem:[#allocation88_spill] sm:$0xff] }
 0x913   : > { %v8636_v10 = vrot.slane %v8615_v6, 7  ;;  %v8614_v7 = vadd.f32 %v14922_v24, %v8533_v41  ;;  %v8637_v61 = vrot.slane %v8616_v9, 6  ;;  %v8587_v37 = vadd.f32 %v8586_v19, %v8585_v35 }
 0x914   : > { %v8591_v12 = vrot.slane %v8590_v63, 4  ;;  %v8621_v55 = vadd.f32 %v14922_v24, %v8582_v27  ;;  %v8638_v38 = vrot.slane %v8617_v28, 5  ;;  %v8639_v60 = vrot.slane %v8618_v40, 4  ;;  %v15814_v27 = vld [vmem:[#allocation73_spill] sm:$0xff] }
 0x915   : > { %v8640_v34 = vrot.slane %v8619_v51, 3  ;;  %v8641_v29 = vrot.slane %v8620_v26, 2  ;;  %v8646_v47 = vsel %vm8645_vm14, %v8614_v7, %v8636_v10  ;;  %v7805_v25 = vsel %vm15808_vm9, %v15782_v48, %v14840_v1 }
 0x916   : > { %v8592_v53 = vadd.f32 %v8591_v12, %v8590_v63  ;;  %v8642_v32 = vrot.slane %v8621_v55, 1  ;;  %v8648_v8 = vsel %vm8647_vm15, %v8637_v61, %v8638_v38  ;;  %v8588_v44 = vrot.slane %v8587_v37, 1 }
 0x917   : > { %v7960_v31 = vpop.permute.xlu0 %7959  ;;  %v8652_v14 = vsel %vm8651_vm13, %v8639_v60, %v8640_v34  ;;  %v8650_v21 = vsel %vm8649_vm10, %v8646_v47, %v8648_v8  ;;  %v7650_v16 = vsel %vm15809_vm6, %v14669_v3, %v14909_v2  ;;  %v7848_v59 = vadd.f32 %v7805_v25, %v7683_v42 }
 0x918   : > { %v8593_v41 = vrot.slane %v8592_v53, 2  ;;  %v8654_v18 = vsel %vm8653_vm5, %v8641_v29, %v8642_v32  ;;  %v8137_v48 = vsel %vm8127_vm0, %v15787_v54, %v14888_v11  ;;  %v7815_v1 = vsel %vm15811_vm11, %v14691_v17, %v7795_v33  ;;  %v15812_v11 = vld [vmem:[#allocation22_spill] sm:$0xff] }
 0x919   : > { %v8656_v13 = vsel %vm8655_vm4, %v8652_v14, %v8654_v18  ;;  %v8014_v4 = vadd.f32 %v7971_v23, %v7848_v59  ;;  %v7694_v58 = vadd.f32 %v7650_v16, %v7495_v20  ;;  %v8589_v56 = vadd.f32 %v8588_v44, %v8587_v37 }
 0x91a   : > { %v8594_v43 = vadd.f32 %v8593_v41, %v8592_v53  ;;  %v8657_v62 = vsel %vm15810_vm8, %v8650_v21, %v8656_v13  ;;  %v7981_v2 = vsel %vm7961_vm2, %v14706_v57, %v7960_v31  ;;  %v8303_v17 = vsel %vm8293_vm3, %v15813_v5, %v15812_v11 }
 0x91b   : > { %8660 = vrot.lane.b32.xlu2 %v8657_v62, %s9906_s24  ;;  %v8180_v35 = vadd.f32 %v8137_v48, %v8014_v4  ;;  %v7859_v0 = vadd.f32 %v7815_v1, %v7694_v58  ;;  %v8622_v33 = vadd.f32 %v14922_v24, %v8589_v56  ;;  %v8469_v63 = vsel %vm8459_vm7, %v15814_v27, %v14895_v52 }
 0x91c   : > { %v8595_v15 = vrot.slane %v8594_v43, 1  ;;  %vm8597_vm2 = vcmask 1022976  }
 0x91d   : > { %v8025_v54 = vadd.f32 %v7981_v2, %v7859_v0  ;;  %v8346_v6 = vadd.f32 %v8303_v17, %v8180_v35 }
 0x91e   : > { %v8596_v3 = vadd.f32 %v8595_v15, %v8594_v43 }
 0x91f   : > { %v8126_v39 = vpop.permute.xlu0 %8125  ;;  %v8512_v40 = vadd.f32 %v8469_v63, %v8346_v6 }
 0x920   : > { %v8147_v36 = vsel %vm8127_vm0, %v14717_v46, %v8126_v39  ;;  %v8623_v45 = vadd.f32 %v14922_v24, %v8596_v3  ;;  %v15815_v46 = vld [vmem:[#allocation27_spill] sm:$0xff]  ;;  %vm8666_vm0 = vcmask 1046528  }
 0x921   : > { %v8191_v9 = vadd.f32 %v8147_v36, %v8025_v54  ;;  %v8313_v28 = vsel %vm8293_vm3, %v15815_v46, %v14905_v22  ;;  %v8598_v7 = vsel %vm8597_vm2, %v8512_v40, 0.0 }
 0x922   : > { %v8643_v19 = vrot.slane %v8623_v45, 7 }
 0x923   : > { %v8357_v51 = vadd.f32 %v8313_v28, %v8191_v9 }
 0x924   : > { %v8658_v57 = vsel %vm8645_vm14, %v8622_v33, %v8643_v19 }
 0x927   : > { %v8458_v26 = vpop.permute.xlu0 %8457 }
 0x928   : > { %v8479_v10 = vsel %vm8459_vm7, %v14918_v30, %v8458_v26  ;;  %v8673_v30 = vlaneseq  ;;  %vm15816_vm7 = vcmask 154624  }
 0x929   : > { %v8523_v12 = vadd.f32 %v8479_v10, %v8357_v51  ;;  %vm15817_vm1 = vmmov %vm15816_vm7 }
 0x92a   : > { %vm8675_vm3 = vcmp.lt.s32.totalorder %v8673_v30, 272 }
 0x92b   : > { %v8599_v55 = vsel %vm8597_vm2, %v8523_v12, 0.0 }
 0x92c   : > { %v8600_v61 = vadd.f32 %v8599_v55, %v8598_v7 }
 0x92e   : > { %v8601_v37 = vrot.slane %v8600_v61, 4 }
 0x930   : > { %v8602_v38 = vadd.f32 %v8601_v37, %v8600_v61 }
 0x932   : > { %v8603_v52 = vrot.slane %v8602_v38, 2 }
 0x934   : > { %v8604_v60 = vadd.f32 %v8603_v52, %v8602_v38 }
 0x936   : > { %v8605_v34 = vrot.slane %v8604_v60, 1 }
 0x938   : > { %v8606_v53 = vadd.f32 %v8605_v34, %v8604_v60 }
 0x93a   : > { %v8624_v22 = vadd.f32 %v14922_v24, %v8606_v53 }
 0x93c   : > { %v8644_v29 = vrot.slane %v8624_v22, 6 }
 0x93e   : > { %v8659_v32 = vsel %vm8649_vm10, %v8658_v57, %v8644_v29 }
 0x93f   : > { %8662 = vrot.lane.b32.xlu0 %v8659_v32, %s9906_s24  ;;  %s9855_s24 = sshra.s32 %s8694_s11, 4  ;;  %s9856_s24 = int_to_ptr.hbm [resolvable:$true] %s9855_s24 }
 0x940   : > { %s9857_s18 = scalar_lea.hbm %s9856_s24, 11  ;;  %p9862_p0 = scmp.lt.s32.totalorder %s9856_s24, %s15023_s8 }
 0x941   : > { %p9858_p11 = scmp.ne.s32.totalorder %s9856_s24, %s9857_s18  ;;  %p9863_p1 = scmp.lt.s32.totalorder %s9861_s19, %s9857_s18 }
 0x943   : > { %p9859_p12 = pnand %p9858_p11, %p10005_p5  ;;  %p9864_p2 = por %p9863_p1, %p9862_p0 }
 0x945   : > { %p9860_p13 = pneg %p9859_p12 }
 0x947   : > { %p9865_p3 = pnand %p9864_p2, %p9860_p13 }
 0x975   : > { %v8661_v47 = vpop.permute.xlu2 %8660 }
 0x976   : > { %v8664_v24 = vrot.slane %v8661_v47, 1 }
 0x9b1   : > { %v8663_v50 = vpop.permute.xlu0 %8662 }
 0x9b2   : > { %v8665_v42 = vrot.slane %v8663_v50, 1 }
 0x9b4   : > { %v8667_v31 = vsel %vm8666_vm0, %v8664_v24, %v8665_v42  ;;  %v8669_v8 = vsel %vm15816_vm7, %v8663_v50, %v8665_v42 }
 0x9b5   : > { %8677 = vst.msk [vmem:[%s300_s27 + $0x8] sm:$0x7] %vm8675_vm3, %v8669_v8  ;;  %v8668_v14 = vsel %vm15817_vm1, %v8661_v47, %v8667_v31 }
 0x9b6   : > { %8672 = vst [vmem:[%s300_s27] sm:$0xff] %v8668_v14 }
 0x9b7   : > { %9868 = shalt.err (!%p9865_p3)
}
 0x9b8   : > { %9308 = dma.vmem_to_hbm [thread:$0]  (%p10005_p5), %s8692_s14, 176, %s8694_s11, %s8679_s6  }
 0x9b9 PF: > { %p9314_p4 = scmp.ge.s32.totalorder %s9903_s10, 2  ;;  %s8705_s21 = sand.u32 1, %s9891_s29  }
 0x9ba   : > { %s8706_s13 = scalar_lea.sflag [#allocation6], %s8705_s21 }
 0x9bb   : > { %p9311_p7 = pnand %p9314_p4, %p10009_p6 }
 0x9bd   : > { %p9312_p8 = pneg %p9311_p7 }
 0x9bf   : > { %9886 = dma.done.wait (%p9312_p8), %s8706_s13, 176  }
 0x9c0   : > { %9888 = vsyncadd (%p9312_p8), %s8706_s13, 4294967120  ;;  %p20_p9 = scmp.ge.s32.totalorder %s9992_s12, 4   ;;  %s15818_s29 = smov %s9895_s30 }
 0x9c1   : > { %s15819_s30 = smov %s9899_s9  ;;  %s15820_s9 = smov %s10003_s15 }
 0x9c2   : > { %s15821_s10 = smov %s9992_s12  ;;  %22 = sbr.rel (!%p20_p9) target bundleno = 6 (0x6), region = 138 }
 0x9c7   :  { %8712 = vsyncpa [#allocation6], 1 }
 0x9c8   :  { %8714 = vsyncpa [#allocation6 + $0x1], 1 }

</bundles_post_ra>
